<compile_context>
chip_gen: v7x
topology: tpu7x:2x2x1
jax: 0.10.0
libtpu: 0.0.40
codegen_flags: <defaults>
</compile_context>

<pallas_src>
import numpy as np
import jax
import jax.numpy as jnp
from jax.experimental import pallas as pl
from jax.experimental.pallas import tpu as pltpu

EPS = 1e-5
LANE = 128


# ---------------------------------------------------------------------------
# Host-side constant builders (pure weight preprocessing, done once).
# ---------------------------------------------------------------------------
def _reflect_idx(i, n):
    if i < 0:
        return -i
    if i >= n:
        return 2 * n - 2 - i
    return i


def _src_conv(o, k, stride, pad, n_in, reflect):
    i = stride * o + k - pad
    if reflect:
        return _reflect_idx(i, n_in)
    return i if 0 <= i < n_in else None


def _src_convT(o, k, stride, pad, n_in):
    t = o + pad - k
    if t % stride:
        return None
    i = t // stride
    return i if 0 <= i < n_in else None


def build_conv(w, b, *, kind, H_in, W_in, C_in, C_out, stride=1, pad=0,
               reflect=False, out_pad=0):
    """Rewrite a (transposed) conv as  out = concat_kh(gather_kh(x)) @ M_stack + bias.

    gather_kh is a vertical row gather:
      * stride-1 convs: a +/-d sublane shift realised IN-KERNEL (R not built),
      * strided / transposed convs: a tiny 0/1 matrix R[kh] (bf16), in-kernel.
    M_stack (KH*LANE, LANE) bf16 folds horizontal taps + channel mixing of every
    vertical tap, stacked along K so the tap sum accumulates inside one GEMM.
    """
    w = np.asarray(w, np.float32)
    b = np.asarray(b, np.float32)
    KH, KW = w.shape[2], w.shape[3]
    if kind == "conv":                 # torch Conv2d weight (Cout, Cin, KH, KW)
        H_out = (H_in + 2 * pad - KH) // stride + 1
        W_out = (W_in + 2 * pad - KW) // stride + 1
        w_eff = np.transpose(w, (2, 3, 1, 0))          # (KH, KW, Cin, Cout)
        rsrc = lambda o, k: _src_conv(o, k, stride, pad, H_in, reflect)
        csrc = lambda o, k: _src_conv(o, k, stride, pad, W_in, reflect)
    else:                              # torch ConvTranspose2d weight (Cin, Cout, KH, KW)
        H_out = (H_in - 1) * stride - 2 * pad + KH + out_pad
        W_out = (W_in - 1) * stride - 2 * pad + KW + out_pad
        w_eff = np.transpose(w, (2, 3, 0, 1))          # (KH, KW, Cin, Cout)
        rsrc = lambda o, k: _src_convT(o, k, stride, pad, H_in)
        csrc = lambda o, k: _src_convT(o, k, stride, pad, W_in)

    assert W_in * C_in <= LANE and W_out * C_out <= LANE

    M = np.zeros((KH, LANE, LANE), np.float32)
    for kh in range(KH):
        for kw in range(KW):
            for ow in range(W_out):
                iw = csrc(ow, kw)
                if iw is None:
                    continue
                M[kh, iw * C_in:(iw + 1) * C_in,
                      ow * C_out:(ow + 1) * C_out] += w_eff[kh, kw]
    M_stack = jnp.asarray(M.reshape(KH * LANE, LANE), jnp.bfloat16)

    R = None
    if not (kind == "conv" and stride == 1):
        Rm = np.zeros((KH, H_out, H_in), np.float32)
        for kh in range(KH):
            for oh in range(H_out):
                ih = rsrc(oh, kh)
                if ih is not None:
                    Rm[kh, oh, ih] = 1.0
        R = jnp.asarray(Rm, jnp.bfloat16)              # 0/1 -> bf16 is exact

    bias = np.zeros((1, LANE), np.float32)
    bias[0, :W_out * C_out] = np.tile(b, W_out)
    return dict(R=R, M=M_stack, bias=jnp.asarray(bias, jnp.float32),
                H_out=H_out, W_out=W_out, KH=KH)


def build_norm_q(H, W, C):
    """Block-diag lane-pooling matrix for the fused InstanceNorm stats.

    stats = rowsum([y | y*y]) @ Q2 gives [mu | E[y^2]] broadcast per channel.
    Entries are 1/(H*W) (exact powers of two here) -> bf16 is exact.
    """
    assert W * C == LANE
    q = np.kron(np.ones((W, W), np.float32), np.eye(C, dtype=np.float32)) / (H * W)
    q2 = np.zeros((2 * LANE, 2 * LANE), np.float32)
    q2[:LANE, :LANE] = q
    q2[LANE:, LANE:] = q
    return jnp.asarray(q2, jnp.bfloat16)


# ---------------------------------------------------------------------------
# The single fused Pallas kernel (one grid step == one image).
# ---------------------------------------------------------------------------
def _generator_kernel(x_ref,
                      m1_ref, b1_ref,
                      r2_ref, m2_ref, b2_ref,
                      r3_ref, m3_ref, b3_ref,
                      mr_ref, br_ref,
                      ru1_ref, mu1_ref, bu1_ref,
                      ru2_ref, mu2_ref, bu2_ref,
                      m4_ref, b4_ref,
                      q1_ref, q2_ref, q3_ref,
                      o_ref):
    f32, bf16 = jnp.float32, jnp.bfloat16

    def shift_zero(x, d):
        # out[r] = x[r + d]; rows falling outside the image are zero (zero pad).
        h = x.shape[0]
        if d == 0:
            return x
        z = jnp.zeros((abs(d), x.shape[1]), x.dtype)
        if d > 0:
            return jnp.concatenate([x[d:], z], axis=0)
        return jnp.concatenate([z, x[:h + d]], axis=0)

    def shift_reflect1(x, d):
        # out[r] = x[r + d] with ReflectionPad2d(1) boundary (d in {-1, 0, 1}).
        h = x.shape[0]
        if d == 0:
            return x
        if d > 0:
            return jnp.concatenate([x[1:], x[h - 2:h - 1]], axis=0)
        return jnp.concatenate([x[1:2], x[:h - 1]], axis=0)

    def inst_norm(y, q_ref):
        # InstanceNorm2d: per (image, channel) stats over space, biased variance,
        # eps=1e-5, no affine.  Fused stats: one sublane sum over [y | y*y]
        # (XLU, f32) then ONE bf16 matmul against a block-diag pooling matrix.
        wc = y.shape[1]
        s = jnp.sum(jnp.concatenate([y, y * y], axis=1), axis=0, keepdims=True)
        stats = jnp.dot(s.astype(bf16), q_ref[...], preferred_element_type=f32)
        mu, ex2 = stats[:, :wc], stats[:, wc:]
        var = jnp.maximum(ex2 - mu * mu, 0.0)      # guard tiny negative (rounding)
        return (y - mu) * jax.lax.rsqrt(var + EPS)

    def conv_s1(x, m, b, pad, reflect):
        # Stride-1 conv: vertical taps as sublane shifts, lane-concatenated so
        # the tap sum accumulates inside a single bf16 MXU GEMM.
        shift = shift_reflect1 if reflect else shift_zero
        taps = [shift(x, d) for d in range(-pad, pad + 1)]
        xg = jnp.concatenate(taps, axis=1).astype(bf16)
        return jnp.dot(xg, m, preferred_element_type=f32) + b

    def conv_rgather(x, r_ref, m, b):
        # Strided / transposed conv: KH independent 0/1 row gathers (bf16,
        # exact), lane-concat, then one stacked bf16 GEMM.
        xb = x.astype(bf16)
        taps = [jnp.dot(r_ref[kh], xb, preferred_element_type=f32).astype(bf16)
                for kh in range(r_ref.shape[0])]
        xg = jnp.concatenate(taps, axis=1)
        return jnp.dot(xg, m, preferred_element_type=f32) + b

    relu = lambda v: jnp.maximum(v, 0.0)

    # ---- encoder -----------------------------------------------------------
    h = relu(inst_norm(conv_s1(x_ref[...], m1_ref[...], b1_ref[...], 3, False),
                       q1_ref))
    h = relu(inst_norm(conv_rgather(h, r2_ref, m2_ref[...], b2_ref[...]), q2_ref))
    h = relu(inst_norm(conv_rgather(h, r3_ref, m3_ref[...], b3_ref[...]), q3_ref))

    # ---- 9 residual blocks (ReflectionPad(1) + 3x3 conv + IN + ReLU, x2, skip)
    for blk in range(mr_ref.shape[0] // 2):
        t = relu(inst_norm(conv_s1(h, mr_ref[2 * blk], br_ref[2 * blk], 1, True),
                           q3_ref))
        h = h + inst_norm(conv_s1(t, mr_ref[2 * blk + 1], br_ref[2 * blk + 1],
                                  1, True), q3_ref)

    # ---- decoder (transposed convs) + final 7x7 conv + tanh -----------------
    h = relu(inst_norm(conv_rgather(h, ru1_ref, mu1_ref[...], bu1_ref[...]), q2_ref))
    h = relu(inst_norm(conv_rgather(h, ru2_ref, mu2_ref[...], bu2_ref[...]), q1_ref))
    o_ref[...] = jnp.tanh(conv_s1(h, m4_ref[...], b4_ref[...], 3, False))


# ---------------------------------------------------------------------------
# Wrapper: build all constants from PyTorch-layout weights, call the kernel.
# ---------------------------------------------------------------------------
def prepare_generator(params, *, N, H, W, input_nc, output_nc, ngf):
    assert W * input_nc <= LANE and W * output_nc <= LANE

    c1 = build_conv(params["c1_w"], params["c1_b"], kind="conv",
                    H_in=H, W_in=W, C_in=input_nc, C_out=ngf, stride=1, pad=3)
    H1, W1 = c1["H_out"], c1["W_out"]
    c2 = build_conv(params["c2_w"], params["c2_b"], kind="conv",
                    H_in=H1, W_in=W1, C_in=ngf, C_out=2 * ngf, stride=2, pad=1)
    H2, W2 = c2["H_out"], c2["W_out"]
    c3 = build_conv(params["c3_w"], params["c3_b"], kind="conv",
                    H_in=H2, W_in=W2, C_in=2 * ngf, C_out=4 * ngf, stride=2, pad=1)
    H3, W3 = c3["H_out"], c3["W_out"]

    res = []
    for (wa, ba, wb, bb) in params["res"]:
        for (wc_, bc_) in ((wa, ba), (wb, bb)):
            res.append(build_conv(wc_, bc_, kind="conv", H_in=H3, W_in=W3,
                                  C_in=4 * ngf, C_out=4 * ngf,
                                  stride=1, pad=1, reflect=True))
    mr = jnp.stack([r["M"] for r in res])        # (2*n_res, 3*LANE, LANE) bf16
    br = jnp.stack([r["bias"] for r in res])     # (2*n_res, 1, LANE) f32

    u1 = build_conv(params["u1_w"], params["u1_b"], kind="convT",
                    H_in=H3, W_in=W3, C_in=4 * ngf, C_out=2 * ngf,
                    stride=2, pad=1, out_pad=1)
    H4, W4 = u1["H_out"], u1["W_out"]
    u2 = build_conv(params["u2_w"], params["u2_b"], kind="convT",
                    H_in=H4, W_in=W4, C_in=2 * ngf, C_out=ngf,
                    stride=2, pad=1, out_pad=1)
    H5, W5 = u2["H_out"], u2["W_out"]
    c4 = build_conv(params["c4_w"], params["c4_b"], kind="conv",
                    H_in=H5, W_in=W5, C_in=ngf, C_out=output_nc, stride=1, pad=3)
    assert (c4["H_out"], c4["W_out"]) == (H, W)

    # Normed trunk levels are exactly lane-dense (W_out * C_out == 128).
    q1 = build_norm_q(H1, W1, ngf)          # after c1 and u2
    q2 = build_norm_q(H2, W2, 2 * ngf)      # after c2 and u1
    q3 = build_norm_q(H3, W3, 4 * ngf)      # after c3 and in every res block

    args = (c1["M"], c1["bias"],
            c2["R"], c2["M"], c2["bias"],
            c3["R"], c3["M"], c3["bias"],
            mr, br,
            u1["R"], u1["M"], u1["bias"],
            u2["R"], u2["M"], u2["bias"],
            c4["M"], c4["bias"],
            q1, q2, q3)

    # Advisory cost estimate.
    def gemm(rows, kh):
        return 2 * rows * (kh * LANE) * LANE

    def gather(rows_out, rows_in, kh):
        return kh * 2 * rows_out * rows_in * LANE

    per_img = (gemm(H1, 7)
               + gemm(H2, 3) + gather(H2, H1, 3)
               + gemm(H3, 3) + gather(H3, H2, 3)
               + len(res) * gemm(H3, 3)
               + gemm(H4, 3) + gather(H4, H3, 3)
               + gemm(H5, 3) + gather(H5, H4, 3)
               + gemm(H, 7))
    n_norm = 3 + len(res) + 2
    per_img += n_norm * (2 * (2 * LANE) * (2 * LANE) + 8 * H1 * LANE)
    transcendentals = N * (n_norm * LANE + H * LANE)
    bytes_accessed = sum(int(a.size) * a.dtype.itemsize for a in args)
    bytes_accessed += 2 * N * H * LANE * 4
    cost = pl.CostEstimate(flops=int(N * per_img),
                           transcendentals=int(transcendentals),
                           bytes_accessed=int(bytes_accessed))
    return dict(args=args, cost=cost, N=N, H=H, W=W, output_nc=output_nc)


def build_forward(consts):
    args = consts["args"]
    N, H, W = consts["N"], consts["H"], consts["W"]
    output_nc = consts["output_nc"]

    # Constants: full-array blocks with constant index maps (fetched once,
    # stay resident across the batch grid).
    const_specs = [pl.BlockSpec(a.shape, (lambda n, _nd=a.ndim: (0,) * _nd))
                   for a in args]
    grid_spec = pltpu.PrefetchScalarGridSpec(
        num_scalar_prefetch=0,
        grid=(N,),                                      # one image per grid step
        in_specs=[pl.BlockSpec((H, LANE), lambda n: (n, 0))] + const_specs,
        out_specs=pl.BlockSpec((H, LANE), lambda n: (n, 0)),
    )
    call = pl.pallas_call(
        _generator_kernel,
        out_shape=jax.ShapeDtypeStruct((N * H, LANE), jnp.float32),
        grid_spec=grid_spec,
        cost_estimate=consts["cost"],
        compiler_params=pltpu.CompilerParams(
            dimension_semantics=("parallel",),          # v7x: image per TensorCore
            vmem_limit_bytes=16 * 1024 * 1024,
        ),
    )

    def fwd(x, *const_args):
        n, h, w, cin = x.shape
        x2d = x.reshape(n * h, w * cin)
        x2d = jnp.pad(x2d, ((0, 0), (0, LANE - w * cin)))   # lane-dense input
        out = call(x2d, *const_args)
        return out[:, :W * output_nc].reshape(n, h, W, output_nc)

    jitted = jax.jit(fwd)
    return lambda x: jitted(x, *args)


# ---------------------------------------------------------------------------
# Parameter init (PyTorch weight layouts, same as the nn.Module spec).
# ---------------------------------------------------------------------------
def init_params(key, input_nc=3, output_nc=3, ngf=8, n_res=9):
    keys = iter(jax.random.split(key, 128))

    def conv_w(cout, cin, k):
        return jax.random.normal(next(keys), (cout, cin, k, k), jnp.float32) * 0.05

    def convT_w(cin, cout, k):
        return jax.random.normal(next(keys), (cin, cout, k, k), jnp.float32) * 0.05

    def bias(c):
        return jax.random.normal(next(keys), (c,), jnp.float32) * 0.01

    return {
        "c1_w": conv_w(ngf, input_nc, 7),     "c1_b": bias(ngf),
        "c2_w": conv_w(ngf * 2, ngf, 3),      "c2_b": bias(ngf * 2),
        "c3_w": conv_w(ngf * 4, ngf * 2, 3),  "c3_b": bias(ngf * 4),
        "u1_w": convT_w(ngf * 4, ngf * 2, 3), "u1_b": bias(ngf * 2),
        "u2_w": convT_w(ngf * 2, ngf, 3),     "u2_b": bias(ngf),
        "c4_w": conv_w(output_nc, ngf, 7),    "c4_b": bias(output_nc),
        "res": [(conv_w(ngf * 4, ngf * 4, 3), bias(ngf * 4),
                 conv_w(ngf * 4, ngf * 4, 3), bias(ngf * 4))
                for _ in range(9)],
    }


if __name__ == "__main__":
    key = jax.random.PRNGKey(0)
    kx, kp = jax.random.split(key)

    # Small shapes consistent with the module: batch=2, 3->3 channels, 16x16, ngf=8.
    N, H, W, INPUT_NC, OUTPUT_NC, NGF = 2, 16, 16, 3, 3, 8
    x = jax.random.normal(kx, (N, H, W, INPUT_NC), jnp.float32)   # NHWC layout
    params = init_params(kp, input_nc=INPUT_NC, output_nc=OUTPUT_NC, ngf=NGF)

    consts = prepare_generator(params, N=N, H=H, W=W,
                               input_nc=INPUT_NC, output_nc=OUTPUT_NC, ngf=NGF)
    fwd = build_forward(consts)

    y = fwd(x)
    jax.block_until_ready(y)

    assert y.shape == (N, H, W, OUTPUT_NC), y.shape
    assert bool(jnp.all(jnp.isfinite(y)))
    assert bool(jnp.all(jnp.abs(y) <= 1.0 + 1e-6))   # tanh output range
    print("KERNEL_OK")
</pallas_src>

<mosaic_0001>
module attributes {stable_mosaic.version = 11 : i64} {
  func.func @_generator_kernel(%arg0: i32, %arg1: memref<16x128xf32, #tpu.memory_space<vmem>>, %arg2: memref<896x128xbf16, #tpu.memory_space<vmem>>, %arg3: memref<1x128xf32, #tpu.memory_space<vmem>>, %arg4: memref<3x8x16xbf16, #tpu.memory_space<vmem>>, %arg5: memref<384x128xbf16, #tpu.memory_space<vmem>>, %arg6: memref<1x128xf32, #tpu.memory_space<vmem>>, %arg7: memref<3x4x8xbf16, #tpu.memory_space<vmem>>, %arg8: memref<384x128xbf16, #tpu.memory_space<vmem>>, %arg9: memref<1x128xf32, #tpu.memory_space<vmem>>, %arg10: memref<18x384x128xbf16, #tpu.memory_space<vmem>>, %arg11: memref<18x1x128xf32, #tpu.memory_space<vmem>>, %arg12: memref<3x8x4xbf16, #tpu.memory_space<vmem>>, %arg13: memref<384x128xbf16, #tpu.memory_space<vmem>>, %arg14: memref<1x128xf32, #tpu.memory_space<vmem>>, %arg15: memref<3x16x8xbf16, #tpu.memory_space<vmem>>, %arg16: memref<384x128xbf16, #tpu.memory_space<vmem>>, %arg17: memref<1x128xf32, #tpu.memory_space<vmem>>, %arg18: memref<896x128xbf16, #tpu.memory_space<vmem>>, %arg19: memref<1x128xf32, #tpu.memory_space<vmem>>, %arg20: memref<256x256xbf16, #tpu.memory_space<vmem>>, %arg21: memref<256x256xbf16, #tpu.memory_space<vmem>>, %arg22: memref<256x256xbf16, #tpu.memory_space<vmem>>, %arg23: memref<16x128xf32, #tpu.memory_space<vmem>>) attributes {dimension_semantics = [#tpu.dimension_semantics<parallel>], iteration_bounds = array<i64: 2>, scalar_prefetch = 0 : i64, scratch_operands = 0 : i64, tpu.core_type = #tpu.core_type<tc>, window_params = [{transform_indices = @transform_0, window_bounds = array<i64: 16, 128>}, {pipeline_mode = #tpu.pipeline_mode<synchronous>, transform_indices = @transform_1, window_bounds = array<i64: 896, 128>}, {pipeline_mode = #tpu.pipeline_mode<synchronous>, transform_indices = @transform_2, window_bounds = array<i64: 1, 128>}, {pipeline_mode = #tpu.pipeline_mode<synchronous>, transform_indices = @transform_3, window_bounds = array<i64: 3, 8, 16>}, {pipeline_mode = #tpu.pipeline_mode<synchronous>, transform_indices = @transform_4, window_bounds = array<i64: 384, 128>}, {pipeline_mode = #tpu.pipeline_mode<synchronous>, transform_indices = @transform_5, window_bounds = array<i64: 1, 128>}, {pipeline_mode = #tpu.pipeline_mode<synchronous>, transform_indices = @transform_6, window_bounds = array<i64: 3, 4, 8>}, {pipeline_mode = #tpu.pipeline_mode<synchronous>, transform_indices = @transform_7, window_bounds = array<i64: 384, 128>}, {pipeline_mode = #tpu.pipeline_mode<synchronous>, transform_indices = @transform_8, window_bounds = array<i64: 1, 128>}, {pipeline_mode = #tpu.pipeline_mode<synchronous>, transform_indices = @transform_9, window_bounds = array<i64: 18, 384, 128>}, {pipeline_mode = #tpu.pipeline_mode<synchronous>, transform_indices = @transform_10, window_bounds = array<i64: 18, 1, 128>}, {pipeline_mode = #tpu.pipeline_mode<synchronous>, transform_indices = @transform_11, window_bounds = array<i64: 3, 8, 4>}, {pipeline_mode = #tpu.pipeline_mode<synchronous>, transform_indices = @transform_12, window_bounds = array<i64: 384, 128>}, {pipeline_mode = #tpu.pipeline_mode<synchronous>, transform_indices = @transform_13, window_bounds = array<i64: 1, 128>}, {pipeline_mode = #tpu.pipeline_mode<synchronous>, transform_indices = @transform_14, window_bounds = array<i64: 3, 16, 8>}, {pipeline_mode = #tpu.pipeline_mode<synchronous>, transform_indices = @transform_15, window_bounds = array<i64: 384, 128>}, {pipeline_mode = #tpu.pipeline_mode<synchronous>, transform_indices = @transform_16, window_bounds = array<i64: 1, 128>}, {pipeline_mode = #tpu.pipeline_mode<synchronous>, transform_indices = @transform_17, window_bounds = array<i64: 896, 128>}, {pipeline_mode = #tpu.pipeline_mode<synchronous>, transform_indices = @transform_18, window_bounds = array<i64: 1, 128>}, {pipeline_mode = #tpu.pipeline_mode<synchronous>, transform_indices = @transform_19, window_bounds = array<i64: 256, 256>}, {pipeline_mode = #tpu.pipeline_mode<synchronous>, transform_indices = @transform_20, window_bounds = array<i64: 256, 256>}, {pipeline_mode = #tpu.pipeline_mode<synchronous>, transform_indices = @transform_21, window_bounds = array<i64: 256, 256>}, {transform_indices = @transform_22, window_bounds = array<i64: 16, 128>}]} {
    %c0 = arith.constant 0 : index
    %c0_0 = arith.constant 0 : index
    %0 = vector.load %arg1[%c0, %c0_0] : memref<16x128xf32, #tpu.memory_space<vmem>>, vector<16x128xf32>
    %c0_1 = arith.constant 0 : index
    %c0_2 = arith.constant 0 : index
    %1 = vector.load %arg2[%c0_1, %c0_2] : memref<896x128xbf16, #tpu.memory_space<vmem>>, vector<896x128xbf16>
    %c0_3 = arith.constant 0 : index
    %c0_4 = arith.constant 0 : index
    %2 = vector.load %arg3[%c0_3, %c0_4] : memref<1x128xf32, #tpu.memory_space<vmem>>, vector<1x128xf32>
    %cst = arith.constant 0.000000e+00 : f32
    %3 = vector.broadcast %cst : f32 to vector<3x128xf32>
    %4 = vector.extract_strided_slice %0 {offsets = [0, 0], sizes = [13, 128], strides = [1, 1]} : vector<16x128xf32> to vector<13x128xf32>
    %5 = tpu.concatenate %3, %4 in 0 : vector<3x128xf32>, vector<13x128xf32> -> vector<16x128xf32>
    %cst_5 = arith.constant 0.000000e+00 : f32
    %6 = vector.broadcast %cst_5 : f32 to vector<2x128xf32>
    %7 = vector.extract_strided_slice %0 {offsets = [0, 0], sizes = [14, 128], strides = [1, 1]} : vector<16x128xf32> to vector<14x128xf32>
    %8 = tpu.concatenate %6, %7 in 0 : vector<2x128xf32>, vector<14x128xf32> -> vector<16x128xf32>
    %cst_6 = arith.constant 0.000000e+00 : f32
    %9 = vector.broadcast %cst_6 : f32 to vector<1x128xf32>
    %10 = vector.extract_strided_slice %0 {offsets = [0, 0], sizes = [15, 128], strides = [1, 1]} : vector<16x128xf32> to vector<15x128xf32>
    %11 = tpu.concatenate %9, %10 in 0 : vector<1x128xf32>, vector<15x128xf32> -> vector<16x128xf32>
    %cst_7 = arith.constant 0.000000e+00 : f32
    %12 = vector.broadcast %cst_7 : f32 to vector<1x128xf32>
    %13 = vector.extract_strided_slice %0 {offsets = [1, 0], sizes = [15, 128], strides = [1, 1]} : vector<16x128xf32> to vector<15x128xf32>
    %14 = tpu.concatenate %13, %12 in 0 : vector<15x128xf32>, vector<1x128xf32> -> vector<16x128xf32>
    %cst_8 = arith.constant 0.000000e+00 : f32
    %15 = vector.broadcast %cst_8 : f32 to vector<2x128xf32>
    %16 = vector.extract_strided_slice %0 {offsets = [2, 0], sizes = [14, 128], strides = [1, 1]} : vector<16x128xf32> to vector<14x128xf32>
    %17 = tpu.concatenate %16, %15 in 0 : vector<14x128xf32>, vector<2x128xf32> -> vector<16x128xf32>
    %cst_9 = arith.constant 0.000000e+00 : f32
    %18 = vector.broadcast %cst_9 : f32 to vector<3x128xf32>
    %19 = vector.extract_strided_slice %0 {offsets = [3, 0], sizes = [13, 128], strides = [1, 1]} : vector<16x128xf32> to vector<13x128xf32>
    %20 = tpu.concatenate %19, %18 in 0 : vector<13x128xf32>, vector<3x128xf32> -> vector<16x128xf32>
    %21 = tpu.concatenate %5, %8, %11, %0, %14, %17, %20 in 1 : vector<16x128xf32>, vector<16x128xf32>, vector<16x128xf32>, vector<16x128xf32>, vector<16x128xf32>, vector<16x128xf32>, vector<16x128xf32> -> vector<16x896xf32>
    %22 = arith.truncf %21 : vector<16x896xf32> to vector<16x896xbf16>
    %cst_10 = arith.constant dense<0.000000e+00> : vector<16x128xf32>
    %23 = tpu.matmul %22, %1, %cst_10 {dimension_numbers = #tpu.dot_dimension_numbers<[1], [0], [0], [1], [0, 0, 1, 1], [], []>} : vector<16x896xbf16>, vector<896x128xbf16>, vector<16x128xf32> -> vector<16x128xf32>
    %24 = vector.broadcast %2 : vector<1x128xf32> to vector<16x128xf32>
    %25 = arith.addf %23, %24 : vector<16x128xf32>
    %26 = arith.mulf %25, %25 : vector<16x128xf32>
    %27 = tpu.concatenate %25, %26 in 1 : vector<16x128xf32>, vector<16x128xf32> -> vector<16x256xf32>
    %cst_11 = arith.constant dense<0.000000e+00> : vector<256xf32>
    %28 = vector.multi_reduction <add>, %27, %cst_11 [0] : vector<16x256xf32> to vector<256xf32>
    %29 = vector.shape_cast %28 : vector<256xf32> to vector<1x256xf32>
    %30 = arith.truncf %29 : vector<1x256xf32> to vector<1x256xbf16>
    %c0_12 = arith.constant 0 : index
    %c0_13 = arith.constant 0 : index
    %31 = vector.load %arg20[%c0_12, %c0_13] : memref<256x256xbf16, #tpu.memory_space<vmem>>, vector<256x256xbf16>
    %cst_14 = arith.constant dense<0.000000e+00> : vector<1x256xf32>
    %32 = tpu.matmul %30, %31, %cst_14 {dimension_numbers = #tpu.dot_dimension_numbers<[1], [0], [0], [1], [0, 0, 1, 1], [], []>} : vector<1x256xbf16>, vector<256x256xbf16>, vector<1x256xf32> -> vector<1x256xf32>
    %33 = vector.extract_strided_slice %32 {offsets = [0, 0], sizes = [1, 128], strides = [1, 1]} : vector<1x256xf32> to vector<1x128xf32>
    %34 = vector.extract_strided_slice %32 {offsets = [0, 128], sizes = [1, 128], strides = [1, 1]} : vector<1x256xf32> to vector<1x128xf32>
    %35 = arith.mulf %33, %33 : vector<1x128xf32>
    %36 = arith.subf %34, %35 : vector<1x128xf32>
    %cst_15 = arith.constant 0.000000e+00 : f32
    %37 = vector.broadcast %cst_15 : f32 to vector<1x128xf32>
    %38 = arith.maximumf %36, %37 : vector<1x128xf32>
    %39 = vector.broadcast %33 : vector<1x128xf32> to vector<16x128xf32>
    %40 = arith.subf %25, %39 : vector<16x128xf32>
    %cst_16 = arith.constant 9.99999974E-6 : f32
    %41 = vector.broadcast %cst_16 : f32 to vector<1x128xf32>
    %42 = arith.addf %38, %41 : vector<1x128xf32>
    %43 = math.rsqrt %42 : vector<1x128xf32>
    %44 = vector.broadcast %43 : vector<1x128xf32> to vector<16x128xf32>
    %45 = arith.mulf %40, %44 : vector<16x128xf32>
    %cst_17 = arith.constant 0.000000e+00 : f32
    %46 = vector.broadcast %cst_17 : f32 to vector<16x128xf32>
    %47 = arith.maximumf %45, %46 : vector<16x128xf32>
    %c0_18 = arith.constant 0 : index
    %c0_19 = arith.constant 0 : index
    %48 = vector.load %arg5[%c0_18, %c0_19] : memref<384x128xbf16, #tpu.memory_space<vmem>>, vector<384x128xbf16>
    %c0_20 = arith.constant 0 : index
    %c0_21 = arith.constant 0 : index
    %49 = vector.load %arg6[%c0_20, %c0_21] : memref<1x128xf32, #tpu.memory_space<vmem>>, vector<1x128xf32>
    %50 = arith.truncf %47 : vector<16x128xf32> to vector<16x128xbf16>
    %c0_22 = arith.constant 0 : index
    %c0_23 = arith.constant 0 : index
    %c0_24 = arith.constant 0 : index
    %51 = vector.load %arg4[%c0_22, %c0_23, %c0_24] : memref<3x8x16xbf16, #tpu.memory_space<vmem>>, vector<1x8x16xbf16>
    %52 = vector.shape_cast %51 : vector<1x8x16xbf16> to vector<8x16xbf16>
    %cst_25 = arith.constant dense<0.000000e+00> : vector<8x128xf32>
    %53 = tpu.matmul %52, %50, %cst_25 {dimension_numbers = #tpu.dot_dimension_numbers<[1], [0], [0], [1], [0, 0, 1, 1], [], []>} : vector<8x16xbf16>, vector<16x128xbf16>, vector<8x128xf32> -> vector<8x128xf32>
    %54 = arith.truncf %53 : vector<8x128xf32> to vector<8x128xbf16>
    %c1 = arith.constant 1 : index
    %c0_26 = arith.constant 0 : index
    %c0_27 = arith.constant 0 : index
    %55 = vector.load %arg4[%c1, %c0_26, %c0_27] : memref<3x8x16xbf16, #tpu.memory_space<vmem>>, vector<1x8x16xbf16>
    %56 = vector.shape_cast %55 : vector<1x8x16xbf16> to vector<8x16xbf16>
    %cst_28 = arith.constant dense<0.000000e+00> : vector<8x128xf32>
    %57 = tpu.matmul %56, %50, %cst_28 {dimension_numbers = #tpu.dot_dimension_numbers<[1], [0], [0], [1], [0, 0, 1, 1], [], []>} : vector<8x16xbf16>, vector<16x128xbf16>, vector<8x128xf32> -> vector<8x128xf32>
    %58 = arith.truncf %57 : vector<8x128xf32> to vector<8x128xbf16>
    %c2 = arith.constant 2 : index
    %c0_29 = arith.constant 0 : index
    %c0_30 = arith.constant 0 : index
    %59 = vector.load %arg4[%c2, %c0_29, %c0_30] : memref<3x8x16xbf16, #tpu.memory_space<vmem>>, vector<1x8x16xbf16>
    %60 = vector.shape_cast %59 : vector<1x8x16xbf16> to vector<8x16xbf16>
    %cst_31 = arith.constant dense<0.000000e+00> : vector<8x128xf32>
    %61 = tpu.matmul %60, %50, %cst_31 {dimension_numbers = #tpu.dot_dimension_numbers<[1], [0], [0], [1], [0, 0, 1, 1], [], []>} : vector<8x16xbf16>, vector<16x128xbf16>, vector<8x128xf32> -> vector<8x128xf32>
    %62 = arith.truncf %61 : vector<8x128xf32> to vector<8x128xbf16>
    %63 = tpu.concatenate %54, %58, %62 in 1 : vector<8x128xbf16>, vector<8x128xbf16>, vector<8x128xbf16> -> vector<8x384xbf16>
    %cst_32 = arith.constant dense<0.000000e+00> : vector<8x128xf32>
    %64 = tpu.matmul %63, %48, %cst_32 {dimension_numbers = #tpu.dot_dimension_numbers<[1], [0], [0], [1], [0, 0, 1, 1], [], []>} : vector<8x384xbf16>, vector<384x128xbf16>, vector<8x128xf32> -> vector<8x128xf32>
    %65 = vector.broadcast %49 : vector<1x128xf32> to vector<8x128xf32>
    %66 = arith.addf %64, %65 : vector<8x128xf32>
    %67 = arith.mulf %66, %66 : vector<8x128xf32>
    %68 = tpu.concatenate %66, %67 in 1 : vector<8x128xf32>, vector<8x128xf32> -> vector<8x256xf32>
    %cst_33 = arith.constant dense<0.000000e+00> : vector<256xf32>
    %69 = vector.multi_reduction <add>, %68, %cst_33 [0] : vector<8x256xf32> to vector<256xf32>
    %70 = vector.shape_cast %69 : vector<256xf32> to vector<1x256xf32>
    %71 = arith.truncf %70 : vector<1x256xf32> to vector<1x256xbf16>
    %c0_34 = arith.constant 0 : index
    %c0_35 = arith.constant 0 : index
    %72 = vector.load %arg21[%c0_34, %c0_35] : memref<256x256xbf16, #tpu.memory_space<vmem>>, vector<256x256xbf16>
    %cst_36 = arith.constant dense<0.000000e+00> : vector<1x256xf32>
    %73 = tpu.matmul %71, %72, %cst_36 {dimension_numbers = #tpu.dot_dimension_numbers<[1], [0], [0], [1], [0, 0, 1, 1], [], []>} : vector<1x256xbf16>, vector<256x256xbf16>, vector<1x256xf32> -> vector<1x256xf32>
    %74 = vector.extract_strided_slice %73 {offsets = [0, 0], sizes = [1, 128], strides = [1, 1]} : vector<1x256xf32> to vector<1x128xf32>
    %75 = vector.extract_strided_slice %73 {offsets = [0, 128], sizes = [1, 128], strides = [1, 1]} : vector<1x256xf32> to vector<1x128xf32>
    %76 = arith.mulf %74, %74 : vector<1x128xf32>
    %77 = arith.subf %75, %76 : vector<1x128xf32>
    %cst_37 = arith.constant 0.000000e+00 : f32
    %78 = vector.broadcast %cst_37 : f32 to vector<1x128xf32>
    %79 = arith.maximumf %77, %78 : vector<1x128xf32>
    %80 = vector.broadcast %74 : vector<1x128xf32> to vector<8x128xf32>
    %81 = arith.subf %66, %80 : vector<8x128xf32>
    %cst_38 = arith.constant 9.99999974E-6 : f32
    %82 = vector.broadcast %cst_38 : f32 to vector<1x128xf32>
    %83 = arith.addf %79, %82 : vector<1x128xf32>
    %84 = math.rsqrt %83 : vector<1x128xf32>
    %85 = vector.broadcast %84 : vector<1x128xf32> to vector<8x128xf32>
    %86 = arith.mulf %81, %85 : vector<8x128xf32>
    %cst_39 = arith.constant 0.000000e+00 : f32
    %87 = vector.broadcast %cst_39 : f32 to vector<8x128xf32>
    %88 = arith.maximumf %86, %87 : vector<8x128xf32>
    %c0_40 = arith.constant 0 : index
    %c0_41 = arith.constant 0 : index
    %89 = vector.load %arg8[%c0_40, %c0_41] : memref<384x128xbf16, #tpu.memory_space<vmem>>, vector<384x128xbf16>
    %c0_42 = arith.constant 0 : index
    %c0_43 = arith.constant 0 : index
    %90 = vector.load %arg9[%c0_42, %c0_43] : memref<1x128xf32, #tpu.memory_space<vmem>>, vector<1x128xf32>
    %91 = arith.truncf %88 : vector<8x128xf32> to vector<8x128xbf16>
    %c0_44 = arith.constant 0 : index
    %c0_45 = arith.constant 0 : index
    %c0_46 = arith.constant 0 : index
    %92 = vector.load %arg7[%c0_44, %c0_45, %c0_46] : memref<3x4x8xbf16, #tpu.memory_space<vmem>>, vector<1x4x8xbf16>
    %93 = vector.shape_cast %92 : vector<1x4x8xbf16> to vector<4x8xbf16>
    %cst_47 = arith.constant dense<0.000000e+00> : vector<4x128xf32>
    %94 = tpu.matmul %93, %91, %cst_47 {dimension_numbers = #tpu.dot_dimension_numbers<[1], [0], [0], [1], [0, 0, 1, 1], [], []>} : vector<4x8xbf16>, vector<8x128xbf16>, vector<4x128xf32> -> vector<4x128xf32>
    %95 = arith.truncf %94 : vector<4x128xf32> to vector<4x128xbf16>
    %c1_48 = arith.constant 1 : index
    %c0_49 = arith.constant 0 : index
    %c0_50 = arith.constant 0 : index
    %96 = vector.load %arg7[%c1_48, %c0_49, %c0_50] : memref<3x4x8xbf16, #tpu.memory_space<vmem>>, vector<1x4x8xbf16>
    %97 = vector.shape_cast %96 : vector<1x4x8xbf16> to vector<4x8xbf16>
    %cst_51 = arith.constant dense<0.000000e+00> : vector<4x128xf32>
    %98 = tpu.matmul %97, %91, %cst_51 {dimension_numbers = #tpu.dot_dimension_numbers<[1], [0], [0], [1], [0, 0, 1, 1], [], []>} : vector<4x8xbf16>, vector<8x128xbf16>, vector<4x128xf32> -> vector<4x128xf32>
    %99 = arith.truncf %98 : vector<4x128xf32> to vector<4x128xbf16>
    %c2_52 = arith.constant 2 : index
    %c0_53 = arith.constant 0 : index
    %c0_54 = arith.constant 0 : index
    %100 = vector.load %arg7[%c2_52, %c0_53, %c0_54] : memref<3x4x8xbf16, #tpu.memory_space<vmem>>, vector<1x4x8xbf16>
    %101 = vector.shape_cast %100 : vector<1x4x8xbf16> to vector<4x8xbf16>
    %cst_55 = arith.constant dense<0.000000e+00> : vector<4x128xf32>
    %102 = tpu.matmul %101, %91, %cst_55 {dimension_numbers = #tpu.dot_dimension_numbers<[1], [0], [0], [1], [0, 0, 1, 1], [], []>} : vector<4x8xbf16>, vector<8x128xbf16>, vector<4x128xf32> -> vector<4x128xf32>
    %103 = arith.truncf %102 : vector<4x128xf32> to vector<4x128xbf16>
    %104 = tpu.concatenate %95, %99, %103 in 1 : vector<4x128xbf16>, vector<4x128xbf16>, vector<4x128xbf16> -> vector<4x384xbf16>
    %cst_56 = arith.constant dense<0.000000e+00> : vector<4x128xf32>
    %105 = tpu.matmul %104, %89, %cst_56 {dimension_numbers = #tpu.dot_dimension_numbers<[1], [0], [0], [1], [0, 0, 1, 1], [], []>} : vector<4x384xbf16>, vector<384x128xbf16>, vector<4x128xf32> -> vector<4x128xf32>
    %106 = vector.broadcast %90 : vector<1x128xf32> to vector<4x128xf32>
    %107 = arith.addf %105, %106 : vector<4x128xf32>
    %108 = arith.mulf %107, %107 : vector<4x128xf32>
    %109 = tpu.concatenate %107, %108 in 1 : vector<4x128xf32>, vector<4x128xf32> -> vector<4x256xf32>
    %cst_57 = arith.constant dense<0.000000e+00> : vector<256xf32>
    %110 = vector.multi_reduction <add>, %109, %cst_57 [0] : vector<4x256xf32> to vector<256xf32>
    %111 = vector.shape_cast %110 : vector<256xf32> to vector<1x256xf32>
    %112 = arith.truncf %111 : vector<1x256xf32> to vector<1x256xbf16>
    %c0_58 = arith.constant 0 : index
    %c0_59 = arith.constant 0 : index
    %113 = vector.load %arg22[%c0_58, %c0_59] : memref<256x256xbf16, #tpu.memory_space<vmem>>, vector<256x256xbf16>
    %cst_60 = arith.constant dense<0.000000e+00> : vector<1x256xf32>
    %114 = tpu.matmul %112, %113, %cst_60 {dimension_numbers = #tpu.dot_dimension_numbers<[1], [0], [0], [1], [0, 0, 1, 1], [], []>} : vector<1x256xbf16>, vector<256x256xbf16>, vector<1x256xf32> -> vector<1x256xf32>
    %115 = vector.extract_strided_slice %114 {offsets = [0, 0], sizes = [1, 128], strides = [1, 1]} : vector<1x256xf32> to vector<1x128xf32>
    %116 = vector.extract_strided_slice %114 {offsets = [0, 128], sizes = [1, 128], strides = [1, 1]} : vector<1x256xf32> to vector<1x128xf32>
    %117 = arith.mulf %115, %115 : vector<1x128xf32>
    %118 = arith.subf %116, %117 : vector<1x128xf32>
    %cst_61 = arith.constant 0.000000e+00 : f32
    %119 = vector.broadcast %cst_61 : f32 to vector<1x128xf32>
    %120 = arith.maximumf %118, %119 : vector<1x128xf32>
    %121 = vector.broadcast %115 : vector<1x128xf32> to vector<4x128xf32>
    %122 = arith.subf %107, %121 : vector<4x128xf32>
    %cst_62 = arith.constant 9.99999974E-6 : f32
    %123 = vector.broadcast %cst_62 : f32 to vector<1x128xf32>
    %124 = arith.addf %120, %123 : vector<1x128xf32>
    %125 = math.rsqrt %124 : vector<1x128xf32>
    %126 = vector.broadcast %125 : vector<1x128xf32> to vector<4x128xf32>
    %127 = arith.mulf %122, %126 : vector<4x128xf32>
    %cst_63 = arith.constant 0.000000e+00 : f32
    %128 = vector.broadcast %cst_63 : f32 to vector<4x128xf32>
    %129 = arith.maximumf %127, %128 : vector<4x128xf32>
    %c0_64 = arith.constant 0 : index
    %c0_65 = arith.constant 0 : index
    %c0_66 = arith.constant 0 : index
    %130 = vector.load %arg10[%c0_64, %c0_65, %c0_66] : memref<18x384x128xbf16, #tpu.memory_space<vmem>>, vector<1x384x128xbf16>
    %131 = vector.shape_cast %130 : vector<1x384x128xbf16> to vector<384x128xbf16>
    %c0_67 = arith.constant 0 : index
    %c0_68 = arith.constant 0 : index
    %c0_69 = arith.constant 0 : index
    %132 = vector.load %arg11[%c0_67, %c0_68, %c0_69] : memref<18x1x128xf32, #tpu.memory_space<vmem>>, vector<1x1x128xf32>
    %133 = vector.shape_cast %132 : vector<1x1x128xf32> to vector<1x128xf32>
    %134 = vector.extract_strided_slice %129 {offsets = [1, 0], sizes = [1, 128], strides = [1, 1]} : vector<4x128xf32> to vector<1x128xf32>
    %135 = vector.extract_strided_slice %129 {offsets = [0, 0], sizes = [3, 128], strides = [1, 1]} : vector<4x128xf32> to vector<3x128xf32>
    %136 = tpu.concatenate %134, %135 in 0 : vector<1x128xf32>, vector<3x128xf32> -> vector<4x128xf32>
    %137 = vector.extract_strided_slice %129 {offsets = [1, 0], sizes = [3, 128], strides = [1, 1]} : vector<4x128xf32> to vector<3x128xf32>
    %138 = vector.extract_strided_slice %129 {offsets = [2, 0], sizes = [1, 128], strides = [1, 1]} : vector<4x128xf32> to vector<1x128xf32>
    %139 = tpu.concatenate %137, %138 in 0 : vector<3x128xf32>, vector<1x128xf32> -> vector<4x128xf32>
    %140 = tpu.concatenate %136, %129, %139 in 1 : vector<4x128xf32>, vector<4x128xf32>, vector<4x128xf32> -> vector<4x384xf32>
    %141 = arith.truncf %140 : vector<4x384xf32> to vector<4x384xbf16>
    %cst_70 = arith.constant dense<0.000000e+00> : vector<4x128xf32>
    %142 = tpu.matmul %141, %131, %cst_70 {dimension_numbers = #tpu.dot_dimension_numbers<[1], [0], [0], [1], [0, 0, 1, 1], [], []>} : vector<4x384xbf16>, vector<384x128xbf16>, vector<4x128xf32> -> vector<4x128xf32>
    %143 = vector.broadcast %133 : vector<1x128xf32> to vector<4x128xf32>
    %144 = arith.addf %142, %143 : vector<4x128xf32>
    %145 = arith.mulf %144, %144 : vector<4x128xf32>
    %146 = tpu.concatenate %144, %145 in 1 : vector<4x128xf32>, vector<4x128xf32> -> vector<4x256xf32>
    %cst_71 = arith.constant dense<0.000000e+00> : vector<256xf32>
    %147 = vector.multi_reduction <add>, %146, %cst_71 [0] : vector<4x256xf32> to vector<256xf32>
    %148 = vector.shape_cast %147 : vector<256xf32> to vector<1x256xf32>
    %149 = arith.truncf %148 : vector<1x256xf32> to vector<1x256xbf16>
    %c0_72 = arith.constant 0 : index
    %c0_73 = arith.constant 0 : index
    %150 = vector.load %arg22[%c0_72, %c0_73] : memref<256x256xbf16, #tpu.memory_space<vmem>>, vector<256x256xbf16>
    %cst_74 = arith.constant dense<0.000000e+00> : vector<1x256xf32>
    %151 = tpu.matmul %149, %150, %cst_74 {dimension_numbers = #tpu.dot_dimension_numbers<[1], [0], [0], [1], [0, 0, 1, 1], [], []>} : vector<1x256xbf16>, vector<256x256xbf16>, vector<1x256xf32> -> vector<1x256xf32>
    %152 = vector.extract_strided_slice %151 {offsets = [0, 0], sizes = [1, 128], strides = [1, 1]} : vector<1x256xf32> to vector<1x128xf32>
    %153 = vector.extract_strided_slice %151 {offsets = [0, 128], sizes = [1, 128], strides = [1, 1]} : vector<1x256xf32> to vector<1x128xf32>
    %154 = arith.mulf %152, %152 : vector<1x128xf32>
    %155 = arith.subf %153, %154 : vector<1x128xf32>
    %cst_75 = arith.constant 0.000000e+00 : f32
    %156 = vector.broadcast %cst_75 : f32 to vector<1x128xf32>
    %157 = arith.maximumf %155, %156 : vector<1x128xf32>
    %158 = vector.broadcast %152 : vector<1x128xf32> to vector<4x128xf32>
    %159 = arith.subf %144, %158 : vector<4x128xf32>
    %cst_76 = arith.constant 9.99999974E-6 : f32
    %160 = vector.broadcast %cst_76 : f32 to vector<1x128xf32>
    %161 = arith.addf %157, %160 : vector<1x128xf32>
    %162 = math.rsqrt %161 : vector<1x128xf32>
    %163 = vector.broadcast %162 : vector<1x128xf32> to vector<4x128xf32>
    %164 = arith.mulf %159, %163 : vector<4x128xf32>
    %cst_77 = arith.constant 0.000000e+00 : f32
    %165 = vector.broadcast %cst_77 : f32 to vector<4x128xf32>
    %166 = arith.maximumf %164, %165 : vector<4x128xf32>
    %c1_78 = arith.constant 1 : index
    %c0_79 = arith.constant 0 : index
    %c0_80 = arith.constant 0 : index
    %167 = vector.load %arg10[%c1_78, %c0_79, %c0_80] : memref<18x384x128xbf16, #tpu.memory_space<vmem>>, vector<1x384x128xbf16>
    %168 = vector.shape_cast %167 : vector<1x384x128xbf16> to vector<384x128xbf16>
    %c1_81 = arith.constant 1 : index
    %c0_82 = arith.constant 0 : index
    %c0_83 = arith.constant 0 : index
    %169 = vector.load %arg11[%c1_81, %c0_82, %c0_83] : memref<18x1x128xf32, #tpu.memory_space<vmem>>, vector<1x1x128xf32>
    %170 = vector.shape_cast %169 : vector<1x1x128xf32> to vector<1x128xf32>
    %171 = vector.extract_strided_slice %166 {offsets = [1, 0], sizes = [1, 128], strides = [1, 1]} : vector<4x128xf32> to vector<1x128xf32>
    %172 = vector.extract_strided_slice %166 {offsets = [0, 0], sizes = [3, 128], strides = [1, 1]} : vector<4x128xf32> to vector<3x128xf32>
    %173 = tpu.concatenate %171, %172 in 0 : vector<1x128xf32>, vector<3x128xf32> -> vector<4x128xf32>
    %174 = vector.extract_strided_slice %166 {offsets = [1, 0], sizes = [3, 128], strides = [1, 1]} : vector<4x128xf32> to vector<3x128xf32>
    %175 = vector.extract_strided_slice %166 {offsets = [2, 0], sizes = [1, 128], strides = [1, 1]} : vector<4x128xf32> to vector<1x128xf32>
    %176 = tpu.concatenate %174, %175 in 0 : vector<3x128xf32>, vector<1x128xf32> -> vector<4x128xf32>
    %177 = tpu.concatenate %173, %166, %176 in 1 : vector<4x128xf32>, vector<4x128xf32>, vector<4x128xf32> -> vector<4x384xf32>
    %178 = arith.truncf %177 : vector<4x384xf32> to vector<4x384xbf16>
    %cst_84 = arith.constant dense<0.000000e+00> : vector<4x128xf32>
    %179 = tpu.matmul %178, %168, %cst_84 {dimension_numbers = #tpu.dot_dimension_numbers<[1], [0], [0], [1], [0, 0, 1, 1], [], []>} : vector<4x384xbf16>, vector<384x128xbf16>, vector<4x128xf32> -> vector<4x128xf32>
    %180 = vector.broadcast %170 : vector<1x128xf32> to vector<4x128xf32>
    %181 = arith.addf %179, %180 : vector<4x128xf32>
    %182 = arith.mulf %181, %181 : vector<4x128xf32>
    %183 = tpu.concatenate %181, %182 in 1 : vector<4x128xf32>, vector<4x128xf32> -> vector<4x256xf32>
    %cst_85 = arith.constant dense<0.000000e+00> : vector<256xf32>
    %184 = vector.multi_reduction <add>, %183, %cst_85 [0] : vector<4x256xf32> to vector<256xf32>
    %185 = vector.shape_cast %184 : vector<256xf32> to vector<1x256xf32>
    %186 = arith.truncf %185 : vector<1x256xf32> to vector<1x256xbf16>
    %c0_86 = arith.constant 0 : index
    %c0_87 = arith.constant 0 : index
    %187 = vector.load %arg22[%c0_86, %c0_87] : memref<256x256xbf16, #tpu.memory_space<vmem>>, vector<256x256xbf16>
    %cst_88 = arith.constant dense<0.000000e+00> : vector<1x256xf32>
    %188 = tpu.matmul %186, %187, %cst_88 {dimension_numbers = #tpu.dot_dimension_numbers<[1], [0], [0], [1], [0, 0, 1, 1], [], []>} : vector<1x256xbf16>, vector<256x256xbf16>, vector<1x256xf32> -> vector<1x256xf32>
    %189 = vector.extract_strided_slice %188 {offsets = [0, 0], sizes = [1, 128], strides = [1, 1]} : vector<1x256xf32> to vector<1x128xf32>
    %190 = vector.extract_strided_slice %188 {offsets = [0, 128], sizes = [1, 128], strides = [1, 1]} : vector<1x256xf32> to vector<1x128xf32>
    %191 = arith.mulf %189, %189 : vector<1x128xf32>
    %192 = arith.subf %190, %191 : vector<1x128xf32>
    %cst_89 = arith.constant 0.000000e+00 : f32
    %193 = vector.broadcast %cst_89 : f32 to vector<1x128xf32>
    %194 = arith.maximumf %192, %193 : vector<1x128xf32>
    %195 = vector.broadcast %189 : vector<1x128xf32> to vector<4x128xf32>
    %196 = arith.subf %181, %195 : vector<4x128xf32>
    %cst_90 = arith.constant 9.99999974E-6 : f32
    %197 = vector.broadcast %cst_90 : f32 to vector<1x128xf32>
    %198 = arith.addf %194, %197 : vector<1x128xf32>
    %199 = math.rsqrt %198 : vector<1x128xf32>
    %200 = vector.broadcast %199 : vector<1x128xf32> to vector<4x128xf32>
    %201 = arith.mulf %196, %200 : vector<4x128xf32>
    %202 = arith.addf %129, %201 : vector<4x128xf32>
    %c2_91 = arith.constant 2 : index
    %c0_92 = arith.constant 0 : index
    %c0_93 = arith.constant 0 : index
    %203 = vector.load %arg10[%c2_91, %c0_92, %c0_93] : memref<18x384x128xbf16, #tpu.memory_space<vmem>>, vector<1x384x128xbf16>
    %204 = vector.shape_cast %203 : vector<1x384x128xbf16> to vector<384x128xbf16>
    %c2_94 = arith.constant 2 : index
    %c0_95 = arith.constant 0 : index
    %c0_96 = arith.constant 0 : index
    %205 = vector.load %arg11[%c2_94, %c0_95, %c0_96] : memref<18x1x128xf32, #tpu.memory_space<vmem>>, vector<1x1x128xf32>
    %206 = vector.shape_cast %205 : vector<1x1x128xf32> to vector<1x128xf32>
    %207 = vector.extract_strided_slice %202 {offsets = [1, 0], sizes = [1, 128], strides = [1, 1]} : vector<4x128xf32> to vector<1x128xf32>
    %208 = vector.extract_strided_slice %202 {offsets = [0, 0], sizes = [3, 128], strides = [1, 1]} : vector<4x128xf32> to vector<3x128xf32>
    %209 = tpu.concatenate %207, %208 in 0 : vector<1x128xf32>, vector<3x128xf32> -> vector<4x128xf32>
    %210 = vector.extract_strided_slice %202 {offsets = [1, 0], sizes = [3, 128], strides = [1, 1]} : vector<4x128xf32> to vector<3x128xf32>
    %211 = vector.extract_strided_slice %202 {offsets = [2, 0], sizes = [1, 128], strides = [1, 1]} : vector<4x128xf32> to vector<1x128xf32>
    %212 = tpu.concatenate %210, %211 in 0 : vector<3x128xf32>, vector<1x128xf32> -> vector<4x128xf32>
    %213 = tpu.concatenate %209, %202, %212 in 1 : vector<4x128xf32>, vector<4x128xf32>, vector<4x128xf32> -> vector<4x384xf32>
    %214 = arith.truncf %213 : vector<4x384xf32> to vector<4x384xbf16>
    %cst_97 = arith.constant dense<0.000000e+00> : vector<4x128xf32>
    %215 = tpu.matmul %214, %204, %cst_97 {dimension_numbers = #tpu.dot_dimension_numbers<[1], [0], [0], [1], [0, 0, 1, 1], [], []>} : vector<4x384xbf16>, vector<384x128xbf16>, vector<4x128xf32> -> vector<4x128xf32>
    %216 = vector.broadcast %206 : vector<1x128xf32> to vector<4x128xf32>
    %217 = arith.addf %215, %216 : vector<4x128xf32>
    %218 = arith.mulf %217, %217 : vector<4x128xf32>
    %219 = tpu.concatenate %217, %218 in 1 : vector<4x128xf32>, vector<4x128xf32> -> vector<4x256xf32>
    %cst_98 = arith.constant dense<0.000000e+00> : vector<256xf32>
    %220 = vector.multi_reduction <add>, %219, %cst_98 [0] : vector<4x256xf32> to vector<256xf32>
    %221 = vector.shape_cast %220 : vector<256xf32> to vector<1x256xf32>
    %222 = arith.truncf %221 : vector<1x256xf32> to vector<1x256xbf16>
    %c0_99 = arith.constant 0 : index
    %c0_100 = arith.constant 0 : index
    %223 = vector.load %arg22[%c0_99, %c0_100] : memref<256x256xbf16, #tpu.memory_space<vmem>>, vector<256x256xbf16>
    %cst_101 = arith.constant dense<0.000000e+00> : vector<1x256xf32>
    %224 = tpu.matmul %222, %223, %cst_101 {dimension_numbers = #tpu.dot_dimension_numbers<[1], [0], [0], [1], [0, 0, 1, 1], [], []>} : vector<1x256xbf16>, vector<256x256xbf16>, vector<1x256xf32> -> vector<1x256xf32>
    %225 = vector.extract_strided_slice %224 {offsets = [0, 0], sizes = [1, 128], strides = [1, 1]} : vector<1x256xf32> to vector<1x128xf32>
    %226 = vector.extract_strided_slice %224 {offsets = [0, 128], sizes = [1, 128], strides = [1, 1]} : vector<1x256xf32> to vector<1x128xf32>
    %227 = arith.mulf %225, %225 : vector<1x128xf32>
    %228 = arith.subf %226, %227 : vector<1x128xf32>
    %cst_102 = arith.constant 0.000000e+00 : f32
    %229 = vector.broadcast %cst_102 : f32 to vector<1x128xf32>
    %230 = arith.maximumf %228, %229 : vector<1x128xf32>
    %231 = vector.broadcast %225 : vector<1x128xf32> to vector<4x128xf32>
    %232 = arith.subf %217, %231 : vector<4x128xf32>
    %cst_103 = arith.constant 9.99999974E-6 : f32
    %233 = vector.broadcast %cst_103 : f32 to vector<1x128xf32>
    %234 = arith.addf %230, %233 : vector<1x128xf32>
    %235 = math.rsqrt %234 : vector<1x128xf32>
    %236 = vector.broadcast %235 : vector<1x128xf32> to vector<4x128xf32>
    %237 = arith.mulf %232, %236 : vector<4x128xf32>
    %cst_104 = arith.constant 0.000000e+00 : f32
    %238 = vector.broadcast %cst_104 : f32 to vector<4x128xf32>
    %239 = arith.maximumf %237, %238 : vector<4x128xf32>
    %c3 = arith.constant 3 : index
    %c0_105 = arith.constant 0 : index
    %c0_106 = arith.constant 0 : index
    %240 = vector.load %arg10[%c3, %c0_105, %c0_106] : memref<18x384x128xbf16, #tpu.memory_space<vmem>>, vector<1x384x128xbf16>
    %241 = vector.shape_cast %240 : vector<1x384x128xbf16> to vector<384x128xbf16>
    %c3_107 = arith.constant 3 : index
    %c0_108 = arith.constant 0 : index
    %c0_109 = arith.constant 0 : index
    %242 = vector.load %arg11[%c3_107, %c0_108, %c0_109] : memref<18x1x128xf32, #tpu.memory_space<vmem>>, vector<1x1x128xf32>
    %243 = vector.shape_cast %242 : vector<1x1x128xf32> to vector<1x128xf32>
    %244 = vector.extract_strided_slice %239 {offsets = [1, 0], sizes = [1, 128], strides = [1, 1]} : vector<4x128xf32> to vector<1x128xf32>
    %245 = vector.extract_strided_slice %239 {offsets = [0, 0], sizes = [3, 128], strides = [1, 1]} : vector<4x128xf32> to vector<3x128xf32>
    %246 = tpu.concatenate %244, %245 in 0 : vector<1x128xf32>, vector<3x128xf32> -> vector<4x128xf32>
    %247 = vector.extract_strided_slice %239 {offsets = [1, 0], sizes = [3, 128], strides = [1, 1]} : vector<4x128xf32> to vector<3x128xf32>
    %248 = vector.extract_strided_slice %239 {offsets = [2, 0], sizes = [1, 128], strides = [1, 1]} : vector<4x128xf32> to vector<1x128xf32>
    %249 = tpu.concatenate %247, %248 in 0 : vector<3x128xf32>, vector<1x128xf32> -> vector<4x128xf32>
    %250 = tpu.concatenate %246, %239, %249 in 1 : vector<4x128xf32>, vector<4x128xf32>, vector<4x128xf32> -> vector<4x384xf32>
    %251 = arith.truncf %250 : vector<4x384xf32> to vector<4x384xbf16>
    %cst_110 = arith.constant dense<0.000000e+00> : vector<4x128xf32>
    %252 = tpu.matmul %251, %241, %cst_110 {dimension_numbers = #tpu.dot_dimension_numbers<[1], [0], [0], [1], [0, 0, 1, 1], [], []>} : vector<4x384xbf16>, vector<384x128xbf16>, vector<4x128xf32> -> vector<4x128xf32>
    %253 = vector.broadcast %243 : vector<1x128xf32> to vector<4x128xf32>
    %254 = arith.addf %252, %253 : vector<4x128xf32>
    %255 = arith.mulf %254, %254 : vector<4x128xf32>
    %256 = tpu.concatenate %254, %255 in 1 : vector<4x128xf32>, vector<4x128xf32> -> vector<4x256xf32>
    %cst_111 = arith.constant dense<0.000000e+00> : vector<256xf32>
    %257 = vector.multi_reduction <add>, %256, %cst_111 [0] : vector<4x256xf32> to vector<256xf32>
    %258 = vector.shape_cast %257 : vector<256xf32> to vector<1x256xf32>
    %259 = arith.truncf %258 : vector<1x256xf32> to vector<1x256xbf16>
    %c0_112 = arith.constant 0 : index
    %c0_113 = arith.constant 0 : index
    %260 = vector.load %arg22[%c0_112, %c0_113] : memref<256x256xbf16, #tpu.memory_space<vmem>>, vector<256x256xbf16>
    %cst_114 = arith.constant dense<0.000000e+00> : vector<1x256xf32>
    %261 = tpu.matmul %259, %260, %cst_114 {dimension_numbers = #tpu.dot_dimension_numbers<[1], [0], [0], [1], [0, 0, 1, 1], [], []>} : vector<1x256xbf16>, vector<256x256xbf16>, vector<1x256xf32> -> vector<1x256xf32>
    %262 = vector.extract_strided_slice %261 {offsets = [0, 0], sizes = [1, 128], strides = [1, 1]} : vector<1x256xf32> to vector<1x128xf32>
    %263 = vector.extract_strided_slice %261 {offsets = [0, 128], sizes = [1, 128], strides = [1, 1]} : vector<1x256xf32> to vector<1x128xf32>
    %264 = arith.mulf %262, %262 : vector<1x128xf32>
    %265 = arith.subf %263, %264 : vector<1x128xf32>
    %cst_115 = arith.constant 0.000000e+00 : f32
    %266 = vector.broadcast %cst_115 : f32 to vector<1x128xf32>
    %267 = arith.maximumf %265, %266 : vector<1x128xf32>
    %268 = vector.broadcast %262 : vector<1x128xf32> to vector<4x128xf32>
    %269 = arith.subf %254, %268 : vector<4x128xf32>
    %cst_116 = arith.constant 9.99999974E-6 : f32
    %270 = vector.broadcast %cst_116 : f32 to vector<1x128xf32>
    %271 = arith.addf %267, %270 : vector<1x128xf32>
    %272 = math.rsqrt %271 : vector<1x128xf32>
    %273 = vector.broadcast %272 : vector<1x128xf32> to vector<4x128xf32>
    %274 = arith.mulf %269, %273 : vector<4x128xf32>
    %275 = arith.addf %202, %274 : vector<4x128xf32>
    %c4 = arith.constant 4 : index
    %c0_117 = arith.constant 0 : index
    %c0_118 = arith.constant 0 : index
    %276 = vector.load %arg10[%c4, %c0_117, %c0_118] : memref<18x384x128xbf16, #tpu.memory_space<vmem>>, vector<1x384x128xbf16>
    %277 = vector.shape_cast %276 : vector<1x384x128xbf16> to vector<384x128xbf16>
    %c4_119 = arith.constant 4 : index
    %c0_120 = arith.constant 0 : index
    %c0_121 = arith.constant 0 : index
    %278 = vector.load %arg11[%c4_119, %c0_120, %c0_121] : memref<18x1x128xf32, #tpu.memory_space<vmem>>, vector<1x1x128xf32>
    %279 = vector.shape_cast %278 : vector<1x1x128xf32> to vector<1x128xf32>
    %280 = vector.extract_strided_slice %275 {offsets = [1, 0], sizes = [1, 128], strides = [1, 1]} : vector<4x128xf32> to vector<1x128xf32>
    %281 = vector.extract_strided_slice %275 {offsets = [0, 0], sizes = [3, 128], strides = [1, 1]} : vector<4x128xf32> to vector<3x128xf32>
    %282 = tpu.concatenate %280, %281 in 0 : vector<1x128xf32>, vector<3x128xf32> -> vector<4x128xf32>
    %283 = vector.extract_strided_slice %275 {offsets = [1, 0], sizes = [3, 128], strides = [1, 1]} : vector<4x128xf32> to vector<3x128xf32>
    %284 = vector.extract_strided_slice %275 {offsets = [2, 0], sizes = [1, 128], strides = [1, 1]} : vector<4x128xf32> to vector<1x128xf32>
    %285 = tpu.concatenate %283, %284 in 0 : vector<3x128xf32>, vector<1x128xf32> -> vector<4x128xf32>
    %286 = tpu.concatenate %282, %275, %285 in 1 : vector<4x128xf32>, vector<4x128xf32>, vector<4x128xf32> -> vector<4x384xf32>
    %287 = arith.truncf %286 : vector<4x384xf32> to vector<4x384xbf16>
    %cst_122 = arith.constant dense<0.000000e+00> : vector<4x128xf32>
    %288 = tpu.matmul %287, %277, %cst_122 {dimension_numbers = #tpu.dot_dimension_numbers<[1], [0], [0], [1], [0, 0, 1, 1], [], []>} : vector<4x384xbf16>, vector<384x128xbf16>, vector<4x128xf32> -> vector<4x128xf32>
    %289 = vector.broadcast %279 : vector<1x128xf32> to vector<4x128xf32>
    %290 = arith.addf %288, %289 : vector<4x128xf32>
    %291 = arith.mulf %290, %290 : vector<4x128xf32>
    %292 = tpu.concatenate %290, %291 in 1 : vector<4x128xf32>, vector<4x128xf32> -> vector<4x256xf32>
    %cst_123 = arith.constant dense<0.000000e+00> : vector<256xf32>
    %293 = vector.multi_reduction <add>, %292, %cst_123 [0] : vector<4x256xf32> to vector<256xf32>
    %294 = vector.shape_cast %293 : vector<256xf32> to vector<1x256xf32>
    %295 = arith.truncf %294 : vector<1x256xf32> to vector<1x256xbf16>
    %c0_124 = arith.constant 0 : index
    %c0_125 = arith.constant 0 : index
    %296 = vector.load %arg22[%c0_124, %c0_125] : memref<256x256xbf16, #tpu.memory_space<vmem>>, vector<256x256xbf16>
    %cst_126 = arith.constant dense<0.000000e+00> : vector<1x256xf32>
    %297 = tpu.matmul %295, %296, %cst_126 {dimension_numbers = #tpu.dot_dimension_numbers<[1], [0], [0], [1], [0, 0, 1, 1], [], []>} : vector<1x256xbf16>, vector<256x256xbf16>, vector<1x256xf32> -> vector<1x256xf32>
    %298 = vector.extract_strided_slice %297 {offsets = [0, 0], sizes = [1, 128], strides = [1, 1]} : vector<1x256xf32> to vector<1x128xf32>
    %299 = vector.extract_strided_slice %297 {offsets = [0, 128], sizes = [1, 128], strides = [1, 1]} : vector<1x256xf32> to vector<1x128xf32>
    %300 = arith.mulf %298, %298 : vector<1x128xf32>
    %301 = arith.subf %299, %300 : vector<1x128xf32>
    %cst_127 = arith.constant 0.000000e+00 : f32
    %302 = vector.broadcast %cst_127 : f32 to vector<1x128xf32>
    %303 = arith.maximumf %301, %302 : vector<1x128xf32>
    %304 = vector.broadcast %298 : vector<1x128xf32> to vector<4x128xf32>
    %305 = arith.subf %290, %304 : vector<4x128xf32>
    %cst_128 = arith.constant 9.99999974E-6 : f32
    %306 = vector.broadcast %cst_128 : f32 to vector<1x128xf32>
    %307 = arith.addf %303, %306 : vector<1x128xf32>
    %308 = math.rsqrt %307 : vector<1x128xf32>
    %309 = vector.broadcast %308 : vector<1x128xf32> to vector<4x128xf32>
    %310 = arith.mulf %305, %309 : vector<4x128xf32>
    %cst_129 = arith.constant 0.000000e+00 : f32
    %311 = vector.broadcast %cst_129 : f32 to vector<4x128xf32>
    %312 = arith.maximumf %310, %311 : vector<4x128xf32>
    %c5 = arith.constant 5 : index
    %c0_130 = arith.constant 0 : index
    %c0_131 = arith.constant 0 : index
    %313 = vector.load %arg10[%c5, %c0_130, %c0_131] : memref<18x384x128xbf16, #tpu.memory_space<vmem>>, vector<1x384x128xbf16>
    %314 = vector.shape_cast %313 : vector<1x384x128xbf16> to vector<384x128xbf16>
    %c5_132 = arith.constant 5 : index
    %c0_133 = arith.constant 0 : index
    %c0_134 = arith.constant 0 : index
    %315 = vector.load %arg11[%c5_132, %c0_133, %c0_134] : memref<18x1x128xf32, #tpu.memory_space<vmem>>, vector<1x1x128xf32>
    %316 = vector.shape_cast %315 : vector<1x1x128xf32> to vector<1x128xf32>
    %317 = vector.extract_strided_slice %312 {offsets = [1, 0], sizes = [1, 128], strides = [1, 1]} : vector<4x128xf32> to vector<1x128xf32>
    %318 = vector.extract_strided_slice %312 {offsets = [0, 0], sizes = [3, 128], strides = [1, 1]} : vector<4x128xf32> to vector<3x128xf32>
    %319 = tpu.concatenate %317, %318 in 0 : vector<1x128xf32>, vector<3x128xf32> -> vector<4x128xf32>
    %320 = vector.extract_strided_slice %312 {offsets = [1, 0], sizes = [3, 128], strides = [1, 1]} : vector<4x128xf32> to vector<3x128xf32>
    %321 = vector.extract_strided_slice %312 {offsets = [2, 0], sizes = [1, 128], strides = [1, 1]} : vector<4x128xf32> to vector<1x128xf32>
    %322 = tpu.concatenate %320, %321 in 0 : vector<3x128xf32>, vector<1x128xf32> -> vector<4x128xf32>
    %323 = tpu.concatenate %319, %312, %322 in 1 : vector<4x128xf32>, vector<4x128xf32>, vector<4x128xf32> -> vector<4x384xf32>
    %324 = arith.truncf %323 : vector<4x384xf32> to vector<4x384xbf16>
    %cst_135 = arith.constant dense<0.000000e+00> : vector<4x128xf32>
    %325 = tpu.matmul %324, %314, %cst_135 {dimension_numbers = #tpu.dot_dimension_numbers<[1], [0], [0], [1], [0, 0, 1, 1], [], []>} : vector<4x384xbf16>, vector<384x128xbf16>, vector<4x128xf32> -> vector<4x128xf32>
    %326 = vector.broadcast %316 : vector<1x128xf32> to vector<4x128xf32>
    %327 = arith.addf %325, %326 : vector<4x128xf32>
    %328 = arith.mulf %327, %327 : vector<4x128xf32>
    %329 = tpu.concatenate %327, %328 in 1 : vector<4x128xf32>, vector<4x128xf32> -> vector<4x256xf32>
    %cst_136 = arith.constant dense<0.000000e+00> : vector<256xf32>
    %330 = vector.multi_reduction <add>, %329, %cst_136 [0] : vector<4x256xf32> to vector<256xf32>
    %331 = vector.shape_cast %330 : vector<256xf32> to vector<1x256xf32>
    %332 = arith.truncf %331 : vector<1x256xf32> to vector<1x256xbf16>
    %c0_137 = arith.constant 0 : index
    %c0_138 = arith.constant 0 : index
    %333 = vector.load %arg22[%c0_137, %c0_138] : memref<256x256xbf16, #tpu.memory_space<vmem>>, vector<256x256xbf16>
    %cst_139 = arith.constant dense<0.000000e+00> : vector<1x256xf32>
    %334 = tpu.matmul %332, %333, %cst_139 {dimension_numbers = #tpu.dot_dimension_numbers<[1], [0], [0], [1], [0, 0, 1, 1], [], []>} : vector<1x256xbf16>, vector<256x256xbf16>, vector<1x256xf32> -> vector<1x256xf32>
    %335 = vector.extract_strided_slice %334 {offsets = [0, 0], sizes = [1, 128], strides = [1, 1]} : vector<1x256xf32> to vector<1x128xf32>
    %336 = vector.extract_strided_slice %334 {offsets = [0, 128], sizes = [1, 128], strides = [1, 1]} : vector<1x256xf32> to vector<1x128xf32>
    %337 = arith.mulf %335, %335 : vector<1x128xf32>
    %338 = arith.subf %336, %337 : vector<1x128xf32>
    %cst_140 = arith.constant 0.000000e+00 : f32
    %339 = vector.broadcast %cst_140 : f32 to vector<1x128xf32>
    %340 = arith.maximumf %338, %339 : vector<1x128xf32>
    %341 = vector.broadcast %335 : vector<1x128xf32> to vector<4x128xf32>
    %342 = arith.subf %327, %341 : vector<4x128xf32>
    %cst_141 = arith.constant 9.99999974E-6 : f32
    %343 = vector.broadcast %cst_141 : f32 to vector<1x128xf32>
    %344 = arith.addf %340, %343 : vector<1x128xf32>
    %345 = math.rsqrt %344 : vector<1x128xf32>
    %346 = vector.broadcast %345 : vector<1x128xf32> to vector<4x128xf32>
    %347 = arith.mulf %342, %346 : vector<4x128xf32>
    %348 = arith.addf %275, %347 : vector<4x128xf32>
    %c6 = arith.constant 6 : index
    %c0_142 = arith.constant 0 : index
    %c0_143 = arith.constant 0 : index
    %349 = vector.load %arg10[%c6, %c0_142, %c0_143] : memref<18x384x128xbf16, #tpu.memory_space<vmem>>, vector<1x384x128xbf16>
    %350 = vector.shape_cast %349 : vector<1x384x128xbf16> to vector<384x128xbf16>
    %c6_144 = arith.constant 6 : index
    %c0_145 = arith.constant 0 : index
    %c0_146 = arith.constant 0 : index
    %351 = vector.load %arg11[%c6_144, %c0_145, %c0_146] : memref<18x1x128xf32, #tpu.memory_space<vmem>>, vector<1x1x128xf32>
    %352 = vector.shape_cast %351 : vector<1x1x128xf32> to vector<1x128xf32>
    %353 = vector.extract_strided_slice %348 {offsets = [1, 0], sizes = [1, 128], strides = [1, 1]} : vector<4x128xf32> to vector<1x128xf32>
    %354 = vector.extract_strided_slice %348 {offsets = [0, 0], sizes = [3, 128], strides = [1, 1]} : vector<4x128xf32> to vector<3x128xf32>
    %355 = tpu.concatenate %353, %354 in 0 : vector<1x128xf32>, vector<3x128xf32> -> vector<4x128xf32>
    %356 = vector.extract_strided_slice %348 {offsets = [1, 0], sizes = [3, 128], strides = [1, 1]} : vector<4x128xf32> to vector<3x128xf32>
    %357 = vector.extract_strided_slice %348 {offsets = [2, 0], sizes = [1, 128], strides = [1, 1]} : vector<4x128xf32> to vector<1x128xf32>
    %358 = tpu.concatenate %356, %357 in 0 : vector<3x128xf32>, vector<1x128xf32> -> vector<4x128xf32>
    %359 = tpu.concatenate %355, %348, %358 in 1 : vector<4x128xf32>, vector<4x128xf32>, vector<4x128xf32> -> vector<4x384xf32>
    %360 = arith.truncf %359 : vector<4x384xf32> to vector<4x384xbf16>
    %cst_147 = arith.constant dense<0.000000e+00> : vector<4x128xf32>
    %361 = tpu.matmul %360, %350, %cst_147 {dimension_numbers = #tpu.dot_dimension_numbers<[1], [0], [0], [1], [0, 0, 1, 1], [], []>} : vector<4x384xbf16>, vector<384x128xbf16>, vector<4x128xf32> -> vector<4x128xf32>
    %362 = vector.broadcast %352 : vector<1x128xf32> to vector<4x128xf32>
    %363 = arith.addf %361, %362 : vector<4x128xf32>
    %364 = arith.mulf %363, %363 : vector<4x128xf32>
    %365 = tpu.concatenate %363, %364 in 1 : vector<4x128xf32>, vector<4x128xf32> -> vector<4x256xf32>
    %cst_148 = arith.constant dense<0.000000e+00> : vector<256xf32>
    %366 = vector.multi_reduction <add>, %365, %cst_148 [0] : vector<4x256xf32> to vector<256xf32>
    %367 = vector.shape_cast %366 : vector<256xf32> to vector<1x256xf32>
    %368 = arith.truncf %367 : vector<1x256xf32> to vector<1x256xbf16>
    %c0_149 = arith.constant 0 : index
    %c0_150 = arith.constant 0 : index
    %369 = vector.load %arg22[%c0_149, %c0_150] : memref<256x256xbf16, #tpu.memory_space<vmem>>, vector<256x256xbf16>
    %cst_151 = arith.constant dense<0.000000e+00> : vector<1x256xf32>
    %370 = tpu.matmul %368, %369, %cst_151 {dimension_numbers = #tpu.dot_dimension_numbers<[1], [0], [0], [1], [0, 0, 1, 1], [], []>} : vector<1x256xbf16>, vector<256x256xbf16>, vector<1x256xf32> -> vector<1x256xf32>
    %371 = vector.extract_strided_slice %370 {offsets = [0, 0], sizes = [1, 128], strides = [1, 1]} : vector<1x256xf32> to vector<1x128xf32>
    %372 = vector.extract_strided_slice %370 {offsets = [0, 128], sizes = [1, 128], strides = [1, 1]} : vector<1x256xf32> to vector<1x128xf32>
    %373 = arith.mulf %371, %371 : vector<1x128xf32>
    %374 = arith.subf %372, %373 : vector<1x128xf32>
    %cst_152 = arith.constant 0.000000e+00 : f32
    %375 = vector.broadcast %cst_152 : f32 to vector<1x128xf32>
    %376 = arith.maximumf %374, %375 : vector<1x128xf32>
    %377 = vector.broadcast %371 : vector<1x128xf32> to vector<4x128xf32>
    %378 = arith.subf %363, %377 : vector<4x128xf32>
    %cst_153 = arith.constant 9.99999974E-6 : f32
    %379 = vector.broadcast %cst_153 : f32 to vector<1x128xf32>
    %380 = arith.addf %376, %379 : vector<1x128xf32>
    %381 = math.rsqrt %380 : vector<1x128xf32>
    %382 = vector.broadcast %381 : vector<1x128xf32> to vector<4x128xf32>
    %383 = arith.mulf %378, %382 : vector<4x128xf32>
    %cst_154 = arith.constant 0.000000e+00 : f32
    %384 = vector.broadcast %cst_154 : f32 to vector<4x128xf32>
    %385 = arith.maximumf %383, %384 : vector<4x128xf32>
    %c7 = arith.constant 7 : index
    %c0_155 = arith.constant 0 : index
    %c0_156 = arith.constant 0 : index
    %386 = vector.load %arg10[%c7, %c0_155, %c0_156] : memref<18x384x128xbf16, #tpu.memory_space<vmem>>, vector<1x384x128xbf16>
    %387 = vector.shape_cast %386 : vector<1x384x128xbf16> to vector<384x128xbf16>
    %c7_157 = arith.constant 7 : index
    %c0_158 = arith.constant 0 : index
    %c0_159 = arith.constant 0 : index
    %388 = vector.load %arg11[%c7_157, %c0_158, %c0_159] : memref<18x1x128xf32, #tpu.memory_space<vmem>>, vector<1x1x128xf32>
    %389 = vector.shape_cast %388 : vector<1x1x128xf32> to vector<1x128xf32>
    %390 = vector.extract_strided_slice %385 {offsets = [1, 0], sizes = [1, 128], strides = [1, 1]} : vector<4x128xf32> to vector<1x128xf32>
    %391 = vector.extract_strided_slice %385 {offsets = [0, 0], sizes = [3, 128], strides = [1, 1]} : vector<4x128xf32> to vector<3x128xf32>
    %392 = tpu.concatenate %390, %391 in 0 : vector<1x128xf32>, vector<3x128xf32> -> vector<4x128xf32>
    %393 = vector.extract_strided_slice %385 {offsets = [1, 0], sizes = [3, 128], strides = [1, 1]} : vector<4x128xf32> to vector<3x128xf32>
    %394 = vector.extract_strided_slice %385 {offsets = [2, 0], sizes = [1, 128], strides = [1, 1]} : vector<4x128xf32> to vector<1x128xf32>
    %395 = tpu.concatenate %393, %394 in 0 : vector<3x128xf32>, vector<1x128xf32> -> vector<4x128xf32>
    %396 = tpu.concatenate %392, %385, %395 in 1 : vector<4x128xf32>, vector<4x128xf32>, vector<4x128xf32> -> vector<4x384xf32>
    %397 = arith.truncf %396 : vector<4x384xf32> to vector<4x384xbf16>
    %cst_160 = arith.constant dense<0.000000e+00> : vector<4x128xf32>
    %398 = tpu.matmul %397, %387, %cst_160 {dimension_numbers = #tpu.dot_dimension_numbers<[1], [0], [0], [1], [0, 0, 1, 1], [], []>} : vector<4x384xbf16>, vector<384x128xbf16>, vector<4x128xf32> -> vector<4x128xf32>
    %399 = vector.broadcast %389 : vector<1x128xf32> to vector<4x128xf32>
    %400 = arith.addf %398, %399 : vector<4x128xf32>
    %401 = arith.mulf %400, %400 : vector<4x128xf32>
    %402 = tpu.concatenate %400, %401 in 1 : vector<4x128xf32>, vector<4x128xf32> -> vector<4x256xf32>
    %cst_161 = arith.constant dense<0.000000e+00> : vector<256xf32>
    %403 = vector.multi_reduction <add>, %402, %cst_161 [0] : vector<4x256xf32> to vector<256xf32>
    %404 = vector.shape_cast %403 : vector<256xf32> to vector<1x256xf32>
    %405 = arith.truncf %404 : vector<1x256xf32> to vector<1x256xbf16>
    %c0_162 = arith.constant 0 : index
    %c0_163 = arith.constant 0 : index
    %406 = vector.load %arg22[%c0_162, %c0_163] : memref<256x256xbf16, #tpu.memory_space<vmem>>, vector<256x256xbf16>
    %cst_164 = arith.constant dense<0.000000e+00> : vector<1x256xf32>
    %407 = tpu.matmul %405, %406, %cst_164 {dimension_numbers = #tpu.dot_dimension_numbers<[1], [0], [0], [1], [0, 0, 1, 1], [], []>} : vector<1x256xbf16>, vector<256x256xbf16>, vector<1x256xf32> -> vector<1x256xf32>
    %408 = vector.extract_strided_slice %407 {offsets = [0, 0], sizes = [1, 128], strides = [1, 1]} : vector<1x256xf32> to vector<1x128xf32>
    %409 = vector.extract_strided_slice %407 {offsets = [0, 128], sizes = [1, 128], strides = [1, 1]} : vector<1x256xf32> to vector<1x128xf32>
    %410 = arith.mulf %408, %408 : vector<1x128xf32>
    %411 = arith.subf %409, %410 : vector<1x128xf32>
    %cst_165 = arith.constant 0.000000e+00 : f32
    %412 = vector.broadcast %cst_165 : f32 to vector<1x128xf32>
    %413 = arith.maximumf %411, %412 : vector<1x128xf32>
    %414 = vector.broadcast %408 : vector<1x128xf32> to vector<4x128xf32>
    %415 = arith.subf %400, %414 : vector<4x128xf32>
    %cst_166 = arith.constant 9.99999974E-6 : f32
    %416 = vector.broadcast %cst_166 : f32 to vector<1x128xf32>
    %417 = arith.addf %413, %416 : vector<1x128xf32>
    %418 = math.rsqrt %417 : vector<1x128xf32>
    %419 = vector.broadcast %418 : vector<1x128xf32> to vector<4x128xf32>
    %420 = arith.mulf %415, %419 : vector<4x128xf32>
    %421 = arith.addf %348, %420 : vector<4x128xf32>
    %c8 = arith.constant 8 : index
    %c0_167 = arith.constant 0 : index
    %c0_168 = arith.constant 0 : index
    %422 = vector.load %arg10[%c8, %c0_167, %c0_168] : memref<18x384x128xbf16, #tpu.memory_space<vmem>>, vector<1x384x128xbf16>
    %423 = vector.shape_cast %422 : vector<1x384x128xbf16> to vector<384x128xbf16>
    %c8_169 = arith.constant 8 : index
    %c0_170 = arith.constant 0 : index
    %c0_171 = arith.constant 0 : index
    %424 = vector.load %arg11[%c8_169, %c0_170, %c0_171] : memref<18x1x128xf32, #tpu.memory_space<vmem>>, vector<1x1x128xf32>
    %425 = vector.shape_cast %424 : vector<1x1x128xf32> to vector<1x128xf32>
    %426 = vector.extract_strided_slice %421 {offsets = [1, 0], sizes = [1, 128], strides = [1, 1]} : vector<4x128xf32> to vector<1x128xf32>
    %427 = vector.extract_strided_slice %421 {offsets = [0, 0], sizes = [3, 128], strides = [1, 1]} : vector<4x128xf32> to vector<3x128xf32>
    %428 = tpu.concatenate %426, %427 in 0 : vector<1x128xf32>, vector<3x128xf32> -> vector<4x128xf32>
    %429 = vector.extract_strided_slice %421 {offsets = [1, 0], sizes = [3, 128], strides = [1, 1]} : vector<4x128xf32> to vector<3x128xf32>
    %430 = vector.extract_strided_slice %421 {offsets = [2, 0], sizes = [1, 128], strides = [1, 1]} : vector<4x128xf32> to vector<1x128xf32>
    %431 = tpu.concatenate %429, %430 in 0 : vector<3x128xf32>, vector<1x128xf32> -> vector<4x128xf32>
    %432 = tpu.concatenate %428, %421, %431 in 1 : vector<4x128xf32>, vector<4x128xf32>, vector<4x128xf32> -> vector<4x384xf32>
    %433 = arith.truncf %432 : vector<4x384xf32> to vector<4x384xbf16>
    %cst_172 = arith.constant dense<0.000000e+00> : vector<4x128xf32>
    %434 = tpu.matmul %433, %423, %cst_172 {dimension_numbers = #tpu.dot_dimension_numbers<[1], [0], [0], [1], [0, 0, 1, 1], [], []>} : vector<4x384xbf16>, vector<384x128xbf16>, vector<4x128xf32> -> vector<4x128xf32>
    %435 = vector.broadcast %425 : vector<1x128xf32> to vector<4x128xf32>
    %436 = arith.addf %434, %435 : vector<4x128xf32>
    %437 = arith.mulf %436, %436 : vector<4x128xf32>
    %438 = tpu.concatenate %436, %437 in 1 : vector<4x128xf32>, vector<4x128xf32> -> vector<4x256xf32>
    %cst_173 = arith.constant dense<0.000000e+00> : vector<256xf32>
    %439 = vector.multi_reduction <add>, %438, %cst_173 [0] : vector<4x256xf32> to vector<256xf32>
    %440 = vector.shape_cast %439 : vector<256xf32> to vector<1x256xf32>
    %441 = arith.truncf %440 : vector<1x256xf32> to vector<1x256xbf16>
    %c0_174 = arith.constant 0 : index
    %c0_175 = arith.constant 0 : index
    %442 = vector.load %arg22[%c0_174, %c0_175] : memref<256x256xbf16, #tpu.memory_space<vmem>>, vector<256x256xbf16>
    %cst_176 = arith.constant dense<0.000000e+00> : vector<1x256xf32>
    %443 = tpu.matmul %441, %442, %cst_176 {dimension_numbers = #tpu.dot_dimension_numbers<[1], [0], [0], [1], [0, 0, 1, 1], [], []>} : vector<1x256xbf16>, vector<256x256xbf16>, vector<1x256xf32> -> vector<1x256xf32>
    %444 = vector.extract_strided_slice %443 {offsets = [0, 0], sizes = [1, 128], strides = [1, 1]} : vector<1x256xf32> to vector<1x128xf32>
    %445 = vector.extract_strided_slice %443 {offsets = [0, 128], sizes = [1, 128], strides = [1, 1]} : vector<1x256xf32> to vector<1x128xf32>
    %446 = arith.mulf %444, %444 : vector<1x128xf32>
    %447 = arith.subf %445, %446 : vector<1x128xf32>
    %cst_177 = arith.constant 0.000000e+00 : f32
    %448 = vector.broadcast %cst_177 : f32 to vector<1x128xf32>
    %449 = arith.maximumf %447, %448 : vector<1x128xf32>
    %450 = vector.broadcast %444 : vector<1x128xf32> to vector<4x128xf32>
    %451 = arith.subf %436, %450 : vector<4x128xf32>
    %cst_178 = arith.constant 9.99999974E-6 : f32
    %452 = vector.broadcast %cst_178 : f32 to vector<1x128xf32>
    %453 = arith.addf %449, %452 : vector<1x128xf32>
    %454 = math.rsqrt %453 : vector<1x128xf32>
    %455 = vector.broadcast %454 : vector<1x128xf32> to vector<4x128xf32>
    %456 = arith.mulf %451, %455 : vector<4x128xf32>
    %cst_179 = arith.constant 0.000000e+00 : f32
    %457 = vector.broadcast %cst_179 : f32 to vector<4x128xf32>
    %458 = arith.maximumf %456, %457 : vector<4x128xf32>
    %c9 = arith.constant 9 : index
    %c0_180 = arith.constant 0 : index
    %c0_181 = arith.constant 0 : index
    %459 = vector.load %arg10[%c9, %c0_180, %c0_181] : memref<18x384x128xbf16, #tpu.memory_space<vmem>>, vector<1x384x128xbf16>
    %460 = vector.shape_cast %459 : vector<1x384x128xbf16> to vector<384x128xbf16>
    %c9_182 = arith.constant 9 : index
    %c0_183 = arith.constant 0 : index
    %c0_184 = arith.constant 0 : index
    %461 = vector.load %arg11[%c9_182, %c0_183, %c0_184] : memref<18x1x128xf32, #tpu.memory_space<vmem>>, vector<1x1x128xf32>
    %462 = vector.shape_cast %461 : vector<1x1x128xf32> to vector<1x128xf32>
    %463 = vector.extract_strided_slice %458 {offsets = [1, 0], sizes = [1, 128], strides = [1, 1]} : vector<4x128xf32> to vector<1x128xf32>
    %464 = vector.extract_strided_slice %458 {offsets = [0, 0], sizes = [3, 128], strides = [1, 1]} : vector<4x128xf32> to vector<3x128xf32>
    %465 = tpu.concatenate %463, %464 in 0 : vector<1x128xf32>, vector<3x128xf32> -> vector<4x128xf32>
    %466 = vector.extract_strided_slice %458 {offsets = [1, 0], sizes = [3, 128], strides = [1, 1]} : vector<4x128xf32> to vector<3x128xf32>
    %467 = vector.extract_strided_slice %458 {offsets = [2, 0], sizes = [1, 128], strides = [1, 1]} : vector<4x128xf32> to vector<1x128xf32>
    %468 = tpu.concatenate %466, %467 in 0 : vector<3x128xf32>, vector<1x128xf32> -> vector<4x128xf32>
    %469 = tpu.concatenate %465, %458, %468 in 1 : vector<4x128xf32>, vector<4x128xf32>, vector<4x128xf32> -> vector<4x384xf32>
    %470 = arith.truncf %469 : vector<4x384xf32> to vector<4x384xbf16>
    %cst_185 = arith.constant dense<0.000000e+00> : vector<4x128xf32>
    %471 = tpu.matmul %470, %460, %cst_185 {dimension_numbers = #tpu.dot_dimension_numbers<[1], [0], [0], [1], [0, 0, 1, 1], [], []>} : vector<4x384xbf16>, vector<384x128xbf16>, vector<4x128xf32> -> vector<4x128xf32>
    %472 = vector.broadcast %462 : vector<1x128xf32> to vector<4x128xf32>
    %473 = arith.addf %471, %472 : vector<4x128xf32>
    %474 = arith.mulf %473, %473 : vector<4x128xf32>
    %475 = tpu.concatenate %473, %474 in 1 : vector<4x128xf32>, vector<4x128xf32> -> vector<4x256xf32>
    %cst_186 = arith.constant dense<0.000000e+00> : vector<256xf32>
    %476 = vector.multi_reduction <add>, %475, %cst_186 [0] : vector<4x256xf32> to vector<256xf32>
    %477 = vector.shape_cast %476 : vector<256xf32> to vector<1x256xf32>
    %478 = arith.truncf %477 : vector<1x256xf32> to vector<1x256xbf16>
    %c0_187 = arith.constant 0 : index
    %c0_188 = arith.constant 0 : index
    %479 = vector.load %arg22[%c0_187, %c0_188] : memref<256x256xbf16, #tpu.memory_space<vmem>>, vector<256x256xbf16>
    %cst_189 = arith.constant dense<0.000000e+00> : vector<1x256xf32>
    %480 = tpu.matmul %478, %479, %cst_189 {dimension_numbers = #tpu.dot_dimension_numbers<[1], [0], [0], [1], [0, 0, 1, 1], [], []>} : vector<1x256xbf16>, vector<256x256xbf16>, vector<1x256xf32> -> vector<1x256xf32>
    %481 = vector.extract_strided_slice %480 {offsets = [0, 0], sizes = [1, 128], strides = [1, 1]} : vector<1x256xf32> to vector<1x128xf32>
    %482 = vector.extract_strided_slice %480 {offsets = [0, 128], sizes = [1, 128], strides = [1, 1]} : vector<1x256xf32> to vector<1x128xf32>
    %483 = arith.mulf %481, %481 : vector<1x128xf32>
    %484 = arith.subf %482, %483 : vector<1x128xf32>
    %cst_190 = arith.constant 0.000000e+00 : f32
    %485 = vector.broadcast %cst_190 : f32 to vector<1x128xf32>
    %486 = arith.maximumf %484, %485 : vector<1x128xf32>
    %487 = vector.broadcast %481 : vector<1x128xf32> to vector<4x128xf32>
    %488 = arith.subf %473, %487 : vector<4x128xf32>
    %cst_191 = arith.constant 9.99999974E-6 : f32
    %489 = vector.broadcast %cst_191 : f32 to vector<1x128xf32>
    %490 = arith.addf %486, %489 : vector<1x128xf32>
    %491 = math.rsqrt %490 : vector<1x128xf32>
    %492 = vector.broadcast %491 : vector<1x128xf32> to vector<4x128xf32>
    %493 = arith.mulf %488, %492 : vector<4x128xf32>
    %494 = arith.addf %421, %493 : vector<4x128xf32>
    %c10 = arith.constant 10 : index
    %c0_192 = arith.constant 0 : index
    %c0_193 = arith.constant 0 : index
    %495 = vector.load %arg10[%c10, %c0_192, %c0_193] : memref<18x384x128xbf16, #tpu.memory_space<vmem>>, vector<1x384x128xbf16>
    %496 = vector.shape_cast %495 : vector<1x384x128xbf16> to vector<384x128xbf16>
    %c10_194 = arith.constant 10 : index
    %c0_195 = arith.constant 0 : index
    %c0_196 = arith.constant 0 : index
    %497 = vector.load %arg11[%c10_194, %c0_195, %c0_196] : memref<18x1x128xf32, #tpu.memory_space<vmem>>, vector<1x1x128xf32>
    %498 = vector.shape_cast %497 : vector<1x1x128xf32> to vector<1x128xf32>
    %499 = vector.extract_strided_slice %494 {offsets = [1, 0], sizes = [1, 128], strides = [1, 1]} : vector<4x128xf32> to vector<1x128xf32>
    %500 = vector.extract_strided_slice %494 {offsets = [0, 0], sizes = [3, 128], strides = [1, 1]} : vector<4x128xf32> to vector<3x128xf32>
    %501 = tpu.concatenate %499, %500 in 0 : vector<1x128xf32>, vector<3x128xf32> -> vector<4x128xf32>
    %502 = vector.extract_strided_slice %494 {offsets = [1, 0], sizes = [3, 128], strides = [1, 1]} : vector<4x128xf32> to vector<3x128xf32>
    %503 = vector.extract_strided_slice %494 {offsets = [2, 0], sizes = [1, 128], strides = [1, 1]} : vector<4x128xf32> to vector<1x128xf32>
    %504 = tpu.concatenate %502, %503 in 0 : vector<3x128xf32>, vector<1x128xf32> -> vector<4x128xf32>
    %505 = tpu.concatenate %501, %494, %504 in 1 : vector<4x128xf32>, vector<4x128xf32>, vector<4x128xf32> -> vector<4x384xf32>
    %506 = arith.truncf %505 : vector<4x384xf32> to vector<4x384xbf16>
    %cst_197 = arith.constant dense<0.000000e+00> : vector<4x128xf32>
    %507 = tpu.matmul %506, %496, %cst_197 {dimension_numbers = #tpu.dot_dimension_numbers<[1], [0], [0], [1], [0, 0, 1, 1], [], []>} : vector<4x384xbf16>, vector<384x128xbf16>, vector<4x128xf32> -> vector<4x128xf32>
    %508 = vector.broadcast %498 : vector<1x128xf32> to vector<4x128xf32>
    %509 = arith.addf %507, %508 : vector<4x128xf32>
    %510 = arith.mulf %509, %509 : vector<4x128xf32>
    %511 = tpu.concatenate %509, %510 in 1 : vector<4x128xf32>, vector<4x128xf32> -> vector<4x256xf32>
    %cst_198 = arith.constant dense<0.000000e+00> : vector<256xf32>
    %512 = vector.multi_reduction <add>, %511, %cst_198 [0] : vector<4x256xf32> to vector<256xf32>
    %513 = vector.shape_cast %512 : vector<256xf32> to vector<1x256xf32>
    %514 = arith.truncf %513 : vector<1x256xf32> to vector<1x256xbf16>
    %c0_199 = arith.constant 0 : index
    %c0_200 = arith.constant 0 : index
    %515 = vector.load %arg22[%c0_199, %c0_200] : memref<256x256xbf16, #tpu.memory_space<vmem>>, vector<256x256xbf16>
    %cst_201 = arith.constant dense<0.000000e+00> : vector<1x256xf32>
    %516 = tpu.matmul %514, %515, %cst_201 {dimension_numbers = #tpu.dot_dimension_numbers<[1], [0], [0], [1], [0, 0, 1, 1], [], []>} : vector<1x256xbf16>, vector<256x256xbf16>, vector<1x256xf32> -> vector<1x256xf32>
    %517 = vector.extract_strided_slice %516 {offsets = [0, 0], sizes = [1, 128], strides = [1, 1]} : vector<1x256xf32> to vector<1x128xf32>
    %518 = vector.extract_strided_slice %516 {offsets = [0, 128], sizes = [1, 128], strides = [1, 1]} : vector<1x256xf32> to vector<1x128xf32>
    %519 = arith.mulf %517, %517 : vector<1x128xf32>
    %520 = arith.subf %518, %519 : vector<1x128xf32>
    %cst_202 = arith.constant 0.000000e+00 : f32
    %521 = vector.broadcast %cst_202 : f32 to vector<1x128xf32>
    %522 = arith.maximumf %520, %521 : vector<1x128xf32>
    %523 = vector.broadcast %517 : vector<1x128xf32> to vector<4x128xf32>
    %524 = arith.subf %509, %523 : vector<4x128xf32>
    %cst_203 = arith.constant 9.99999974E-6 : f32
    %525 = vector.broadcast %cst_203 : f32 to vector<1x128xf32>
    %526 = arith.addf %522, %525 : vector<1x128xf32>
    %527 = math.rsqrt %526 : vector<1x128xf32>
    %528 = vector.broadcast %527 : vector<1x128xf32> to vector<4x128xf32>
    %529 = arith.mulf %524, %528 : vector<4x128xf32>
    %cst_204 = arith.constant 0.000000e+00 : f32
    %530 = vector.broadcast %cst_204 : f32 to vector<4x128xf32>
    %531 = arith.maximumf %529, %530 : vector<4x128xf32>
    %c11 = arith.constant 11 : index
    %c0_205 = arith.constant 0 : index
    %c0_206 = arith.constant 0 : index
    %532 = vector.load %arg10[%c11, %c0_205, %c0_206] : memref<18x384x128xbf16, #tpu.memory_space<vmem>>, vector<1x384x128xbf16>
    %533 = vector.shape_cast %532 : vector<1x384x128xbf16> to vector<384x128xbf16>
    %c11_207 = arith.constant 11 : index
    %c0_208 = arith.constant 0 : index
    %c0_209 = arith.constant 0 : index
    %534 = vector.load %arg11[%c11_207, %c0_208, %c0_209] : memref<18x1x128xf32, #tpu.memory_space<vmem>>, vector<1x1x128xf32>
    %535 = vector.shape_cast %534 : vector<1x1x128xf32> to vector<1x128xf32>
    %536 = vector.extract_strided_slice %531 {offsets = [1, 0], sizes = [1, 128], strides = [1, 1]} : vector<4x128xf32> to vector<1x128xf32>
    %537 = vector.extract_strided_slice %531 {offsets = [0, 0], sizes = [3, 128], strides = [1, 1]} : vector<4x128xf32> to vector<3x128xf32>
    %538 = tpu.concatenate %536, %537 in 0 : vector<1x128xf32>, vector<3x128xf32> -> vector<4x128xf32>
    %539 = vector.extract_strided_slice %531 {offsets = [1, 0], sizes = [3, 128], strides = [1, 1]} : vector<4x128xf32> to vector<3x128xf32>
    %540 = vector.extract_strided_slice %531 {offsets = [2, 0], sizes = [1, 128], strides = [1, 1]} : vector<4x128xf32> to vector<1x128xf32>
    %541 = tpu.concatenate %539, %540 in 0 : vector<3x128xf32>, vector<1x128xf32> -> vector<4x128xf32>
    %542 = tpu.concatenate %538, %531, %541 in 1 : vector<4x128xf32>, vector<4x128xf32>, vector<4x128xf32> -> vector<4x384xf32>
    %543 = arith.truncf %542 : vector<4x384xf32> to vector<4x384xbf16>
    %cst_210 = arith.constant dense<0.000000e+00> : vector<4x128xf32>
    %544 = tpu.matmul %543, %533, %cst_210 {dimension_numbers = #tpu.dot_dimension_numbers<[1], [0], [0], [1], [0, 0, 1, 1], [], []>} : vector<4x384xbf16>, vector<384x128xbf16>, vector<4x128xf32> -> vector<4x128xf32>
    %545 = vector.broadcast %535 : vector<1x128xf32> to vector<4x128xf32>
    %546 = arith.addf %544, %545 : vector<4x128xf32>
    %547 = arith.mulf %546, %546 : vector<4x128xf32>
    %548 = tpu.concatenate %546, %547 in 1 : vector<4x128xf32>, vector<4x128xf32> -> vector<4x256xf32>
    %cst_211 = arith.constant dense<0.000000e+00> : vector<256xf32>
    %549 = vector.multi_reduction <add>, %548, %cst_211 [0] : vector<4x256xf32> to vector<256xf32>
    %550 = vector.shape_cast %549 : vector<256xf32> to vector<1x256xf32>
    %551 = arith.truncf %550 : vector<1x256xf32> to vector<1x256xbf16>
    %c0_212 = arith.constant 0 : index
    %c0_213 = arith.constant 0 : index
    %552 = vector.load %arg22[%c0_212, %c0_213] : memref<256x256xbf16, #tpu.memory_space<vmem>>, vector<256x256xbf16>
    %cst_214 = arith.constant dense<0.000000e+00> : vector<1x256xf32>
    %553 = tpu.matmul %551, %552, %cst_214 {dimension_numbers = #tpu.dot_dimension_numbers<[1], [0], [0], [1], [0, 0, 1, 1], [], []>} : vector<1x256xbf16>, vector<256x256xbf16>, vector<1x256xf32> -> vector<1x256xf32>
    %554 = vector.extract_strided_slice %553 {offsets = [0, 0], sizes = [1, 128], strides = [1, 1]} : vector<1x256xf32> to vector<1x128xf32>
    %555 = vector.extract_strided_slice %553 {offsets = [0, 128], sizes = [1, 128], strides = [1, 1]} : vector<1x256xf32> to vector<1x128xf32>
    %556 = arith.mulf %554, %554 : vector<1x128xf32>
    %557 = arith.subf %555, %556 : vector<1x128xf32>
    %cst_215 = arith.constant 0.000000e+00 : f32
    %558 = vector.broadcast %cst_215 : f32 to vector<1x128xf32>
    %559 = arith.maximumf %557, %558 : vector<1x128xf32>
    %560 = vector.broadcast %554 : vector<1x128xf32> to vector<4x128xf32>
    %561 = arith.subf %546, %560 : vector<4x128xf32>
    %cst_216 = arith.constant 9.99999974E-6 : f32
    %562 = vector.broadcast %cst_216 : f32 to vector<1x128xf32>
    %563 = arith.addf %559, %562 : vector<1x128xf32>
    %564 = math.rsqrt %563 : vector<1x128xf32>
    %565 = vector.broadcast %564 : vector<1x128xf32> to vector<4x128xf32>
    %566 = arith.mulf %561, %565 : vector<4x128xf32>
    %567 = arith.addf %494, %566 : vector<4x128xf32>
    %c12 = arith.constant 12 : index
    %c0_217 = arith.constant 0 : index
    %c0_218 = arith.constant 0 : index
    %568 = vector.load %arg10[%c12, %c0_217, %c0_218] : memref<18x384x128xbf16, #tpu.memory_space<vmem>>, vector<1x384x128xbf16>
    %569 = vector.shape_cast %568 : vector<1x384x128xbf16> to vector<384x128xbf16>
    %c12_219 = arith.constant 12 : index
    %c0_220 = arith.constant 0 : index
    %c0_221 = arith.constant 0 : index
    %570 = vector.load %arg11[%c12_219, %c0_220, %c0_221] : memref<18x1x128xf32, #tpu.memory_space<vmem>>, vector<1x1x128xf32>
    %571 = vector.shape_cast %570 : vector<1x1x128xf32> to vector<1x128xf32>
    %572 = vector.extract_strided_slice %567 {offsets = [1, 0], sizes = [1, 128], strides = [1, 1]} : vector<4x128xf32> to vector<1x128xf32>
    %573 = vector.extract_strided_slice %567 {offsets = [0, 0], sizes = [3, 128], strides = [1, 1]} : vector<4x128xf32> to vector<3x128xf32>
    %574 = tpu.concatenate %572, %573 in 0 : vector<1x128xf32>, vector<3x128xf32> -> vector<4x128xf32>
    %575 = vector.extract_strided_slice %567 {offsets = [1, 0], sizes = [3, 128], strides = [1, 1]} : vector<4x128xf32> to vector<3x128xf32>
    %576 = vector.extract_strided_slice %567 {offsets = [2, 0], sizes = [1, 128], strides = [1, 1]} : vector<4x128xf32> to vector<1x128xf32>
    %577 = tpu.concatenate %575, %576 in 0 : vector<3x128xf32>, vector<1x128xf32> -> vector<4x128xf32>
    %578 = tpu.concatenate %574, %567, %577 in 1 : vector<4x128xf32>, vector<4x128xf32>, vector<4x128xf32> -> vector<4x384xf32>
    %579 = arith.truncf %578 : vector<4x384xf32> to vector<4x384xbf16>
    %cst_222 = arith.constant dense<0.000000e+00> : vector<4x128xf32>
    %580 = tpu.matmul %579, %569, %cst_222 {dimension_numbers = #tpu.dot_dimension_numbers<[1], [0], [0], [1], [0, 0, 1, 1], [], []>} : vector<4x384xbf16>, vector<384x128xbf16>, vector<4x128xf32> -> vector<4x128xf32>
    %581 = vector.broadcast %571 : vector<1x128xf32> to vector<4x128xf32>
    %582 = arith.addf %580, %581 : vector<4x128xf32>
    %583 = arith.mulf %582, %582 : vector<4x128xf32>
    %584 = tpu.concatenate %582, %583 in 1 : vector<4x128xf32>, vector<4x128xf32> -> vector<4x256xf32>
    %cst_223 = arith.constant dense<0.000000e+00> : vector<256xf32>
    %585 = vector.multi_reduction <add>, %584, %cst_223 [0] : vector<4x256xf32> to vector<256xf32>
    %586 = vector.shape_cast %585 : vector<256xf32> to vector<1x256xf32>
    %587 = arith.truncf %586 : vector<1x256xf32> to vector<1x256xbf16>
    %c0_224 = arith.constant 0 : index
    %c0_225 = arith.constant 0 : index
    %588 = vector.load %arg22[%c0_224, %c0_225] : memref<256x256xbf16, #tpu.memory_space<vmem>>, vector<256x256xbf16>
    %cst_226 = arith.constant dense<0.000000e+00> : vector<1x256xf32>
    %589 = tpu.matmul %587, %588, %cst_226 {dimension_numbers = #tpu.dot_dimension_numbers<[1], [0], [0], [1], [0, 0, 1, 1], [], []>} : vector<1x256xbf16>, vector<256x256xbf16>, vector<1x256xf32> -> vector<1x256xf32>
    %590 = vector.extract_strided_slice %589 {offsets = [0, 0], sizes = [1, 128], strides = [1, 1]} : vector<1x256xf32> to vector<1x128xf32>
    %591 = vector.extract_strided_slice %589 {offsets = [0, 128], sizes = [1, 128], strides = [1, 1]} : vector<1x256xf32> to vector<1x128xf32>
    %592 = arith.mulf %590, %590 : vector<1x128xf32>
    %593 = arith.subf %591, %592 : vector<1x128xf32>
    %cst_227 = arith.constant 0.000000e+00 : f32
    %594 = vector.broadcast %cst_227 : f32 to vector<1x128xf32>
    %595 = arith.maximumf %593, %594 : vector<1x128xf32>
    %596 = vector.broadcast %590 : vector<1x128xf32> to vector<4x128xf32>
    %597 = arith.subf %582, %596 : vector<4x128xf32>
    %cst_228 = arith.constant 9.99999974E-6 : f32
    %598 = vector.broadcast %cst_228 : f32 to vector<1x128xf32>
    %599 = arith.addf %595, %598 : vector<1x128xf32>
    %600 = math.rsqrt %599 : vector<1x128xf32>
    %601 = vector.broadcast %600 : vector<1x128xf32> to vector<4x128xf32>
    %602 = arith.mulf %597, %601 : vector<4x128xf32>
    %cst_229 = arith.constant 0.000000e+00 : f32
    %603 = vector.broadcast %cst_229 : f32 to vector<4x128xf32>
    %604 = arith.maximumf %602, %603 : vector<4x128xf32>
    %c13 = arith.constant 13 : index
    %c0_230 = arith.constant 0 : index
    %c0_231 = arith.constant 0 : index
    %605 = vector.load %arg10[%c13, %c0_230, %c0_231] : memref<18x384x128xbf16, #tpu.memory_space<vmem>>, vector<1x384x128xbf16>
    %606 = vector.shape_cast %605 : vector<1x384x128xbf16> to vector<384x128xbf16>
    %c13_232 = arith.constant 13 : index
    %c0_233 = arith.constant 0 : index
    %c0_234 = arith.constant 0 : index
    %607 = vector.load %arg11[%c13_232, %c0_233, %c0_234] : memref<18x1x128xf32, #tpu.memory_space<vmem>>, vector<1x1x128xf32>
    %608 = vector.shape_cast %607 : vector<1x1x128xf32> to vector<1x128xf32>
    %609 = vector.extract_strided_slice %604 {offsets = [1, 0], sizes = [1, 128], strides = [1, 1]} : vector<4x128xf32> to vector<1x128xf32>
    %610 = vector.extract_strided_slice %604 {offsets = [0, 0], sizes = [3, 128], strides = [1, 1]} : vector<4x128xf32> to vector<3x128xf32>
    %611 = tpu.concatenate %609, %610 in 0 : vector<1x128xf32>, vector<3x128xf32> -> vector<4x128xf32>
    %612 = vector.extract_strided_slice %604 {offsets = [1, 0], sizes = [3, 128], strides = [1, 1]} : vector<4x128xf32> to vector<3x128xf32>
    %613 = vector.extract_strided_slice %604 {offsets = [2, 0], sizes = [1, 128], strides = [1, 1]} : vector<4x128xf32> to vector<1x128xf32>
    %614 = tpu.concatenate %612, %613 in 0 : vector<3x128xf32>, vector<1x128xf32> -> vector<4x128xf32>
    %615 = tpu.concatenate %611, %604, %614 in 1 : vector<4x128xf32>, vector<4x128xf32>, vector<4x128xf32> -> vector<4x384xf32>
    %616 = arith.truncf %615 : vector<4x384xf32> to vector<4x384xbf16>
    %cst_235 = arith.constant dense<0.000000e+00> : vector<4x128xf32>
    %617 = tpu.matmul %616, %606, %cst_235 {dimension_numbers = #tpu.dot_dimension_numbers<[1], [0], [0], [1], [0, 0, 1, 1], [], []>} : vector<4x384xbf16>, vector<384x128xbf16>, vector<4x128xf32> -> vector<4x128xf32>
    %618 = vector.broadcast %608 : vector<1x128xf32> to vector<4x128xf32>
    %619 = arith.addf %617, %618 : vector<4x128xf32>
    %620 = arith.mulf %619, %619 : vector<4x128xf32>
    %621 = tpu.concatenate %619, %620 in 1 : vector<4x128xf32>, vector<4x128xf32> -> vector<4x256xf32>
    %cst_236 = arith.constant dense<0.000000e+00> : vector<256xf32>
    %622 = vector.multi_reduction <add>, %621, %cst_236 [0] : vector<4x256xf32> to vector<256xf32>
    %623 = vector.shape_cast %622 : vector<256xf32> to vector<1x256xf32>
    %624 = arith.truncf %623 : vector<1x256xf32> to vector<1x256xbf16>
    %c0_237 = arith.constant 0 : index
    %c0_238 = arith.constant 0 : index
    %625 = vector.load %arg22[%c0_237, %c0_238] : memref<256x256xbf16, #tpu.memory_space<vmem>>, vector<256x256xbf16>
    %cst_239 = arith.constant dense<0.000000e+00> : vector<1x256xf32>
    %626 = tpu.matmul %624, %625, %cst_239 {dimension_numbers = #tpu.dot_dimension_numbers<[1], [0], [0], [1], [0, 0, 1, 1], [], []>} : vector<1x256xbf16>, vector<256x256xbf16>, vector<1x256xf32> -> vector<1x256xf32>
    %627 = vector.extract_strided_slice %626 {offsets = [0, 0], sizes = [1, 128], strides = [1, 1]} : vector<1x256xf32> to vector<1x128xf32>
    %628 = vector.extract_strided_slice %626 {offsets = [0, 128], sizes = [1, 128], strides = [1, 1]} : vector<1x256xf32> to vector<1x128xf32>
    %629 = arith.mulf %627, %627 : vector<1x128xf32>
    %630 = arith.subf %628, %629 : vector<1x128xf32>
    %cst_240 = arith.constant 0.000000e+00 : f32
    %631 = vector.broadcast %cst_240 : f32 to vector<1x128xf32>
    %632 = arith.maximumf %630, %631 : vector<1x128xf32>
    %633 = vector.broadcast %627 : vector<1x128xf32> to vector<4x128xf32>
    %634 = arith.subf %619, %633 : vector<4x128xf32>
    %cst_241 = arith.constant 9.99999974E-6 : f32
    %635 = vector.broadcast %cst_241 : f32 to vector<1x128xf32>
    %636 = arith.addf %632, %635 : vector<1x128xf32>
    %637 = math.rsqrt %636 : vector<1x128xf32>
    %638 = vector.broadcast %637 : vector<1x128xf32> to vector<4x128xf32>
    %639 = arith.mulf %634, %638 : vector<4x128xf32>
    %640 = arith.addf %567, %639 : vector<4x128xf32>
    %c14 = arith.constant 14 : index
    %c0_242 = arith.constant 0 : index
    %c0_243 = arith.constant 0 : index
    %641 = vector.load %arg10[%c14, %c0_242, %c0_243] : memref<18x384x128xbf16, #tpu.memory_space<vmem>>, vector<1x384x128xbf16>
    %642 = vector.shape_cast %641 : vector<1x384x128xbf16> to vector<384x128xbf16>
    %c14_244 = arith.constant 14 : index
    %c0_245 = arith.constant 0 : index
    %c0_246 = arith.constant 0 : index
    %643 = vector.load %arg11[%c14_244, %c0_245, %c0_246] : memref<18x1x128xf32, #tpu.memory_space<vmem>>, vector<1x1x128xf32>
    %644 = vector.shape_cast %643 : vector<1x1x128xf32> to vector<1x128xf32>
    %645 = vector.extract_strided_slice %640 {offsets = [1, 0], sizes = [1, 128], strides = [1, 1]} : vector<4x128xf32> to vector<1x128xf32>
    %646 = vector.extract_strided_slice %640 {offsets = [0, 0], sizes = [3, 128], strides = [1, 1]} : vector<4x128xf32> to vector<3x128xf32>
    %647 = tpu.concatenate %645, %646 in 0 : vector<1x128xf32>, vector<3x128xf32> -> vector<4x128xf32>
    %648 = vector.extract_strided_slice %640 {offsets = [1, 0], sizes = [3, 128], strides = [1, 1]} : vector<4x128xf32> to vector<3x128xf32>
    %649 = vector.extract_strided_slice %640 {offsets = [2, 0], sizes = [1, 128], strides = [1, 1]} : vector<4x128xf32> to vector<1x128xf32>
    %650 = tpu.concatenate %648, %649 in 0 : vector<3x128xf32>, vector<1x128xf32> -> vector<4x128xf32>
    %651 = tpu.concatenate %647, %640, %650 in 1 : vector<4x128xf32>, vector<4x128xf32>, vector<4x128xf32> -> vector<4x384xf32>
    %652 = arith.truncf %651 : vector<4x384xf32> to vector<4x384xbf16>
    %cst_247 = arith.constant dense<0.000000e+00> : vector<4x128xf32>
    %653 = tpu.matmul %652, %642, %cst_247 {dimension_numbers = #tpu.dot_dimension_numbers<[1], [0], [0], [1], [0, 0, 1, 1], [], []>} : vector<4x384xbf16>, vector<384x128xbf16>, vector<4x128xf32> -> vector<4x128xf32>
    %654 = vector.broadcast %644 : vector<1x128xf32> to vector<4x128xf32>
    %655 = arith.addf %653, %654 : vector<4x128xf32>
    %656 = arith.mulf %655, %655 : vector<4x128xf32>
    %657 = tpu.concatenate %655, %656 in 1 : vector<4x128xf32>, vector<4x128xf32> -> vector<4x256xf32>
    %cst_248 = arith.constant dense<0.000000e+00> : vector<256xf32>
    %658 = vector.multi_reduction <add>, %657, %cst_248 [0] : vector<4x256xf32> to vector<256xf32>
    %659 = vector.shape_cast %658 : vector<256xf32> to vector<1x256xf32>
    %660 = arith.truncf %659 : vector<1x256xf32> to vector<1x256xbf16>
    %c0_249 = arith.constant 0 : index
    %c0_250 = arith.constant 0 : index
    %661 = vector.load %arg22[%c0_249, %c0_250] : memref<256x256xbf16, #tpu.memory_space<vmem>>, vector<256x256xbf16>
    %cst_251 = arith.constant dense<0.000000e+00> : vector<1x256xf32>
    %662 = tpu.matmul %660, %661, %cst_251 {dimension_numbers = #tpu.dot_dimension_numbers<[1], [0], [0], [1], [0, 0, 1, 1], [], []>} : vector<1x256xbf16>, vector<256x256xbf16>, vector<1x256xf32> -> vector<1x256xf32>
    %663 = vector.extract_strided_slice %662 {offsets = [0, 0], sizes = [1, 128], strides = [1, 1]} : vector<1x256xf32> to vector<1x128xf32>
    %664 = vector.extract_strided_slice %662 {offsets = [0, 128], sizes = [1, 128], strides = [1, 1]} : vector<1x256xf32> to vector<1x128xf32>
    %665 = arith.mulf %663, %663 : vector<1x128xf32>
    %666 = arith.subf %664, %665 : vector<1x128xf32>
    %cst_252 = arith.constant 0.000000e+00 : f32
    %667 = vector.broadcast %cst_252 : f32 to vector<1x128xf32>
    %668 = arith.maximumf %666, %667 : vector<1x128xf32>
    %669 = vector.broadcast %663 : vector<1x128xf32> to vector<4x128xf32>
    %670 = arith.subf %655, %669 : vector<4x128xf32>
    %cst_253 = arith.constant 9.99999974E-6 : f32
    %671 = vector.broadcast %cst_253 : f32 to vector<1x128xf32>
    %672 = arith.addf %668, %671 : vector<1x128xf32>
    %673 = math.rsqrt %672 : vector<1x128xf32>
    %674 = vector.broadcast %673 : vector<1x128xf32> to vector<4x128xf32>
    %675 = arith.mulf %670, %674 : vector<4x128xf32>
    %cst_254 = arith.constant 0.000000e+00 : f32
    %676 = vector.broadcast %cst_254 : f32 to vector<4x128xf32>
    %677 = arith.maximumf %675, %676 : vector<4x128xf32>
    %c15 = arith.constant 15 : index
    %c0_255 = arith.constant 0 : index
    %c0_256 = arith.constant 0 : index
    %678 = vector.load %arg10[%c15, %c0_255, %c0_256] : memref<18x384x128xbf16, #tpu.memory_space<vmem>>, vector<1x384x128xbf16>
    %679 = vector.shape_cast %678 : vector<1x384x128xbf16> to vector<384x128xbf16>
    %c15_257 = arith.constant 15 : index
    %c0_258 = arith.constant 0 : index
    %c0_259 = arith.constant 0 : index
    %680 = vector.load %arg11[%c15_257, %c0_258, %c0_259] : memref<18x1x128xf32, #tpu.memory_space<vmem>>, vector<1x1x128xf32>
    %681 = vector.shape_cast %680 : vector<1x1x128xf32> to vector<1x128xf32>
    %682 = vector.extract_strided_slice %677 {offsets = [1, 0], sizes = [1, 128], strides = [1, 1]} : vector<4x128xf32> to vector<1x128xf32>
    %683 = vector.extract_strided_slice %677 {offsets = [0, 0], sizes = [3, 128], strides = [1, 1]} : vector<4x128xf32> to vector<3x128xf32>
    %684 = tpu.concatenate %682, %683 in 0 : vector<1x128xf32>, vector<3x128xf32> -> vector<4x128xf32>
    %685 = vector.extract_strided_slice %677 {offsets = [1, 0], sizes = [3, 128], strides = [1, 1]} : vector<4x128xf32> to vector<3x128xf32>
    %686 = vector.extract_strided_slice %677 {offsets = [2, 0], sizes = [1, 128], strides = [1, 1]} : vector<4x128xf32> to vector<1x128xf32>
    %687 = tpu.concatenate %685, %686 in 0 : vector<3x128xf32>, vector<1x128xf32> -> vector<4x128xf32>
    %688 = tpu.concatenate %684, %677, %687 in 1 : vector<4x128xf32>, vector<4x128xf32>, vector<4x128xf32> -> vector<4x384xf32>
    %689 = arith.truncf %688 : vector<4x384xf32> to vector<4x384xbf16>
    %cst_260 = arith.constant dense<0.000000e+00> : vector<4x128xf32>
    %690 = tpu.matmul %689, %679, %cst_260 {dimension_numbers = #tpu.dot_dimension_numbers<[1], [0], [0], [1], [0, 0, 1, 1], [], []>} : vector<4x384xbf16>, vector<384x128xbf16>, vector<4x128xf32> -> vector<4x128xf32>
    %691 = vector.broadcast %681 : vector<1x128xf32> to vector<4x128xf32>
    %692 = arith.addf %690, %691 : vector<4x128xf32>
    %693 = arith.mulf %692, %692 : vector<4x128xf32>
    %694 = tpu.concatenate %692, %693 in 1 : vector<4x128xf32>, vector<4x128xf32> -> vector<4x256xf32>
    %cst_261 = arith.constant dense<0.000000e+00> : vector<256xf32>
    %695 = vector.multi_reduction <add>, %694, %cst_261 [0] : vector<4x256xf32> to vector<256xf32>
    %696 = vector.shape_cast %695 : vector<256xf32> to vector<1x256xf32>
    %697 = arith.truncf %696 : vector<1x256xf32> to vector<1x256xbf16>
    %c0_262 = arith.constant 0 : index
    %c0_263 = arith.constant 0 : index
    %698 = vector.load %arg22[%c0_262, %c0_263] : memref<256x256xbf16, #tpu.memory_space<vmem>>, vector<256x256xbf16>
    %cst_264 = arith.constant dense<0.000000e+00> : vector<1x256xf32>
    %699 = tpu.matmul %697, %698, %cst_264 {dimension_numbers = #tpu.dot_dimension_numbers<[1], [0], [0], [1], [0, 0, 1, 1], [], []>} : vector<1x256xbf16>, vector<256x256xbf16>, vector<1x256xf32> -> vector<1x256xf32>
    %700 = vector.extract_strided_slice %699 {offsets = [0, 0], sizes = [1, 128], strides = [1, 1]} : vector<1x256xf32> to vector<1x128xf32>
    %701 = vector.extract_strided_slice %699 {offsets = [0, 128], sizes = [1, 128], strides = [1, 1]} : vector<1x256xf32> to vector<1x128xf32>
    %702 = arith.mulf %700, %700 : vector<1x128xf32>
    %703 = arith.subf %701, %702 : vector<1x128xf32>
    %cst_265 = arith.constant 0.000000e+00 : f32
    %704 = vector.broadcast %cst_265 : f32 to vector<1x128xf32>
    %705 = arith.maximumf %703, %704 : vector<1x128xf32>
    %706 = vector.broadcast %700 : vector<1x128xf32> to vector<4x128xf32>
    %707 = arith.subf %692, %706 : vector<4x128xf32>
    %cst_266 = arith.constant 9.99999974E-6 : f32
    %708 = vector.broadcast %cst_266 : f32 to vector<1x128xf32>
    %709 = arith.addf %705, %708 : vector<1x128xf32>
    %710 = math.rsqrt %709 : vector<1x128xf32>
    %711 = vector.broadcast %710 : vector<1x128xf32> to vector<4x128xf32>
    %712 = arith.mulf %707, %711 : vector<4x128xf32>
    %713 = arith.addf %640, %712 : vector<4x128xf32>
    %c16 = arith.constant 16 : index
    %c0_267 = arith.constant 0 : index
    %c0_268 = arith.constant 0 : index
    %714 = vector.load %arg10[%c16, %c0_267, %c0_268] : memref<18x384x128xbf16, #tpu.memory_space<vmem>>, vector<1x384x128xbf16>
    %715 = vector.shape_cast %714 : vector<1x384x128xbf16> to vector<384x128xbf16>
    %c16_269 = arith.constant 16 : index
    %c0_270 = arith.constant 0 : index
    %c0_271 = arith.constant 0 : index
    %716 = vector.load %arg11[%c16_269, %c0_270, %c0_271] : memref<18x1x128xf32, #tpu.memory_space<vmem>>, vector<1x1x128xf32>
    %717 = vector.shape_cast %716 : vector<1x1x128xf32> to vector<1x128xf32>
    %718 = vector.extract_strided_slice %713 {offsets = [1, 0], sizes = [1, 128], strides = [1, 1]} : vector<4x128xf32> to vector<1x128xf32>
    %719 = vector.extract_strided_slice %713 {offsets = [0, 0], sizes = [3, 128], strides = [1, 1]} : vector<4x128xf32> to vector<3x128xf32>
    %720 = tpu.concatenate %718, %719 in 0 : vector<1x128xf32>, vector<3x128xf32> -> vector<4x128xf32>
    %721 = vector.extract_strided_slice %713 {offsets = [1, 0], sizes = [3, 128], strides = [1, 1]} : vector<4x128xf32> to vector<3x128xf32>
    %722 = vector.extract_strided_slice %713 {offsets = [2, 0], sizes = [1, 128], strides = [1, 1]} : vector<4x128xf32> to vector<1x128xf32>
    %723 = tpu.concatenate %721, %722 in 0 : vector<3x128xf32>, vector<1x128xf32> -> vector<4x128xf32>
    %724 = tpu.concatenate %720, %713, %723 in 1 : vector<4x128xf32>, vector<4x128xf32>, vector<4x128xf32> -> vector<4x384xf32>
    %725 = arith.truncf %724 : vector<4x384xf32> to vector<4x384xbf16>
    %cst_272 = arith.constant dense<0.000000e+00> : vector<4x128xf32>
    %726 = tpu.matmul %725, %715, %cst_272 {dimension_numbers = #tpu.dot_dimension_numbers<[1], [0], [0], [1], [0, 0, 1, 1], [], []>} : vector<4x384xbf16>, vector<384x128xbf16>, vector<4x128xf32> -> vector<4x128xf32>
    %727 = vector.broadcast %717 : vector<1x128xf32> to vector<4x128xf32>
    %728 = arith.addf %726, %727 : vector<4x128xf32>
    %729 = arith.mulf %728, %728 : vector<4x128xf32>
    %730 = tpu.concatenate %728, %729 in 1 : vector<4x128xf32>, vector<4x128xf32> -> vector<4x256xf32>
    %cst_273 = arith.constant dense<0.000000e+00> : vector<256xf32>
    %731 = vector.multi_reduction <add>, %730, %cst_273 [0] : vector<4x256xf32> to vector<256xf32>
    %732 = vector.shape_cast %731 : vector<256xf32> to vector<1x256xf32>
    %733 = arith.truncf %732 : vector<1x256xf32> to vector<1x256xbf16>
    %c0_274 = arith.constant 0 : index
    %c0_275 = arith.constant 0 : index
    %734 = vector.load %arg22[%c0_274, %c0_275] : memref<256x256xbf16, #tpu.memory_space<vmem>>, vector<256x256xbf16>
    %cst_276 = arith.constant dense<0.000000e+00> : vector<1x256xf32>
    %735 = tpu.matmul %733, %734, %cst_276 {dimension_numbers = #tpu.dot_dimension_numbers<[1], [0], [0], [1], [0, 0, 1, 1], [], []>} : vector<1x256xbf16>, vector<256x256xbf16>, vector<1x256xf32> -> vector<1x256xf32>
    %736 = vector.extract_strided_slice %735 {offsets = [0, 0], sizes = [1, 128], strides = [1, 1]} : vector<1x256xf32> to vector<1x128xf32>
    %737 = vector.extract_strided_slice %735 {offsets = [0, 128], sizes = [1, 128], strides = [1, 1]} : vector<1x256xf32> to vector<1x128xf32>
    %738 = arith.mulf %736, %736 : vector<1x128xf32>
    %739 = arith.subf %737, %738 : vector<1x128xf32>
    %cst_277 = arith.constant 0.000000e+00 : f32
    %740 = vector.broadcast %cst_277 : f32 to vector<1x128xf32>
    %741 = arith.maximumf %739, %740 : vector<1x128xf32>
    %742 = vector.broadcast %736 : vector<1x128xf32> to vector<4x128xf32>
    %743 = arith.subf %728, %742 : vector<4x128xf32>
    %cst_278 = arith.constant 9.99999974E-6 : f32
    %744 = vector.broadcast %cst_278 : f32 to vector<1x128xf32>
    %745 = arith.addf %741, %744 : vector<1x128xf32>
    %746 = math.rsqrt %745 : vector<1x128xf32>
    %747 = vector.broadcast %746 : vector<1x128xf32> to vector<4x128xf32>
    %748 = arith.mulf %743, %747 : vector<4x128xf32>
    %cst_279 = arith.constant 0.000000e+00 : f32
    %749 = vector.broadcast %cst_279 : f32 to vector<4x128xf32>
    %750 = arith.maximumf %748, %749 : vector<4x128xf32>
    %c17 = arith.constant 17 : index
    %c0_280 = arith.constant 0 : index
    %c0_281 = arith.constant 0 : index
    %751 = vector.load %arg10[%c17, %c0_280, %c0_281] : memref<18x384x128xbf16, #tpu.memory_space<vmem>>, vector<1x384x128xbf16>
    %752 = vector.shape_cast %751 : vector<1x384x128xbf16> to vector<384x128xbf16>
    %c17_282 = arith.constant 17 : index
    %c0_283 = arith.constant 0 : index
    %c0_284 = arith.constant 0 : index
    %753 = vector.load %arg11[%c17_282, %c0_283, %c0_284] : memref<18x1x128xf32, #tpu.memory_space<vmem>>, vector<1x1x128xf32>
    %754 = vector.shape_cast %753 : vector<1x1x128xf32> to vector<1x128xf32>
    %755 = vector.extract_strided_slice %750 {offsets = [1, 0], sizes = [1, 128], strides = [1, 1]} : vector<4x128xf32> to vector<1x128xf32>
    %756 = vector.extract_strided_slice %750 {offsets = [0, 0], sizes = [3, 128], strides = [1, 1]} : vector<4x128xf32> to vector<3x128xf32>
    %757 = tpu.concatenate %755, %756 in 0 : vector<1x128xf32>, vector<3x128xf32> -> vector<4x128xf32>
    %758 = vector.extract_strided_slice %750 {offsets = [1, 0], sizes = [3, 128], strides = [1, 1]} : vector<4x128xf32> to vector<3x128xf32>
    %759 = vector.extract_strided_slice %750 {offsets = [2, 0], sizes = [1, 128], strides = [1, 1]} : vector<4x128xf32> to vector<1x128xf32>
    %760 = tpu.concatenate %758, %759 in 0 : vector<3x128xf32>, vector<1x128xf32> -> vector<4x128xf32>
    %761 = tpu.concatenate %757, %750, %760 in 1 : vector<4x128xf32>, vector<4x128xf32>, vector<4x128xf32> -> vector<4x384xf32>
    %762 = arith.truncf %761 : vector<4x384xf32> to vector<4x384xbf16>
    %cst_285 = arith.constant dense<0.000000e+00> : vector<4x128xf32>
    %763 = tpu.matmul %762, %752, %cst_285 {dimension_numbers = #tpu.dot_dimension_numbers<[1], [0], [0], [1], [0, 0, 1, 1], [], []>} : vector<4x384xbf16>, vector<384x128xbf16>, vector<4x128xf32> -> vector<4x128xf32>
    %764 = vector.broadcast %754 : vector<1x128xf32> to vector<4x128xf32>
    %765 = arith.addf %763, %764 : vector<4x128xf32>
    %766 = arith.mulf %765, %765 : vector<4x128xf32>
    %767 = tpu.concatenate %765, %766 in 1 : vector<4x128xf32>, vector<4x128xf32> -> vector<4x256xf32>
    %cst_286 = arith.constant dense<0.000000e+00> : vector<256xf32>
    %768 = vector.multi_reduction <add>, %767, %cst_286 [0] : vector<4x256xf32> to vector<256xf32>
    %769 = vector.shape_cast %768 : vector<256xf32> to vector<1x256xf32>
    %770 = arith.truncf %769 : vector<1x256xf32> to vector<1x256xbf16>
    %c0_287 = arith.constant 0 : index
    %c0_288 = arith.constant 0 : index
    %771 = vector.load %arg22[%c0_287, %c0_288] : memref<256x256xbf16, #tpu.memory_space<vmem>>, vector<256x256xbf16>
    %cst_289 = arith.constant dense<0.000000e+00> : vector<1x256xf32>
    %772 = tpu.matmul %770, %771, %cst_289 {dimension_numbers = #tpu.dot_dimension_numbers<[1], [0], [0], [1], [0, 0, 1, 1], [], []>} : vector<1x256xbf16>, vector<256x256xbf16>, vector<1x256xf32> -> vector<1x256xf32>
    %773 = vector.extract_strided_slice %772 {offsets = [0, 0], sizes = [1, 128], strides = [1, 1]} : vector<1x256xf32> to vector<1x128xf32>
    %774 = vector.extract_strided_slice %772 {offsets = [0, 128], sizes = [1, 128], strides = [1, 1]} : vector<1x256xf32> to vector<1x128xf32>
    %775 = arith.mulf %773, %773 : vector<1x128xf32>
    %776 = arith.subf %774, %775 : vector<1x128xf32>
    %cst_290 = arith.constant 0.000000e+00 : f32
    %777 = vector.broadcast %cst_290 : f32 to vector<1x128xf32>
    %778 = arith.maximumf %776, %777 : vector<1x128xf32>
    %779 = vector.broadcast %773 : vector<1x128xf32> to vector<4x128xf32>
    %780 = arith.subf %765, %779 : vector<4x128xf32>
    %cst_291 = arith.constant 9.99999974E-6 : f32
    %781 = vector.broadcast %cst_291 : f32 to vector<1x128xf32>
    %782 = arith.addf %778, %781 : vector<1x128xf32>
    %783 = math.rsqrt %782 : vector<1x128xf32>
    %784 = vector.broadcast %783 : vector<1x128xf32> to vector<4x128xf32>
    %785 = arith.mulf %780, %784 : vector<4x128xf32>
    %786 = arith.addf %713, %785 : vector<4x128xf32>
    %c0_292 = arith.constant 0 : index
    %c0_293 = arith.constant 0 : index
    %787 = vector.load %arg13[%c0_292, %c0_293] : memref<384x128xbf16, #tpu.memory_space<vmem>>, vector<384x128xbf16>
    %c0_294 = arith.constant 0 : index
    %c0_295 = arith.constant 0 : index
    %788 = vector.load %arg14[%c0_294, %c0_295] : memref<1x128xf32, #tpu.memory_space<vmem>>, vector<1x128xf32>
    %789 = arith.truncf %786 : vector<4x128xf32> to vector<4x128xbf16>
    %c0_296 = arith.constant 0 : index
    %c0_297 = arith.constant 0 : index
    %c0_298 = arith.constant 0 : index
    %790 = vector.load %arg12[%c0_296, %c0_297, %c0_298] : memref<3x8x4xbf16, #tpu.memory_space<vmem>>, vector<1x8x4xbf16>
    %791 = vector.shape_cast %790 : vector<1x8x4xbf16> to vector<8x4xbf16>
    %cst_299 = arith.constant dense<0.000000e+00> : vector<8x128xf32>
    %792 = tpu.matmul %791, %789, %cst_299 {dimension_numbers = #tpu.dot_dimension_numbers<[1], [0], [0], [1], [0, 0, 1, 1], [], []>} : vector<8x4xbf16>, vector<4x128xbf16>, vector<8x128xf32> -> vector<8x128xf32>
    %793 = arith.truncf %792 : vector<8x128xf32> to vector<8x128xbf16>
    %c1_300 = arith.constant 1 : index
    %c0_301 = arith.constant 0 : index
    %c0_302 = arith.constant 0 : index
    %794 = vector.load %arg12[%c1_300, %c0_301, %c0_302] : memref<3x8x4xbf16, #tpu.memory_space<vmem>>, vector<1x8x4xbf16>
    %795 = vector.shape_cast %794 : vector<1x8x4xbf16> to vector<8x4xbf16>
    %cst_303 = arith.constant dense<0.000000e+00> : vector<8x128xf32>
    %796 = tpu.matmul %795, %789, %cst_303 {dimension_numbers = #tpu.dot_dimension_numbers<[1], [0], [0], [1], [0, 0, 1, 1], [], []>} : vector<8x4xbf16>, vector<4x128xbf16>, vector<8x128xf32> -> vector<8x128xf32>
    %797 = arith.truncf %796 : vector<8x128xf32> to vector<8x128xbf16>
    %c2_304 = arith.constant 2 : index
    %c0_305 = arith.constant 0 : index
    %c0_306 = arith.constant 0 : index
    %798 = vector.load %arg12[%c2_304, %c0_305, %c0_306] : memref<3x8x4xbf16, #tpu.memory_space<vmem>>, vector<1x8x4xbf16>
    %799 = vector.shape_cast %798 : vector<1x8x4xbf16> to vector<8x4xbf16>
    %cst_307 = arith.constant dense<0.000000e+00> : vector<8x128xf32>
    %800 = tpu.matmul %799, %789, %cst_307 {dimension_numbers = #tpu.dot_dimension_numbers<[1], [0], [0], [1], [0, 0, 1, 1], [], []>} : vector<8x4xbf16>, vector<4x128xbf16>, vector<8x128xf32> -> vector<8x128xf32>
    %801 = arith.truncf %800 : vector<8x128xf32> to vector<8x128xbf16>
    %802 = tpu.concatenate %793, %797, %801 in 1 : vector<8x128xbf16>, vector<8x128xbf16>, vector<8x128xbf16> -> vector<8x384xbf16>
    %cst_308 = arith.constant dense<0.000000e+00> : vector<8x128xf32>
    %803 = tpu.matmul %802, %787, %cst_308 {dimension_numbers = #tpu.dot_dimension_numbers<[1], [0], [0], [1], [0, 0, 1, 1], [], []>} : vector<8x384xbf16>, vector<384x128xbf16>, vector<8x128xf32> -> vector<8x128xf32>
    %804 = vector.broadcast %788 : vector<1x128xf32> to vector<8x128xf32>
    %805 = arith.addf %803, %804 : vector<8x128xf32>
    %806 = arith.mulf %805, %805 : vector<8x128xf32>
    %807 = tpu.concatenate %805, %806 in 1 : vector<8x128xf32>, vector<8x128xf32> -> vector<8x256xf32>
    %cst_309 = arith.constant dense<0.000000e+00> : vector<256xf32>
    %808 = vector.multi_reduction <add>, %807, %cst_309 [0] : vector<8x256xf32> to vector<256xf32>
    %809 = vector.shape_cast %808 : vector<256xf32> to vector<1x256xf32>
    %810 = arith.truncf %809 : vector<1x256xf32> to vector<1x256xbf16>
    %c0_310 = arith.constant 0 : index
    %c0_311 = arith.constant 0 : index
    %811 = vector.load %arg21[%c0_310, %c0_311] : memref<256x256xbf16, #tpu.memory_space<vmem>>, vector<256x256xbf16>
    %cst_312 = arith.constant dense<0.000000e+00> : vector<1x256xf32>
    %812 = tpu.matmul %810, %811, %cst_312 {dimension_numbers = #tpu.dot_dimension_numbers<[1], [0], [0], [1], [0, 0, 1, 1], [], []>} : vector<1x256xbf16>, vector<256x256xbf16>, vector<1x256xf32> -> vector<1x256xf32>
    %813 = vector.extract_strided_slice %812 {offsets = [0, 0], sizes = [1, 128], strides = [1, 1]} : vector<1x256xf32> to vector<1x128xf32>
    %814 = vector.extract_strided_slice %812 {offsets = [0, 128], sizes = [1, 128], strides = [1, 1]} : vector<1x256xf32> to vector<1x128xf32>
    %815 = arith.mulf %813, %813 : vector<1x128xf32>
    %816 = arith.subf %814, %815 : vector<1x128xf32>
    %cst_313 = arith.constant 0.000000e+00 : f32
    %817 = vector.broadcast %cst_313 : f32 to vector<1x128xf32>
    %818 = arith.maximumf %816, %817 : vector<1x128xf32>
    %819 = vector.broadcast %813 : vector<1x128xf32> to vector<8x128xf32>
    %820 = arith.subf %805, %819 : vector<8x128xf32>
    %cst_314 = arith.constant 9.99999974E-6 : f32
    %821 = vector.broadcast %cst_314 : f32 to vector<1x128xf32>
    %822 = arith.addf %818, %821 : vector<1x128xf32>
    %823 = math.rsqrt %822 : vector<1x128xf32>
    %824 = vector.broadcast %823 : vector<1x128xf32> to vector<8x128xf32>
    %825 = arith.mulf %820, %824 : vector<8x128xf32>
    %cst_315 = arith.constant 0.000000e+00 : f32
    %826 = vector.broadcast %cst_315 : f32 to vector<8x128xf32>
    %827 = arith.maximumf %825, %826 : vector<8x128xf32>
    %c0_316 = arith.constant 0 : index
    %c0_317 = arith.constant 0 : index
    %828 = vector.load %arg16[%c0_316, %c0_317] : memref<384x128xbf16, #tpu.memory_space<vmem>>, vector<384x128xbf16>
    %c0_318 = arith.constant 0 : index
    %c0_319 = arith.constant 0 : index
    %829 = vector.load %arg17[%c0_318, %c0_319] : memref<1x128xf32, #tpu.memory_space<vmem>>, vector<1x128xf32>
    %830 = arith.truncf %827 : vector<8x128xf32> to vector<8x128xbf16>
    %c0_320 = arith.constant 0 : index
    %c0_321 = arith.constant 0 : index
    %c0_322 = arith.constant 0 : index
    %831 = vector.load %arg15[%c0_320, %c0_321, %c0_322] : memref<3x16x8xbf16, #tpu.memory_space<vmem>>, vector<1x16x8xbf16>
    %832 = vector.shape_cast %831 : vector<1x16x8xbf16> to vector<16x8xbf16>
    %cst_323 = arith.constant dense<0.000000e+00> : vector<16x128xf32>
    %833 = tpu.matmul %832, %830, %cst_323 {dimension_numbers = #tpu.dot_dimension_numbers<[1], [0], [0], [1], [0, 0, 1, 1], [], []>} : vector<16x8xbf16>, vector<8x128xbf16>, vector<16x128xf32> -> vector<16x128xf32>
    %834 = arith.truncf %833 : vector<16x128xf32> to vector<16x128xbf16>
    %c1_324 = arith.constant 1 : index
    %c0_325 = arith.constant 0 : index
    %c0_326 = arith.constant 0 : index
    %835 = vector.load %arg15[%c1_324, %c0_325, %c0_326] : memref<3x16x8xbf16, #tpu.memory_space<vmem>>, vector<1x16x8xbf16>
    %836 = vector.shape_cast %835 : vector<1x16x8xbf16> to vector<16x8xbf16>
    %cst_327 = arith.constant dense<0.000000e+00> : vector<16x128xf32>
    %837 = tpu.matmul %836, %830, %cst_327 {dimension_numbers = #tpu.dot_dimension_numbers<[1], [0], [0], [1], [0, 0, 1, 1], [], []>} : vector<16x8xbf16>, vector<8x128xbf16>, vector<16x128xf32> -> vector<16x128xf32>
    %838 = arith.truncf %837 : vector<16x128xf32> to vector<16x128xbf16>
    %c2_328 = arith.constant 2 : index
    %c0_329 = arith.constant 0 : index
    %c0_330 = arith.constant 0 : index
    %839 = vector.load %arg15[%c2_328, %c0_329, %c0_330] : memref<3x16x8xbf16, #tpu.memory_space<vmem>>, vector<1x16x8xbf16>
    %840 = vector.shape_cast %839 : vector<1x16x8xbf16> to vector<16x8xbf16>
    %cst_331 = arith.constant dense<0.000000e+00> : vector<16x128xf32>
    %841 = tpu.matmul %840, %830, %cst_331 {dimension_numbers = #tpu.dot_dimension_numbers<[1], [0], [0], [1], [0, 0, 1, 1], [], []>} : vector<16x8xbf16>, vector<8x128xbf16>, vector<16x128xf32> -> vector<16x128xf32>
    %842 = arith.truncf %841 : vector<16x128xf32> to vector<16x128xbf16>
    %843 = tpu.concatenate %834, %838, %842 in 1 : vector<16x128xbf16>, vector<16x128xbf16>, vector<16x128xbf16> -> vector<16x384xbf16>
    %cst_332 = arith.constant dense<0.000000e+00> : vector<16x128xf32>
    %844 = tpu.matmul %843, %828, %cst_332 {dimension_numbers = #tpu.dot_dimension_numbers<[1], [0], [0], [1], [0, 0, 1, 1], [], []>} : vector<16x384xbf16>, vector<384x128xbf16>, vector<16x128xf32> -> vector<16x128xf32>
    %845 = vector.broadcast %829 : vector<1x128xf32> to vector<16x128xf32>
    %846 = arith.addf %844, %845 : vector<16x128xf32>
    %847 = arith.mulf %846, %846 : vector<16x128xf32>
    %848 = tpu.concatenate %846, %847 in 1 : vector<16x128xf32>, vector<16x128xf32> -> vector<16x256xf32>
    %cst_333 = arith.constant dense<0.000000e+00> : vector<256xf32>
    %849 = vector.multi_reduction <add>, %848, %cst_333 [0] : vector<16x256xf32> to vector<256xf32>
    %850 = vector.shape_cast %849 : vector<256xf32> to vector<1x256xf32>
    %851 = arith.truncf %850 : vector<1x256xf32> to vector<1x256xbf16>
    %c0_334 = arith.constant 0 : index
    %c0_335 = arith.constant 0 : index
    %852 = vector.load %arg20[%c0_334, %c0_335] : memref<256x256xbf16, #tpu.memory_space<vmem>>, vector<256x256xbf16>
    %cst_336 = arith.constant dense<0.000000e+00> : vector<1x256xf32>
    %853 = tpu.matmul %851, %852, %cst_336 {dimension_numbers = #tpu.dot_dimension_numbers<[1], [0], [0], [1], [0, 0, 1, 1], [], []>} : vector<1x256xbf16>, vector<256x256xbf16>, vector<1x256xf32> -> vector<1x256xf32>
    %854 = vector.extract_strided_slice %853 {offsets = [0, 0], sizes = [1, 128], strides = [1, 1]} : vector<1x256xf32> to vector<1x128xf32>
    %855 = vector.extract_strided_slice %853 {offsets = [0, 128], sizes = [1, 128], strides = [1, 1]} : vector<1x256xf32> to vector<1x128xf32>
    %856 = arith.mulf %854, %854 : vector<1x128xf32>
    %857 = arith.subf %855, %856 : vector<1x128xf32>
    %cst_337 = arith.constant 0.000000e+00 : f32
    %858 = vector.broadcast %cst_337 : f32 to vector<1x128xf32>
    %859 = arith.maximumf %857, %858 : vector<1x128xf32>
    %860 = vector.broadcast %854 : vector<1x128xf32> to vector<16x128xf32>
    %861 = arith.subf %846, %860 : vector<16x128xf32>
    %cst_338 = arith.constant 9.99999974E-6 : f32
    %862 = vector.broadcast %cst_338 : f32 to vector<1x128xf32>
    %863 = arith.addf %859, %862 : vector<1x128xf32>
    %864 = math.rsqrt %863 : vector<1x128xf32>
    %865 = vector.broadcast %864 : vector<1x128xf32> to vector<16x128xf32>
    %866 = arith.mulf %861, %865 : vector<16x128xf32>
    %cst_339 = arith.constant 0.000000e+00 : f32
    %867 = vector.broadcast %cst_339 : f32 to vector<16x128xf32>
    %868 = arith.maximumf %866, %867 : vector<16x128xf32>
    %c0_340 = arith.constant 0 : index
    %c0_341 = arith.constant 0 : index
    %869 = vector.load %arg18[%c0_340, %c0_341] : memref<896x128xbf16, #tpu.memory_space<vmem>>, vector<896x128xbf16>
    %c0_342 = arith.constant 0 : index
    %c0_343 = arith.constant 0 : index
    %870 = vector.load %arg19[%c0_342, %c0_343] : memref<1x128xf32, #tpu.memory_space<vmem>>, vector<1x128xf32>
    %cst_344 = arith.constant 0.000000e+00 : f32
    %871 = vector.broadcast %cst_344 : f32 to vector<3x128xf32>
    %872 = vector.extract_strided_slice %868 {offsets = [0, 0], sizes = [13, 128], strides = [1, 1]} : vector<16x128xf32> to vector<13x128xf32>
    %873 = tpu.concatenate %871, %872 in 0 : vector<3x128xf32>, vector<13x128xf32> -> vector<16x128xf32>
    %cst_345 = arith.constant 0.000000e+00 : f32
    %874 = vector.broadcast %cst_345 : f32 to vector<2x128xf32>
    %875 = vector.extract_strided_slice %868 {offsets = [0, 0], sizes = [14, 128], strides = [1, 1]} : vector<16x128xf32> to vector<14x128xf32>
    %876 = tpu.concatenate %874, %875 in 0 : vector<2x128xf32>, vector<14x128xf32> -> vector<16x128xf32>
    %cst_346 = arith.constant 0.000000e+00 : f32
    %877 = vector.broadcast %cst_346 : f32 to vector<1x128xf32>
    %878 = vector.extract_strided_slice %868 {offsets = [0, 0], sizes = [15, 128], strides = [1, 1]} : vector<16x128xf32> to vector<15x128xf32>
    %879 = tpu.concatenate %877, %878 in 0 : vector<1x128xf32>, vector<15x128xf32> -> vector<16x128xf32>
    %cst_347 = arith.constant 0.000000e+00 : f32
    %880 = vector.broadcast %cst_347 : f32 to vector<1x128xf32>
    %881 = vector.extract_strided_slice %868 {offsets = [1, 0], sizes = [15, 128], strides = [1, 1]} : vector<16x128xf32> to vector<15x128xf32>
    %882 = tpu.concatenate %881, %880 in 0 : vector<15x128xf32>, vector<1x128xf32> -> vector<16x128xf32>
    %cst_348 = arith.constant 0.000000e+00 : f32
    %883 = vector.broadcast %cst_348 : f32 to vector<2x128xf32>
    %884 = vector.extract_strided_slice %868 {offsets = [2, 0], sizes = [14, 128], strides = [1, 1]} : vector<16x128xf32> to vector<14x128xf32>
    %885 = tpu.concatenate %884, %883 in 0 : vector<14x128xf32>, vector<2x128xf32> -> vector<16x128xf32>
    %cst_349 = arith.constant 0.000000e+00 : f32
    %886 = vector.broadcast %cst_349 : f32 to vector<3x128xf32>
    %887 = vector.extract_strided_slice %868 {offsets = [3, 0], sizes = [13, 128], strides = [1, 1]} : vector<16x128xf32> to vector<13x128xf32>
    %888 = tpu.concatenate %887, %886 in 0 : vector<13x128xf32>, vector<3x128xf32> -> vector<16x128xf32>
    %889 = tpu.concatenate %873, %876, %879, %868, %882, %885, %888 in 1 : vector<16x128xf32>, vector<16x128xf32>, vector<16x128xf32>, vector<16x128xf32>, vector<16x128xf32>, vector<16x128xf32>, vector<16x128xf32> -> vector<16x896xf32>
    %890 = arith.truncf %889 : vector<16x896xf32> to vector<16x896xbf16>
    %cst_350 = arith.constant dense<0.000000e+00> : vector<16x128xf32>
    %891 = tpu.matmul %890, %869, %cst_350 {dimension_numbers = #tpu.dot_dimension_numbers<[1], [0], [0], [1], [0, 0, 1, 1], [], []>} : vector<16x896xbf16>, vector<896x128xbf16>, vector<16x128xf32> -> vector<16x128xf32>
    %892 = vector.broadcast %870 : vector<1x128xf32> to vector<16x128xf32>
    %893 = arith.addf %891, %892 : vector<16x128xf32>
    %894 = math.tanh %893 : vector<16x128xf32>
    %c0_351 = arith.constant 0 : index
    %c0_352 = arith.constant 0 : index
    %895 = vector.load %arg23[%c0_351, %c0_352] : memref<16x128xf32, #tpu.memory_space<vmem>>, vector<16x128xf32>
    tpu.vector_store %arg23[%c0_351, %c0_352], %894 {strides = array<i32>} : memref<16x128xf32, #tpu.memory_space<vmem>>, vector<16x128xf32>,
    return
  }
  func.func @transform_0(%arg0: i32) -> (i32, i32) {
    %c0_i32 = arith.constant 0 : i32
    %c0_i32_0 = arith.constant 0 : i32
    return %arg0, %c0_i32 : i32, i32
  }
  func.func @transform_1(%arg0: i32) -> (i32, i32) {
    %c0_i32 = arith.constant 0 : i32
    %c0_i32_0 = arith.constant 0 : i32
    %c0_i32_1 = arith.constant 0 : i32
    return %c0_i32, %c0_i32_0 : i32, i32
  }
  func.func @transform_2(%arg0: i32) -> (i32, i32) {
    %c0_i32 = arith.constant 0 : i32
    %c0_i32_0 = arith.constant 0 : i32
    %c0_i32_1 = arith.constant 0 : i32
    return %c0_i32, %c0_i32_0 : i32, i32
  }
  func.func @transform_3(%arg0: i32) -> (i32, i32, i32) {
    %c0_i32 = arith.constant 0 : i32
    %c0_i32_0 = arith.constant 0 : i32
    %c0_i32_1 = arith.constant 0 : i32
    %c0_i32_2 = arith.constant 0 : i32
    return %c0_i32, %c0_i32_0, %c0_i32_1 : i32, i32, i32
  }
  func.func @transform_4(%arg0: i32) -> (i32, i32) {
    %c0_i32 = arith.constant 0 : i32
    %c0_i32_0 = arith.constant 0 : i32
    %c0_i32_1 = arith.constant 0 : i32
    return %c0_i32, %c0_i32_0 : i32, i32
  }
  func.func @transform_5(%arg0: i32) -> (i32, i32) {
    %c0_i32 = arith.constant 0 : i32
    %c0_i32_0 = arith.constant 0 : i32
    %c0_i32_1 = arith.constant 0 : i32
    return %c0_i32, %c0_i32_0 : i32, i32
  }
  func.func @transform_6(%arg0: i32) -> (i32, i32, i32) {
    %c0_i32 = arith.constant 0 : i32
    %c0_i32_0 = arith.constant 0 : i32
    %c0_i32_1 = arith.constant 0 : i32
    %c0_i32_2 = arith.constant 0 : i32
    return %c0_i32, %c0_i32_0, %c0_i32_1 : i32, i32, i32
  }
  func.func @transform_7(%arg0: i32) -> (i32, i32) {
    %c0_i32 = arith.constant 0 : i32
    %c0_i32_0 = arith.constant 0 : i32
    %c0_i32_1 = arith.constant 0 : i32
    return %c0_i32, %c0_i32_0 : i32, i32
  }
  func.func @transform_8(%arg0: i32) -> (i32, i32) {
    %c0_i32 = arith.constant 0 : i32
    %c0_i32_0 = arith.constant 0 : i32
    %c0_i32_1 = arith.constant 0 : i32
    return %c0_i32, %c0_i32_0 : i32, i32
  }
  func.func @transform_9(%arg0: i32) -> (i32, i32, i32) {
    %c0_i32 = arith.constant 0 : i32
    %c0_i32_0 = arith.constant 0 : i32
    %c0_i32_1 = arith.constant 0 : i32
    %c0_i32_2 = arith.constant 0 : i32
    return %c0_i32, %c0_i32_0, %c0_i32_1 : i32, i32, i32
  }
  func.func @transform_10(%arg0: i32) -> (i32, i32, i32) {
    %c0_i32 = arith.constant 0 : i32
    %c0_i32_0 = arith.constant 0 : i32
    %c0_i32_1 = arith.constant 0 : i32
    %c0_i32_2 = arith.constant 0 : i32
    return %c0_i32, %c0_i32_0, %c0_i32_1 : i32, i32, i32
  }
  func.func @transform_11(%arg0: i32) -> (i32, i32, i32) {
    %c0_i32 = arith.constant 0 : i32
    %c0_i32_0 = arith.constant 0 : i32
    %c0_i32_1 = arith.constant 0 : i32
    %c0_i32_2 = arith.constant 0 : i32
    return %c0_i32, %c0_i32_0, %c0_i32_1 : i32, i32, i32
  }
  func.func @transform_12(%arg0: i32) -> (i32, i32) {
    %c0_i32 = arith.constant 0 : i32
    %c0_i32_0 = arith.constant 0 : i32
    %c0_i32_1 = arith.constant 0 : i32
    return %c0_i32, %c0_i32_0 : i32, i32
  }
  func.func @transform_13(%arg0: i32) -> (i32, i32) {
    %c0_i32 = arith.constant 0 : i32
    %c0_i32_0 = arith.constant 0 : i32
    %c0_i32_1 = arith.constant 0 : i32
    return %c0_i32, %c0_i32_0 : i32, i32
  }
  func.func @transform_14(%arg0: i32) -> (i32, i32, i32) {
    %c0_i32 = arith.constant 0 : i32
    %c0_i32_0 = arith.constant 0 : i32
    %c0_i32_1 = arith.constant 0 : i32
    %c0_i32_2 = arith.constant 0 : i32
    return %c0_i32, %c0_i32_0, %c0_i32_1 : i32, i32, i32
  }
  func.func @transform_15(%arg0: i32) -> (i32, i32) {
    %c0_i32 = arith.constant 0 : i32
    %c0_i32_0 = arith.constant 0 : i32
    %c0_i32_1 = arith.constant 0 : i32
    return %c0_i32, %c0_i32_0 : i32, i32
  }
  func.func @transform_16(%arg0: i32) -> (i32, i32) {
    %c0_i32 = arith.constant 0 : i32
    %c0_i32_0 = arith.constant 0 : i32
    %c0_i32_1 = arith.constant 0 : i32
    return %c0_i32, %c0_i32_0 : i32, i32
  }
  func.func @transform_17(%arg0: i32) -> (i32, i32) {
    %c0_i32 = arith.constant 0 : i32
    %c0_i32_0 = arith.constant 0 : i32
    %c0_i32_1 = arith.constant 0 : i32
    return %c0_i32, %c0_i32_0 : i32, i32
  }
  func.func @transform_18(%arg0: i32) -> (i32, i32) {
    %c0_i32 = arith.constant 0 : i32
    %c0_i32_0 = arith.constant 0 : i32
    %c0_i32_1 = arith.constant 0 : i32
    return %c0_i32, %c0_i32_0 : i32, i32
  }
  func.func @transform_19(%arg0: i32) -> (i32, i32) {
    %c0_i32 = arith.constant 0 : i32
    %c0_i32_0 = arith.constant 0 : i32
    %c0_i32_1 = arith.constant 0 : i32
    return %c0_i32, %c0_i32_0 : i32, i32
  }
  func.func @transform_20(%arg0: i32) -> (i32, i32) {
    %c0_i32 = arith.constant 0 : i32
    %c0_i32_0 = arith.constant 0 : i32
    %c0_i32_1 = arith.constant 0 : i32
    return %c0_i32, %c0_i32_0 : i32, i32
  }
  func.func @transform_21(%arg0: i32) -> (i32, i32) {
    %c0_i32 = arith.constant 0 : i32
    %c0_i32_0 = arith.constant 0 : i32
    %c0_i32_1 = arith.constant 0 : i32
    return %c0_i32, %c0_i32_0 : i32, i32
  }
  func.func @transform_22(%arg0: i32) -> (i32, i32) {
    %c0_i32 = arith.constant 0 : i32
    %c0_i32_0 = arith.constant 0 : i32
    return %arg0, %c0_i32 : i32, i32
  }
}

</mosaic_0001>

<bundles_post_ra>
// kernel: fwd.1
= control target key start
LH: loop header
LB: loop body
LE: loop exit
PB: predicated region body
PF: predicated region fallthrough
CT: control target
= control target key end

     0   :  { %s18140_s0 = inlined_call_operand.vmem [shape: f32[32,128], index: 0, kind: input, shape index: {}]   ;;  %s18141_s1 = inlined_call_operand.hbm [shape: bf16[896,128], index: 1, kind: input, shape index: {}]   ;;  %s18142_s2 = inlined_call_operand.hbm [shape: f32[1,128], index: 2, kind: input, shape index: {}]   ;;  %s18143_s3 = inlined_call_operand.hbm [shape: bf16[3,8,16], index: 3, kind: input, shape index: {}]   ;;  %s18144_s4 = inlined_call_operand.hbm [shape: bf16[384,128], index: 4, kind: input, shape index: {}]   ;;  %s18145_s5 = inlined_call_operand.hbm [shape: f32[1,128], index: 5, kind: input, shape index: {}]   ;;  %s18146_s6 = inlined_call_operand.hbm [shape: bf16[3,4,8], index: 6, kind: input, shape index: {}]   ;;  %s18147_s7 = inlined_call_operand.hbm [shape: bf16[384,128], index: 7, kind: input, shape index: {}]   ;;  %s18148_s8 = inlined_call_operand.hbm [shape: f32[1,128], index: 8, kind: input, shape index: {}]   ;;  %s18149_s9 = inlined_call_operand.hbm [shape: bf16[18,384,128], index: 9, kind: input, shape index: {}]   ;;  %s18150_s10 = inlined_call_operand.hbm [shape: f32[18,1,128], index: 10, kind: input, shape index: {}]   ;;  %s18151_s11 = inlined_call_operand.vmem [shape: bf16[3,8,4], index: 11, kind: input, shape index: {}]   ;;  %s18152_s12 = inlined_call_operand.hbm [shape: bf16[384,128], index: 12, kind: input, shape index: {}]   ;;  %s18153_s13 = inlined_call_operand.hbm [shape: f32[1,128], index: 13, kind: input, shape index: {}]   ;;  %s18154_s14 = inlined_call_operand.vmem [shape: bf16[3,16,8], index: 14, kind: input, shape index: {}]   ;;  %s18155_s15 = inlined_call_operand.hbm [shape: bf16[384,128], index: 15, kind: input, shape index: {}]   ;;  %s18156_s16 = inlined_call_operand.hbm [shape: f32[1,128], index: 16, kind: input, shape index: {}]   ;;  %s18157_s17 = inlined_call_operand.hbm [shape: bf16[896,128], index: 17, kind: input, shape index: {}]   ;;  %s18158_s18 = inlined_call_operand.hbm [shape: f32[1,128], index: 18, kind: input, shape index: {}]   ;;  %s18159_s19 = inlined_call_operand.hbm [shape: bf16[256,256], index: 19, kind: input, shape index: {}]   ;;  %s18160_s20 = inlined_call_operand.hbm [shape: bf16[256,256], index: 20, kind: input, shape index: {}]   ;;  %s18161_s21 = inlined_call_operand.hbm [shape: bf16[256,256], index: 21, kind: input, shape index: {}]   ;;  %s18162_s22 = inlined_call_operand.vmem [shape: f32[32,128], index: 22, kind: output, shape index: {}]  }
   0x1   :  { %18189 = sst [smem:[#allocation43_spill]] %s18140_s0 }
   0x2   :  { %18190 = sst [smem:[#allocation44_spill]] %s18141_s1 }
   0x3   :  { %18191 = sst [smem:[#allocation45_spill]] %s18142_s2 }
   0x4   :  { %18192 = sst [smem:[#allocation46_spill]] %s18143_s3 }
   0x5   :  { %18193 = sst [smem:[#allocation47_spill]] %s18144_s4 }
   0x6   :  { %18194 = sst [smem:[#allocation48_spill]] %s18145_s5 }
   0x7   :  { %18195 = sst [smem:[#allocation49_spill]] %s18146_s6 }
   0x8   :  { %18196 = sst [smem:[#allocation50_spill]] %s18148_s8 }
   0x9   :  { %18197 = sst [smem:[#allocation51_spill]] %s18150_s10 }
   0xa   :  { %18198 = sst [smem:[#allocation52_spill]] %s18151_s11 }
   0xb   :  { %18199 = sst [smem:[#allocation53_spill]] %s18153_s13 }
   0xc   :  { %18200 = sst [smem:[#allocation54_spill]] %s18154_s14 }
   0xd   :  { %18201 = sst [smem:[#allocation55_spill]] %s18162_s22 }
   0xe   :  { %27 = vsyncpa [#allocation3], 0 }
   0xf   :  { %28 = vsyncpa [#allocation5], 0 }
  0x10   :  { %29 = vsyncpa [#allocation8], 0 }
  0x11   :  { %30 = vsyncpa [#allocation11], 0 }
  0x12   :  { %31 = vsyncpa [#allocation14], 0 }
  0x13   :  { %32 = vsyncpa [#allocation17], 0 }
  0x14   :  { %33 = vsyncpa [#allocation20], 0 }
  0x15   :  { %34 = vsyncpa [#allocation23], 0 }
  0x16   :  { %35 = vsyncpa [#allocation26], 0 }
  0x17   :  { %36 = vsyncpa [#allocation29], 0  ;;  %s15997_s3 = smov 0  }
  0x18 LB: > { %18202 = sst [smem:[#allocation41_spill]] %s15850_s3  ;;  %s15852_s28 = smov [#allocation4]   ;;  %s15850_s3 = sphi %s15997_s3, %s42_s3  }
  0x19   : > { %s566_s29 = sshll.u32 %s15852_s28, 4  ;;  %s18169_s30 = sadd.s32 4294967295, %s15850_s3   ;;  %s567_s29 = int_to_ptr.vmem [resolvable:$true] %s566_s29 }
  0x1a   : > { %p11755_p0 = scmp.ge.s32.totalorder %s15850_s3, 1  ;;  %p540_p1 = scmp.lt.s32.totalorder %s15850_s3, 3 }
  0x1b   : > { %p16007_p2 = scmp.eq.s32.totalorder %s18169_s30, 0  ;;  %s15853_s23 = smov [#allocation7]  }
  0x1c   : > { %p16011_p3 = pnand %p11755_p0, %p540_p1  ;;  %s589_s1 = sshll.u32 %s15853_s23, 4  ;;  %s16017_s1 = int_to_ptr.vmem [resolvable:$true] %s589_s1 }
  0x1d   : > { %s18203_s4 = scalar_select %p16007_p2, 1, 0 }
  0x1e   : > { %s18205_s0 = scalar_select %p16011_p3, 1, 0 }
  0x1f   : > { %18204 = sst [smem:[#allocation42_spill]] %s18203_s4  ;;  %p14109_p4 = pneg %p16011_p3 }
  0x20   : > { %s15854_s24 = smov [#allocation10]   ;;  %s18207_s2 = sld [smem:[#allocation45_spill]] }
  0x21   : > { %p16021_p5 = pnand %p16007_p2, %p14109_p4  ;;  %s613_s6 = sshll.u32 %s15854_s24, 4  ;;  %s16025_s6 = int_to_ptr.vmem [resolvable:$true] %s613_s6 }
  0x23   : > { %p16035_p7 = pneg %p16021_p5 }
  0x26   : > { %s15272_s27 = scalar_lea.hbm %s18207_s2, 16 }
  0x27   : > { %p15273_p6 = scmp.ne.s32.totalorder %s18207_s2, %s15272_s27  ;;  %p15279_p10 = scmp.lt.u32.totalorder %s15272_s27, %s18207_s2 }
  0x29   : > { %p15275_p8 = pnand %p16035_p7, %p15273_p6 }
  0x2b   : > { %p15276_p9 = pneg %p15275_p8 }
  0x2d   : > { %p15281_p11 = pnand %p15279_p10, %p15276_p9 }
  0x2f   : > { %15284 = shalt.err (!%p15281_p11)
}
  0x30   : > { %s15285_s25 = scalar_lea.vmem %s567_s29, 16  ;;  %s15292_s30 = scalar_lea.vmem %s567_s29, 32 }
  0x31   : > { %p15286_p12 = scmp.ne.s32.totalorder %s567_s29, %s15285_s25  ;;  %p15293_p1 = scmp.lt.s32.totalorder %s567_s29, %s567_s29 }
  0x32   : > { %p15294_p4 = scmp.lt.s32.totalorder %s15292_s30, %s15285_s25 }
  0x33   : > { %p15288_p13 = pnand %p15286_p12, %p16035_p7 }
  0x34   : > { %p15295_p2 = por %p15294_p4, %p15293_p1 }
  0x35   : > { %p15289_p0 = pneg %p15288_p13 }
  0x37   : > { %p15296_p3 = pnand %p15295_p2, %p15289_p0 }
  0x39   : > { %15299 = shalt.err (!%p15296_p3)
}
  0x3a   : > { %14115 = dma.hbm_to_vmem [thread:$0]  (!%p16021_p5), %s18207_s2, 16, %s567_s29, [#allocation5]  }
  0x3b   : > { %s18209_s24 = sld [smem:[#allocation47_spill]] }
  0x41   : > { %s15300_s14 = scalar_lea.hbm %s18209_s24, 3072 }
  0x42   : > { %p15301_p6 = scmp.ne.s32.totalorder %s18209_s24, %s15300_s14  ;;  %p15307_p2 = scmp.lt.u32.totalorder %s15300_s14, %s18209_s24 }
  0x44   : > { %p15303_p8 = pnand %p15301_p6, %p16035_p7 }
  0x46   : > { %p15304_p9 = pneg %p15303_p8 }
  0x48   : > { %p15309_p3 = pnand %p15307_p2, %p15304_p9 }
  0x4a   : > { %15312 = shalt.err (!%p15309_p3)
}
  0x4b   : > { %s15313_s29 = scalar_lea.vmem %s16017_s1, 3072  ;;  %p15321_p13 = scmp.lt.s32.totalorder %s16017_s1, %s16017_s1 }
  0x4c   : > { %p15314_p10 = scmp.ne.s32.totalorder %s16017_s1, %s15313_s29  ;;  %p15322_p0 = scmp.lt.s32.totalorder %s15313_s29, %s15313_s29 }
  0x4e   : > { %p15316_p11 = pnand %p15314_p10, %p16035_p7  ;;  %p15323_p1 = por %p15322_p0, %p15321_p13 }
  0x50   : > { %p15317_p12 = pneg %p15316_p11 }
  0x52   : > { %p15324_p4 = pnand %p15323_p1, %p15317_p12 }
  0x54   : > { %15327 = shalt.err (!%p15324_p4)
}
  0x55   : > { %s18179_s11 = smov 64   ;;  %s18181_s14 = smov 4  }
  0x56   : > { %14121 = dma.hbm_to_vmem [thread:$0]  (!%p16021_p5), %s18209_s24, 3072, %s16017_s1, [#allocation8], %s18179_s11, %s18179_s11, %s18181_s14  }
  0x57   : > { %s18210_s27 = sld [smem:[#allocation49_spill]] }
  0x5d   : > { %s15328_s25 = scalar_lea.hbm %s18210_s27, 96 }
  0x5e   : > { %p15329_p6 = scmp.ne.s32.totalorder %s18210_s27, %s15328_s25  ;;  %p15335_p2 = scmp.lt.u32.totalorder %s15328_s25, %s18210_s27 }
  0x60   : > { %p15331_p8 = pnand %p15329_p6, %p16035_p7 }
  0x62   : > { %p15332_p9 = pneg %p15331_p8 }
  0x64   : > { %p15337_p3 = pnand %p15335_p2, %p15332_p9 }
  0x66   : > { %15340 = shalt.err (!%p15337_p3)
}
  0x67   : > { %s15341_s1 = scalar_lea.vmem %s16025_s6, 96  ;;  %p15349_p13 = scmp.lt.s32.totalorder %s16025_s6, %s16025_s6 }
  0x68   : > { %p15342_p10 = scmp.ne.s32.totalorder %s16025_s6, %s15341_s1  ;;  %p15350_p0 = scmp.lt.s32.totalorder %s15341_s1, %s15341_s1 }
  0x6a   : > { %p15344_p11 = pnand %p15342_p10, %p16035_p7  ;;  %p15351_p1 = por %p15350_p0, %p15349_p13 }
  0x6c   : > { %p15345_p12 = pneg %p15344_p11 }
  0x6e   : > { %p15352_p4 = pnand %p15351_p1, %p15345_p12 }
  0x70   : > { %15355 = shalt.err (!%p15352_p4)
}
  0x71   : > { %s15857_s3 = smov 32   ;;  %s15858_s4 = smov 2  }
  0x72   : > { %14127 = dma.hbm_to_vmem [thread:$0]  (!%p16021_p5), %s18210_s27, 96, %s16025_s6, [#allocation11], %s15857_s3, %s15857_s3, %s15858_s4  }
  0x73   : > { %s15859_s28 = smov [#allocation13]   ;;  %s15860_s25 = smov [#allocation16]  }
  0x74   : > { %s640_s22 = sshll.u32 %s15859_s28, 4  ;;  %s663_s30 = sshll.u32 %s15860_s25, 4  ;;  %s641_s22 = int_to_ptr.vmem [resolvable:$true] %s640_s22  ;;  %s16100_s30 = int_to_ptr.vmem [resolvable:$true] %s663_s30 }
  0x75   : > { %s18211_s8 = sld [smem:[#allocation50_spill]] }
  0x7b   : > { %s15356_s11 = scalar_lea.hbm %s18211_s8, 16 }
  0x7c   : > { %p15357_p6 = scmp.ne.s32.totalorder %s18211_s8, %s15356_s11  ;;  %p15363_p2 = scmp.lt.u32.totalorder %s15356_s11, %s18211_s8 }
  0x7e   : > { %p15359_p8 = pnand %p15357_p6, %p16035_p7 }
  0x80   : > { %p15360_p9 = pneg %p15359_p8 }
  0x82   : > { %p15365_p3 = pnand %p15363_p2, %p15360_p9 }
  0x84   : > { %15368 = shalt.err (!%p15365_p3)
}
  0x85   : > { %s15369_s3 = scalar_lea.vmem %s641_s22, 16  ;;  %s15376_s4 = scalar_lea.vmem %s641_s22, 32 }
  0x86   : > { %p15370_p10 = scmp.ne.s32.totalorder %s641_s22, %s15369_s3  ;;  %p15377_p13 = scmp.lt.s32.totalorder %s641_s22, %s641_s22 }
  0x87   : > { %p15378_p0 = scmp.lt.s32.totalorder %s15376_s4, %s15369_s3 }
  0x88   : > { %p15372_p11 = pnand %p15370_p10, %p16035_p7 }
  0x89   : > { %p15379_p1 = por %p15378_p0, %p15377_p13 }
  0x8a   : > { %p15373_p12 = pneg %p15372_p11 }
  0x8c   : > { %p15380_p4 = pnand %p15379_p1, %p15373_p12 }
  0x8e   : > { %15383 = shalt.err (!%p15380_p4)
}
  0x8f   : > { %14133 = dma.hbm_to_vmem [thread:$0]  (!%p16021_p5), %s18211_s8, 16, %s641_s22, [#allocation14]  }
  0x90   : > { %s18212_s10 = sld [smem:[#allocation51_spill]] }
  0x96   : > { %s15384_s28 = scalar_lea.hbm %s18212_s10, 288 }
  0x97   : > { %p15385_p6 = scmp.ne.s32.totalorder %s18212_s10, %s15384_s28  ;;  %p15391_p2 = scmp.lt.u32.totalorder %s15384_s28, %s18212_s10 }
  0x99   : > { %p15387_p8 = pnand %p15385_p6, %p16035_p7 }
  0x9b   : > { %p15388_p9 = pneg %p15387_p8 }
  0x9d   : > { %p15393_p3 = pnand %p15391_p2, %p15388_p9 }
  0x9f   : > { %15396 = shalt.err (!%p15393_p3)
}
  0xa0   : > { %s15397_s22 = scalar_lea.vmem %s16100_s30, 288  ;;  %p15405_p13 = scmp.lt.s32.totalorder %s16100_s30, %s16100_s30 }
  0xa1   : > { %p15398_p10 = scmp.ne.s32.totalorder %s16100_s30, %s15397_s22  ;;  %p15406_p0 = scmp.lt.s32.totalorder %s15397_s22, %s15397_s22 }
  0xa3   : > { %p15400_p11 = pnand %p15398_p10, %p16035_p7  ;;  %p15407_p1 = por %p15406_p0, %p15405_p13 }
  0xa5   : > { %p15401_p12 = pneg %p15400_p11 }
  0xa7   : > { %p15408_p4 = pnand %p15407_p1, %p15401_p12 }
  0xa9   : > { %15411 = shalt.err (!%p15408_p4)
}
  0xaa   : > { %s15861_s6 = smov 16   ;;  %s15862_s3 = smov 1  }
  0xab   : > { %14139 = dma.hbm_to_vmem [thread:$0]  (!%p16021_p5), %s18212_s10, 288, %s16100_s30, [#allocation17], %s15861_s6, %s15861_s6, %s15862_s3  }
  0xac   : > { %s15863_s14 = smov [#allocation19]   ;;  %s15864_s26 = smov [#allocation22]  }
  0xad   : > { %s693_s11 = sshll.u32 %s15863_s14, 4  ;;  %s720_s28 = sshll.u32 %s15864_s26, 4  ;;  %s694_s11 = int_to_ptr.vmem [resolvable:$true] %s693_s11  ;;  %s16143_s28 = int_to_ptr.vmem [resolvable:$true] %s720_s28 }
  0xae   : > { %s18213_s13 = sld [smem:[#allocation53_spill]] }
  0xb4   : > { %s15412_s1 = scalar_lea.hbm %s18213_s13, 16 }
  0xb5   : > { %p15413_p6 = scmp.ne.s32.totalorder %s18213_s13, %s15412_s1  ;;  %p15419_p2 = scmp.lt.u32.totalorder %s15412_s1, %s18213_s13 }
  0xb7   : > { %p15415_p8 = pnand %p15413_p6, %p16035_p7 }
  0xb9   : > { %p15416_p9 = pneg %p15415_p8 }
  0xbb   : > { %p15421_p3 = pnand %p15419_p2, %p15416_p9 }
  0xbd   : > { %15424 = shalt.err (!%p15421_p3)
}
  0xbe   : > { %s15425_s6 = scalar_lea.vmem %s694_s11, 16  ;;  %s15432_s3 = scalar_lea.vmem %s694_s11, 32 }
  0xbf   : > { %p15426_p10 = scmp.ne.s32.totalorder %s694_s11, %s15425_s6  ;;  %p15433_p13 = scmp.lt.s32.totalorder %s694_s11, %s694_s11 }
  0xc0   : > { %p15434_p0 = scmp.lt.s32.totalorder %s15432_s3, %s15425_s6 }
  0xc1   : > { %p15428_p11 = pnand %p15426_p10, %p16035_p7 }
  0xc2   : > { %p15435_p1 = por %p15434_p0, %p15433_p13 }
  0xc3   : > { %p15429_p12 = pneg %p15428_p11 }
  0xc5   : > { %p15436_p4 = pnand %p15435_p1, %p15429_p12 }
  0xc7   : > { %15439 = shalt.err (!%p15436_p4)
}
  0xc8   : > { %14145 = dma.hbm_to_vmem [thread:$0]  (!%p16021_p5), %s18213_s13, 16, %s694_s11, [#allocation20]  }
  0xc9   : > { %s15440_s29 = scalar_lea.hbm %s18156_s16, 16 }
  0xca   : > { %p15441_p6 = scmp.ne.s32.totalorder %s18156_s16, %s15440_s29  ;;  %p15447_p2 = scmp.lt.u32.totalorder %s15440_s29, %s18156_s16 }
  0xcc   : > { %p15443_p8 = pnand %p15441_p6, %p16035_p7 }
  0xce   : > { %p15444_p9 = pneg %p15443_p8 }
  0xd0   : > { %p15449_p3 = pnand %p15447_p2, %p15444_p9 }
  0xd2   : > { %15452 = shalt.err (!%p15449_p3)
}
  0xd3   : > { %s15453_s11 = scalar_lea.vmem %s16143_s28, 16  ;;  %s15460_s30 = scalar_lea.vmem %s16143_s28, 32 }
  0xd4   : > { %p15454_p10 = scmp.ne.s32.totalorder %s16143_s28, %s15453_s11  ;;  %p15461_p13 = scmp.lt.s32.totalorder %s16143_s28, %s16143_s28 }
  0xd5   : > { %p15462_p0 = scmp.lt.s32.totalorder %s15460_s30, %s15453_s11 }
  0xd6   : > { %p15456_p11 = pnand %p15454_p10, %p16035_p7 }
  0xd7   : > { %p15463_p1 = por %p15462_p0, %p15461_p13 }
  0xd8   : > { %p15457_p12 = pneg %p15456_p11 }
  0xda   : > { %p15464_p4 = pnand %p15463_p1, %p15457_p12 }
  0xdc   : > { %15467 = shalt.err (!%p15464_p4)
}
  0xdd   : > { %14151 = dma.hbm_to_vmem [thread:$0]  (!%p16021_p5), %s18156_s16, 16, %s16143_s28, [#allocation23]  }
  0xde   : > { %s15865_s24 = smov [#allocation25]   ;;  %s15468_s29 = scalar_lea.hbm %s18158_s18, 16 }
  0xdf   : > { %s744_s14 = sshll.u32 %s15865_s24, 4  ;;  %p15469_p6 = scmp.ne.s32.totalorder %s18158_s18, %s15468_s29  ;;  %s745_s14 = int_to_ptr.vmem [resolvable:$true] %s744_s14 }
  0xe0   : > { %p15475_p2 = scmp.lt.u32.totalorder %s15468_s29, %s18158_s18 }
  0xe1   : > { %p15471_p8 = pnand %p15469_p6, %p16035_p7 }
  0xe3   : > { %p15472_p9 = pneg %p15471_p8 }
  0xe5   : > { %p15477_p3 = pnand %p15475_p2, %p15472_p9 }
  0xe7   : > { %15480 = shalt.err (!%p15477_p3)
}
  0xe8   : > { %s15481_s28 = scalar_lea.vmem %s745_s14, 16  ;;  %s15488_s11 = scalar_lea.vmem %s745_s14, 32 }
  0xe9   : > { %p15482_p10 = scmp.ne.s32.totalorder %s745_s14, %s15481_s28  ;;  %p15489_p13 = scmp.lt.s32.totalorder %s745_s14, %s745_s14 }
  0xea   : > { %p15490_p0 = scmp.lt.s32.totalorder %s15488_s11, %s15481_s28 }
  0xeb   : > { %p15484_p11 = pnand %p15482_p10, %p16035_p7 }
  0xec   : > { %p15491_p1 = por %p15490_p0, %p15489_p13 }
  0xed   : > { %p15485_p12 = pneg %p15484_p11 }
  0xef   : > { %p15492_p4 = pnand %p15491_p1, %p15485_p12 }
  0xf1   : > { %15495 = shalt.err (!%p15492_p4)
}
  0xf2   : > { %14157 = dma.hbm_to_vmem [thread:$0]  (!%p16021_p5), %s18158_s18, 16, %s745_s14, [#allocation26]  }
  0xf3   : > { %s15866_s3 = smov [#allocation28]   ;;  %s15867_s26 = smov [#allocation2]  }
  0xf4   : > { %s767_s24 = sshll.u32 %s15866_s3, 4  ;;  %s552_s25 = sshll.u32 %s15867_s26, 4  ;;  %s768_s24 = int_to_ptr.vmem [resolvable:$true] %s767_s24  ;;  %s553_s25 = int_to_ptr.vmem [resolvable:$true] %s552_s25 }
  0xf5   : > { %s15496_s2 = scalar_lea.hbm %s18160_s20, 4096 }
  0xf6   : > { %p15497_p6 = scmp.ne.s32.totalorder %s18160_s20, %s15496_s2  ;;  %p15503_p2 = scmp.lt.u32.totalorder %s15496_s2, %s18160_s20 }
  0xf8   : > { %p15499_p8 = pnand %p15497_p6, %p16035_p7 }
  0xfa   : > { %p15500_p9 = pneg %p15499_p8 }
  0xfc   : > { %p15505_p3 = pnand %p15503_p2, %p15500_p9 }
  0xfe   : > { %15508 = shalt.err (!%p15505_p3)
}
  0xff   : > { %s15509_s14 = scalar_lea.vmem %s768_s24, 4096  ;;  %p15517_p13 = scmp.lt.s32.totalorder %s768_s24, %s768_s24 }
 0x100   : > { %p15510_p10 = scmp.ne.s32.totalorder %s768_s24, %s15509_s14  ;;  %p15518_p0 = scmp.lt.s32.totalorder %s15509_s14, %s15509_s14 }
 0x102   : > { %p15512_p11 = pnand %p15510_p10, %p16035_p7  ;;  %p15519_p1 = por %p15518_p0, %p15517_p13 }
 0x104   : > { %p15513_p12 = pneg %p15512_p11 }
 0x106   : > { %p15520_p4 = pnand %p15519_p1, %p15513_p12 }
 0x108   : > { %15523 = shalt.err (!%p15520_p4)
}
 0x109   : > { %s18184_s30 = smov 128   ;;  %s18186_s6 = smov 8  }
 0x10a   : > { %14163 = dma.hbm_to_vmem [thread:$0]  (!%p16021_p5), %s18160_s20, 4096, %s768_s24, [#allocation29], %s18184_s30, %s18184_s30, %s18186_s6  }
 0x10b   : > { %s18214_s2 = sld [smem:[#allocation44_spill]] }
 0x111   : > { %s15524_s22 = scalar_lea.hbm %s18214_s2, 7168 }
 0x112   : > { %p15525_p6 = scmp.ne.s32.totalorder %s18214_s2, %s15524_s22  ;;  %p15531_p2 = scmp.lt.u32.totalorder %s15524_s22, %s18214_s2 }
 0x114   : > { %p15527_p8 = pnand %p15525_p6, %p16035_p7 }
 0x116   : > { %p15528_p9 = pneg %p15527_p8 }
 0x118   : > { %p15533_p3 = pnand %p15531_p2, %p15528_p9 }
 0x11a   : > { %15536 = shalt.err (!%p15533_p3)
}
 0x11b   : > { %s15537_s3 = scalar_lea.vmem %s553_s25, 7168  ;;  %p15545_p13 = scmp.lt.s32.totalorder %s553_s25, %s553_s25 }
 0x11c   : > { %p15538_p10 = scmp.ne.s32.totalorder %s553_s25, %s15537_s3  ;;  %p15546_p0 = scmp.lt.s32.totalorder %s15537_s3, %s15537_s3 }
 0x11e   : > { %p15540_p11 = pnand %p15538_p10, %p16035_p7  ;;  %p15547_p1 = por %p15546_p0, %p15545_p13 }
 0x120   : > { %p15541_p12 = pneg %p15540_p11 }
 0x122   : > { %p15548_p4 = pnand %p15547_p1, %p15541_p12 }
 0x124   : > { %15551 = shalt.err (!%p15548_p4)
}
 0x125   : > { %s18215_s24 = smov 4   ;;  %s18216_s26 = smov 64  }
 0x126   : > { %14112 = dma.hbm_to_vmem [thread:$0]  (!%p16021_p5), %s18214_s2, 7168, %s553_s25, [#allocation3], %s18216_s26, %s18216_s26, %s18215_s24  }
 0x127   : > { %s15870_s22 = smov [#allocation6]   ;;  %s15871_s28 = smov [#allocation9]  }
 0x128   : > { %s576_s4 = sshll.u32 %s15870_s22, 4  ;;  %s603_s11 = sshll.u32 %s15871_s28, 4  ;;  %s577_s4 = int_to_ptr.vmem [resolvable:$true] %s576_s4  ;;  %s604_s11 = int_to_ptr.vmem [resolvable:$true] %s603_s11 }
 0x129   : > { %s18217_s30 = sld [smem:[#allocation46_spill]] }
 0x12f   : > { %s15552_s6 = scalar_lea.hbm %s18217_s30, 192 }
 0x130   : > { %p15553_p6 = scmp.ne.s32.totalorder %s18217_s30, %s15552_s6  ;;  %p15559_p2 = scmp.lt.u32.totalorder %s15552_s6, %s18217_s30 }
 0x132   : > { %p15555_p8 = pnand %p15553_p6, %p16035_p7 }
 0x134   : > { %p15556_p9 = pneg %p15555_p8 }
 0x136   : > { %p15561_p3 = pnand %p15559_p2, %p15556_p9 }
 0x138   : > { %15564 = shalt.err (!%p15561_p3)
}
 0x139   : > { %s15565_s25 = scalar_lea.vmem %s577_s4, 192  ;;  %p15573_p13 = scmp.lt.s32.totalorder %s577_s4, %s577_s4 }
 0x13a   : > { %p15566_p10 = scmp.ne.s32.totalorder %s577_s4, %s15565_s25  ;;  %p15574_p0 = scmp.lt.s32.totalorder %s15565_s25, %s15565_s25 }
 0x13c   : > { %p15568_p11 = pnand %p15566_p10, %p16035_p7  ;;  %p15575_p1 = por %p15574_p0, %p15573_p13 }
 0x13e   : > { %p15569_p12 = pneg %p15568_p11 }
 0x140   : > { %p15576_p4 = pnand %p15575_p1, %p15569_p12 }
 0x142   : > { %15579 = shalt.err (!%p15576_p4)
}
 0x143   : > { %14118 = dma.hbm_to_vmem [thread:$0]  (!%p16021_p5), %s18217_s30, 192, %s577_s4, [#allocation5], %s18216_s26, %s18216_s26, %s18215_s24  }
 0x144   : > { %s18218_s1 = sld [smem:[#allocation48_spill]] }
 0x14a   : > { %s15580_s22 = scalar_lea.hbm %s18218_s1, 16 }
 0x14b   : > { %p15581_p6 = scmp.ne.s32.totalorder %s18218_s1, %s15580_s22  ;;  %p15587_p2 = scmp.lt.u32.totalorder %s15580_s22, %s18218_s1 }
 0x14d   : > { %p15583_p8 = pnand %p15581_p6, %p16035_p7 }
 0x14f   : > { %p15584_p9 = pneg %p15583_p8 }
 0x151   : > { %p15589_p3 = pnand %p15587_p2, %p15584_p9 }
 0x153   : > { %15592 = shalt.err (!%p15589_p3)
}
 0x154   : > { %s15593_s25 = scalar_lea.vmem %s604_s11, 16  ;;  %s15600_s4 = scalar_lea.vmem %s604_s11, 32 }
 0x155   : > { %p15594_p10 = scmp.ne.s32.totalorder %s604_s11, %s15593_s25  ;;  %p15601_p13 = scmp.lt.s32.totalorder %s604_s11, %s604_s11 }
 0x156   : > { %p15602_p0 = scmp.lt.s32.totalorder %s15600_s4, %s15593_s25 }
 0x157   : > { %p15596_p11 = pnand %p15594_p10, %p16035_p7 }
 0x158   : > { %p15603_p1 = por %p15602_p0, %p15601_p13 }
 0x159   : > { %p15597_p12 = pneg %p15596_p11 }
 0x15b   : > { %p15604_p4 = pnand %p15603_p1, %p15597_p12 }
 0x15d   : > { %15607 = shalt.err (!%p15604_p4)
}
 0x15e   : > { %14124 = dma.hbm_to_vmem [thread:$0]  (!%p16021_p5), %s18218_s1, 16, %s604_s11, [#allocation8]  }
 0x15f   : > { %s15872_s13 = smov [#allocation12]   ;;  %s15873_s22 = smov [#allocation15]  }
 0x160   : > { %s626_s6 = sshll.u32 %s15872_s13, 4  ;;  %s650_s28 = sshll.u32 %s15873_s22, 4  ;;  %s627_s6 = int_to_ptr.vmem [resolvable:$true] %s626_s6  ;;  %s651_s28 = int_to_ptr.vmem [resolvable:$true] %s650_s28 }
 0x161   : > { %s15608_s29 = scalar_lea.hbm %s18147_s7, 3072 }
 0x162   : > { %p15609_p6 = scmp.ne.s32.totalorder %s18147_s7, %s15608_s29  ;;  %p15615_p2 = scmp.lt.u32.totalorder %s15608_s29, %s18147_s7 }
 0x164   : > { %p15611_p8 = pnand %p15609_p6, %p16035_p7 }
 0x166   : > { %p15612_p9 = pneg %p15611_p8 }
 0x168   : > { %p15617_p3 = pnand %p15615_p2, %p15612_p9 }
 0x16a   : > { %15620 = shalt.err (!%p15617_p3)
}
 0x16b   : > { %s15621_s11 = scalar_lea.vmem %s627_s6, 3072  ;;  %p15629_p13 = scmp.lt.s32.totalorder %s627_s6, %s627_s6 }
 0x16c   : > { %p15622_p10 = scmp.ne.s32.totalorder %s627_s6, %s15621_s11  ;;  %p15630_p0 = scmp.lt.s32.totalorder %s15621_s11, %s15621_s11 }
 0x16e   : > { %p15624_p11 = pnand %p15622_p10, %p16035_p7  ;;  %p15631_p1 = por %p15630_p0, %p15629_p13 }
 0x170   : > { %p15625_p12 = pneg %p15624_p11 }
 0x172   : > { %p15632_p4 = pnand %p15631_p1, %p15625_p12 }
 0x174   : > { %15635 = shalt.err (!%p15632_p4)
}
 0x175   : > { %14130 = dma.hbm_to_vmem [thread:$0]  (!%p16021_p5), %s18147_s7, 3072, %s627_s6, [#allocation11], %s18216_s26, %s18216_s26, %s18215_s24  }
 0x176   : > { %s15636_s14 = scalar_lea.hbm %s18149_s9, 55296 }
 0x177   : > { %p15637_p6 = scmp.ne.s32.totalorder %s18149_s9, %s15636_s14  ;;  %p15643_p2 = scmp.lt.u32.totalorder %s15636_s14, %s18149_s9 }
 0x179   : > { %p15639_p8 = pnand %p15637_p6, %p16035_p7 }
 0x17b   : > { %p15640_p9 = pneg %p15639_p8 }
 0x17d   : > { %p15645_p3 = pnand %p15643_p2, %p15640_p9 }
 0x17f   : > { %15648 = shalt.err (!%p15645_p3)
}
 0x180   : > { %s15649_s8 = scalar_lea.vmem %s651_s28, 55296  ;;  %p15657_p13 = scmp.lt.s32.totalorder %s651_s28, %s651_s28 }
 0x181   : > { %p15650_p10 = scmp.ne.s32.totalorder %s651_s28, %s15649_s8  ;;  %p15658_p0 = scmp.lt.s32.totalorder %s15649_s8, %s15649_s8 }
 0x183   : > { %p15652_p11 = pnand %p15650_p10, %p16035_p7  ;;  %p15659_p1 = por %p15658_p0, %p15657_p13 }
 0x185   : > { %p15653_p12 = pneg %p15652_p11 }
 0x187   : > { %p15660_p4 = pnand %p15659_p1, %p15653_p12 }
 0x189   : > { %15663 = shalt.err (!%p15660_p4)
}
 0x18a   : > { %14136 = dma.hbm_to_vmem [thread:$0]  (!%p16021_p5), %s18149_s9, 55296, %s651_s28, [#allocation14], %s18216_s26, %s18216_s26, %s18215_s24  }
 0x18b   : > { %s15874_s2 = smov [#allocation18]   ;;  %s15875_s13 = smov [#allocation21]  }
 0x18c   : > { %s679_s10 = sshll.u32 %s15874_s2, 4  ;;  %s706_s22 = sshll.u32 %s15875_s13, 4  ;;  %s680_s10 = int_to_ptr.vmem [resolvable:$true] %s679_s10  ;;  %s707_s22 = int_to_ptr.vmem [resolvable:$true] %s706_s22 }
 0x18d   : > { %s15664_s29 = scalar_lea.hbm %s18152_s12, 3072 }
 0x18e   : > { %p15665_p6 = scmp.ne.s32.totalorder %s18152_s12, %s15664_s29  ;;  %p15671_p2 = scmp.lt.u32.totalorder %s15664_s29, %s18152_s12 }
 0x190   : > { %p15667_p8 = pnand %p15665_p6, %p16035_p7 }
 0x192   : > { %p15668_p9 = pneg %p15667_p8 }
 0x194   : > { %p15673_p3 = pnand %p15671_p2, %p15668_p9 }
 0x196   : > { %15676 = shalt.err (!%p15673_p3)
}
 0x197   : > { %s15677_s28 = scalar_lea.vmem %s680_s10, 3072  ;;  %p15685_p13 = scmp.lt.s32.totalorder %s680_s10, %s680_s10 }
 0x198   : > { %p15678_p10 = scmp.ne.s32.totalorder %s680_s10, %s15677_s28  ;;  %p15686_p0 = scmp.lt.s32.totalorder %s15677_s28, %s15677_s28 }
 0x19a   : > { %p15680_p11 = pnand %p15678_p10, %p16035_p7  ;;  %p15687_p1 = por %p15686_p0, %p15685_p13 }
 0x19c   : > { %p15681_p12 = pneg %p15680_p11 }
 0x19e   : > { %p15688_p4 = pnand %p15687_p1, %p15681_p12 }
 0x1a0   : > { %15691 = shalt.err (!%p15688_p4)
}
 0x1a1   : > { %14142 = dma.hbm_to_vmem [thread:$0]  (!%p16021_p5), %s18152_s12, 3072, %s680_s10, [#allocation17], %s18216_s26, %s18216_s26, %s18215_s24  }
 0x1a2   : > { %s15692_s3 = scalar_lea.hbm %s18155_s15, 3072 }
 0x1a3   : > { %p15693_p6 = scmp.ne.s32.totalorder %s18155_s15, %s15692_s3  ;;  %p15699_p2 = scmp.lt.u32.totalorder %s15692_s3, %s18155_s15 }
 0x1a5   : > { %p15695_p8 = pnand %p15693_p6, %p16035_p7 }
 0x1a7   : > { %p15696_p9 = pneg %p15695_p8 }
 0x1a9   : > { %p15701_p3 = pnand %p15699_p2, %p15696_p9 }
 0x1ab   : > { %15704 = shalt.err (!%p15701_p3)
}
 0x1ac   : > { %s15705_s6 = scalar_lea.vmem %s707_s22, 3072  ;;  %p15713_p13 = scmp.lt.s32.totalorder %s707_s22, %s707_s22 }
 0x1ad   : > { %p15706_p10 = scmp.ne.s32.totalorder %s707_s22, %s15705_s6  ;;  %p15714_p0 = scmp.lt.s32.totalorder %s15705_s6, %s15705_s6 }
 0x1af   : > { %p15708_p11 = pnand %p15706_p10, %p16035_p7  ;;  %p15715_p1 = por %p15714_p0, %p15713_p13 }
 0x1b1   : > { %p15709_p12 = pneg %p15708_p11 }
 0x1b3   : > { %p15716_p4 = pnand %p15715_p1, %p15709_p12 }
 0x1b5   : > { %15719 = shalt.err (!%p15716_p4)
}
 0x1b6   : > { %14148 = dma.hbm_to_vmem [thread:$0]  (!%p16021_p5), %s18155_s15, 3072, %s707_s22, [#allocation20], %s18216_s26, %s18216_s26, %s18215_s24  }
 0x1b7   : > { %s15876_s11 = smov [#allocation24]   ;;  %s15877_s13 = smov [#allocation27]  }
 0x1b8   : > { %s730_s2 = sshll.u32 %s15876_s11, 4  ;;  %s754_s14 = sshll.u32 %s15877_s13, 4  ;;  %s731_s2 = int_to_ptr.vmem [resolvable:$true] %s730_s2  ;;  %s755_s14 = int_to_ptr.vmem [resolvable:$true] %s754_s14 }
 0x1b9   : > { %s15720_s25 = scalar_lea.hbm %s18157_s17, 7168 }
 0x1ba   : > { %p15721_p6 = scmp.ne.s32.totalorder %s18157_s17, %s15720_s25  ;;  %p15727_p2 = scmp.lt.u32.totalorder %s15720_s25, %s18157_s17 }
 0x1bc   : > { %p15723_p8 = pnand %p15721_p6, %p16035_p7 }
 0x1be   : > { %p15724_p9 = pneg %p15723_p8 }
 0x1c0   : > { %p15729_p3 = pnand %p15727_p2, %p15724_p9 }
 0x1c2   : > { %15732 = shalt.err (!%p15729_p3)
}
 0x1c3   : > { %s15733_s22 = scalar_lea.vmem %s731_s2, 7168  ;;  %p15741_p13 = scmp.lt.s32.totalorder %s731_s2, %s731_s2 }
 0x1c4   : > { %p15734_p10 = scmp.ne.s32.totalorder %s731_s2, %s15733_s22  ;;  %p15742_p0 = scmp.lt.s32.totalorder %s15733_s22, %s15733_s22 }
 0x1c6   : > { %p15736_p11 = pnand %p15734_p10, %p16035_p7  ;;  %p15743_p1 = por %p15742_p0, %p15741_p13 }
 0x1c8   : > { %p15737_p12 = pneg %p15736_p11 }
 0x1ca   : > { %p15744_p4 = pnand %p15743_p1, %p15737_p12 }
 0x1cc   : > { %15747 = shalt.err (!%p15744_p4)
}
 0x1cd   : > { %14154 = dma.hbm_to_vmem [thread:$0]  (!%p16021_p5), %s18157_s17, 7168, %s731_s2, [#allocation23], %s18216_s26, %s18216_s26, %s18215_s24  }
 0x1ce   : > { %s15748_s29 = scalar_lea.hbm %s18159_s19, 4096 }
 0x1cf   : > { %p15749_p6 = scmp.ne.s32.totalorder %s18159_s19, %s15748_s29  ;;  %p15755_p2 = scmp.lt.u32.totalorder %s15748_s29, %s18159_s19 }
 0x1d1   : > { %p15751_p8 = pnand %p15749_p6, %p16035_p7 }
 0x1d3   : > { %p15752_p9 = pneg %p15751_p8 }
 0x1d5   : > { %p15757_p3 = pnand %p15755_p2, %p15752_p9 }
 0x1d7   : > { %15760 = shalt.err (!%p15757_p3)
}
 0x1d8   : > { %s15761_s10 = scalar_lea.vmem %s755_s14, 4096  ;;  %p15769_p13 = scmp.lt.s32.totalorder %s755_s14, %s755_s14 }
 0x1d9   : > { %p15762_p10 = scmp.ne.s32.totalorder %s755_s14, %s15761_s10  ;;  %p15770_p0 = scmp.lt.s32.totalorder %s15761_s10, %s15761_s10 }
 0x1db   : > { %p15764_p11 = pnand %p15762_p10, %p16035_p7  ;;  %p15771_p1 = por %p15770_p0, %p15769_p13 }
 0x1dd   : > { %p15765_p12 = pneg %p15764_p11 }
 0x1df   : > { %p15772_p4 = pnand %p15771_p1, %p15765_p12 }
 0x1e1   : > { %15775 = shalt.err (!%p15772_p4)
}
 0x1e2   : > { %s18219_s24 = smov 8   ;;  %s18220_s26 = smov 128  }
 0x1e3   : > { %14160 = dma.hbm_to_vmem [thread:$0]  (!%p16021_p5), %s18159_s19, 4096, %s755_s14, [#allocation26], %s18220_s26, %s18220_s26, %s18219_s24  }
 0x1e4   : > { %s15878_s28 = smov [#allocation30]   ;;  %s15776_s29 = scalar_lea.hbm %s18161_s21, 4096 }
 0x1e5   : > { %s780_s11 = sshll.u32 %s15878_s28, 4  ;;  %p15777_p6 = scmp.ne.s32.totalorder %s18161_s21, %s15776_s29  ;;  %s781_s11 = int_to_ptr.vmem [resolvable:$true] %s780_s11 }
 0x1e6   : > { %p15783_p2 = scmp.lt.u32.totalorder %s15776_s29, %s18161_s21 }
 0x1e7   : > { %p15779_p8 = pnand %p15777_p6, %p16035_p7 }
 0x1e9   : > { %p15780_p9 = pneg %p15779_p8 }
 0x1eb   : > { %p15785_p3 = pnand %p15783_p2, %p15780_p9 }
 0x1ed   : > { %15788 = shalt.err (!%p15785_p3)
}
 0x1ee   : > { %s15789_s14 = scalar_lea.vmem %s781_s11, 4096  ;;  %p15797_p13 = scmp.lt.s32.totalorder %s781_s11, %s781_s11 }
 0x1ef   : > { %p15790_p10 = scmp.ne.s32.totalorder %s781_s11, %s15789_s14  ;;  %p15798_p0 = scmp.lt.s32.totalorder %s15789_s14, %s15789_s14 }
 0x1f1   : > { %p15792_p11 = pnand %p15790_p10, %p16035_p7  ;;  %p15799_p1 = por %p15798_p0, %p15797_p13 }
 0x1f3   : > { %p15793_p12 = pneg %p15792_p11 }
 0x1f5   : > { %p15800_p4 = pnand %p15799_p1, %p15793_p12 }
 0x1f7   : > { %15803 = shalt.err (!%p15800_p4)
}
 0x1f8   : > { %14166 = dma.hbm_to_vmem [thread:$0]  (!%p16021_p5), %s18161_s21, 4096, %s781_s11, [#allocation29], %s18220_s26, %s18220_s26, %s18219_s24  }
 0x1f9   : > { %p18221_p6 = scmp.ne.s32.totalorder %s18205_s0, 0 }
 0x1fa   : > { %s18222_s23 = sld [smem:[#allocation42_spill]] (!%p18221_p6) }
 0x1fb   : > { %805 = sbr.rel (%p18221_p6) target bundleno = 13320 (0x3408), region = 108 }
 0x200   : > { %p18223_p7 = scmp.ne.s32.totalorder (!%p18221_p6), %s18222_s23, 0 }
 0x202   : > { %15809 = dma.done.wait (%p18223_p7), [#allocation3], 7168  }
 0x203   : > { %15811 = vsyncadd (%p18223_p7), [#allocation3], 4294960128 }
 0x204   : > { %15813 = dma.done.wait (%p18223_p7), [#allocation5], 208  }
 0x205   : > { %15815 = vsyncadd (%p18223_p7), [#allocation5], 4294967088 }
 0x206   : > { %15817 = dma.done.wait (%p18223_p7), [#allocation8], 3088  }
 0x207   : > { %15819 = vsyncadd (%p18223_p7), [#allocation8], 4294964208 }
 0x208   : > { %15821 = dma.done.wait (%p18223_p7), [#allocation11], 3168  }
 0x209   : > { %15823 = vsyncadd (%p18223_p7), [#allocation11], 4294964128 }
 0x20a   : > { %15825 = dma.done.wait (%p18223_p7), [#allocation14], 55312  }
 0x20b   : > { %15827 = vsyncadd (%p18223_p7), [#allocation14], 4294911984 }
 0x20c   : > { %15829 = dma.done.wait (%p18223_p7), [#allocation17], 3360  }
 0x20d   : > { %15831 = vsyncadd (%p18223_p7), [#allocation17], 4294963936 }
 0x20e   : > { %15833 = dma.done.wait (%p18223_p7), [#allocation20], 3088  }
 0x20f   : > { %15835 = vsyncadd (%p18223_p7), [#allocation20], 4294964208 }
 0x210   : > { %15837 = dma.done.wait (%p18223_p7), [#allocation23], 7184  }
 0x211   : > { %15839 = vsyncadd (%p18223_p7), [#allocation23], 4294960112 }
 0x212   : > { %15841 = dma.done.wait (%p18223_p7), [#allocation26], 4112  }
 0x213   : > { %15843 = vsyncadd (%p18223_p7), [#allocation26], 4294963184 }
 0x214   : > { %15845 = dma.done.wait (%p18223_p7), [#allocation29], 8192  }
 0x215   : > { %15847 = vsyncadd (%p18223_p7), [#allocation29], 4294959104  ;;  %v14243_v0 = vld [vmem:[#allocation2 + $0x40] sm:$0xff]   ;;  %v14247_v4 = vld [vmem:[#allocation2 + $0x48] sm:$0xff]   ;;  %s18224_s0 = sld [smem:[#allocation41_spill]]  ;;  %vm1076_vm0 = vcmask 1041408  }
 0x216   : > { %v14244_v1 = vld [vmem:[#allocation2] sm:$0xff]   ;;  %12625 = vmatprep.subr.bf16.mxu0 %v14243_v0  ;;  %v14248_v5 = vld [vmem:[#allocation2 + $0x8] sm:$0xff]   ;;  %v14251_v8 = vld [vmem:[#allocation2 + $0x50] sm:$0xff]   ;;  %vm1069_vm2 = vcmask 1042432   ;;  %vm1083_vm3 = vcmask 1040384   ;;  %vm15879_vm6 = vmmov 1  }
 0x217   : > { %v14245_v2 = vld [vmem:[#allocation2 + $0xc0] sm:$0xff]   ;;  %12626 = vmatpush3.bf16.msra.mxu0 %v14244_v1  ;;  %v14249_v6 = vld [vmem:[#allocation2 + $0xc8] sm:$0xff]   ;;  %v14252_v9 = vld [vmem:[#allocation2 + $0x10] sm:$0xff]   ;;  %s18234_s11 = sld [smem:[#allocation43_spill]]  ;;  %vm1097_vm10 = vcmask 1045504   ;;  %v15880_v52 = vmov 0.0  }
 0x218   : > { %v14246_v3 = vld [vmem:[#allocation2 + $0x80] sm:$0xff]   ;;  %12647 = vmatprep.subr.bf16.mxu1 %v14245_v2  ;;  %12627 = vmatprep.subr.bf16.mxu0 %v14247_v4  ;;  %v14250_v7 = vld [vmem:[#allocation2 + $0x88] sm:$0xff]   ;;  %v14253_v10 = vld [vmem:[#allocation2 + $0xd0] sm:$0xff]   ;;  %vm15881_vm12 = vmmov 0   ;;  %vm1090_vm13 = vcmask 1046528   ;;  %vm1104_vm15 = vcmask 1044480  }
 0x219   : > { %12648 = vmatpush3.bf16.msra.mxu1 %v14246_v3  ;;  %v14254_v11 = vld [vmem:[#allocation2 + $0x90] sm:$0xff]   ;;  %v14255_v12 = vld [vmem:[#allocation2 + $0x58] sm:$0xff]   ;;  %vm16478_vm1 = vmneg %vm1076_vm0  ;;  %s18245_s25 = sld [smem:[#allocation52_spill]]  ;;  %s18246_s23 = sld [smem:[#allocation54_spill]] }
 0x21a   : > { %12649 = vmatprep.subr.bf16.mxu1 %v14249_v6  ;;  %v14256_v13 = vld [vmem:[#allocation2 + $0x18] sm:$0xff]   ;;  %v14259_v17 = vld [vmem:[#allocation2 + $0x60] sm:$0xff]   ;;  %v14263_v21 = vld [vmem:[#allocation2 + $0x68] sm:$0xff]   ;;  %s18247_s3 = sld [smem:[#allocation55_spill]] }
 0x21b   : > { %12628 = vmatpush3.bf16.msra.mxu0 %v14248_v5  ;;  %v14257_v14 = vld [vmem:[#allocation2 + $0xd8] sm:$0xff]   ;;  %s18225_s5 = sadd.s32 4294967295, %s18224_s0   ;;  %v14260_v18 = vld [vmem:[#allocation2 + $0x20] sm:$0xff]   ;;  %v14264_v22 = vld [vmem:[#allocation2 + $0x28] sm:$0xff]  }
 0x21c   : > { %12629 = vmatprep.subr.bf16.mxu0 %v14251_v8  ;;  %s11796_s24 = sshll.u32 %s18225_s5, 1  ;;  %v14258_v15 = vld [vmem:[#allocation2 + $0x98] sm:$0xff]   ;;  %v14261_v19 = vld [vmem:[#allocation2 + $0xe0] sm:$0xff]   ;;  %vm16485_vm4 = vmneg %vm1069_vm2 }
 0x21d   : > { %12650 = vmatpush3.bf16.msra.mxu1 %v14250_v7  ;;  %p940_p5 = scmp.lt.s32.totalorder %s11796_s24, 3  ;;  %v14262_v20 = vld [vmem:[#allocation2 + $0xa0] sm:$0xff]   ;;  %v14265_v24 = vld [vmem:[#allocation2 + $0xe8] sm:$0xff]   ;;  %vm16490_vm5 = vmneg %vm1083_vm3 }
 0x21e   : > { %12651 = vmatprep.subr.bf16.mxu1 %v14253_v10  ;;  %v14266_v25 = vld [vmem:[#allocation2 + $0xa8] sm:$0xff]   ;;  %v14267_v27 = vld [vmem:[#allocation2 + $0x70] sm:$0xff]   ;;  %vm16498_vm7 = vmpackc.low %vm15879_vm6, %vm16478_vm1 }
 0x21f   : > { %12630 = vmatpush3.bf16.msra.mxu0 %v14252_v9  ;;  %s18250_s24 = smov (!%p940_p5, %s11796_s24), 3  ;;  %v14268_v28 = vld [vmem:[#allocation2 + $0x30] sm:$0xff]   ;;  %v14271_v32 = vld [vmem:[#allocation2 + $0x78] sm:$0xff]   ;;  %vm16517_vm8 = vmpackc.low %vm15879_vm6, %vm16485_vm4  ;;  %vm1945_vm4 = vcmask 130048  }
 0x220   : > { %12631 = vmatprep.subr.bf16.mxu0 %v14255_v12  ;;  %s11797_s26 = sshll.u32 %s18250_s24, 3  ;;  %v14269_v29 = vld [vmem:[#allocation2 + $0xf0] sm:$0xff]   ;;  %v14272_v33 = vld [vmem:[#allocation2 + $0x38] sm:$0xff]   ;;  %v14275_v44 = vld [vmem:[#allocation2 + $0x140] sm:$0xff]  }
 0x221   : > { %12652 = vmatpush3.bf16.msra.mxu1 %v14254_v11  ;;  %v14270_v31 = vld [vmem:[#allocation2 + $0xb0] sm:$0xff]   ;;  %s943_s13 = scalar_lea.vmem %s18234_s11, %s11797_s26  ;;  %v14273_v34 = vld [vmem:[#allocation2 + $0xf8] sm:$0xff]   ;;  %vm16529_vm9 = vmpackc.low %vm15879_vm6, %vm16490_vm5  ;;  %vm2631_vm5 = vcmask 1043456   ;;  %s949_s29 = scalar_lea.vmem %s18247_s3, %s11797_s26 }
 0x222   : > { %12653 = vmatprep.subr.bf16.mxu1 %v14257_v14  ;;  %v16507_v35 = vld [vmem:[%s943_s13] sm:$0xff]  ;;  %v16509_v36 = vld [vmem:[%s943_s13 + $0x8] sm:$0xff]  ;;  %v14274_v39 = vld [vmem:[#allocation2 + $0xb8] sm:$0xff]  }
 0x223   : > { %12632 = vmatpush3.bf16.msra.mxu0 %v14256_v13  ;;  %v1077_v37 = vrot.slane %v16507_v35, 6  ;;  %v1078_v38 = vrot.slane %v16509_v36, 6  ;;  %v1070_v40 = vrot.slane %v16507_v35, 5  ;;  %v1114_v42 = vpack.c.bf16 %v16509_v36, %v16507_v35  ;;  %v14276_v50 = vld [vmem:[#allocation2 + $0x100] sm:$0xff]   ;;  %v14278_v54 = vld [vmem:[#allocation2 + $0x148] sm:$0xff]   ;;  %vm16545_vm11 = vmpackc.low %vm1097_vm10, %vm15879_vm6 }
 0x224   : > { %12633 = vmatprep.subr.bf16.mxu0 %v14259_v17  ;;  %v1071_v43 = vrot.slane %v16509_v36, 5  ;;  %v1084_v46 = vrot.slane %v16507_v35, 7  ;;  %v1085_v51 = vrot.slane %v16509_v36, 7  ;;  %v1098_v55 = vrot.slane %v16507_v35, 2  ;;  %v14277_v57 = vld [vmem:[#allocation2 + $0x180] sm:$0xff]   ;;  %v14279_v61 = vld [vmem:[#allocation2 + $0x108] sm:$0xff]   ;;  %vm16565_vm14 = vmpackc.low %vm1090_vm13, %vm15879_vm6 }
 0x225   : > { %12654 = vmatpush3.bf16.msra.mxu1 %v14258_v15  ;;  %v1079_v45 = vsel %vm1076_vm0, %v1077_v37, %v1078_v38  ;;  %1533 = vmatprep.mubr.bf16.mxu1 %v1114_v42  ;;  %v1099_v58 = vrot.slane %v16509_v36, 2  ;;  %v14281_v63 = vld [vmem:[#allocation2 + $0x150] sm:$0xff]   ;;  %v14280_v1 = vld [vmem:[#allocation2 + $0x188] sm:$0xff]   ;;  %v14284_v3 = vld [vmem:[#allocation2 + $0x158] sm:$0xff]   ;;  %v1091_v17 = vrot.slane %v16507_v35, 1 }
 0x226   : > { %12655 = vmatprep.subr.bf16.mxu1 %v14261_v19  ;;  %v11859_v48 = vpack.c.bf16 %v1079_v45, %v1077_v37  ;;  %v1072_v49 = vsel %vm1069_vm2, %v1070_v40, %v1071_v43  ;;  %v1086_v56 = vsel %vm1083_vm3, %v1084_v46, %v1085_v51  ;;  %v14282_v2 = vld [vmem:[#allocation2 + $0x110] sm:$0xff]   ;;  %v14285_v5 = vld [vmem:[#allocation2 + $0x118] sm:$0xff]   ;;  %v14287_v6 = vld [vmem:[#allocation2 + $0x160] sm:$0xff]  }
 0x227   : > { %12634 = vmatpush3.bf16.msra.mxu0 %v14260_v18  ;;  %v11863_v53 = vpack.c.bf16 %v1072_v49, %v1070_v40  ;;  %v11867_v59 = vpack.c.bf16 %v1086_v56, %v1084_v46  ;;  %v1100_v62 = vsel %vm1097_vm10, %v1098_v55, %v1099_v58  ;;  %v14283_v4 = vld [vmem:[#allocation2 + $0x190] sm:$0xff]   ;;  %v14286_v7 = vld [vmem:[#allocation2 + $0x198] sm:$0xff]   ;;  %v14288_v8 = vld [vmem:[#allocation2 + $0x120] sm:$0xff]   ;;  %v1092_v18 = vrot.slane %v16509_v36, 1 }
 0x228   : > { %12635 = vmatprep.subr.bf16.mxu0 %v14263_v21  ;;  %11860 = vmatprep.mubr.msk.bf16.mxu0 %vm16498_vm7, %v11859_v48  ;;  %v11870_v0 = vpack.c.bf16 %v1099_v58, %v1100_v62  ;;  %v14290_v9 = vld [vmem:[#allocation2 + $0x168] sm:$0xff]   ;;  %v14289_v10 = vld [vmem:[#allocation2 + $0x1a0] sm:$0xff]   ;;  %v14293_v12 = vld [vmem:[#allocation2 + $0x170] sm:$0xff]   ;;  %v1105_v21 = vrot.slane %v16507_v35, 3 }
 0x229   : > { %12656 = vmatpush3.bf16.msra.mxu1 %v14262_v20  ;;  %v14291_v11 = vld [vmem:[#allocation2 + $0x128] sm:$0xff]   ;;  %v14294_v14 = vld [vmem:[#allocation2 + $0x130] sm:$0xff]   ;;  %v14296_v15 = vld [vmem:[#allocation2 + $0x178] sm:$0xff]   ;;  %v1093_v26 = vsel %vm1090_vm13, %v1091_v17, %v1092_v18 }
 0x22a   : > { %12657 = vmatprep.subr.bf16.mxu1 %v14265_v24  ;;  %v14292_v13 = vld [vmem:[#allocation2 + $0x1a8] sm:$0xff]   ;;  %v14295_v16 = vld [vmem:[#allocation2 + $0x1b0] sm:$0xff]   ;;  %v14297_v20 = vld [vmem:[#allocation2 + $0x138] sm:$0xff]  }
 0x22b   : > { %12636 = vmatpush3.bf16.msra.mxu0 %v14264_v22  ;;  %v1106_v22 = vrot.slane %v16509_v36, 3  ;;  %vm16573_vm1 = vmpackc.low %vm1104_vm15, %vm15879_vm6  ;;  %v14301_v24 = vld [vmem:[#allocation27 + $0x4] ss:$8 sps:$4 sm:$0xff]   ;;  %v14305_v35 = vld [vmem:[#allocation27 + $0x20] ss:$8 sps:$4 sm:$0xff]   ;;  %vm2627_vm6 = vcmask 64512  }
 0x22c   : > { %12637 = vmatprep.subr.bf16.mxu0 %v14267_v27  ;;  %v14310_v36 = vld [vmem:[#allocation27 + $0x34] ss:$8 sps:$4 sm:$0xff]   ;;  %v14308_v37 = vld [vmem:[#allocation27 + $0x30] ss:$8 sps:$4 sm:$0xff]   ;;  %v14313_v38 = vld [vmem:[#allocation27 + $0x44] ss:$8 sps:$4 sm:$0xff]  }
 0x22d   : > { %12658 = vmatpush3.bf16.msra.mxu1 %v14266_v25  ;;  %v14298_v25 = vld [vmem:[#allocation2 + $0x1b8] sm:$0xff]   ;;  %v1107_v27 = vsel %vm1104_vm15, %v1105_v21, %v1106_v22  ;;  %v14316_v40 = vld [vmem:[#allocation27 + $0x54] ss:$8 sps:$4 sm:$0xff]   ;;  %v14314_v42 = vld [vmem:[#allocation27 + $0x50] ss:$8 sps:$4 sm:$0xff]  }
 0x22e   : > { %12659 = vmatprep.subr.bf16.mxu1 %v14269_v29  ;;  %v11873_v29 = vpack.c.bf16 %v1092_v18, %v1093_v26  ;;  %v14319_v43 = vld [vmem:[#allocation27 + $0x64] ss:$8 sps:$4 sm:$0xff]   ;;  %v14322_v45 = vld [vmem:[#allocation27 + $0x74] ss:$8 sps:$4 sm:$0xff]   ;;  %v14320_v46 = vld [vmem:[#allocation27 + $0x70] ss:$8 sps:$4 sm:$0xff]  }
 0x22f   : > { %12638 = vmatpush3.bf16.msra.mxu0 %v14268_v28  ;;  %v14299_v28 = vld [vmem:[#allocation27] ss:$8 sps:$4 sm:$0xff]   ;;  %v14325_v48 = vld [vmem:[#allocation27 + $0x84] ss:$8 sps:$4 sm:$0xff]   ;;  %v14326_v51 = vld [vmem:[#allocation27 + $0x90] ss:$8 sps:$4 sm:$0xff]  }
 0x230   : > { %12639 = vmatprep.subr.bf16.mxu0 %v14271_v32  ;;  %v14304_v32 = vld [vmem:[#allocation27 + $0x14] ss:$8 sps:$4 sm:$0xff]   ;;  %v14323_v49 = vld [vmem:[#allocation27 + $0x80] ss:$8 sps:$4 sm:$0xff]   ;;  %v14332_v56 = vld [vmem:[#allocation27 + $0xb0] ss:$8 sps:$4 sm:$0xff]  }
 0x231   : > { %12660 = vmatpush3.bf16.msra.mxu1 %v14270_v31  ;;  %v11876_v31 = vpack.c.bf16 %v1106_v22, %v1107_v27  ;;  %v14334_v55 = vld [vmem:[#allocation27 + $0xb4] ss:$8 sps:$4 sm:$0xff]   ;;  %v14335_v58 = vld [vmem:[#allocation27 + $0xc0] ss:$8 sps:$4 sm:$0xff]  }
 0x232   : > { %12661 = vmatprep.subr.bf16.mxu1 %v14273_v34  ;;  %v14307_v34 = vld [vmem:[#allocation27 + $0x24] ss:$8 sps:$4 sm:$0xff]   ;;  %v14341_v62 = vld [vmem:[#allocation27 + $0xe0] ss:$8 sps:$4 sm:$0xff]   ;;  %v15013_v41 = vld [vmem:[#allocation24 + $0x98] sm:$0xff]  }
 0x233   : > { %12640 = vmatpush3.bf16.msra.mxu0 %v14272_v33  ;;  %v14302_v33 = vld [vmem:[#allocation27 + $0x10] ss:$8 sps:$4 sm:$0xff]   ;;  %v15014_v19 = vld [vmem:[#allocation24 + $0xe0] sm:$0xff]   ;;  %v15027_v47 = vld [vmem:[#allocation24 + $0x1a8] sm:$0xff]  }
 0x234   : > { %12669 = vmatprep.subr.bf16.mxu0 %v14275_v44  ;;  %v14317_v44 = vld [vmem:[#allocation27 + $0x60] ss:$8 sps:$4 sm:$0xff]   ;;  %v15010_v30 = vld [vmem:[#allocation24 + $0xd0] sm:$0xff]  }
 0x235   : > { %12662 = vmatpush3.bf16.msra.mxu1 %v14274_v39  ;;  %v14311_v39 = vld [vmem:[#allocation27 + $0x40] ss:$8 sps:$4 sm:$0xff]   ;;  %v15011_v60 = vld [vmem:[#allocation24 + $0x90] sm:$0xff]  }
 0x236   : > { %13481 = vmatprep.subr.bf16.mxu1 %v15880_v52  ;;  %11864 = vmatmul.mubr.msk.bf16.vlgmr.msra.gmra.mrb[0].mxu0 %vm16517_vm8, %v11863_v53  ;;  %v14331_v53 = vld [vmem:[#allocation27 + $0xa4] ss:$8 sps:$4 sm:$0xff]  }
 0x237   : > { %12670 = vmatpush3.bf16.msra.mxu0 %v14276_v50  ;;  %11871 = vmatprep.mubr.msk.bf16.mxu0 %vm16545_vm11, %v11870_v0  ;;  %v14328_v50 = vld [vmem:[#allocation27 + $0x94] ss:$8 sps:$4 sm:$0xff]  }
 0x238   : > { %11868 = vmatmul.mubr.msk.bf16.vlgmr.msra.gmra.mrb[0].mxu1 %vm16529_vm9, %v11867_v59  ;;  %12671 = vmatprep.subr.bf16.mxu0 %v14278_v54  ;;  %v14329_v54 = vld [vmem:[#allocation27 + $0xa0] ss:$8 sps:$4 sm:$0xff]   ;;  %v14340_v59 = vld [vmem:[#allocation27 + $0xd4] ss:$8 sps:$4 sm:$0xff]  }
 0x239   : > { %13482 = vmatpush3.bf16.msra.mxu1 %v14277_v57  ;;  %13497 = vmatprep.mubr.msk.bf16.mxu1 %vm15881_vm12, %v15880_v52  ;;  %v14337_v57 = vld [vmem:[#allocation27 + $0xc4] ss:$8 sps:$4 sm:$0xff]   ;;  %v14346_v0 = vld [vmem:[#allocation27 + $0xf4] ss:$8 sps:$4 sm:$0xff]  }
 0x23a   : > { %13483 = vmatprep.subr.bf16.mxu1 %v15880_v52 }
 0x23b   : > { %12672 = vmatpush3.bf16.msra.mxu0 %v14279_v61  ;;  %v14338_v61 = vld [vmem:[#allocation27 + $0xd0] ss:$8 sps:$4 sm:$0xff]  }
 0x23c   : > { %12673 = vmatprep.subr.bf16.mxu0 %v14281_v63  ;;  %v14343_v63 = vld [vmem:[#allocation27 + $0xe4] ss:$8 sps:$4 sm:$0xff]  }
 0x23d   : > { %13484 = vmatpush3.bf16.msra.mxu1 %v14280_v1  ;;  %v14344_v1 = vld [vmem:[#allocation27 + $0xf0] ss:$8 sps:$4 sm:$0xff]  }
 0x23e   : > { %13485 = vmatprep.subr.bf16.mxu1 %v15880_v52 }
 0x23f   : > { %12674 = vmatpush3.bf16.msra.mxu0 %v14282_v2  ;;  %v11800_v2 = vld [vmem:[#allocation4] ss:$0 sm:$0xff] }
 0x240   : > { %12675 = vmatprep.subr.bf16.mxu0 %v14284_v3 }
 0x241   : > { %13486 = vmatpush3.bf16.msra.mxu1 %v14283_v4 }
 0x242   : > { %13487 = vmatprep.subr.bf16.mxu1 %v15880_v52 }
 0x243   : > { %12676 = vmatpush3.bf16.msra.mxu0 %v14285_v5 }
 0x244   : > { %12677 = vmatprep.subr.bf16.mxu0 %v14287_v6 }
 0x245   : > { %13488 = vmatpush3.bf16.msra.mxu1 %v14286_v7 }
 0x246   : > { %13489 = vmatprep.subr.bf16.mxu1 %v15880_v52 }
 0x247   : > { %12678 = vmatpush3.bf16.msra.mxu0 %v14288_v8 }
 0x248   : > { %12679 = vmatprep.subr.bf16.mxu0 %v14290_v9 }
 0x249   : > { %13490 = vmatpush3.bf16.msra.mxu1 %v14289_v10 }
 0x24a   : > { %13491 = vmatprep.subr.bf16.mxu1 %v15880_v52 }
 0x24b   : > { %12680 = vmatpush3.bf16.msra.mxu0 %v14291_v11 }
 0x24c   : > { %12681 = vmatprep.subr.bf16.mxu0 %v14293_v12 }
 0x24d   : > { %13492 = vmatpush3.bf16.msra.mxu1 %v14292_v13 }
 0x24e   : > { %13493 = vmatprep.subr.bf16.mxu1 %v15880_v52 }
 0x24f   : > { %12682 = vmatpush3.bf16.msra.mxu0 %v14294_v14 }
 0x250   : > { %12683 = vmatprep.subr.bf16.mxu0 %v14296_v15 }
 0x251   : > { %13494 = vmatpush3.bf16.msra.mxu1 %v14295_v16 }
 0x252   : > { %13495 = vmatprep.subr.bf16.mxu1 %v15880_v52 }
 0x253   : > { %12684 = vmatpush3.bf16.msra.mxu0 %v14297_v20 }
 0x254   : > { %1834 = vmatprep.subr.bf16.mxu0 %v14301_v24 }
 0x255   : > { %13496 = vmatpush3.bf16.msra.mxu1 %v14298_v25 }
 0x256   : > { %11874 = vmatmul.mubr.msk.bf16.vlgmr.msra.gmra.mrb[4].mxu0 %vm16565_vm14, %v11873_v29  ;;  %13501 = vmatprep.subr.bf16.mxu1 %v15880_v52 }
 0x257   : > { %1835 = vmatpush1.bf16.msra.mxu0 %v14299_v28 }
 0x258   : > { %13498 = vmatmul.mubr.msk.bf16.vlgmr.msra.gmra.mrb[4].mxu1 %vm16573_vm1, %v11876_v31  ;;  %1836 = vmatprep.subr.bf16.mxu0 %v14304_v32 }
 0x259   : > { %13503 = vmatprep.mubr.msk.bf16.mxu1 %vm15881_vm12, %v15880_v52 }
 0x25b   : > { %1837 = vmatpush1.bf16.msra.mxu0 %v14302_v33 }
 0x25c   : > { %1838 = vmatprep.subr.bf16.mxu0 %v14307_v34 }
 0x25f   : > { %1839 = vmatpush1.bf16.msra.mxu0 %v14305_v35 }
 0x260   : > { %1840 = vmatprep.subr.bf16.mxu0 %v14310_v36 }
 0x263   : > { %1841 = vmatpush1.bf16.msra.mxu0 %v14308_v37 }
 0x264   : > { %1842 = vmatprep.subr.bf16.mxu0 %v14313_v38 }
 0x267   : > { %1843 = vmatpush1.bf16.msra.mxu0 %v14311_v39 }
 0x268   : > { %1844 = vmatprep.subr.bf16.mxu0 %v14316_v40 }
 0x26b   : > { %1845 = vmatpush1.bf16.msra.mxu0 %v14314_v42 }
 0x26c   : > { %1846 = vmatprep.subr.bf16.mxu0 %v14319_v43 }
 0x26f   : > { %1847 = vmatpush1.bf16.msra.mxu0 %v14317_v44 }
 0x270   : > { %1848 = vmatprep.subr.bf16.mxu0 %v14322_v45 }
 0x273   : > { %1849 = vmatpush1.bf16.msra.mxu0 %v14320_v46 }
 0x274   : > { %1850 = vmatprep.subr.bf16.mxu0 %v14325_v48 }
 0x277   : > { %1851 = vmatpush1.bf16.msra.mxu0 %v14323_v49 }
 0x278   : > { %1852 = vmatprep.subr.bf16.mxu0 %v14328_v50 }
 0x27b   : > { %1853 = vmatpush1.bf16.msra.mxu0 %v14326_v51 }
 0x27c   : > { %1854 = vmatprep.subr.bf16.mxu0 %v14331_v53 }
 0x27f   : > { %1855 = vmatpush1.bf16.msra.mxu0 %v14329_v54 }
 0x280   : > { %1856 = vmatprep.subr.bf16.mxu0 %v14334_v55 }
 0x283   : > { %1857 = vmatpush1.bf16.msra.mxu0 %v14332_v56 }
 0x284   : > { %1858 = vmatprep.subr.bf16.mxu0 %v14337_v57 }
 0x287   : > { %1859 = vmatpush1.bf16.msra.mxu0 %v14335_v58 }
 0x288   : > { %1860 = vmatprep.subr.bf16.mxu0 %v14340_v59 }
 0x28b   : > { %1861 = vmatpush1.bf16.msra.mxu0 %v14338_v61 }
 0x28c   : > { %1862 = vmatprep.subr.bf16.mxu0 %v14343_v63 }
 0x28f   : > { %1863 = vmatpush1.bf16.msra.mxu0 %v14341_v62 }
 0x290   : > { %1864 = vmatprep.subr.bf16.mxu0 %v14346_v0  ;;  %v1878_v0 = vlaneseq }
 0x293   : > { %1865 = vmatpush1.bf16.msra.mxu0 %v14344_v1 }
 0x309   : > { %v12641_v3 = vpop.f32.mrb[0].mxu0 }
 0x30a   : > { %v12642_v4 = vpop.f32.mrb[1].mxu0 }
 0x30b   : > { %v12643_v5 = vadd.f32 %v12642_v4, %v12641_v3  ;;  %v12644_v6 = vpop.f32.mrb[2].mxu0  ;;  %v12663_v7 = vpop.f32.mrb[0].mxu1  ;;  %v1879_v3 = vshrl.u32 %v1878_v0, 7 }
 0x30c   : > { %v12645_v8 = vpop.f32.mrb[3].mxu0  ;;  %v12664_v9 = vpop.f32.mrb[1].mxu1 }
 0x30d   : > { %v1495_v10 = vadd.f32 %v12643_v5, %v11800_v2  ;;  %v12646_v11 = vadd.f32 %v12645_v8, %v12644_v6  ;;  %v12665_v12 = vadd.f32 %v12664_v9, %v12663_v7  ;;  %v12666_v13 = vpop.f32.mrb[2].mxu1  ;;  %v16588_v4 = vsub.s32 0, %v1879_v3  ;;  %v14367_v3 = vld [vmem:[#allocation7 + $0xa0] sm:$0xff]  }
 0x30e   : > { %v12667_v14 = vpop.f32.mrb[3].mxu1 }
 0x30f   : > { %v1498_v15 = vadd.f32 %v12646_v11, %v11800_v2  ;;  %v1536_v16 = vadd.f32 %v12665_v12, %v1495_v10  ;;  %v12668_v17 = vadd.f32 %v12667_v14, %v12666_v13 }
 0x311   : > { %v1539_v18 = vadd.f32 %v12668_v17, %v1498_v15  ;;  %v1944_v15 = vld [vmem:[#allocation6] sm:$0xf]  ;;  %v14347_v17 = vld [vmem:[#allocation7 + $0x40] sm:$0xff]  }
 0x329   : > { %v12685_v20 = vpop.f32.mrb[4].mxu0 }
 0x32a   : > { %v12686_v21 = vpop.f32.mrb[5].mxu0 }
 0x32b   : > { %v12687_v22 = vadd.f32 %v12686_v21, %v12685_v20  ;;  %v12688_v24 = vpop.f32.mrb[6].mxu0  ;;  %v1617_v25 = vpop.f32.mrb[4].mxu1  ;;  %v14348_v20 = vld [vmem:[#allocation7] sm:$0xff]   ;;  %v14349_v21 = vld [vmem:[#allocation7 + $0x48] sm:$0xff]  }
 0x32c   : > { %v12689_v26 = vpop.f32.mrb[7].mxu0  ;;  %v13499_v27 = vpop.f32.mrb[5].mxu1 }
 0x32d   : > { %v1577_v28 = vadd.f32 %v12687_v22, %v1536_v16  ;;  %v12690_v29 = vadd.f32 %v12689_v26, %v12688_v24  ;;  %v1620_v31 = vpop.f32.mrb[6].mxu1  ;;  %v1991_v16 = vld [vmem:[#allocation6 + $0x4] sm:$0xf]  ;;  %v14350_v22 = vld [vmem:[#allocation7 + $0x8] sm:$0xff]   ;;  %v14351_v24 = vld [vmem:[#allocation7 + $0x50] sm:$0xff]  }
 0x32e   : > { %v13500_v32 = vpop.f32.mrb[7].mxu1  ;;  %v14353_v26 = vld [vmem:[#allocation7 + $0x58] sm:$0xff]  }
 0x32f   : > { %v1618_v33 = vadd.f32 %v1617_v25, %v1577_v28  ;;  %v1580_v34 = vadd.f32 %v12690_v29, %v1539_v18  ;;  %v2037_v18 = vld [vmem:[#allocation6 + $0x8] sm:$0xf]  ;;  %v14352_v25 = vld [vmem:[#allocation7 + $0x10] sm:$0xff]   ;;  %v14355_v28 = vld [vmem:[#allocation7 + $0x60] sm:$0xff]  }
 0x330   : > { %v14354_v27 = vld [vmem:[#allocation7 + $0x18] sm:$0xff]   ;;  %v14356_v29 = vld [vmem:[#allocation7 + $0x20] sm:$0xff]   ;;  %v14358_v32 = vld [vmem:[#allocation7 + $0x28] sm:$0xff]  }
 0x331   : > { %v1621_v35 = vadd.f32 %v1620_v31, %v1580_v34  ;;  %v1624_v36 = vmul.f32 %v1618_v33, %v1618_v33  ;;  %v14357_v31 = vld [vmem:[#allocation7 + $0x68] sm:$0xff]   ;;  %v14360_v34 = vld [vmem:[#allocation7 + $0x30] sm:$0xff]  }
 0x333   : > { %v1625_v37 = vmul.f32 %v1621_v35, %v1621_v35  ;;  %v1626_v38 = vadd.f32 %v1621_v35, %v1618_v33 }
 0x335   : > { %v1627_v39 = vrot.slane %v1626_v38, 4  ;;  %v1633_v40 = vadd.f32 %v1625_v37, %v1624_v36  ;;  %v14362_v36 = vld [vmem:[#allocation7 + $0x38] sm:$0xff]   ;;  %v14371_v37 = vld [vmem:[#allocation28] ss:$8 sps:$4 sm:$0xff]  }
 0x337   : > { %v1628_v42 = vadd.f32 %v1627_v39, %v1626_v38  ;;  %v1634_v43 = vrot.slane %v1633_v40, 4  ;;  %v14373_v38 = vld [vmem:[#allocation28 + $0x4] ss:$8 sps:$4 sm:$0xff]   ;;  %v14376_v39 = vld [vmem:[#allocation28 + $0x14] ss:$8 sps:$4 sm:$0xff]  }
 0x338   : > { %2519 = vmatprep.subr.bf16.mxu0 %v14373_v38 }
 0x339   : > { %v1629_v44 = vrot.slane %v1628_v42, 2  ;;  %v1635_v45 = vadd.f32 %v1634_v43, %v1633_v40  ;;  %v14374_v40 = vld [vmem:[#allocation28 + $0x10] ss:$8 sps:$4 sm:$0xff]   ;;  %v14377_v43 = vld [vmem:[#allocation28 + $0x20] ss:$8 sps:$4 sm:$0xff]  }
 0x33b   : > { %v1630_v46 = vadd.f32 %v1629_v44, %v1628_v42  ;;  %v1636_v48 = vrot.slane %v1635_v45, 2  ;;  %v14379_v42 = vld [vmem:[#allocation28 + $0x24] ss:$8 sps:$4 sm:$0xff]   ;;  %v14382_v44 = vld [vmem:[#allocation28 + $0x34] ss:$8 sps:$4 sm:$0xff]  }
 0x33d   : > { %v1637_v49 = vadd.f32 %v1636_v48, %v1635_v45  ;;  %v1631_v50 = vrot.slane %v1630_v46, 1  ;;  %v14380_v45 = vld [vmem:[#allocation28 + $0x30] ss:$8 sps:$4 sm:$0xff]  }
 0x33f   : > { %v1638_v51 = vrot.slane %v1637_v49, 1  ;;  %v1632_v53 = vadd.f32 %v1631_v50, %v1630_v46 }
 0x341   : > { %v1639_v54 = vadd.f32 %v1638_v51, %v1637_v49  ;;  %v1640_v56 = vpack.c.bf16 %v1632_v53, %v1632_v53 }
 0x343   : > { %v1641_v55 = vpack.c.bf16 %v1639_v54, %v1639_v54 }
 0x345   : > { %1866 = vmatprep.mubr.bf16.mxu0 %v1641_v55  ;;  %v14363_v55 = vld [vmem:[#allocation7 + $0x80] sm:$0xff]  }
 0x346   : > { %1867 = vmatmul.mubr.bf16.vlgmr.msra.gmra.mrb[8].mxu0 %v1640_v56 }
 0x347   : > { %2520 = vmatpush1.bf16.msra.mxu0 %v14371_v37 }
 0x348   : > { %2521 = vmatprep.subr.bf16.mxu0 %v14376_v39 }
 0x34b   : > { %2522 = vmatpush1.bf16.msra.mxu0 %v14374_v40 }
 0x34c   : > { %2523 = vmatprep.subr.bf16.mxu0 %v14379_v42  ;;  %v11913_v42 = vld [vmem:[#allocation9] ss:$0 sm:$0xff] }
 0x34f   : > { %2524 = vmatpush1.bf16.msra.mxu0 %v14377_v43 }
 0x350   : > { %2525 = vmatprep.subr.bf16.mxu0 %v14382_v44 }
 0x353   : > { %2526 = vmatpush1.bf16.msra.mxu0 %v14380_v45 }
 0x419   : > { %v1868_v57 = vpop.f32.mrb[8].mxu0 }
 0x41a   : > { %v1875_v58 = vmul.f32 %v1868_v57, %v1868_v57  ;;  %v1870_v59 = vpop.f32.mrb[9].mxu0  ;;  %v1881_v5 = vrot.slane %v1868_v57, %v16588_v4 }
 0x41b   : > { %v1872_v61 = vpop.f32.mrb[10].mxu0 }
 0x41c   : > { %v1876_v62 = vsub.f32 %v1870_v59, %v1875_v58  ;;  %v1873_v63 = vpop.f32.mrb[11].mxu0  ;;  %v1882_v7 = vsub.f32 %v1618_v33, %v1881_v5  ;;  %v1883_v8 = vsub.f32 %v1621_v35, %v1881_v5  ;;  %v14359_v33 = vld [vmem:[#allocation7 + $0x70] sm:$0xff]   ;;  %v14361_v35 = vld [vmem:[#allocation7 + $0x78] sm:$0xff]   ;;  %v14364_v59 = vld [vmem:[#allocation7 + $0x88] sm:$0xff]  }
 0x41d   : > { %v14368_v5 = vld [vmem:[#allocation7 + $0xa8] sm:$0xff]  }
 0x41e   : > { %v1877_v1 = vmax.f32 %v1876_v62, 0.0  ;;  %v14365_v62 = vld [vmem:[#allocation7 + $0x90] sm:$0xff]  }
 0x420   : > { %v1884_v2 = vadd.f32 1e-05, %v1877_v1 }
 0x422   : > { %15030 = vrsqrt.f32 %v1884_v2  ;;  %v14366_v2 = vld [vmem:[#allocation7 + $0x98] sm:$0xff]  }
 0x42c   : > { %v15031_v6 = vpop.eup %15030 }
 0x42d   : > { %v1889_v9 = vrot.slane %v15031_v6, %v16588_v4  ;;  %v14369_v6 = vld [vmem:[#allocation7 + $0xb0] sm:$0xff]  }
 0x42f   : > { %v1890_v10 = vmul.f32 %v1889_v9, %v1882_v7  ;;  %v1891_v11 = vmul.f32 %v1889_v9, %v1883_v8  ;;  %v14370_v7 = vld [vmem:[#allocation7 + $0xb8] sm:$0xff]   ;;  %v14385_v9 = vld [vmem:[#allocation28 + $0x44] ss:$8 sps:$4 sm:$0xff]  }
 0x430   : > { %2527 = vmatprep.subr.bf16.mxu0 %v14385_v9 }
 0x431   : > { %v1892_v12 = vmax.f32 %v1890_v10, 0.0  ;;  %v1893_v13 = vmax.f32 %v1891_v11, 0.0  ;;  %v14383_v10 = vld [vmem:[#allocation28 + $0x40] ss:$8 sps:$4 sm:$0xff]   ;;  %v14388_v11 = vld [vmem:[#allocation28 + $0x54] ss:$8 sps:$4 sm:$0xff]  }
 0x432   : > { %2528 = vmatpush1.bf16.msra.mxu0 %v14383_v10 }
 0x433   : > { %v1943_v14 = vpack.c.bf16 %v1893_v13, %v1892_v12  ;;  %v14386_v12 = vld [vmem:[#allocation28 + $0x50] ss:$8 sps:$4 sm:$0xff]   ;;  %2529 = vmatprep.subr.bf16.mxu0 %v14388_v11  ;;  %v14391_v13 = vld [vmem:[#allocation28 + $0x64] ss:$8 sps:$4 sm:$0xff]  }
 0x435   : > { %13502 = vmatpush3.bf16.msra.mxu1 %v1943_v14 }
 0x436   : > { %13507 = vmatprep.subr.bf16.mxu1 %v15880_v52  ;;  %2530 = vmatpush1.bf16.msra.mxu0 %v14386_v12 }
 0x437   : > { %2531 = vmatprep.subr.bf16.mxu0 %v14391_v13 }
 0x438   : > { %13504 = vmatmul.mubr.msk.bf16.vlgmr.msra.gmra.mrb[8].mxu1 %vm1945_vm4, %v1944_v15  ;;  %v14394_v15 = vld [vmem:[#allocation28 + $0x74] ss:$8 sps:$4 sm:$0xff]  }
 0x439   : > { %13508 = vmatpush3.bf16.msra.mxu1 %v1943_v14  ;;  %13509 = vmatprep.mubr.msk.bf16.mxu1 %vm15881_vm12, %v15880_v52 }
 0x43a   : > { %13513 = vmatprep.subr.bf16.mxu1 %v15880_v52 }
 0x440   : > { %13510 = vmatmul.mubr.msk.bf16.vlgmr.msra.gmra.mrb[12].mxu1 %vm1945_vm4, %v1991_v16  ;;  %v14392_v16 = vld [vmem:[#allocation28 + $0x70] ss:$8 sps:$4 sm:$0xff]  }
 0x441   : > { %13514 = vmatpush3.bf16.msra.mxu1 %v1943_v14  ;;  %13515 = vmatprep.mubr.msk.bf16.mxu1 %vm15881_vm12, %v15880_v52  ;;  %v14389_v14 = vld [vmem:[#allocation28 + $0x60] ss:$8 sps:$4 sm:$0xff]  }
 0x442   : > { %12706 = vmatprep.subr.bf16.mxu1 %v14347_v17  ;;  %2532 = vmatpush1.bf16.msra.mxu0 %v14389_v14  ;;  %v14397_v17 = vld [vmem:[#allocation28 + $0x84] ss:$8 sps:$4 sm:$0xff]  }
 0x443   : > { %2533 = vmatprep.subr.bf16.mxu0 %v14394_v15 }
 0x446   : > { %2534 = vmatpush1.bf16.msra.mxu0 %v14392_v16 }
 0x447   : > { %2535 = vmatprep.subr.bf16.mxu0 %v14397_v17 }
 0x448   : > { %13516 = vmatmul.mubr.msk.bf16.vlgmr.msra.gmra.mrb[16].mxu1 %vm1945_vm4, %v2037_v18  ;;  %v14395_v18 = vld [vmem:[#allocation28 + $0x80] ss:$8 sps:$4 sm:$0xff]   ;;  %vm9883_vm4 = vcmask 31744  }
 0x449   : > { %12707 = vmatpush3.bf16.msra.mxu1 %v14348_v20  ;;  %v14400_v20 = vld [vmem:[#allocation28 + $0x94] ss:$8 sps:$4 sm:$0xff]  }
 0x44a   : > { %12708 = vmatprep.subr.bf16.mxu1 %v14349_v21  ;;  %2536 = vmatpush1.bf16.msra.mxu0 %v14395_v18  ;;  %v14398_v21 = vld [vmem:[#allocation28 + $0x90] ss:$8 sps:$4 sm:$0xff]  }
 0x44b   : > { %2537 = vmatprep.subr.bf16.mxu0 %v14400_v20 }
 0x44d   : > { %12709 = vmatpush3.bf16.msra.mxu1 %v14350_v22  ;;  %v14403_v22 = vld [vmem:[#allocation28 + $0xa4] ss:$8 sps:$4 sm:$0xff]  }
 0x44e   : > { %12710 = vmatprep.subr.bf16.mxu1 %v14351_v24  ;;  %2538 = vmatpush1.bf16.msra.mxu0 %v14398_v21  ;;  %v14401_v24 = vld [vmem:[#allocation28 + $0xa0] ss:$8 sps:$4 sm:$0xff]  }
 0x44f   : > { %2539 = vmatprep.subr.bf16.mxu0 %v14403_v22 }
 0x451   : > { %12711 = vmatpush3.bf16.msra.mxu1 %v14352_v25  ;;  %v14406_v25 = vld [vmem:[#allocation28 + $0xb4] ss:$8 sps:$4 sm:$0xff]  }
 0x452   : > { %12712 = vmatprep.subr.bf16.mxu1 %v14353_v26  ;;  %2540 = vmatpush1.bf16.msra.mxu0 %v14401_v24  ;;  %v14404_v26 = vld [vmem:[#allocation28 + $0xb0] ss:$8 sps:$4 sm:$0xff]  }
 0x453   : > { %2541 = vmatprep.subr.bf16.mxu0 %v14406_v25  ;;  %v2626_v25 = vld [vmem:[#allocation10] sm:$0x3] }
 0x455   : > { %12713 = vmatpush3.bf16.msra.mxu1 %v14354_v27  ;;  %v14409_v27 = vld [vmem:[#allocation28 + $0xc4] ss:$8 sps:$4 sm:$0xff]  }
 0x456   : > { %12714 = vmatprep.subr.bf16.mxu1 %v14355_v28  ;;  %2542 = vmatpush1.bf16.msra.mxu0 %v14404_v26  ;;  %v14407_v28 = vld [vmem:[#allocation28 + $0xc0] ss:$8 sps:$4 sm:$0xff]  }
 0x457   : > { %2543 = vmatprep.subr.bf16.mxu0 %v14409_v27  ;;  %v2677_v26 = vld [vmem:[#allocation10 + $0x2] sm:$0x3]  ;;  %v14419_v27 = vld [vmem:[#allocation12 + $0x40] sm:$0xff]  }
 0x459   : > { %12715 = vmatpush3.bf16.msra.mxu1 %v14356_v29  ;;  %v14412_v29 = vld [vmem:[#allocation28 + $0xd4] ss:$8 sps:$4 sm:$0xff]  }
 0x45a   : > { %12716 = vmatprep.subr.bf16.mxu1 %v14357_v31  ;;  %2544 = vmatpush1.bf16.msra.mxu0 %v14407_v28  ;;  %v14410_v31 = vld [vmem:[#allocation28 + $0xd0] ss:$8 sps:$4 sm:$0xff]   ;;  %v2723_v28 = vld [vmem:[#allocation10 + $0x4] sm:$0x3] }
 0x45b   : > { %2545 = vmatprep.subr.bf16.mxu0 %v14412_v29  ;;  %v14420_v29 = vld [vmem:[#allocation12] sm:$0xff]  }
 0x45d   : > { %12717 = vmatpush3.bf16.msra.mxu1 %v14358_v32  ;;  %v14415_v32 = vld [vmem:[#allocation28 + $0xe4] ss:$8 sps:$4 sm:$0xff]  }
 0x45e   : > { %12718 = vmatprep.subr.bf16.mxu1 %v14359_v33  ;;  %2546 = vmatpush1.bf16.msra.mxu0 %v14410_v31  ;;  %v14413_v33 = vld [vmem:[#allocation28 + $0xe0] ss:$8 sps:$4 sm:$0xff]   ;;  %v14421_v31 = vld [vmem:[#allocation12 + $0x48] sm:$0xff]  }
 0x45f   : > { %2547 = vmatprep.subr.bf16.mxu0 %v14415_v32  ;;  %v14422_v32 = vld [vmem:[#allocation12 + $0x8] sm:$0xff]  }
 0x461   : > { %12719 = vmatpush3.bf16.msra.mxu1 %v14360_v34  ;;  %v14418_v34 = vld [vmem:[#allocation28 + $0xf4] ss:$8 sps:$4 sm:$0xff]  }
 0x462   : > { %12720 = vmatprep.subr.bf16.mxu1 %v14361_v35  ;;  %2548 = vmatpush1.bf16.msra.mxu0 %v14413_v33  ;;  %v14416_v35 = vld [vmem:[#allocation28 + $0xf0] ss:$8 sps:$4 sm:$0xff]  }
 0x463   : > { %2549 = vmatprep.subr.bf16.mxu0 %v14418_v34  ;;  %v14423_v33 = vld [vmem:[#allocation12 + $0x50] sm:$0xff]  }
 0x464   : > { %v14425_v34 = vld [vmem:[#allocation12 + $0x10] sm:$0xff]  }
 0x465   : > { %12721 = vmatpush3.bf16.msra.mxu1 %v14362_v36 }
 0x466   : > { %13519 = vmatprep.subr.bf16.mxu1 %v15880_v52  ;;  %2550 = vmatpush1.bf16.msra.mxu0 %v14416_v35  ;;  %v14426_v35 = vld [vmem:[#allocation12 + $0x58] sm:$0xff]  }
 0x467   : > { %13557 = vmatprep.subr.bf16.mxu0 %v15880_v52 }
 0x50b   : > { %v1983_v46 = vpop.f32.mrb[8].mxu1 }
 0x50c   : > { %v13505_v48 = vpop.f32.mrb[9].mxu1  ;;  %v1989_v56 = vpack.c.bf16 %v1983_v46, %v1983_v46 }
 0x50d   : > { %v1986_v49 = vpop.f32.mrb[10].mxu1 }
 0x50e   : > { %v13506_v50 = vpop.f32.mrb[11].mxu1 }
 0x513   : > { %v2029_v51 = vpop.f32.mrb[12].mxu1 }
 0x514   : > { %v2035_v53 = vpack.c.bf16 %v2029_v51, %v2029_v51  ;;  %v13511_v54 = vpop.f32.mrb[13].mxu1 }
 0x515   : > { %v2032_v57 = vpop.f32.mrb[14].mxu1 }
 0x516   : > { %v13512_v58 = vpop.f32.mrb[15].mxu1  ;;  %2264 = vmatprep.mubr.bf16.mxu1 %v2035_v53 }
 0x517   : > { %2265 = vmatmul.mubr.bf16.vlgmr.msra.gmra.mrb[20].mxu1 %v1989_v56 }
 0x518   : > { %13520 = vmatpush3.bf16.msra.mxu1 %v14363_v55  ;;  %13535 = vmatprep.mubr.msk.bf16.mxu1 %vm15881_vm12, %v15880_v52 }
 0x519   : > { %13521 = vmatprep.subr.bf16.mxu1 %v15880_v52 }
 0x51b   : > { %v2075_v61 = vpop.f32.mrb[16].mxu1 }
 0x51c   : > { %13522 = vmatpush3.bf16.msra.mxu1 %v14364_v59  ;;  %v13517_v63 = vpop.f32.mrb[17].mxu1  ;;  %v2081_v8 = vpack.c.bf16 %v2075_v61, %v2075_v61 }
 0x51d   : > { %13523 = vmatprep.subr.bf16.mxu1 %v15880_v52  ;;  %v2078_v0 = vpop.f32.mrb[18].mxu1 }
 0x51e   : > { %v13518_v1 = vpop.f32.mrb[19].mxu1 }
 0x520   : > { %13524 = vmatpush3.bf16.msra.mxu1 %v14365_v62 }
 0x521   : > { %13525 = vmatprep.subr.bf16.mxu1 %v15880_v52 }
 0x524   : > { %13526 = vmatpush3.bf16.msra.mxu1 %v14366_v2 }
 0x525   : > { %13527 = vmatprep.subr.bf16.mxu1 %v15880_v52 }
 0x528   : > { %13528 = vmatpush3.bf16.msra.mxu1 %v14367_v3  ;;  %v14424_v3 = vld [vmem:[#allocation12 + $0x80] sm:$0xff]  }
 0x529   : > { %13529 = vmatprep.subr.bf16.mxu1 %v15880_v52 }
 0x52c   : > { %13530 = vmatpush3.bf16.msra.mxu1 %v14368_v5  ;;  %v14427_v5 = vld [vmem:[#allocation12 + $0x88] sm:$0xff]  }
 0x52d   : > { %13531 = vmatprep.subr.bf16.mxu1 %v15880_v52 }
 0x530   : > { %13532 = vmatpush3.bf16.msra.mxu1 %v14369_v6  ;;  %v14430_v6 = vld [vmem:[#allocation12 + $0x90] sm:$0xff]  }
 0x531   : > { %13533 = vmatprep.subr.bf16.mxu1 %v15880_v52 }
 0x534   : > { %13534 = vmatpush3.bf16.msra.mxu1 %v14370_v7 }
 0x535   : > { %13539 = vmatprep.subr.bf16.mxu1 %v15880_v52 }
 0x537   : > { %13536 = vmatmul.mubr.bf16.vlgmr.msra.gmra.mrb[24].mxu1 %v2081_v8 }
 0x538   : > { %13541 = vmatprep.mubr.msk.bf16.mxu1 %vm15881_vm12, %v15880_v52 }
 0x5ea   : > { %v12722_v36 = vpop.f32.mrb[20].mxu1 }
 0x5eb   : > { %v12723_v37 = vpop.f32.mrb[21].mxu1 }
 0x5ec   : > { %v12724_v38 = vadd.f32 %v12723_v37, %v12722_v36  ;;  %v12725_v39 = vpop.f32.mrb[22].mxu1  ;;  %v14428_v36 = vld [vmem:[#allocation12 + $0x18] sm:$0xff]   ;;  %v14429_v37 = vld [vmem:[#allocation12 + $0x60] sm:$0xff]  }
 0x5ed   : > { %v12726_v40 = vpop.f32.mrb[23].mxu1  ;;  %v14432_v39 = vld [vmem:[#allocation12 + $0x68] sm:$0xff]  }
 0x5ee   : > { %v2267_v43 = vadd.f32 %v12724_v38, %v11913_v42  ;;  %v14431_v38 = vld [vmem:[#allocation12 + $0x20] sm:$0xff]   ;;  %v14433_v40 = vld [vmem:[#allocation12 + $0x98] sm:$0xff]   ;;  %v14434_v42 = vld [vmem:[#allocation12 + $0x28] sm:$0xff]  }
 0x60a   : > { %v2306_v44 = vpop.f32.mrb[24].mxu1 }
 0x60b   : > { %v2307_v45 = vadd.f32 %v2306_v44, %v2267_v43  ;;  %v13537_v46 = vpop.f32.mrb[25].mxu1  ;;  %v14435_v43 = vld [vmem:[#allocation12 + $0x70] sm:$0xff]   ;;  %v14436_v44 = vld [vmem:[#allocation12 + $0xa0] sm:$0xff]  }
 0x60c   : > { %v2309_v48 = vpop.f32.mrb[26].mxu1  ;;  %v14438_v46 = vld [vmem:[#allocation12 + $0x78] sm:$0xff]  }
 0x60d   : > { %v2312_v49 = vmul.f32 %v2307_v45, %v2307_v45  ;;  %v2313_v50 = vrot.slane %v2307_v45, 4  ;;  %v13538_v51 = vpop.f32.mrb[27].mxu1  ;;  %v14439_v48 = vld [vmem:[#allocation12 + $0xa8] sm:$0xff]  }
 0x60e   : > { %v14442_v51 = vld [vmem:[#allocation12 + $0xb8] sm:$0xff]  }
 0x60f   : > { %v2314_v53 = vadd.f32 %v2313_v50, %v2307_v45  ;;  %v2319_v54 = vrot.slane %v2312_v49, 4  ;;  %v14441_v50 = vld [vmem:[#allocation12 + $0xb0] sm:$0xff]  }
 0x611   : > { %v2315_v55 = vrot.slane %v2314_v53, 2  ;;  %v2320_v56 = vadd.f32 %v2319_v54, %v2312_v49  ;;  %v14440_v49 = vld [vmem:[#allocation12 + $0x38] sm:$0xff]  }
 0x613   : > { %v2321_v57 = vrot.slane %v2320_v56, 2  ;;  %v2316_v58 = vadd.f32 %v2315_v55, %v2314_v53  ;;  %v16633_v53 = vld [vmem:[#allocation30 + $0x4] ss:$8 sps:$4 sm:$0xff]  }
 0x615   : > { %v2322_v59 = vadd.f32 %v2321_v57, %v2320_v56  ;;  %v2317_v61 = vrot.slane %v2316_v58, 1 }
 0x617   : > { %v2323_v62 = vrot.slane %v2322_v59, 1  ;;  %v2318_v63 = vadd.f32 %v2317_v61, %v2316_v58 }
 0x619   : > { %v2324_v0 = vadd.f32 %v2323_v62, %v2322_v59  ;;  %v2325_v2 = vpack.c.bf16 %v2318_v63, %v2318_v63  ;;  %v16636_v62 = vld [vmem:[#allocation30] ss:$8 sps:$4 sm:$0xff]  }
 0x61b   : > { %v2326_v1 = vpack.c.bf16 %v2324_v0, %v2324_v0 }
 0x61d   : > { %2551 = vmatprep.mubr.bf16.mxu0 %v2326_v1  ;;  %v16638_v1 = vld [vmem:[#allocation30 + $0x14] ss:$8 sps:$4 sm:$0xff]  }
 0x61e   : > { %2552 = vmatmul.mubr.bf16.vlgmr.msra.gmra.mrb[12].mxu0 %v2325_v2 }
 0x61f   : > { %13573 = vmatprep.mubr.msk.bf16.mxu0 %vm15881_vm12, %v15880_v52  ;;  %13558 = vmatpush3.bf16.msra.mxu0 %v14424_v3  ;;  %v16641_v3 = vld [vmem:[#allocation30 + $0x10] ss:$8 sps:$4 sm:$0xff]  }
 0x620   : > { %13559 = vmatprep.subr.bf16.mxu0 %v15880_v52 }
 0x623   : > { %13560 = vmatpush3.bf16.msra.mxu0 %v14427_v5  ;;  %v16644_v5 = vld [vmem:[#allocation30 + $0x24] ss:$8 sps:$4 sm:$0xff]  }
 0x624   : > { %13561 = vmatprep.subr.bf16.mxu0 %v15880_v52 }
 0x627   : > { %13562 = vmatpush3.bf16.msra.mxu0 %v14430_v6 }
 0x628   : > { %13563 = vmatprep.subr.bf16.mxu0 %v15880_v52 }
 0x62b   : > { %13564 = vmatpush3.bf16.msra.mxu0 %v14433_v40  ;;  %v16725_v40 = vld [vmem:[#allocation30 + $0xf0] ss:$8 sps:$4 sm:$0xff]  }
 0x62c   : > { %13565 = vmatprep.subr.bf16.mxu0 %v15880_v52 }
 0x62f   : > { %13566 = vmatpush3.bf16.msra.mxu0 %v14436_v44 }
 0x630   : > { %13567 = vmatprep.subr.bf16.mxu0 %v15880_v52 }
 0x633   : > { %13568 = vmatpush3.bf16.msra.mxu0 %v14439_v48 }
 0x634   : > { %13569 = vmatprep.subr.bf16.mxu0 %v15880_v52 }
 0x637   : > { %13570 = vmatpush3.bf16.msra.mxu0 %v14441_v50  ;;  %v11973_v50 = vld [vmem:[#allocation13] ss:$0 sm:$0xff] }
 0x638   : > { %13571 = vmatprep.subr.bf16.mxu0 %v15880_v52 }
 0x63b   : > { %13572 = vmatpush3.bf16.msra.mxu0 %v14442_v51 }
 0x6f1   : > { %v2553_v7 = vpop.f32.mrb[12].mxu0 }
 0x6f2   : > { %v2560_v8 = vmul.f32 %v2553_v7, %v2553_v7  ;;  %v2555_v9 = vpop.f32.mrb[13].mxu0  ;;  %v2566_v15 = vrot.slane %v2553_v7, %v16588_v4 }
 0x6f3   : > { %v2557_v10 = vpop.f32.mrb[14].mxu0 }
 0x6f4   : > { %v2561_v11 = vsub.f32 %v2555_v9, %v2560_v8  ;;  %v2558_v12 = vpop.f32.mrb[15].mxu0  ;;  %v2567_v17 = vsub.f32 %v2307_v45, %v2566_v15  ;;  %v14437_v45 = vld [vmem:[#allocation12 + $0x30] sm:$0xff]   ;;  %v16647_v9 = vld [vmem:[#allocation30 + $0x20] ss:$8 sps:$4 sm:$0xff]  }
 0x6f5   : > { %v16659_v15 = vld [vmem:[#allocation30 + $0x40] ss:$8 sps:$4 sm:$0xff]  }
 0x6f6   : > { %v2562_v13 = vmax.f32 %v2561_v11, 0.0  ;;  %v16650_v11 = vld [vmem:[#allocation30 + $0x34] ss:$8 sps:$4 sm:$0xff]  }
 0x6f8   : > { %v2568_v14 = vadd.f32 1e-05, %v2562_v13  ;;  %v16653_v13 = vld [vmem:[#allocation30 + $0x30] ss:$8 sps:$4 sm:$0xff]  }
 0x6fa   : > { %15032 = vrsqrt.f32 %v2568_v14  ;;  %v16656_v14 = vld [vmem:[#allocation30 + $0x44] ss:$8 sps:$4 sm:$0xff]  }
 0x704   : > { %v15033_v16 = vpop.eup %15032 }
 0x705   : > { %v2573_v18 = vrot.slane %v15033_v16, %v16588_v4  ;;  %v16662_v16 = vld [vmem:[#allocation30 + $0x54] ss:$8 sps:$4 sm:$0xff]  }
 0x707   : > { %v2574_v20 = vmul.f32 %v2573_v18, %v2567_v17  ;;  %v16665_v17 = vld [vmem:[#allocation30 + $0x50] ss:$8 sps:$4 sm:$0xff]   ;;  %v16668_v18 = vld [vmem:[#allocation30 + $0x64] ss:$8 sps:$4 sm:$0xff]  }
 0x709   : > { %v2575_v21 = vmax.f32 %v2574_v20, 0.0  ;;  %v16671_v20 = vld [vmem:[#allocation30 + $0x60] ss:$8 sps:$4 sm:$0xff]  }
 0x70b   : > { %v2625_v22 = vpack.c.bf16 %v2575_v21, %v2575_v21  ;;  %v16674_v21 = vld [vmem:[#allocation30 + $0x74] ss:$8 sps:$4 sm:$0xff]  }
 0x70d   : > { %v2633_v24 = vsel %vm2631_vm5, %v2625_v22, 0  ;;  %v16677_v22 = vld [vmem:[#allocation30 + $0x70] ss:$8 sps:$4 sm:$0xff]  }
 0x70e   : > { %13540 = vmatpush3.bf16.msra.mxu1 %v2633_v24 }
 0x70f   : > { %13545 = vmatprep.subr.bf16.mxu1 %v15880_v52 }
 0x711   : > { %13542 = vmatmul.mubr.msk.bf16.vlgmr.msra.gmra.mrb[28].mxu1 %vm2627_vm6, %v2626_v25  ;;  %v16683_v25 = vld [vmem:[#allocation30 + $0x80] ss:$8 sps:$4 sm:$0xff]  }
 0x712   : > { %13546 = vmatpush3.bf16.msra.mxu1 %v2633_v24  ;;  %13547 = vmatprep.mubr.msk.bf16.mxu1 %vm15881_vm12, %v15880_v52 }
 0x713   : > { %13551 = vmatprep.subr.bf16.mxu1 %v15880_v52 }
 0x719   : > { %13548 = vmatmul.mubr.msk.bf16.vlgmr.msra.gmra.mrb[32].mxu1 %vm2627_vm6, %v2677_v26  ;;  %v16687_v26 = vld [vmem:[#allocation30 + $0x94] ss:$8 sps:$4 sm:$0xff]  }
 0x71a   : > { %13552 = vmatpush3.bf16.msra.mxu1 %v2633_v24  ;;  %13553 = vmatprep.mubr.msk.bf16.mxu1 %vm15881_vm12, %v15880_v52  ;;  %v16680_v24 = vld [vmem:[#allocation30 + $0x84] ss:$8 sps:$4 sm:$0xff]  }
 0x71b   : > { %12743 = vmatprep.subr.bf16.mxu1 %v14419_v27  ;;  %v16689_v27 = vld [vmem:[#allocation30 + $0x90] ss:$8 sps:$4 sm:$0xff]  }
 0x721   : > { %13554 = vmatmul.mubr.msk.bf16.vlgmr.msra.gmra.mrb[36].mxu1 %vm2627_vm6, %v2723_v28  ;;  %v16693_v28 = vld [vmem:[#allocation30 + $0xa4] ss:$8 sps:$4 sm:$0xff]  }
 0x722   : > { %12744 = vmatpush3.bf16.msra.mxu1 %v14420_v29  ;;  %v16695_v29 = vld [vmem:[#allocation30 + $0xa0] ss:$8 sps:$4 sm:$0xff]  }
 0x723   : > { %12745 = vmatprep.subr.bf16.mxu1 %v14421_v31  ;;  %v16699_v31 = vld [vmem:[#allocation30 + $0xb4] ss:$8 sps:$4 sm:$0xff]  }
 0x726   : > { %12746 = vmatpush3.bf16.msra.mxu1 %v14422_v32  ;;  %v16701_v32 = vld [vmem:[#allocation30 + $0xb0] ss:$8 sps:$4 sm:$0xff]  }
 0x727   : > { %12747 = vmatprep.subr.bf16.mxu1 %v14423_v33  ;;  %v16705_v33 = vld [vmem:[#allocation30 + $0xc4] ss:$8 sps:$4 sm:$0xff]  }
 0x72a   : > { %12748 = vmatpush3.bf16.msra.mxu1 %v14425_v34  ;;  %v16707_v34 = vld [vmem:[#allocation30 + $0xc0] ss:$8 sps:$4 sm:$0xff]  }
 0x72b   : > { %12749 = vmatprep.subr.bf16.mxu1 %v14426_v35  ;;  %v16711_v35 = vld [vmem:[#allocation30 + $0xd4] ss:$8 sps:$4 sm:$0xff]  }
 0x72e   : > { %12750 = vmatpush3.bf16.msra.mxu1 %v14428_v36  ;;  %v16713_v36 = vld [vmem:[#allocation30 + $0xd0] ss:$8 sps:$4 sm:$0xff]  }
 0x72f   : > { %12751 = vmatprep.subr.bf16.mxu1 %v14429_v37  ;;  %v16716_v37 = vld [vmem:[#allocation30 + $0xe4] ss:$8 sps:$4 sm:$0xff]  }
 0x732   : > { %12752 = vmatpush3.bf16.msra.mxu1 %v14431_v38  ;;  %v16719_v38 = vld [vmem:[#allocation30 + $0xe0] ss:$8 sps:$4 sm:$0xff]  }
 0x733   : > { %12753 = vmatprep.subr.bf16.mxu1 %v14432_v39  ;;  %v16722_v39 = vld [vmem:[#allocation30 + $0xf4] ss:$8 sps:$4 sm:$0xff]  }
 0x736   : > { %12754 = vmatpush3.bf16.msra.mxu1 %v14434_v42  ;;  %v14491_v42 = vld [vmem:[#allocation15 + $0x40] sm:$0xff]  }
 0x737   : > { %12755 = vmatprep.subr.bf16.mxu1 %v14435_v43  ;;  %v14492_v43 = vld [vmem:[#allocation15] sm:$0xff]   ;;  %12774 = vmatprep.subr.bf16.mxu0 %v14491_v42 }
 0x73a   : > { %12756 = vmatpush3.bf16.msra.mxu1 %v14437_v45 }
 0x73b   : > { %12757 = vmatprep.subr.bf16.mxu1 %v14438_v46 }
 0x73e   : > { %12758 = vmatpush3.bf16.msra.mxu1 %v14440_v49 }
 0x73f   : > { %3207 = vmatprep.subr.bf16.mxu1 %v16633_v53 }
 0x7e4   : > { %v2669_v54 = vpop.f32.mrb[28].mxu1 }
 0x7e5   : > { %v13543_v55 = vpop.f32.mrb[29].mxu1  ;;  %v2675_v63 = vpack.c.bf16 %v2669_v54, %v2669_v54 }
 0x7e6   : > { %v2672_v56 = vpop.f32.mrb[30].mxu1 }
 0x7e7   : > { %v13544_v57 = vpop.f32.mrb[31].mxu1 }
 0x7ec   : > { %v2715_v58 = vpop.f32.mrb[32].mxu1 }
 0x7ed   : > { %v2721_v59 = vpack.c.bf16 %v2715_v58, %v2715_v58  ;;  %v13549_v61 = vpop.f32.mrb[33].mxu1 }
 0x7ee   : > { %v2718_v0 = vpop.f32.mrb[34].mxu1 }
 0x7ef   : > { %v13550_v2 = vpop.f32.mrb[35].mxu1  ;;  %2950 = vmatprep.mubr.bf16.mxu1 %v2721_v59 }
 0x7f0   : > { %2951 = vmatmul.mubr.bf16.vlgmr.msra.gmra.mrb[40].mxu1 %v2675_v63 }
 0x7f1   : > { %3208 = vmatpush1.bf16.msra.mxu1 %v16636_v62 }
 0x7f2   : > { %3209 = vmatprep.subr.bf16.mxu1 %v16638_v1 }
 0x7f4   : > { %v2761_v6 = vpop.f32.mrb[36].mxu1 }
 0x7f5   : > { %v2767_v7 = vpack.c.bf16 %v2761_v6, %v2761_v6  ;;  %v13555_v8 = vpop.f32.mrb[37].mxu1  ;;  %3210 = vmatpush1.bf16.msra.mxu1 %v16641_v3 }
 0x7f6   : > { %v2764_v10 = vpop.f32.mrb[38].mxu1  ;;  %3211 = vmatprep.subr.bf16.mxu1 %v16644_v5 }
 0x7f7   : > { %v13556_v12 = vpop.f32.mrb[39].mxu1  ;;  %13574 = vmatmul.mubr.bf16.vlgmr.msra.gmra.mrb[16].mxu0 %v2767_v7 }
 0x7f8   : > { %12775 = vmatpush3.bf16.msra.mxu0 %v14492_v43 }
 0x7f9   : > { %3212 = vmatpush1.bf16.msra.mxu1 %v16647_v9 }
 0x7fa   : > { %3213 = vmatprep.subr.bf16.mxu1 %v16650_v11 }
 0x7fd   : > { %3214 = vmatpush1.bf16.msra.mxu1 %v16653_v13 }
 0x7fe   : > { %3215 = vmatprep.subr.bf16.mxu1 %v16656_v14 }
 0x801   : > { %3216 = vmatpush1.bf16.msra.mxu1 %v16659_v15 }
 0x802   : > { %3217 = vmatprep.subr.bf16.mxu1 %v16662_v16 }
 0x805   : > { %3218 = vmatpush1.bf16.msra.mxu1 %v16665_v17 }
 0x806   : > { %3219 = vmatprep.subr.bf16.mxu1 %v16668_v18 }
 0x809   : > { %3220 = vmatpush1.bf16.msra.mxu1 %v16671_v20 }
 0x80a   : > { %3221 = vmatprep.subr.bf16.mxu1 %v16674_v21 }
 0x80d   : > { %3222 = vmatpush1.bf16.msra.mxu1 %v16677_v22 }
 0x80e   : > { %3223 = vmatprep.subr.bf16.mxu1 %v16680_v24 }
 0x811   : > { %3224 = vmatpush1.bf16.msra.mxu1 %v16683_v25 }
 0x812   : > { %3225 = vmatprep.subr.bf16.mxu1 %v16687_v26 }
 0x815   : > { %3226 = vmatpush1.bf16.msra.mxu1 %v16689_v27 }
 0x816   : > { %3227 = vmatprep.subr.bf16.mxu1 %v16693_v28 }
 0x819   : > { %3228 = vmatpush1.bf16.msra.mxu1 %v16695_v29 }
 0x81a   : > { %3229 = vmatprep.subr.bf16.mxu1 %v16699_v31 }
 0x81d   : > { %3230 = vmatpush1.bf16.msra.mxu1 %v16701_v32 }
 0x81e   : > { %3231 = vmatprep.subr.bf16.mxu1 %v16705_v33 }
 0x821   : > { %3232 = vmatpush1.bf16.msra.mxu1 %v16707_v34 }
 0x822   : > { %3233 = vmatprep.subr.bf16.mxu1 %v16711_v35 }
 0x825   : > { %3234 = vmatpush1.bf16.msra.mxu1 %v16713_v36 }
 0x826   : > { %3235 = vmatprep.subr.bf16.mxu1 %v16716_v37 }
 0x829   : > { %3236 = vmatpush1.bf16.msra.mxu1 %v16719_v38 }
 0x82a   : > { %3237 = vmatprep.subr.bf16.mxu1 %v16722_v39 }
 0x82d   : > { %3238 = vmatpush1.bf16.msra.mxu1 %v16725_v40 }
 0x82e   : > { %3570 = vmatprep.subr.bf16.mxu1 %v16633_v53 }
 0x8c3   : > { %v12759_v44 = vpop.f32.mrb[40].mxu1 }
 0x8c4   : > { %v12760_v45 = vpop.f32.mrb[41].mxu1 }
 0x8c5   : > { %v12761_v46 = vadd.f32 %v12760_v45, %v12759_v44  ;;  %v12762_v48 = vpop.f32.mrb[42].mxu1 }
 0x8c6   : > { %v12763_v49 = vpop.f32.mrb[43].mxu1 }
 0x8c7   : > { %v2953_v51 = vadd.f32 %v12761_v46, %v11973_v50  ;;  %v14493_v50 = vld [vmem:[#allocation15 + $0x48] sm:$0xff]  }
 0x8c8   : > { %12776 = vmatprep.subr.bf16.mxu0 %v14493_v50 }
 0x8ca   : > { %v2992_v54 = vpop.f32.mrb[16].mxu0 }
 0x8cb   : > { %v16730_v55 = vadd.f32 %v2992_v54, %v2953_v51  ;;  %v13575_v56 = vpop.f32.mrb[17].mxu0  ;;  %v14494_v51 = vld [vmem:[#allocation15 + $0x8] sm:$0xff]   ;;  %v14495_v54 = vld [vmem:[#allocation15 + $0x50] sm:$0xff]  }
 0x8cc   : > { %v2995_v57 = vpop.f32.mrb[18].mxu0  ;;  %12777 = vmatpush3.bf16.msra.mxu0 %v14494_v51  ;;  %v14496_v56 = vld [vmem:[#allocation15 + $0x10] sm:$0xff]  }
 0x8cd   : > { %v2998_v58 = vmul.f32 %v16730_v55, %v16730_v55  ;;  %v2999_v59 = vsel %vm2631_vm5, %v16730_v55, 0.0  ;;  %v13576_v61 = vpop.f32.mrb[19].mxu0  ;;  %12778 = vmatprep.subr.bf16.mxu0 %v14495_v54  ;;  %v14497_v57 = vld [vmem:[#allocation15 + $0x58] sm:$0xff]  }
 0x8ce   : > { %v3000_v63 = vrot.slane %v2999_v59, 4  ;;  %v14500_v61 = vld [vmem:[#allocation15 + $0x20] sm:$0xff]  }
 0x8cf   : > { %v3006_v0 = vsel %vm2631_vm5, %v2998_v58, 0.0  ;;  %v14498_v58 = vld [vmem:[#allocation15 + $0x18] sm:$0xff]  }
 0x8d0   : > { %v3001_v2 = vadd.f32 %v3000_v63, %v2999_v59  ;;  %v3007_v6 = vrot.slane %v3006_v0, 4  ;;  %12779 = vmatpush3.bf16.msra.mxu0 %v14496_v56  ;;  %v14499_v59 = vld [vmem:[#allocation15 + $0x60] sm:$0xff]   ;;  %v14501_v63 = vld [vmem:[#allocation15 + $0x68] sm:$0xff]  }
 0x8d1   : > { %12780 = vmatprep.subr.bf16.mxu0 %v14497_v57 }
 0x8d2   : > { %v3002_v7 = vrot.slane %v3001_v2, 2  ;;  %v3008_v8 = vadd.f32 %v3007_v6, %v3006_v0  ;;  %v14502_v0 = vld [vmem:[#allocation15 + $0x28] sm:$0xff]   ;;  %v14504_v6 = vld [vmem:[#allocation15 + $0x30] sm:$0xff]  }
 0x8d4   : > { %v3003_v10 = vadd.f32 %v3002_v7, %v3001_v2  ;;  %v3009_v12 = vrot.slane %v3008_v8, 2  ;;  %12781 = vmatpush3.bf16.msra.mxu0 %v14498_v58  ;;  %v14503_v2 = vld [vmem:[#allocation15 + $0x70] sm:$0xff]   ;;  %v14505_v7 = vld [vmem:[#allocation15 + $0x78] sm:$0xff]  }
 0x8d5   : > { %12782 = vmatprep.subr.bf16.mxu0 %v14499_v59 }
 0x8d6   : > { %v3010_v42 = vadd.f32 %v3009_v12, %v3008_v8  ;;  %v3004_v43 = vrot.slane %v3003_v10, 1  ;;  %v14506_v8 = vld [vmem:[#allocation15 + $0x38] sm:$0xff]  }
 0x8d8   : > { %v3011_v44 = vrot.slane %v3010_v42, 1  ;;  %v3005_v45 = vadd.f32 %v3004_v43, %v3003_v10  ;;  %12783 = vmatpush3.bf16.msra.mxu0 %v14500_v61 }
 0x8d9   : > { %12784 = vmatprep.subr.bf16.mxu0 %v14501_v63 }
 0x8da   : > { %v3012_v46 = vadd.f32 %v3011_v44, %v3010_v42  ;;  %v3013_v49 = vpack.c.bf16 %v3005_v45, %v3005_v45 }
 0x8dc   : > { %v3014_v48 = vpack.c.bf16 %v3012_v46, %v3012_v46  ;;  %12785 = vmatpush3.bf16.msra.mxu0 %v14502_v0  ;;  %v14507_v0 = vld [vmem:[#allocation15 + $0x80] sm:$0xff]  }
 0x8dd   : > { %12786 = vmatprep.subr.bf16.mxu0 %v14503_v2 }
 0x8de   : > { %3239 = vmatprep.mubr.bf16.mxu1 %v3014_v48 }
 0x8df   : > { %3240 = vmatmul.mubr.bf16.vlgmr.msra.gmra.mrb[44].mxu1 %v3013_v49 }
 0x8e0   : > { %3571 = vmatpush1.bf16.msra.mxu1 %v16636_v62  ;;  %12787 = vmatpush3.bf16.msra.mxu0 %v14504_v6  ;;  %v14509_v6 = vld [vmem:[#allocation15 + $0x90] sm:$0xff]  }
 0x8e1   : > { %3572 = vmatprep.subr.bf16.mxu1 %v16638_v1  ;;  %12788 = vmatprep.subr.bf16.mxu0 %v14505_v7  ;;  %v14510_v7 = vld [vmem:[#allocation15 + $0x98] sm:$0xff]  }
 0x8e4   : > { %3573 = vmatpush1.bf16.msra.mxu1 %v16641_v3  ;;  %12789 = vmatpush3.bf16.msra.mxu0 %v14506_v8  ;;  %v14511_v8 = vld [vmem:[#allocation15 + $0xa0] sm:$0xff]  }
 0x8e5   : > { %3574 = vmatprep.subr.bf16.mxu1 %v16644_v5  ;;  %13577 = vmatprep.subr.bf16.mxu0 %v15880_v52 }
 0x8e8   : > { %3575 = vmatpush1.bf16.msra.mxu1 %v16647_v9 }
 0x8e9   : > { %3576 = vmatprep.subr.bf16.mxu1 %v16650_v11 }
 0x8ec   : > { %3577 = vmatpush1.bf16.msra.mxu1 %v16653_v13 }
 0x8ed   : > { %3578 = vmatprep.subr.bf16.mxu1 %v16656_v14 }
 0x8f0   : > { %3579 = vmatpush1.bf16.msra.mxu1 %v16659_v15 }
 0x8f1   : > { %3580 = vmatprep.subr.bf16.mxu1 %v16662_v16 }
 0x8f4   : > { %3581 = vmatpush1.bf16.msra.mxu1 %v16665_v17 }
 0x8f5   : > { %3582 = vmatprep.subr.bf16.mxu1 %v16668_v18 }
 0x8f8   : > { %3583 = vmatpush1.bf16.msra.mxu1 %v16671_v20 }
 0x8f9   : > { %3584 = vmatprep.subr.bf16.mxu1 %v16674_v21 }
 0x8fc   : > { %3585 = vmatpush1.bf16.msra.mxu1 %v16677_v22 }
 0x8fd   : > { %3586 = vmatprep.subr.bf16.mxu1 %v16680_v24 }
 0x900   : > { %3587 = vmatpush1.bf16.msra.mxu1 %v16683_v25 }
 0x901   : > { %3588 = vmatprep.subr.bf16.mxu1 %v16687_v26 }
 0x904   : > { %3589 = vmatpush1.bf16.msra.mxu1 %v16689_v27 }
 0x905   : > { %3590 = vmatprep.subr.bf16.mxu1 %v16693_v28 }
 0x908   : > { %3591 = vmatpush1.bf16.msra.mxu1 %v16695_v29 }
 0x909   : > { %3592 = vmatprep.subr.bf16.mxu1 %v16699_v31 }
 0x90c   : > { %3593 = vmatpush1.bf16.msra.mxu1 %v16701_v32 }
 0x90d   : > { %3594 = vmatprep.subr.bf16.mxu1 %v16705_v33 }
 0x910   : > { %3595 = vmatpush1.bf16.msra.mxu1 %v16707_v34 }
 0x911   : > { %3596 = vmatprep.subr.bf16.mxu1 %v16711_v35 }
 0x914   : > { %3597 = vmatpush1.bf16.msra.mxu1 %v16713_v36 }
 0x915   : > { %3598 = vmatprep.subr.bf16.mxu1 %v16716_v37 }
 0x918   : > { %3599 = vmatpush1.bf16.msra.mxu1 %v16719_v38 }
 0x919   : > { %3600 = vmatprep.subr.bf16.mxu1 %v16722_v39 }
 0x91c   : > { %3601 = vmatpush1.bf16.msra.mxu1 %v16725_v40 }
 0x91d   : > { %3935 = vmatprep.subr.bf16.mxu1 %v16633_v53 }
 0x9b2   : > { %v3241_v10 = vpop.f32.mrb[44].mxu1 }
 0x9b3   : > { %v3248_v12 = vmul.f32 %v3241_v10, %v3241_v10  ;;  %v3243_v42 = vpop.f32.mrb[45].mxu1  ;;  %v3254_v49 = vrot.slane %v3241_v10, %v16588_v4  ;;  %v14512_v10 = vld [vmem:[#allocation15 + $0xa8] sm:$0xff]  }
 0x9b4   : > { %v3245_v43 = vpop.f32.mrb[46].mxu1 }
 0x9b5   : > { %v3249_v44 = vsub.f32 %v3243_v42, %v3248_v12  ;;  %v3246_v45 = vpop.f32.mrb[47].mxu1  ;;  %v3255_v51 = vsub.f32 %v16730_v55, %v3254_v49  ;;  %v14508_v55 = vld [vmem:[#allocation15 + $0x88] sm:$0xff]   ;;  %v14513_v12 = vld [vmem:[#allocation15 + $0xb0] sm:$0xff]   ;;  %v14514_v42 = vld [vmem:[#allocation15 + $0xb8] sm:$0xff]  }
 0x9b6   : > { %v14515_v45 = vld [vmem:[#allocation15 + $0x100] sm:$0xff]  }
 0x9b7   : > { %v3250_v46 = vmax.f32 %v3249_v44, 0.0 }
 0x9b9   : > { %v3256_v48 = vadd.f32 1e-05, %v3250_v46  ;;  %v14516_v46 = vld [vmem:[#allocation15 + $0xc0] sm:$0xff]  }
 0x9bb   : > { %15034 = vrsqrt.f32 %v3256_v48 }
 0x9c5   : > { %v15035_v50 = vpop.eup %15034 }
 0x9c6   : > { %v3261_v54 = vrot.slane %v15035_v50, %v16588_v4 }
 0x9c8   : > { %v3262_v56 = vmul.f32 %v3261_v54, %v3255_v51 }
 0x9ca   : > { %v16773_v57 = vmax.f32 %v3262_v56, 0.0  ;;  %v12030_v56 = vld [vmem:[#allocation16] ss:$0 sm:$0xff] }
 0x9cc   : > { %v3321_v58 = vpack.c.bf16 %v16773_v57, %v16773_v57  ;;  %v3314_v59 = vrot.slane %v16773_v57, 1  ;;  %v3316_v61 = vrot.slane %v16773_v57, 7 }
 0x9ce   : > { %3505 = vmatprep.mubr.bf16.mxu0 %v3321_v58  ;;  %v3318_v63 = vsel %vm1083_vm3, %v3314_v59, %v3316_v61  ;;  %v3319_v43 = vsel %vm1069_vm2, %v3314_v59, %v3316_v61 }
 0x9cf   : > { %v3320_v2 = vpack.c.bf16 %v3318_v63, %v3318_v63  ;;  %v3322_v44 = vpack.c.bf16 %v3319_v43, %v3319_v43 }
 0x9d1   : > { %3506 = vmatmul.mubr.bf16.vlgmr.msra.gmra.mrb[20].mxu0 %v3320_v2 }
 0x9d2   : > { %13578 = vmatpush3.bf16.msra.mxu0 %v14507_v0  ;;  %13593 = vmatprep.mubr.msk.bf16.mxu0 %vm15881_vm12, %v15880_v52 }
 0x9d3   : > { %13579 = vmatprep.subr.bf16.mxu0 %v15880_v52 }
 0x9d6   : > { %13580 = vmatpush3.bf16.msra.mxu0 %v14508_v55 }
 0x9d7   : > { %13581 = vmatprep.subr.bf16.mxu0 %v15880_v52 }
 0x9da   : > { %13582 = vmatpush3.bf16.msra.mxu0 %v14509_v6 }
 0x9db   : > { %13583 = vmatprep.subr.bf16.mxu0 %v15880_v52 }
 0x9de   : > { %13584 = vmatpush3.bf16.msra.mxu0 %v14510_v7 }
 0x9df   : > { %13585 = vmatprep.subr.bf16.mxu0 %v15880_v52 }
 0x9e2   : > { %13586 = vmatpush3.bf16.msra.mxu0 %v14511_v8 }
 0x9e3   : > { %13587 = vmatprep.subr.bf16.mxu0 %v15880_v52 }
 0x9e6   : > { %13588 = vmatpush3.bf16.msra.mxu0 %v14512_v10 }
 0x9e7   : > { %13589 = vmatprep.subr.bf16.mxu0 %v15880_v52 }
 0x9ea   : > { %13590 = vmatpush3.bf16.msra.mxu0 %v14513_v12 }
 0x9eb   : > { %13591 = vmatprep.subr.bf16.mxu0 %v15880_v52 }
 0x9ee   : > { %13592 = vmatpush3.bf16.msra.mxu0 %v14514_v42 }
 0x9ef   : > { %12805 = vmatprep.subr.bf16.mxu0 %v14515_v45 }
 0x9f1   : > { %13594 = vmatmul.mubr.bf16.vlgmr.msra.gmra.mrb[24].mxu0 %v3322_v44 }
 0x9f2   : > { %12806 = vmatpush3.bf16.msra.mxu0 %v14516_v46 }
 0xaa4   : > { %v12790_v48 = vpop.f32.mrb[20].mxu0 }
 0xaa5   : > { %v12791_v49 = vpop.f32.mrb[21].mxu0 }
 0xaa6   : > { %v12792_v50 = vadd.f32 %v12791_v49, %v12790_v48  ;;  %v12793_v51 = vpop.f32.mrb[22].mxu0 }
 0xaa7   : > { %v12794_v54 = vpop.f32.mrb[23].mxu0 }
 0xaa8   : > { %v3508_v58 = vadd.f32 %v12792_v50, %v12030_v56 }
 0xac4   : > { %v3547_v63 = vpop.f32.mrb[24].mxu0 }
 0xac5   : > { %v16790_v0 = vadd.f32 %v3547_v63, %v3508_v58  ;;  %v13595_v2 = vpop.f32.mrb[25].mxu0  ;;  %v14517_v58 = vld [vmem:[#allocation15 + $0x108] sm:$0xff]  }
 0xac6   : > { %v3550_v55 = vpop.f32.mrb[26].mxu0  ;;  %v14518_v63 = vld [vmem:[#allocation15 + $0xc8] sm:$0xff]   ;;  %12807 = vmatprep.subr.bf16.mxu0 %v14517_v58  ;;  %v14519_v2 = vld [vmem:[#allocation15 + $0x110] sm:$0xff]  }
 0xac7   : > { %v3553_v59 = vmul.f32 %v16790_v0, %v16790_v0  ;;  %v3554_v61 = vsel %vm2631_vm5, %v16790_v0, 0.0  ;;  %v13596_v6 = vpop.f32.mrb[27].mxu0  ;;  %12808 = vmatpush3.bf16.msra.mxu0 %v14518_v63  ;;  %v14520_v55 = vld [vmem:[#allocation15 + $0xd0] sm:$0xff]  }
 0xac8   : > { %v3555_v7 = vrot.slane %v3554_v61, 4  ;;  %12809 = vmatprep.subr.bf16.mxu0 %v14519_v2  ;;  %v14523_v6 = vld [vmem:[#allocation15 + $0x120] sm:$0xff]  }
 0xac9   : > { %v3561_v8 = vsel %vm2631_vm5, %v3553_v59, 0.0  ;;  %v14521_v59 = vld [vmem:[#allocation15 + $0x118] sm:$0xff]  }
 0xaca   : > { %v3556_v10 = vadd.f32 %v3555_v7, %v3554_v61  ;;  %v3562_v12 = vrot.slane %v3561_v8, 4  ;;  %v14522_v61 = vld [vmem:[#allocation15 + $0xd8] sm:$0xff]   ;;  %v14524_v7 = vld [vmem:[#allocation15 + $0xe0] sm:$0xff]  }
 0xacb   : > { %12810 = vmatpush3.bf16.msra.mxu0 %v14520_v55 }
 0xacc   : > { %v3557_v42 = vrot.slane %v3556_v10, 2  ;;  %v3563_v43 = vadd.f32 %v3562_v12, %v3561_v8  ;;  %12811 = vmatprep.subr.bf16.mxu0 %v14521_v59  ;;  %v14525_v8 = vld [vmem:[#allocation15 + $0x128] sm:$0xff]   ;;  %v14527_v12 = vld [vmem:[#allocation15 + $0x130] sm:$0xff]  }
 0xace   : > { %v3558_v44 = vadd.f32 %v3557_v42, %v3556_v10  ;;  %v3564_v45 = vrot.slane %v3563_v43, 2  ;;  %v14526_v10 = vld [vmem:[#allocation15 + $0xe8] sm:$0xff]   ;;  %v14528_v42 = vld [vmem:[#allocation15 + $0xf0] sm:$0xff]  }
 0xacf   : > { %12812 = vmatpush3.bf16.msra.mxu0 %v14522_v61 }
 0xad0   : > { %v3565_v46 = vadd.f32 %v3564_v45, %v3563_v43  ;;  %v3559_v48 = vrot.slane %v3558_v44, 1  ;;  %12813 = vmatprep.subr.bf16.mxu0 %v14523_v6  ;;  %v14529_v43 = vld [vmem:[#allocation15 + $0x138] sm:$0xff]  }
 0xad2   : > { %v3566_v49 = vrot.slane %v3565_v46, 1  ;;  %v3560_v50 = vadd.f32 %v3559_v48, %v3558_v44  ;;  %v14530_v44 = vld [vmem:[#allocation15 + $0xf8] sm:$0xff]  }
 0xad3   : > { %12814 = vmatpush3.bf16.msra.mxu0 %v14524_v7 }
 0xad4   : > { %v3567_v51 = vadd.f32 %v3566_v49, %v3565_v46  ;;  %v3568_v56 = vpack.c.bf16 %v3560_v50, %v3560_v50  ;;  %12815 = vmatprep.subr.bf16.mxu0 %v14525_v8 }
 0xad6   : > { %v3569_v54 = vpack.c.bf16 %v3567_v51, %v3567_v51 }
 0xad7   : > { %12816 = vmatpush3.bf16.msra.mxu0 %v14526_v10 }
 0xad8   : > { %3602 = vmatprep.mubr.bf16.mxu1 %v3569_v54  ;;  %12817 = vmatprep.subr.bf16.mxu0 %v14527_v12  ;;  %v14531_v12 = vld [vmem:[#allocation15 + $0x140] sm:$0xff]  }
 0xad9   : > { %3603 = vmatmul.mubr.bf16.vlgmr.msra.gmra.mrb[48].mxu1 %v3568_v56 }
 0xada   : > { %3936 = vmatpush1.bf16.msra.mxu1 %v16636_v62 }
 0xadb   : > { %3937 = vmatprep.subr.bf16.mxu1 %v16638_v1  ;;  %12818 = vmatpush3.bf16.msra.mxu0 %v14528_v42 }
 0xadc   : > { %12819 = vmatprep.subr.bf16.mxu0 %v14529_v43  ;;  %v14532_v43 = vld [vmem:[#allocation15 + $0x148] sm:$0xff]  }
 0xade   : > { %3938 = vmatpush1.bf16.msra.mxu1 %v16641_v3 }
 0xadf   : > { %3939 = vmatprep.subr.bf16.mxu1 %v16644_v5  ;;  %12820 = vmatpush3.bf16.msra.mxu0 %v14530_v44  ;;  %v14534_v44 = vld [vmem:[#allocation15 + $0x158] sm:$0xff]  }
 0xae0   : > { %13597 = vmatprep.subr.bf16.mxu0 %v15880_v52 }
 0xae2   : > { %3940 = vmatpush1.bf16.msra.mxu1 %v16647_v9 }
 0xae3   : > { %3941 = vmatprep.subr.bf16.mxu1 %v16650_v11 }
 0xae6   : > { %3942 = vmatpush1.bf16.msra.mxu1 %v16653_v13 }
 0xae7   : > { %3943 = vmatprep.subr.bf16.mxu1 %v16656_v14 }
 0xaea   : > { %3944 = vmatpush1.bf16.msra.mxu1 %v16659_v15 }
 0xaeb   : > { %3945 = vmatprep.subr.bf16.mxu1 %v16662_v16 }
 0xaee   : > { %3946 = vmatpush1.bf16.msra.mxu1 %v16665_v17 }
 0xaef   : > { %3947 = vmatprep.subr.bf16.mxu1 %v16668_v18 }
 0xaf2   : > { %3948 = vmatpush1.bf16.msra.mxu1 %v16671_v20 }
 0xaf3   : > { %3949 = vmatprep.subr.bf16.mxu1 %v16674_v21 }
 0xaf6   : > { %3950 = vmatpush1.bf16.msra.mxu1 %v16677_v22 }
 0xaf7   : > { %3951 = vmatprep.subr.bf16.mxu1 %v16680_v24 }
 0xafa   : > { %3952 = vmatpush1.bf16.msra.mxu1 %v16683_v25 }
 0xafb   : > { %3953 = vmatprep.subr.bf16.mxu1 %v16687_v26 }
 0xafe   : > { %3954 = vmatpush1.bf16.msra.mxu1 %v16689_v27 }
 0xaff   : > { %3955 = vmatprep.subr.bf16.mxu1 %v16693_v28 }
 0xb02   : > { %3956 = vmatpush1.bf16.msra.mxu1 %v16695_v29 }
 0xb03   : > { %3957 = vmatprep.subr.bf16.mxu1 %v16699_v31 }
 0xb06   : > { %3958 = vmatpush1.bf16.msra.mxu1 %v16701_v32 }
 0xb07   : > { %3959 = vmatprep.subr.bf16.mxu1 %v16705_v33 }
 0xb0a   : > { %3960 = vmatpush1.bf16.msra.mxu1 %v16707_v34 }
 0xb0b   : > { %3961 = vmatprep.subr.bf16.mxu1 %v16711_v35 }
 0xb0e   : > { %3962 = vmatpush1.bf16.msra.mxu1 %v16713_v36 }
 0xb0f   : > { %3963 = vmatprep.subr.bf16.mxu1 %v16716_v37 }
 0xb12   : > { %3964 = vmatpush1.bf16.msra.mxu1 %v16719_v38 }
 0xb13   : > { %3965 = vmatprep.subr.bf16.mxu1 %v16722_v39 }
 0xb16   : > { %3966 = vmatpush1.bf16.msra.mxu1 %v16725_v40 }
 0xb17   : > { %4300 = vmatprep.subr.bf16.mxu1 %v16633_v53 }
 0xbac   : > { %v3604_v45 = vpop.f32.mrb[48].mxu1 }
 0xbad   : > { %v3611_v46 = vmul.f32 %v3604_v45, %v3604_v45  ;;  %v3606_v48 = vpop.f32.mrb[49].mxu1  ;;  %v3617_v58 = vrot.slane %v3604_v45, %v16588_v4  ;;  %v14535_v45 = vld [vmem:[#allocation15 + $0x160] sm:$0xff]  }
 0xbae   : > { %v3608_v49 = vpop.f32.mrb[50].mxu1 }
 0xbaf   : > { %v3612_v50 = vsub.f32 %v3606_v48, %v3611_v46  ;;  %v3609_v51 = vpop.f32.mrb[51].mxu1  ;;  %v3618_v2 = vsub.f32 %v16790_v0, %v3617_v58  ;;  %v14533_v0 = vld [vmem:[#allocation15 + $0x150] sm:$0xff]   ;;  %v14536_v46 = vld [vmem:[#allocation15 + $0x168] sm:$0xff]   ;;  %v14538_v49 = vld [vmem:[#allocation15 + $0x178] sm:$0xff]  }
 0xbb0   : > { %v14537_v48 = vld [vmem:[#allocation15 + $0x170] sm:$0xff]  }
 0xbb1   : > { %v3613_v54 = vmax.f32 %v3612_v50, 0.0 }
 0xbb3   : > { %v3619_v56 = vadd.f32 1e-05, %v3613_v54  ;;  %v14539_v54 = vld [vmem:[#allocation15 + $0x1c0] sm:$0xff]  }
 0xbb5   : > { %15036 = vrsqrt.f32 %v3619_v56  ;;  %v14540_v56 = vld [vmem:[#allocation15 + $0x180] sm:$0xff]  }
 0xbbf   : > { %v15037_v63 = vpop.eup %15036 }
 0xbc0   : > { %v3624_v55 = vrot.slane %v15037_v63, %v16588_v4 }
 0xbc2   : > { %v3625_v59 = vmul.f32 %v3624_v55, %v3618_v2 }
 0xbc4   : > { %v3626_v61 = vmax.f32 %v3625_v59, 0.0 }
 0xbc6   : > { %v3686_v6 = vpack.c.bf16 %v3626_v61, %v3626_v61  ;;  %v3679_v7 = vrot.slane %v3626_v61, 1  ;;  %v3681_v8 = vrot.slane %v3626_v61, 7  ;;  %v12055_v61 = vld [vmem:[#allocation16 + $0x1] ss:$0 sm:$0xff] }
 0xbc8   : > { %3870 = vmatprep.mubr.bf16.mxu0 %v3686_v6  ;;  %v3683_v10 = vsel %vm1083_vm3, %v3679_v7, %v3681_v8  ;;  %v3684_v50 = vsel %vm1069_vm2, %v3679_v7, %v3681_v8 }
 0xbc9   : > { %v3685_v42 = vpack.c.bf16 %v3683_v10, %v3683_v10  ;;  %v3687_v51 = vpack.c.bf16 %v3684_v50, %v3684_v50 }
 0xbcb   : > { %3871 = vmatmul.mubr.bf16.vlgmr.msra.gmra.mrb[28].mxu0 %v3685_v42 }
 0xbcc   : > { %13598 = vmatpush3.bf16.msra.mxu0 %v14531_v12  ;;  %13613 = vmatprep.mubr.msk.bf16.mxu0 %vm15881_vm12, %v15880_v52 }
 0xbcd   : > { %13599 = vmatprep.subr.bf16.mxu0 %v15880_v52 }
 0xbd0   : > { %13600 = vmatpush3.bf16.msra.mxu0 %v14532_v43 }
 0xbd1   : > { %13601 = vmatprep.subr.bf16.mxu0 %v15880_v52 }
 0xbd4   : > { %13602 = vmatpush3.bf16.msra.mxu0 %v14533_v0 }
 0xbd5   : > { %13603 = vmatprep.subr.bf16.mxu0 %v15880_v52 }
 0xbd8   : > { %13604 = vmatpush3.bf16.msra.mxu0 %v14534_v44 }
 0xbd9   : > { %13605 = vmatprep.subr.bf16.mxu0 %v15880_v52 }
 0xbdc   : > { %13606 = vmatpush3.bf16.msra.mxu0 %v14535_v45 }
 0xbdd   : > { %13607 = vmatprep.subr.bf16.mxu0 %v15880_v52 }
 0xbe0   : > { %13608 = vmatpush3.bf16.msra.mxu0 %v14536_v46 }
 0xbe1   : > { %13609 = vmatprep.subr.bf16.mxu0 %v15880_v52 }
 0xbe4   : > { %13610 = vmatpush3.bf16.msra.mxu0 %v14537_v48 }
 0xbe5   : > { %13611 = vmatprep.subr.bf16.mxu0 %v15880_v52 }
 0xbe8   : > { %13612 = vmatpush3.bf16.msra.mxu0 %v14538_v49 }
 0xbe9   : > { %12836 = vmatprep.subr.bf16.mxu0 %v14539_v54 }
 0xbeb   : > { %13614 = vmatmul.mubr.bf16.vlgmr.msra.gmra.mrb[32].mxu0 %v3687_v51 }
 0xbec   : > { %12837 = vmatpush3.bf16.msra.mxu0 %v14540_v56 }
 0xc9e   : > { %v12821_v58 = vpop.f32.mrb[28].mxu0 }
 0xc9f   : > { %v12822_v63 = vpop.f32.mrb[29].mxu0 }
 0xca0   : > { %v12823_v2 = vadd.f32 %v12822_v63, %v12821_v58  ;;  %v12824_v55 = vpop.f32.mrb[30].mxu0 }
 0xca1   : > { %v12825_v59 = vpop.f32.mrb[31].mxu0 }
 0xca2   : > { %v3873_v6 = vadd.f32 %v12823_v2, %v12055_v61 }
 0xcbe   : > { %v3912_v10 = vpop.f32.mrb[32].mxu0 }
 0xcbf   : > { %v16844_v12 = vadd.f32 %v3912_v10, %v3873_v6  ;;  %v13615_v42 = vpop.f32.mrb[33].mxu0 }
 0xcc0   : > { %v3915_v43 = vpop.f32.mrb[34].mxu0 }
 0xcc1   : > { %v3918_v7 = vmul.f32 %v16844_v12, %v16844_v12  ;;  %v3919_v8 = vsel %vm2631_vm5, %v16844_v12, 0.0  ;;  %v13616_v0 = vpop.f32.mrb[35].mxu0 }
 0xcc2   : > { %v3920_v44 = vrot.slane %v3919_v8, 4 }
 0xcc3   : > { %v3926_v45 = vsel %vm2631_vm5, %v3918_v7, 0.0 }
 0xcc4   : > { %v3921_v46 = vadd.f32 %v3920_v44, %v3919_v8  ;;  %v3927_v48 = vrot.slane %v3926_v45, 4 }
 0xcc6   : > { %v3922_v49 = vrot.slane %v3921_v46, 2  ;;  %v3928_v50 = vadd.f32 %v3927_v48, %v3926_v45  ;;  %v14555_v45 = vld [vmem:[#allocation15 + $0x200] sm:$0xff]   ;;  %v14558_v48 = vld [vmem:[#allocation15 + $0x218] sm:$0xff]  }
 0xcc8   : > { %v3923_v51 = vadd.f32 %v3922_v49, %v3921_v46  ;;  %v3929_v54 = vrot.slane %v3928_v50, 2  ;;  %v14559_v49 = vld [vmem:[#allocation15 + $0x220] sm:$0xff]  }
 0xcca   : > { %v3930_v56 = vadd.f32 %v3929_v54, %v3928_v50  ;;  %v3924_v58 = vrot.slane %v3923_v51, 1  ;;  %v14560_v50 = vld [vmem:[#allocation15 + $0x228] sm:$0xff]   ;;  %v14562_v54 = vld [vmem:[#allocation15 + $0x238] sm:$0xff]  }
 0xccc   : > { %v3931_v63 = vrot.slane %v3930_v56, 1  ;;  %v3925_v2 = vadd.f32 %v3924_v58, %v3923_v51  ;;  %v14561_v51 = vld [vmem:[#allocation15 + $0x230] sm:$0xff]  }
 0xcce   : > { %v3932_v55 = vadd.f32 %v3931_v63, %v3930_v56  ;;  %v3933_v61 = vpack.c.bf16 %v3925_v2, %v3925_v2  ;;  %v14563_v63 = vld [vmem:[#allocation15 + $0x280] sm:$0xff]  }
 0xccf   : > { %v14564_v2 = vld [vmem:[#allocation15 + $0x240] sm:$0xff]  }
 0xcd0   : > { %v3934_v59 = vpack.c.bf16 %v3932_v55, %v3932_v55 }
 0xcd2   : > { %3967 = vmatprep.mubr.bf16.mxu1 %v3934_v59 }
 0xcd3   : > { %3968 = vmatmul.mubr.bf16.vlgmr.msra.gmra.mrb[52].mxu1 %v3933_v61 }
 0xcd4   : > { %4301 = vmatpush1.bf16.msra.mxu1 %v16636_v62  ;;  %v14541_v62 = vld [vmem:[#allocation15 + $0x1c8] sm:$0xff]  }
 0xcd5   : > { %4302 = vmatprep.subr.bf16.mxu1 %v16638_v1  ;;  %v14542_v1 = vld [vmem:[#allocation15 + $0x188] sm:$0xff]   ;;  %12838 = vmatprep.subr.bf16.mxu0 %v14541_v62 }
 0xcd6   : > { %12839 = vmatpush3.bf16.msra.mxu0 %v14542_v1 }
 0xcd8   : > { %4303 = vmatpush1.bf16.msra.mxu1 %v16641_v3  ;;  %v14543_v3 = vld [vmem:[#allocation15 + $0x1d0] sm:$0xff]  }
 0xcd9   : > { %4304 = vmatprep.subr.bf16.mxu1 %v16644_v5  ;;  %v14544_v5 = vld [vmem:[#allocation15 + $0x190] sm:$0xff]   ;;  %12840 = vmatprep.subr.bf16.mxu0 %v14543_v3  ;;  %v12080_v3 = vld [vmem:[#allocation16 + $0x2] ss:$0 sm:$0xff] }
 0xcda   : > { %12841 = vmatpush3.bf16.msra.mxu0 %v14544_v5 }
 0xcdc   : > { %4305 = vmatpush1.bf16.msra.mxu1 %v16647_v9  ;;  %v14545_v9 = vld [vmem:[#allocation15 + $0x1d8] sm:$0xff]  }
 0xcdd   : > { %4306 = vmatprep.subr.bf16.mxu1 %v16650_v11  ;;  %v14546_v11 = vld [vmem:[#allocation15 + $0x198] sm:$0xff]   ;;  %12842 = vmatprep.subr.bf16.mxu0 %v14545_v9 }
 0xcde   : > { %12843 = vmatpush3.bf16.msra.mxu0 %v14546_v11 }
 0xce0   : > { %4307 = vmatpush1.bf16.msra.mxu1 %v16653_v13  ;;  %v14547_v13 = vld [vmem:[#allocation15 + $0x1e0] sm:$0xff]  }
 0xce1   : > { %4308 = vmatprep.subr.bf16.mxu1 %v16656_v14  ;;  %v14548_v14 = vld [vmem:[#allocation15 + $0x1a0] sm:$0xff]   ;;  %12844 = vmatprep.subr.bf16.mxu0 %v14547_v13 }
 0xce2   : > { %12845 = vmatpush3.bf16.msra.mxu0 %v14548_v14 }
 0xce4   : > { %4309 = vmatpush1.bf16.msra.mxu1 %v16659_v15  ;;  %v14549_v15 = vld [vmem:[#allocation15 + $0x1e8] sm:$0xff]  }
 0xce5   : > { %4310 = vmatprep.subr.bf16.mxu1 %v16662_v16  ;;  %v14550_v16 = vld [vmem:[#allocation15 + $0x1a8] sm:$0xff]   ;;  %12846 = vmatprep.subr.bf16.mxu0 %v14549_v15 }
 0xce6   : > { %12847 = vmatpush3.bf16.msra.mxu0 %v14550_v16 }
 0xce8   : > { %4311 = vmatpush1.bf16.msra.mxu1 %v16665_v17  ;;  %v14552_v17 = vld [vmem:[#allocation15 + $0x1b0] sm:$0xff]  }
 0xce9   : > { %4312 = vmatprep.subr.bf16.mxu1 %v16668_v18  ;;  %v14553_v18 = vld [vmem:[#allocation15 + $0x1f8] sm:$0xff]  }
 0xcec   : > { %4313 = vmatpush1.bf16.msra.mxu1 %v16671_v20  ;;  %v14554_v20 = vld [vmem:[#allocation15 + $0x1b8] sm:$0xff]  }
 0xced   : > { %4314 = vmatprep.subr.bf16.mxu1 %v16674_v21 }
 0xcf0   : > { %4315 = vmatpush1.bf16.msra.mxu1 %v16677_v22 }
 0xcf1   : > { %4316 = vmatprep.subr.bf16.mxu1 %v16680_v24 }
 0xcf4   : > { %4317 = vmatpush1.bf16.msra.mxu1 %v16683_v25 }
 0xcf5   : > { %4318 = vmatprep.subr.bf16.mxu1 %v16687_v26 }
 0xcf8   : > { %4319 = vmatpush1.bf16.msra.mxu1 %v16689_v27 }
 0xcf9   : > { %4320 = vmatprep.subr.bf16.mxu1 %v16693_v28 }
 0xcfc   : > { %4321 = vmatpush1.bf16.msra.mxu1 %v16695_v29 }
 0xcfd   : > { %4322 = vmatprep.subr.bf16.mxu1 %v16699_v31 }
 0xd00   : > { %4323 = vmatpush1.bf16.msra.mxu1 %v16701_v32 }
 0xd01   : > { %4324 = vmatprep.subr.bf16.mxu1 %v16705_v33 }
 0xd04   : > { %4325 = vmatpush1.bf16.msra.mxu1 %v16707_v34 }
 0xd05   : > { %4326 = vmatprep.subr.bf16.mxu1 %v16711_v35 }
 0xd08   : > { %4327 = vmatpush1.bf16.msra.mxu1 %v16713_v36 }
 0xd09   : > { %4328 = vmatprep.subr.bf16.mxu1 %v16716_v37 }
 0xd0c   : > { %4329 = vmatpush1.bf16.msra.mxu1 %v16719_v38 }
 0xd0d   : > { %4330 = vmatprep.subr.bf16.mxu1 %v16722_v39 }
 0xd10   : > { %4331 = vmatpush1.bf16.msra.mxu1 %v16725_v40 }
 0xd11   : > { %4665 = vmatprep.subr.bf16.mxu1 %v16633_v53  ;;  %v14551_v53 = vld [vmem:[#allocation15 + $0x1f0] sm:$0xff]  }
 0xd12   : > { %12848 = vmatprep.subr.bf16.mxu0 %v14551_v53 }
 0xd13   : > { %12849 = vmatpush3.bf16.msra.mxu0 %v14552_v17 }
 0xd14   : > { %12850 = vmatprep.subr.bf16.mxu0 %v14553_v18 }
 0xd17   : > { %12851 = vmatpush3.bf16.msra.mxu0 %v14554_v20 }
 0xd18   : > { %13617 = vmatprep.subr.bf16.mxu0 %v15880_v52 }
 0xda6   : > { %v3969_v21 = vpop.f32.mrb[52].mxu1 }
 0xda7   : > { %v3976_v22 = vmul.f32 %v3969_v21, %v3969_v21  ;;  %v3971_v24 = vpop.f32.mrb[53].mxu1  ;;  %v3982_v31 = vrot.slane %v3969_v21, %v16588_v4 }
 0xda8   : > { %v3973_v25 = vpop.f32.mrb[54].mxu1 }
 0xda9   : > { %v3977_v26 = vsub.f32 %v3971_v24, %v3976_v22  ;;  %v3974_v27 = vpop.f32.mrb[55].mxu1  ;;  %v3983_v6 = vsub.f32 %v16844_v12, %v3982_v31  ;;  %v14556_v12 = vld [vmem:[#allocation15 + $0x208] sm:$0xff]  }
 0xdab   : > { %v3978_v28 = vmax.f32 %v3977_v26, 0.0 }
 0xdad   : > { %v3984_v29 = vadd.f32 1e-05, %v3978_v28 }
 0xdaf   : > { %15038 = vrsqrt.f32 %v3984_v29 }
 0xdb9   : > { %v15039_v32 = vpop.eup %15038 }
 0xdba   : > { %v3989_v10 = vrot.slane %v15039_v32, %v16588_v4 }
 0xdbc   : > { %v3990_v42 = vmul.f32 %v3989_v10, %v3983_v6 }
 0xdbe   : > { %v16888_v43 = vadd.f32 %v3990_v42, %v16773_v57  ;;  %v14557_v57 = vld [vmem:[#allocation15 + $0x210] sm:$0xff]   ;;  %v16912_v42 = vld [vmem:[#allocation30] ss:$8 sps:$4 sm:$0xff]  }
 0xdc0   : > { %v4051_v7 = vpack.c.bf16 %v16888_v43, %v16888_v43  ;;  %v4044_v8 = vrot.slane %v16888_v43, 1  ;;  %v4046_v0 = vrot.slane %v16888_v43, 7 }
 0xdc2   : > { %4235 = vmatprep.mubr.bf16.mxu0 %v4051_v7  ;;  %v4048_v44 = vsel %vm1083_vm3, %v4044_v8, %v4046_v0  ;;  %v4049_v56 = vsel %vm1069_vm2, %v4044_v8, %v4046_v0  ;;  %v16915_v7 = vld [vmem:[#allocation30 + $0x14] ss:$8 sps:$4 sm:$0xff]   ;;  %v16918_v8 = vld [vmem:[#allocation30 + $0x10] ss:$8 sps:$4 sm:$0xff]   ;;  %v16921_v0 = vld [vmem:[#allocation30 + $0x24] ss:$8 sps:$4 sm:$0xff]  }
 0xdc3   : > { %v4050_v46 = vpack.c.bf16 %v4048_v44, %v4048_v44  ;;  %v4052_v58 = vpack.c.bf16 %v4049_v56, %v4049_v56  ;;  %v16924_v44 = vld [vmem:[#allocation30 + $0x20] ss:$8 sps:$4 sm:$0xff]   ;;  %v16954_v56 = vld [vmem:[#allocation30 + $0x70] ss:$8 sps:$4 sm:$0xff]  }
 0xdc5   : > { %4236 = vmatmul.mubr.bf16.vlgmr.msra.gmra.mrb[36].mxu0 %v4050_v46  ;;  %v16930_v46 = vld [vmem:[#allocation30 + $0x30] ss:$8 sps:$4 sm:$0xff]  }
 0xdc6   : > { %13618 = vmatpush3.bf16.msra.mxu0 %v14555_v45  ;;  %13633 = vmatprep.mubr.msk.bf16.mxu0 %vm15881_vm12, %v15880_v52  ;;  %v16927_v45 = vld [vmem:[#allocation30 + $0x34] ss:$8 sps:$4 sm:$0xff]  }
 0xdc7   : > { %13619 = vmatprep.subr.bf16.mxu0 %v15880_v52 }
 0xdca   : > { %13620 = vmatpush3.bf16.msra.mxu0 %v14556_v12  ;;  %v16933_v12 = vld [vmem:[#allocation30 + $0x44] ss:$8 sps:$4 sm:$0xff]  }
 0xdcb   : > { %13621 = vmatprep.subr.bf16.mxu0 %v15880_v52 }
 0xdce   : > { %13622 = vmatpush3.bf16.msra.mxu0 %v14557_v57  ;;  %v16936_v57 = vld [vmem:[#allocation30 + $0x40] ss:$8 sps:$4 sm:$0xff]  }
 0xdcf   : > { %13623 = vmatprep.subr.bf16.mxu0 %v15880_v52 }
 0xdd2   : > { %13624 = vmatpush3.bf16.msra.mxu0 %v14558_v48  ;;  %v16939_v48 = vld [vmem:[#allocation30 + $0x54] ss:$8 sps:$4 sm:$0xff]  }
 0xdd3   : > { %13625 = vmatprep.subr.bf16.mxu0 %v15880_v52 }
 0xdd6   : > { %13626 = vmatpush3.bf16.msra.mxu0 %v14559_v49  ;;  %v16942_v49 = vld [vmem:[#allocation30 + $0x50] ss:$8 sps:$4 sm:$0xff]  }
 0xdd7   : > { %13627 = vmatprep.subr.bf16.mxu0 %v15880_v52 }
 0xdda   : > { %13628 = vmatpush3.bf16.msra.mxu0 %v14560_v50  ;;  %v16945_v50 = vld [vmem:[#allocation30 + $0x64] ss:$8 sps:$4 sm:$0xff]  }
 0xddb   : > { %13629 = vmatprep.subr.bf16.mxu0 %v15880_v52 }
 0xdde   : > { %13630 = vmatpush3.bf16.msra.mxu0 %v14561_v51  ;;  %v16948_v51 = vld [vmem:[#allocation30 + $0x60] ss:$8 sps:$4 sm:$0xff]  }
 0xddf   : > { %13631 = vmatprep.subr.bf16.mxu0 %v15880_v52 }
 0xde2   : > { %13632 = vmatpush3.bf16.msra.mxu0 %v14562_v54  ;;  %v16951_v54 = vld [vmem:[#allocation30 + $0x74] ss:$8 sps:$4 sm:$0xff]  }
 0xde3   : > { %12867 = vmatprep.subr.bf16.mxu0 %v14563_v63  ;;  %v16960_v63 = vld [vmem:[#allocation30 + $0x80] ss:$8 sps:$4 sm:$0xff]  }
 0xde5   : > { %13634 = vmatmul.mubr.bf16.vlgmr.msra.gmra.mrb[40].mxu0 %v4052_v58  ;;  %v16957_v58 = vld [vmem:[#allocation30 + $0x84] ss:$8 sps:$4 sm:$0xff]  }
 0xde6   : > { %12868 = vmatpush3.bf16.msra.mxu0 %v14564_v2  ;;  %v16963_v2 = vld [vmem:[#allocation30 + $0x94] ss:$8 sps:$4 sm:$0xff]  }
 0xe98   : > { %v12852_v55 = vpop.f32.mrb[36].mxu0 }
 0xe99   : > { %v12853_v59 = vpop.f32.mrb[37].mxu0 }
 0xe9a   : > { %v12854_v61 = vadd.f32 %v12853_v59, %v12852_v55  ;;  %v12855_v62 = vpop.f32.mrb[38].mxu0  ;;  %v16966_v55 = vld [vmem:[#allocation30 + $0x90] ss:$8 sps:$4 sm:$0xff]   ;;  %v16969_v59 = vld [vmem:[#allocation30 + $0xa4] ss:$8 sps:$4 sm:$0xff]  }
 0xe9b   : > { %v12856_v1 = vpop.f32.mrb[39].mxu0  ;;  %v16975_v62 = vld [vmem:[#allocation30 + $0xb4] ss:$8 sps:$4 sm:$0xff]  }
 0xe9c   : > { %v4238_v5 = vadd.f32 %v12854_v61, %v12080_v3  ;;  %v16972_v61 = vld [vmem:[#allocation30 + $0xa0] ss:$8 sps:$4 sm:$0xff]   ;;  %v16978_v1 = vld [vmem:[#allocation30 + $0xb0] ss:$8 sps:$4 sm:$0xff]   ;;  %v16989_v3 = vld [vmem:[#allocation30 + $0x4] ss:$8 sps:$4 sm:$0xff]  }
 0xeb8   : > { %v4277_v9 = vpop.f32.mrb[40].mxu0 }
 0xeb9   : > { %v16905_v11 = vadd.f32 %v4277_v9, %v4238_v5  ;;  %v13635_v13 = vpop.f32.mrb[41].mxu0  ;;  %v14565_v5 = vld [vmem:[#allocation15 + $0x288] sm:$0xff]   ;;  %v14571_v9 = vld [vmem:[#allocation15 + $0x2a0] sm:$0xff]  }
 0xeba   : > { %v4280_v14 = vpop.f32.mrb[42].mxu0  ;;  %12869 = vmatprep.subr.bf16.mxu0 %v14565_v5  ;;  %v14575_v13 = vld [vmem:[#allocation15 + $0x2b0] sm:$0xff]  }
 0xebb   : > { %v4283_v15 = vmul.f32 %v16905_v11, %v16905_v11  ;;  %v4284_v16 = vsel %vm2631_vm5, %v16905_v11, 0.0  ;;  %v13636_v53 = vpop.f32.mrb[43].mxu0  ;;  %v14576_v14 = vld [vmem:[#allocation15 + $0x270] sm:$0xff]  }
 0xebc   : > { %v4285_v17 = vrot.slane %v4284_v16, 4 }
 0xebd   : > { %v4291_v18 = vsel %vm2631_vm5, %v4283_v15, 0.0  ;;  %v14577_v15 = vld [vmem:[#allocation15 + $0x2b8] sm:$0xff]  }
 0xebe   : > { %v4286_v20 = vadd.f32 %v4285_v17, %v4284_v16  ;;  %v4292_v21 = vrot.slane %v4291_v18, 4  ;;  %v14578_v16 = vld [vmem:[#allocation15 + $0x278] sm:$0xff]  }
 0xec0   : > { %v4287_v22 = vrot.slane %v4286_v20, 2  ;;  %v4293_v24 = vadd.f32 %v4292_v21, %v4291_v18 }
 0xec2   : > { %v4288_v25 = vadd.f32 %v4287_v22, %v4286_v20  ;;  %v4294_v26 = vrot.slane %v4293_v24, 2 }
 0xec4   : > { %v4295_v27 = vadd.f32 %v4294_v26, %v4293_v24  ;;  %v4289_v28 = vrot.slane %v4288_v25, 1 }
 0xec6   : > { %v4296_v29 = vrot.slane %v4295_v27, 1  ;;  %v4290_v31 = vadd.f32 %v4289_v28, %v4288_v25 }
 0xec8   : > { %v4297_v32 = vadd.f32 %v4296_v29, %v4295_v27  ;;  %v4298_v10 = vpack.c.bf16 %v4290_v31, %v4290_v31 }
 0xeca   : > { %v4299_v6 = vpack.c.bf16 %v4297_v32, %v4297_v32 }
 0xecc   : > { %4332 = vmatprep.mubr.bf16.mxu1 %v4299_v6 }
 0xecd   : > { %4333 = vmatmul.mubr.bf16.vlgmr.msra.gmra.mrb[56].mxu1 %v4298_v10 }
 0xece   : > { %4666 = vmatpush1.bf16.msra.mxu1 %v16912_v42 }
 0xecf   : > { %4667 = vmatprep.subr.bf16.mxu1 %v16915_v7 }
 0xed2   : > { %4668 = vmatpush1.bf16.msra.mxu1 %v16918_v8 }
 0xed3   : > { %4669 = vmatprep.subr.bf16.mxu1 %v16921_v0 }
 0xed6   : > { %4670 = vmatpush1.bf16.msra.mxu1 %v16924_v44 }
 0xed7   : > { %4671 = vmatprep.subr.bf16.mxu1 %v16927_v45 }
 0xeda   : > { %4672 = vmatpush1.bf16.msra.mxu1 %v16930_v46 }
 0xedb   : > { %4673 = vmatprep.subr.bf16.mxu1 %v16933_v12 }
 0xede   : > { %4674 = vmatpush1.bf16.msra.mxu1 %v16936_v57 }
 0xedf   : > { %4675 = vmatprep.subr.bf16.mxu1 %v16939_v48 }
 0xee2   : > { %4676 = vmatpush1.bf16.msra.mxu1 %v16942_v49 }
 0xee3   : > { %4677 = vmatprep.subr.bf16.mxu1 %v16945_v50 }
 0xee6   : > { %4678 = vmatpush1.bf16.msra.mxu1 %v16948_v51 }
 0xee7   : > { %4679 = vmatprep.subr.bf16.mxu1 %v16951_v54 }
 0xeea   : > { %4680 = vmatpush1.bf16.msra.mxu1 %v16954_v56 }
 0xeeb   : > { %4681 = vmatprep.subr.bf16.mxu1 %v16957_v58 }
 0xeee   : > { %4682 = vmatpush1.bf16.msra.mxu1 %v16960_v63 }
 0xeef   : > { %4683 = vmatprep.subr.bf16.mxu1 %v16963_v2 }
 0xef2   : > { %4684 = vmatpush1.bf16.msra.mxu1 %v16966_v55 }
 0xef3   : > { %4685 = vmatprep.subr.bf16.mxu1 %v16969_v59 }
 0xef6   : > { %4686 = vmatpush1.bf16.msra.mxu1 %v16972_v61 }
 0xef7   : > { %4687 = vmatprep.subr.bf16.mxu1 %v16975_v62 }
 0xefa   : > { %4688 = vmatpush1.bf16.msra.mxu1 %v16978_v1 }
 0xefb   : > { %4689 = vmatprep.subr.bf16.mxu1 %v16705_v33  ;;  %v14566_v33 = vld [vmem:[#allocation15 + $0x248] sm:$0xff]  }
 0xefc   : > { %12870 = vmatpush3.bf16.msra.mxu0 %v14566_v33 }
 0xefe   : > { %4690 = vmatpush1.bf16.msra.mxu1 %v16707_v34  ;;  %v14567_v34 = vld [vmem:[#allocation15 + $0x290] sm:$0xff]  }
 0xeff   : > { %4691 = vmatprep.subr.bf16.mxu1 %v16711_v35  ;;  %v14568_v35 = vld [vmem:[#allocation15 + $0x250] sm:$0xff]   ;;  %12871 = vmatprep.subr.bf16.mxu0 %v14567_v34  ;;  %v14579_v34 = vld [vmem:[#allocation15 + $0x2c0] sm:$0xff]  }
 0xf00   : > { %12872 = vmatpush3.bf16.msra.mxu0 %v14568_v35 }
 0xf02   : > { %4692 = vmatpush1.bf16.msra.mxu1 %v16713_v36  ;;  %v14569_v36 = vld [vmem:[#allocation15 + $0x298] sm:$0xff]  }
 0xf03   : > { %4693 = vmatprep.subr.bf16.mxu1 %v16716_v37  ;;  %v14570_v37 = vld [vmem:[#allocation15 + $0x258] sm:$0xff]   ;;  %12873 = vmatprep.subr.bf16.mxu0 %v14569_v36  ;;  %v14580_v36 = vld [vmem:[#allocation15 + $0x2c8] sm:$0xff]  }
 0xf04   : > { %12874 = vmatpush3.bf16.msra.mxu0 %v14570_v37  ;;  %v14582_v37 = vld [vmem:[#allocation15 + $0x2d8] sm:$0xff]  }
 0xf05   : > { %12875 = vmatprep.subr.bf16.mxu0 %v14571_v9  ;;  %v14583_v9 = vld [vmem:[#allocation15 + $0x2e0] sm:$0xff]  }
 0xf06   : > { %4694 = vmatpush1.bf16.msra.mxu1 %v16719_v38  ;;  %v14572_v38 = vld [vmem:[#allocation15 + $0x260] sm:$0xff]  }
 0xf07   : > { %4695 = vmatprep.subr.bf16.mxu1 %v16722_v39  ;;  %v14573_v39 = vld [vmem:[#allocation15 + $0x2a8] sm:$0xff]  }
 0xf08   : > { %12876 = vmatpush3.bf16.msra.mxu0 %v14572_v38  ;;  %v14584_v38 = vld [vmem:[#allocation15 + $0x2e8] sm:$0xff]  }
 0xf09   : > { %12877 = vmatprep.subr.bf16.mxu0 %v14573_v39  ;;  %v14585_v39 = vld [vmem:[#allocation15 + $0x2f0] sm:$0xff]  }
 0xf0a   : > { %4696 = vmatpush1.bf16.msra.mxu1 %v16725_v40  ;;  %v14574_v40 = vld [vmem:[#allocation15 + $0x268] sm:$0xff]  }
 0xf0b   : > { %5030 = vmatprep.subr.bf16.mxu1 %v16989_v3 }
 0xf0c   : > { %12878 = vmatpush3.bf16.msra.mxu0 %v14574_v40  ;;  %v14586_v40 = vld [vmem:[#allocation15 + $0x2f8] sm:$0xff]  }
 0xf0d   : > { %12879 = vmatprep.subr.bf16.mxu0 %v14575_v13 }
 0xf10   : > { %12880 = vmatpush3.bf16.msra.mxu0 %v14576_v14 }
 0xf11   : > { %12881 = vmatprep.subr.bf16.mxu0 %v14577_v15  ;;  %v14587_v15 = vld [vmem:[#allocation15 + $0x340] sm:$0xff]  }
 0xf14   : > { %12882 = vmatpush3.bf16.msra.mxu0 %v14578_v16  ;;  %v14588_v16 = vld [vmem:[#allocation15 + $0x300] sm:$0xff]  }
 0xf15   : > { %13637 = vmatprep.subr.bf16.mxu0 %v15880_v52 }
 0xfa0   : > { %v4334_v53 = vpop.f32.mrb[56].mxu1 }
 0xfa1   : > { %v4341_v17 = vmul.f32 %v4334_v53, %v4334_v53  ;;  %v4336_v18 = vpop.f32.mrb[57].mxu1  ;;  %v4347_v26 = vrot.slane %v4334_v53, %v16588_v4 }
 0xfa2   : > { %v4338_v20 = vpop.f32.mrb[58].mxu1 }
 0xfa3   : > { %v4342_v21 = vsub.f32 %v4336_v18, %v4341_v17  ;;  %v4339_v22 = vpop.f32.mrb[59].mxu1  ;;  %v4348_v28 = vsub.f32 %v16905_v11, %v4347_v26  ;;  %v14581_v11 = vld [vmem:[#allocation15 + $0x2d0] sm:$0xff]  }
 0xfa4   : > { %v12105_v22 = vld [vmem:[#allocation16 + $0x3] ss:$0 sm:$0xff] }
 0xfa5   : > { %v4343_v24 = vmax.f32 %v4342_v21, 0.0 }
 0xfa7   : > { %v4349_v25 = vadd.f32 1e-05, %v4343_v24 }
 0xfa9   : > { %15040 = vrsqrt.f32 %v4349_v25 }
 0xfb3   : > { %v15041_v27 = vpop.eup %15040 }
 0xfb4   : > { %v4354_v29 = vrot.slane %v15041_v27, %v16588_v4 }
 0xfb6   : > { %v4355_v31 = vmul.f32 %v4354_v29, %v4348_v28 }
 0xfb8   : > { %v4356_v32 = vmax.f32 %v4355_v31, 0.0 }
 0xfba   : > { %v4416_v6 = vpack.c.bf16 %v4356_v32, %v4356_v32  ;;  %v4409_v10 = vrot.slane %v4356_v32, 1  ;;  %v4411_v5 = vrot.slane %v4356_v32, 7 }
 0xfbc   : > { %4600 = vmatprep.mubr.bf16.mxu0 %v4416_v6  ;;  %v4413_v33 = vsel %vm1083_vm3, %v4409_v10, %v4411_v5  ;;  %v4414_v13 = vsel %vm1069_vm2, %v4409_v10, %v4411_v5 }
 0xfbd   : > { %v4415_v35 = vpack.c.bf16 %v4413_v33, %v4413_v33  ;;  %v4417_v14 = vpack.c.bf16 %v4414_v13, %v4414_v13 }
 0xfbf   : > { %4601 = vmatmul.mubr.bf16.vlgmr.msra.gmra.mrb[44].mxu0 %v4415_v35 }
 0xfc0   : > { %13638 = vmatpush3.bf16.msra.mxu0 %v14579_v34  ;;  %13653 = vmatprep.mubr.msk.bf16.mxu0 %vm15881_vm12, %v15880_v52 }
 0xfc1   : > { %13639 = vmatprep.subr.bf16.mxu0 %v15880_v52 }
 0xfc4   : > { %13640 = vmatpush3.bf16.msra.mxu0 %v14580_v36 }
 0xfc5   : > { %13641 = vmatprep.subr.bf16.mxu0 %v15880_v52 }
 0xfc8   : > { %13642 = vmatpush3.bf16.msra.mxu0 %v14581_v11 }
 0xfc9   : > { %13643 = vmatprep.subr.bf16.mxu0 %v15880_v52 }
 0xfcc   : > { %13644 = vmatpush3.bf16.msra.mxu0 %v14582_v37 }
 0xfcd   : > { %13645 = vmatprep.subr.bf16.mxu0 %v15880_v52 }
 0xfd0   : > { %13646 = vmatpush3.bf16.msra.mxu0 %v14583_v9 }
 0xfd1   : > { %13647 = vmatprep.subr.bf16.mxu0 %v15880_v52 }
 0xfd4   : > { %13648 = vmatpush3.bf16.msra.mxu0 %v14584_v38 }
 0xfd5   : > { %13649 = vmatprep.subr.bf16.mxu0 %v15880_v52 }
 0xfd8   : > { %13650 = vmatpush3.bf16.msra.mxu0 %v14585_v39 }
 0xfd9   : > { %13651 = vmatprep.subr.bf16.mxu0 %v15880_v52 }
 0xfdc   : > { %13652 = vmatpush3.bf16.msra.mxu0 %v14586_v40 }
 0xfdd   : > { %12898 = vmatprep.subr.bf16.mxu0 %v14587_v15  ;;  %v17037_v15 = vld [vmem:[#allocation30 + $0xc4] ss:$8 sps:$4 sm:$0xff]  }
 0xfdf   : > { %13654 = vmatmul.mubr.bf16.vlgmr.msra.gmra.mrb[48].mxu0 %v4417_v14 }
 0xfe0   : > { %12899 = vmatpush3.bf16.msra.mxu0 %v14588_v16  ;;  %v17040_v16 = vld [vmem:[#allocation30 + $0xc0] ss:$8 sps:$4 sm:$0xff]  }
0x1092   : > { %v12883_v53 = vpop.f32.mrb[44].mxu0 }
0x1093   : > { %v12884_v17 = vpop.f32.mrb[45].mxu0 }
0x1094   : > { %v12885_v18 = vadd.f32 %v12884_v17, %v12883_v53  ;;  %v12886_v20 = vpop.f32.mrb[46].mxu0  ;;  %v17043_v53 = vld [vmem:[#allocation30 + $0xd4] ss:$8 sps:$4 sm:$0xff]   ;;  %v17046_v17 = vld [vmem:[#allocation30 + $0xd0] ss:$8 sps:$4 sm:$0xff]  }
0x1095   : > { %v12887_v21 = vpop.f32.mrb[47].mxu0  ;;  %v17052_v20 = vld [vmem:[#allocation30 + $0xe0] ss:$8 sps:$4 sm:$0xff]  }
0x1096   : > { %v4603_v24 = vadd.f32 %v12885_v18, %v12105_v22  ;;  %v17049_v18 = vld [vmem:[#allocation30 + $0xe4] ss:$8 sps:$4 sm:$0xff]   ;;  %v17055_v21 = vld [vmem:[#allocation30 + $0xf4] ss:$8 sps:$4 sm:$0xff]   ;;  %v17058_v22 = vld [vmem:[#allocation30 + $0xf0] ss:$8 sps:$4 sm:$0xff]  }
0x10b2   : > { %v4642_v25 = vpop.f32.mrb[48].mxu0 }
0x10b3   : > { %v17007_v26 = vadd.f32 %v4642_v25, %v4603_v24  ;;  %v13655_v27 = vpop.f32.mrb[49].mxu0  ;;  %v14589_v24 = vld [vmem:[#allocation15 + $0x348] sm:$0xff]  }
0x10b4   : > { %v4645_v28 = vpop.f32.mrb[50].mxu0  ;;  %v14590_v25 = vld [vmem:[#allocation15 + $0x308] sm:$0xff]   ;;  %12900 = vmatprep.subr.bf16.mxu0 %v14589_v24  ;;  %v14591_v27 = vld [vmem:[#allocation15 + $0x350] sm:$0xff]  }
0x10b5   : > { %v4648_v29 = vmul.f32 %v17007_v26, %v17007_v26  ;;  %v4649_v31 = vsel %vm2631_vm5, %v17007_v26, 0.0  ;;  %v13656_v32 = vpop.f32.mrb[51].mxu0  ;;  %12901 = vmatpush3.bf16.msra.mxu0 %v14590_v25  ;;  %v14592_v28 = vld [vmem:[#allocation15 + $0x310] sm:$0xff]  }
0x10b6   : > { %v4650_v6 = vrot.slane %v4649_v31, 4  ;;  %12902 = vmatprep.subr.bf16.mxu0 %v14591_v27  ;;  %v14595_v32 = vld [vmem:[#allocation15 + $0x360] sm:$0xff]  }
0x10b7   : > { %v4656_v10 = vsel %vm2631_vm5, %v4648_v29, 0.0  ;;  %v14593_v29 = vld [vmem:[#allocation15 + $0x358] sm:$0xff]  }
0x10b8   : > { %v4651_v5 = vadd.f32 %v4650_v6, %v4649_v31  ;;  %v4657_v33 = vrot.slane %v4656_v10, 4  ;;  %v14594_v31 = vld [vmem:[#allocation15 + $0x318] sm:$0xff]   ;;  %v14596_v6 = vld [vmem:[#allocation15 + $0x320] sm:$0xff]  }
0x10b9   : > { %12903 = vmatpush3.bf16.msra.mxu0 %v14592_v28 }
0x10ba   : > { %v4652_v34 = vrot.slane %v4651_v5, 2  ;;  %v4658_v35 = vadd.f32 %v4657_v33, %v4656_v10  ;;  %12904 = vmatprep.subr.bf16.mxu0 %v14593_v29  ;;  %v14597_v10 = vld [vmem:[#allocation15 + $0x368] sm:$0xff]   ;;  %v14599_v33 = vld [vmem:[#allocation15 + $0x370] sm:$0xff]  }
0x10bc   : > { %v4653_v36 = vadd.f32 %v4652_v34, %v4651_v5  ;;  %v4659_v11 = vrot.slane %v4658_v35, 2  ;;  %v14598_v5 = vld [vmem:[#allocation15 + $0x328] sm:$0xff]   ;;  %v14600_v34 = vld [vmem:[#allocation15 + $0x330] sm:$0xff]  }
0x10bd   : > { %12905 = vmatpush3.bf16.msra.mxu0 %v14594_v31 }
0x10be   : > { %v4660_v37 = vadd.f32 %v4659_v11, %v4658_v35  ;;  %v4654_v9 = vrot.slane %v4653_v36, 1  ;;  %12906 = vmatprep.subr.bf16.mxu0 %v14595_v32  ;;  %v14601_v35 = vld [vmem:[#allocation15 + $0x378] sm:$0xff]  }
0x10c0   : > { %v4661_v38 = vrot.slane %v4660_v37, 1  ;;  %v4655_v39 = vadd.f32 %v4654_v9, %v4653_v36  ;;  %v14602_v36 = vld [vmem:[#allocation15 + $0x338] sm:$0xff]  }
0x10c1   : > { %12907 = vmatpush3.bf16.msra.mxu0 %v14596_v6 }
0x10c2   : > { %v4662_v40 = vadd.f32 %v4661_v38, %v4660_v37  ;;  %v4663_v14 = vpack.c.bf16 %v4655_v39, %v4655_v39  ;;  %12908 = vmatprep.subr.bf16.mxu0 %v14597_v10 }
0x10c4   : > { %v4664_v13 = vpack.c.bf16 %v4662_v40, %v4662_v40 }
0x10c5   : > { %12909 = vmatpush3.bf16.msra.mxu0 %v14598_v5 }
0x10c6   : > { %4697 = vmatprep.mubr.bf16.mxu1 %v4664_v13  ;;  %12910 = vmatprep.subr.bf16.mxu0 %v14599_v33  ;;  %v14603_v33 = vld [vmem:[#allocation15 + $0x380] sm:$0xff]  }
0x10c7   : > { %4698 = vmatmul.mubr.bf16.vlgmr.msra.gmra.mrb[60].mxu1 %v4663_v14 }
0x10c8   : > { %5031 = vmatpush1.bf16.msra.mxu1 %v16912_v42 }
0x10c9   : > { %5032 = vmatprep.subr.bf16.mxu1 %v16915_v7  ;;  %12911 = vmatpush3.bf16.msra.mxu0 %v14600_v34 }
0x10ca   : > { %12912 = vmatprep.subr.bf16.mxu0 %v14601_v35  ;;  %v14606_v35 = vld [vmem:[#allocation15 + $0x398] sm:$0xff]  }
0x10cc   : > { %5033 = vmatpush1.bf16.msra.mxu1 %v16918_v8 }
0x10cd   : > { %5034 = vmatprep.subr.bf16.mxu1 %v16921_v0  ;;  %12913 = vmatpush3.bf16.msra.mxu0 %v14602_v36  ;;  %v14607_v36 = vld [vmem:[#allocation15 + $0x3a0] sm:$0xff]  }
0x10ce   : > { %13657 = vmatprep.subr.bf16.mxu0 %v15880_v52 }
0x10d0   : > { %5035 = vmatpush1.bf16.msra.mxu1 %v16924_v44 }
0x10d1   : > { %5036 = vmatprep.subr.bf16.mxu1 %v16927_v45 }
0x10d4   : > { %5037 = vmatpush1.bf16.msra.mxu1 %v16930_v46 }
0x10d5   : > { %5038 = vmatprep.subr.bf16.mxu1 %v16933_v12 }
0x10d8   : > { %5039 = vmatpush1.bf16.msra.mxu1 %v16936_v57 }
0x10d9   : > { %5040 = vmatprep.subr.bf16.mxu1 %v16939_v48 }
0x10dc   : > { %5041 = vmatpush1.bf16.msra.mxu1 %v16942_v49 }
0x10dd   : > { %5042 = vmatprep.subr.bf16.mxu1 %v16945_v50 }
0x10e0   : > { %5043 = vmatpush1.bf16.msra.mxu1 %v16948_v51 }
0x10e1   : > { %5044 = vmatprep.subr.bf16.mxu1 %v16951_v54 }
0x10e4   : > { %5045 = vmatpush1.bf16.msra.mxu1 %v16954_v56 }
0x10e5   : > { %5046 = vmatprep.subr.bf16.mxu1 %v16957_v58 }
0x10e8   : > { %5047 = vmatpush1.bf16.msra.mxu1 %v16960_v63 }
0x10e9   : > { %5048 = vmatprep.subr.bf16.mxu1 %v16963_v2 }
0x10ec   : > { %5049 = vmatpush1.bf16.msra.mxu1 %v16966_v55 }
0x10ed   : > { %5050 = vmatprep.subr.bf16.mxu1 %v16969_v59 }
0x10f0   : > { %5051 = vmatpush1.bf16.msra.mxu1 %v16972_v61 }
0x10f1   : > { %5052 = vmatprep.subr.bf16.mxu1 %v16975_v62 }
0x10f4   : > { %5053 = vmatpush1.bf16.msra.mxu1 %v16978_v1 }
0x10f5   : > { %5054 = vmatprep.subr.bf16.mxu1 %v17037_v15 }
0x10f8   : > { %5055 = vmatpush1.bf16.msra.mxu1 %v17040_v16 }
0x10f9   : > { %5056 = vmatprep.subr.bf16.mxu1 %v17043_v53 }
0x10fc   : > { %5057 = vmatpush1.bf16.msra.mxu1 %v17046_v17 }
0x10fd   : > { %5058 = vmatprep.subr.bf16.mxu1 %v17049_v18 }
0x1100   : > { %5059 = vmatpush1.bf16.msra.mxu1 %v17052_v20 }
0x1101   : > { %5060 = vmatprep.subr.bf16.mxu1 %v17055_v21 }
0x1104   : > { %5061 = vmatpush1.bf16.msra.mxu1 %v17058_v22 }
0x1105   : > { %5395 = vmatprep.subr.bf16.mxu1 %v16989_v3 }
0x119a   : > { %v4699_v11 = vpop.f32.mrb[60].mxu1 }
0x119b   : > { %v4706_v37 = vmul.f32 %v4699_v11, %v4699_v11  ;;  %v4701_v9 = vpop.f32.mrb[61].mxu1  ;;  %v4712_v24 = vrot.slane %v4699_v11, %v16588_v4  ;;  %v14608_v11 = vld [vmem:[#allocation15 + $0x3a8] sm:$0xff]  }
0x119c   : > { %v4703_v38 = vpop.f32.mrb[62].mxu1 }
0x119d   : > { %v4707_v39 = vsub.f32 %v4701_v9, %v4706_v37  ;;  %v4704_v40 = vpop.f32.mrb[63].mxu1  ;;  %v4713_v27 = vsub.f32 %v17007_v26, %v4712_v24  ;;  %v14604_v26 = vld [vmem:[#allocation15 + $0x388] sm:$0xff]   ;;  %v14609_v37 = vld [vmem:[#allocation15 + $0x3b0] sm:$0xff]   ;;  %v14610_v9 = vld [vmem:[#allocation15 + $0x3b8] sm:$0xff]  }
0x119e   : > { %v14611_v40 = vld [vmem:[#allocation15 + $0x400] sm:$0xff]  }
0x119f   : > { %v4708_v13 = vmax.f32 %v4707_v39, 0.0 }
0x11a1   : > { %v4714_v14 = vadd.f32 1e-05, %v4708_v13  ;;  %v14612_v13 = vld [vmem:[#allocation15 + $0x3c0] sm:$0xff]  }
0x11a3   : > { %15042 = vrsqrt.f32 %v4714_v14 }
0x11ad   : > { %v15043_v25 = vpop.eup %15042 }
0x11ae   : > { %v4719_v28 = vrot.slane %v15043_v25, %v16588_v4 }
0x11b0   : > { %v4720_v29 = vmul.f32 %v4719_v28, %v4713_v27 }
0x11b2   : > { %v17067_v31 = vadd.f32 %v4720_v29, %v16888_v43  ;;  %v14605_v43 = vld [vmem:[#allocation15 + $0x390] sm:$0xff]   ;;  %v12130_v29 = vld [vmem:[#allocation16 + $0x4] ss:$0 sm:$0xff] }
0x11b4   : > { %v4781_v32 = vpack.c.bf16 %v17067_v31, %v17067_v31  ;;  %v4774_v6 = vrot.slane %v17067_v31, 1  ;;  %v4776_v10 = vrot.slane %v17067_v31, 7 }
0x11b6   : > { %4965 = vmatprep.mubr.bf16.mxu0 %v4781_v32  ;;  %v4778_v5 = vsel %vm1083_vm3, %v4774_v6, %v4776_v10  ;;  %v4779_v38 = vsel %vm1069_vm2, %v4774_v6, %v4776_v10 }
0x11b7   : > { %v4780_v34 = vpack.c.bf16 %v4778_v5, %v4778_v5  ;;  %v4782_v39 = vpack.c.bf16 %v4779_v38, %v4779_v38 }
0x11b9   : > { %4966 = vmatmul.mubr.bf16.vlgmr.msra.gmra.mrb[52].mxu0 %v4780_v34 }
0x11ba   : > { %13658 = vmatpush3.bf16.msra.mxu0 %v14603_v33  ;;  %13673 = vmatprep.mubr.msk.bf16.mxu0 %vm15881_vm12, %v15880_v52 }
0x11bb   : > { %13659 = vmatprep.subr.bf16.mxu0 %v15880_v52 }
0x11be   : > { %13660 = vmatpush3.bf16.msra.mxu0 %v14604_v26 }
0x11bf   : > { %13661 = vmatprep.subr.bf16.mxu0 %v15880_v52 }
0x11c2   : > { %13662 = vmatpush3.bf16.msra.mxu0 %v14605_v43 }
0x11c3   : > { %13663 = vmatprep.subr.bf16.mxu0 %v15880_v52 }
0x11c6   : > { %13664 = vmatpush3.bf16.msra.mxu0 %v14606_v35 }
0x11c7   : > { %13665 = vmatprep.subr.bf16.mxu0 %v15880_v52 }
0x11ca   : > { %13666 = vmatpush3.bf16.msra.mxu0 %v14607_v36 }
0x11cb   : > { %13667 = vmatprep.subr.bf16.mxu0 %v15880_v52 }
0x11ce   : > { %13668 = vmatpush3.bf16.msra.mxu0 %v14608_v11 }
0x11cf   : > { %13669 = vmatprep.subr.bf16.mxu0 %v15880_v52 }
0x11d2   : > { %13670 = vmatpush3.bf16.msra.mxu0 %v14609_v37 }
0x11d3   : > { %13671 = vmatprep.subr.bf16.mxu0 %v15880_v52 }
0x11d6   : > { %13672 = vmatpush3.bf16.msra.mxu0 %v14610_v9 }
0x11d7   : > { %12929 = vmatprep.subr.bf16.mxu0 %v14611_v40 }
0x11d9   : > { %13674 = vmatmul.mubr.bf16.vlgmr.msra.gmra.mrb[56].mxu0 %v4782_v39 }
0x11da   : > { %12930 = vmatpush3.bf16.msra.mxu0 %v14612_v13 }
0x128c   : > { %v12914_v14 = vpop.f32.mrb[52].mxu0 }
0x128d   : > { %v12915_v24 = vpop.f32.mrb[53].mxu0 }
0x128e   : > { %v12916_v25 = vadd.f32 %v12915_v24, %v12914_v14  ;;  %v12917_v27 = vpop.f32.mrb[54].mxu0 }
0x128f   : > { %v12918_v28 = vpop.f32.mrb[55].mxu0 }
0x1290   : > { %v4968_v32 = vadd.f32 %v12916_v25, %v12130_v29 }
0x12ac   : > { %v5007_v5 = vpop.f32.mrb[56].mxu0 }
0x12ad   : > { %v17084_v33 = vadd.f32 %v5007_v5, %v4968_v32  ;;  %v13675_v34 = vpop.f32.mrb[57].mxu0  ;;  %v14613_v32 = vld [vmem:[#allocation15 + $0x408] sm:$0xff]  }
0x12ae   : > { %v5010_v26 = vpop.f32.mrb[58].mxu0  ;;  %v14614_v5 = vld [vmem:[#allocation15 + $0x3c8] sm:$0xff]   ;;  %12931 = vmatprep.subr.bf16.mxu0 %v14613_v32  ;;  %v14615_v34 = vld [vmem:[#allocation15 + $0x410] sm:$0xff]  }
0x12af   : > { %v5013_v6 = vmul.f32 %v17084_v33, %v17084_v33  ;;  %v5014_v10 = vsel %vm2631_vm5, %v17084_v33, 0.0  ;;  %v13676_v43 = vpop.f32.mrb[59].mxu0  ;;  %12932 = vmatpush3.bf16.msra.mxu0 %v14614_v5  ;;  %v14616_v26 = vld [vmem:[#allocation15 + $0x3d0] sm:$0xff]  }
0x12b0   : > { %v5015_v35 = vrot.slane %v5014_v10, 4  ;;  %12933 = vmatprep.subr.bf16.mxu0 %v14615_v34  ;;  %v14619_v43 = vld [vmem:[#allocation15 + $0x420] sm:$0xff]  }
0x12b1   : > { %v5021_v36 = vsel %vm2631_vm5, %v5013_v6, 0.0  ;;  %v14617_v6 = vld [vmem:[#allocation15 + $0x418] sm:$0xff]  }
0x12b2   : > { %v5016_v11 = vadd.f32 %v5015_v35, %v5014_v10  ;;  %v5022_v37 = vrot.slane %v5021_v36, 4  ;;  %v14618_v10 = vld [vmem:[#allocation15 + $0x3d8] sm:$0xff]   ;;  %v14620_v35 = vld [vmem:[#allocation15 + $0x3e0] sm:$0xff]  }
0x12b3   : > { %12934 = vmatpush3.bf16.msra.mxu0 %v14616_v26 }
0x12b4   : > { %v5017_v9 = vrot.slane %v5016_v11, 2  ;;  %v5023_v38 = vadd.f32 %v5022_v37, %v5021_v36  ;;  %12935 = vmatprep.subr.bf16.mxu0 %v14617_v6  ;;  %v14621_v36 = vld [vmem:[#allocation15 + $0x428] sm:$0xff]   ;;  %v14623_v37 = vld [vmem:[#allocation15 + $0x430] sm:$0xff]  }
0x12b6   : > { %v5018_v39 = vadd.f32 %v5017_v9, %v5016_v11  ;;  %v5024_v40 = vrot.slane %v5023_v38, 2  ;;  %v14622_v11 = vld [vmem:[#allocation15 + $0x3e8] sm:$0xff]   ;;  %v14624_v9 = vld [vmem:[#allocation15 + $0x3f0] sm:$0xff]  }
0x12b7   : > { %12936 = vmatpush3.bf16.msra.mxu0 %v14618_v10 }
0x12b8   : > { %v5025_v13 = vadd.f32 %v5024_v40, %v5023_v38  ;;  %v5019_v14 = vrot.slane %v5018_v39, 1  ;;  %12937 = vmatprep.subr.bf16.mxu0 %v14619_v43  ;;  %v14625_v38 = vld [vmem:[#allocation15 + $0x438] sm:$0xff]  }
0x12ba   : > { %v5026_v24 = vrot.slane %v5025_v13, 1  ;;  %v5020_v25 = vadd.f32 %v5019_v14, %v5018_v39  ;;  %v14626_v39 = vld [vmem:[#allocation15 + $0x3f8] sm:$0xff]  }
0x12bb   : > { %12938 = vmatpush3.bf16.msra.mxu0 %v14620_v35 }
0x12bc   : > { %v5027_v27 = vadd.f32 %v5026_v24, %v5025_v13  ;;  %v5028_v29 = vpack.c.bf16 %v5020_v25, %v5020_v25  ;;  %12939 = vmatprep.subr.bf16.mxu0 %v14621_v36 }
0x12be   : > { %v5029_v28 = vpack.c.bf16 %v5027_v27, %v5027_v27 }
0x12bf   : > { %12940 = vmatpush3.bf16.msra.mxu0 %v14622_v11 }
0x12c0   : > { %5062 = vmatprep.mubr.bf16.mxu1 %v5029_v28  ;;  %12941 = vmatprep.subr.bf16.mxu0 %v14623_v37  ;;  %v14627_v37 = vld [vmem:[#allocation15 + $0x440] sm:$0xff]  }
0x12c1   : > { %5063 = vmatmul.mubr.bf16.vlgmr.msra.gmra.mrb[64].mxu1 %v5028_v29 }
0x12c2   : > { %5396 = vmatpush1.bf16.msra.mxu1 %v16912_v42 }
0x12c3   : > { %5397 = vmatprep.subr.bf16.mxu1 %v16915_v7  ;;  %12942 = vmatpush3.bf16.msra.mxu0 %v14624_v9 }
0x12c4   : > { %12943 = vmatprep.subr.bf16.mxu0 %v14625_v38  ;;  %v14628_v38 = vld [vmem:[#allocation15 + $0x448] sm:$0xff]  }
0x12c6   : > { %5398 = vmatpush1.bf16.msra.mxu1 %v16918_v8 }
0x12c7   : > { %5399 = vmatprep.subr.bf16.mxu1 %v16921_v0  ;;  %12944 = vmatpush3.bf16.msra.mxu0 %v14626_v39  ;;  %v14630_v39 = vld [vmem:[#allocation15 + $0x458] sm:$0xff]  }
0x12c8   : > { %13677 = vmatprep.subr.bf16.mxu0 %v15880_v52 }
0x12ca   : > { %5400 = vmatpush1.bf16.msra.mxu1 %v16924_v44 }
0x12cb   : > { %5401 = vmatprep.subr.bf16.mxu1 %v16927_v45 }
0x12ce   : > { %5402 = vmatpush1.bf16.msra.mxu1 %v16930_v46 }
0x12cf   : > { %5403 = vmatprep.subr.bf16.mxu1 %v16933_v12 }
0x12d2   : > { %5404 = vmatpush1.bf16.msra.mxu1 %v16936_v57 }
0x12d3   : > { %5405 = vmatprep.subr.bf16.mxu1 %v16939_v48 }
0x12d6   : > { %5406 = vmatpush1.bf16.msra.mxu1 %v16942_v49 }
0x12d7   : > { %5407 = vmatprep.subr.bf16.mxu1 %v16945_v50 }
0x12da   : > { %5408 = vmatpush1.bf16.msra.mxu1 %v16948_v51 }
0x12db   : > { %5409 = vmatprep.subr.bf16.mxu1 %v16951_v54 }
0x12de   : > { %5410 = vmatpush1.bf16.msra.mxu1 %v16954_v56 }
0x12df   : > { %5411 = vmatprep.subr.bf16.mxu1 %v16957_v58 }
0x12e2   : > { %5412 = vmatpush1.bf16.msra.mxu1 %v16960_v63 }
0x12e3   : > { %5413 = vmatprep.subr.bf16.mxu1 %v16963_v2 }
0x12e6   : > { %5414 = vmatpush1.bf16.msra.mxu1 %v16966_v55 }
0x12e7   : > { %5415 = vmatprep.subr.bf16.mxu1 %v16969_v59 }
0x12ea   : > { %5416 = vmatpush1.bf16.msra.mxu1 %v16972_v61 }
0x12eb   : > { %5417 = vmatprep.subr.bf16.mxu1 %v16975_v62 }
0x12ee   : > { %5418 = vmatpush1.bf16.msra.mxu1 %v16978_v1 }
0x12ef   : > { %5419 = vmatprep.subr.bf16.mxu1 %v17037_v15 }
0x12f2   : > { %5420 = vmatpush1.bf16.msra.mxu1 %v17040_v16 }
0x12f3   : > { %5421 = vmatprep.subr.bf16.mxu1 %v17043_v53 }
0x12f6   : > { %5422 = vmatpush1.bf16.msra.mxu1 %v17046_v17 }
0x12f7   : > { %5423 = vmatprep.subr.bf16.mxu1 %v17049_v18 }
0x12fa   : > { %5424 = vmatpush1.bf16.msra.mxu1 %v17052_v20 }
0x12fb   : > { %5425 = vmatprep.subr.bf16.mxu1 %v17055_v21 }
0x12fe   : > { %5426 = vmatpush1.bf16.msra.mxu1 %v17058_v22 }
0x12ff   : > { %5760 = vmatprep.subr.bf16.mxu1 %v16989_v3 }
0x1394   : > { %v5064_v40 = vpop.f32.mrb[64].mxu1 }
0x1395   : > { %v5071_v13 = vmul.f32 %v5064_v40, %v5064_v40  ;;  %v5066_v14 = vpop.f32.mrb[65].mxu1  ;;  %v5077_v32 = vrot.slane %v5064_v40, %v16588_v4  ;;  %v14631_v40 = vld [vmem:[#allocation15 + $0x460] sm:$0xff]  }
0x1396   : > { %v5068_v24 = vpop.f32.mrb[66].mxu1 }
0x1397   : > { %v5072_v25 = vsub.f32 %v5066_v14, %v5071_v13  ;;  %v5069_v27 = vpop.f32.mrb[67].mxu1  ;;  %v5078_v34 = vsub.f32 %v17084_v33, %v5077_v32  ;;  %v14629_v33 = vld [vmem:[#allocation15 + $0x450] sm:$0xff]   ;;  %v14632_v13 = vld [vmem:[#allocation15 + $0x468] sm:$0xff]   ;;  %v14634_v24 = vld [vmem:[#allocation15 + $0x478] sm:$0xff]  }
0x1398   : > { %v14633_v14 = vld [vmem:[#allocation15 + $0x470] sm:$0xff]  }
0x1399   : > { %v5073_v28 = vmax.f32 %v5072_v25, 0.0 }
0x139b   : > { %v5079_v29 = vadd.f32 1e-05, %v5073_v28  ;;  %v14635_v28 = vld [vmem:[#allocation15 + $0x4c0] sm:$0xff]  }
0x139d   : > { %15044 = vrsqrt.f32 %v5079_v29  ;;  %v14636_v29 = vld [vmem:[#allocation15 + $0x480] sm:$0xff]  }
0x13a7   : > { %v15045_v5 = vpop.eup %15044 }
0x13a8   : > { %v5084_v26 = vrot.slane %v15045_v5, %v16588_v4 }
0x13aa   : > { %v5085_v6 = vmul.f32 %v5084_v26, %v5078_v34 }
0x13ac   : > { %v5086_v10 = vmax.f32 %v5085_v6, 0.0 }
0x13ae   : > { %v5146_v43 = vpack.c.bf16 %v5086_v10, %v5086_v10  ;;  %v5139_v35 = vrot.slane %v5086_v10, 1  ;;  %v5141_v36 = vrot.slane %v5086_v10, 7  ;;  %v12155_v10 = vld [vmem:[#allocation16 + $0x5] ss:$0 sm:$0xff] }
0x13b0   : > { %5330 = vmatprep.mubr.bf16.mxu0 %v5146_v43  ;;  %v5143_v11 = vsel %vm1083_vm3, %v5139_v35, %v5141_v36  ;;  %v5144_v25 = vsel %vm1069_vm2, %v5139_v35, %v5141_v36 }
0x13b1   : > { %v5145_v9 = vpack.c.bf16 %v5143_v11, %v5143_v11  ;;  %v5147_v27 = vpack.c.bf16 %v5144_v25, %v5144_v25 }
0x13b3   : > { %5331 = vmatmul.mubr.bf16.vlgmr.msra.gmra.mrb[60].mxu0 %v5145_v9 }
0x13b4   : > { %13678 = vmatpush3.bf16.msra.mxu0 %v14627_v37  ;;  %13693 = vmatprep.mubr.msk.bf16.mxu0 %vm15881_vm12, %v15880_v52 }
0x13b5   : > { %13679 = vmatprep.subr.bf16.mxu0 %v15880_v52 }
0x13b8   : > { %13680 = vmatpush3.bf16.msra.mxu0 %v14628_v38 }
0x13b9   : > { %13681 = vmatprep.subr.bf16.mxu0 %v15880_v52 }
0x13bc   : > { %13682 = vmatpush3.bf16.msra.mxu0 %v14629_v33 }
0x13bd   : > { %13683 = vmatprep.subr.bf16.mxu0 %v15880_v52 }
0x13c0   : > { %13684 = vmatpush3.bf16.msra.mxu0 %v14630_v39 }
0x13c1   : > { %13685 = vmatprep.subr.bf16.mxu0 %v15880_v52 }
0x13c4   : > { %13686 = vmatpush3.bf16.msra.mxu0 %v14631_v40 }
0x13c5   : > { %13687 = vmatprep.subr.bf16.mxu0 %v15880_v52 }
0x13c8   : > { %13688 = vmatpush3.bf16.msra.mxu0 %v14632_v13 }
0x13c9   : > { %13689 = vmatprep.subr.bf16.mxu0 %v15880_v52 }
0x13cc   : > { %13690 = vmatpush3.bf16.msra.mxu0 %v14633_v14 }
0x13cd   : > { %13691 = vmatprep.subr.bf16.mxu0 %v15880_v52 }
0x13d0   : > { %13692 = vmatpush3.bf16.msra.mxu0 %v14634_v24 }
0x13d1   : > { %12960 = vmatprep.subr.bf16.mxu0 %v14635_v28 }
0x13d3   : > { %13694 = vmatmul.mubr.bf16.vlgmr.msra.gmra.mrb[64].mxu0 %v5147_v27 }
0x13d4   : > { %12961 = vmatpush3.bf16.msra.mxu0 %v14636_v29 }
0x1486   : > { %v12945_v32 = vpop.f32.mrb[60].mxu0 }
0x1487   : > { %v12946_v5 = vpop.f32.mrb[61].mxu0 }
0x1488   : > { %v12947_v34 = vadd.f32 %v12946_v5, %v12945_v32  ;;  %v12948_v26 = vpop.f32.mrb[62].mxu0 }
0x1489   : > { %v12949_v6 = vpop.f32.mrb[63].mxu0 }
0x148a   : > { %v5333_v43 = vadd.f32 %v12947_v34, %v12155_v10 }
0x14a6   : > { %v5372_v11 = vpop.f32.mrb[64].mxu0 }
0x14a7   : > { %v17138_v37 = vadd.f32 %v5372_v11, %v5333_v43  ;;  %v13695_v9 = vpop.f32.mrb[65].mxu0 }
0x14a8   : > { %v5375_v38 = vpop.f32.mrb[66].mxu0 }
0x14a9   : > { %v5378_v35 = vmul.f32 %v17138_v37, %v17138_v37  ;;  %v5379_v36 = vsel %vm2631_vm5, %v17138_v37, 0.0  ;;  %v13696_v33 = vpop.f32.mrb[67].mxu0 }
0x14aa   : > { %v5380_v39 = vrot.slane %v5379_v36, 4 }
0x14ab   : > { %v5386_v40 = vsel %vm2631_vm5, %v5378_v35, 0.0 }
0x14ac   : > { %v5381_v13 = vadd.f32 %v5380_v39, %v5379_v36  ;;  %v5387_v14 = vrot.slane %v5386_v40, 4 }
0x14ae   : > { %v5382_v24 = vrot.slane %v5381_v13, 2  ;;  %v5388_v25 = vadd.f32 %v5387_v14, %v5386_v40  ;;  %v14651_v40 = vld [vmem:[#allocation15 + $0x500] sm:$0xff]   ;;  %v14654_v14 = vld [vmem:[#allocation15 + $0x518] sm:$0xff]  }
0x14b0   : > { %v5383_v27 = vadd.f32 %v5382_v24, %v5381_v13  ;;  %v5389_v28 = vrot.slane %v5388_v25, 2  ;;  %v14655_v24 = vld [vmem:[#allocation15 + $0x520] sm:$0xff]  }
0x14b2   : > { %v5390_v29 = vadd.f32 %v5389_v28, %v5388_v25  ;;  %v5384_v32 = vrot.slane %v5383_v27, 1  ;;  %v14656_v25 = vld [vmem:[#allocation15 + $0x528] sm:$0xff]   ;;  %v14658_v28 = vld [vmem:[#allocation15 + $0x538] sm:$0xff]  }
0x14b4   : > { %v5391_v5 = vrot.slane %v5390_v29, 1  ;;  %v5385_v34 = vadd.f32 %v5384_v32, %v5383_v27  ;;  %v14657_v27 = vld [vmem:[#allocation15 + $0x530] sm:$0xff]  }
0x14b6   : > { %v5392_v26 = vadd.f32 %v5391_v5, %v5390_v29  ;;  %v5393_v10 = vpack.c.bf16 %v5385_v34, %v5385_v34  ;;  %v14659_v5 = vld [vmem:[#allocation15 + $0x580] sm:$0xff]  }
0x14b7   : > { %v14660_v34 = vld [vmem:[#allocation15 + $0x540] sm:$0xff]  }
0x14b8   : > { %v5394_v6 = vpack.c.bf16 %v5392_v26, %v5392_v26 }
0x14ba   : > { %5427 = vmatprep.mubr.bf16.mxu1 %v5394_v6 }
0x14bb   : > { %5428 = vmatmul.mubr.bf16.vlgmr.msra.gmra.mrb[68].mxu1 %v5393_v10 }
0x14bc   : > { %5761 = vmatpush1.bf16.msra.mxu1 %v16912_v42  ;;  %v14637_v42 = vld [vmem:[#allocation15 + $0x4c8] sm:$0xff]  }
0x14bd   : > { %5762 = vmatprep.subr.bf16.mxu1 %v16915_v7  ;;  %v14638_v7 = vld [vmem:[#allocation15 + $0x488] sm:$0xff]   ;;  %12962 = vmatprep.subr.bf16.mxu0 %v14637_v42 }
0x14be   : > { %12963 = vmatpush3.bf16.msra.mxu0 %v14638_v7 }
0x14c0   : > { %5763 = vmatpush1.bf16.msra.mxu1 %v16918_v8  ;;  %v14639_v8 = vld [vmem:[#allocation15 + $0x4d0] sm:$0xff]  }
0x14c1   : > { %5764 = vmatprep.subr.bf16.mxu1 %v16921_v0  ;;  %v14640_v0 = vld [vmem:[#allocation15 + $0x490] sm:$0xff]   ;;  %12964 = vmatprep.subr.bf16.mxu0 %v14639_v8  ;;  %v12180_v8 = vld [vmem:[#allocation16 + $0x6] ss:$0 sm:$0xff] }
0x14c2   : > { %12965 = vmatpush3.bf16.msra.mxu0 %v14640_v0 }
0x14c4   : > { %5765 = vmatpush1.bf16.msra.mxu1 %v16924_v44  ;;  %v14641_v44 = vld [vmem:[#allocation15 + $0x4d8] sm:$0xff]  }
0x14c5   : > { %5766 = vmatprep.subr.bf16.mxu1 %v16927_v45  ;;  %v14642_v45 = vld [vmem:[#allocation15 + $0x498] sm:$0xff]   ;;  %12966 = vmatprep.subr.bf16.mxu0 %v14641_v44 }
0x14c6   : > { %12967 = vmatpush3.bf16.msra.mxu0 %v14642_v45 }
0x14c8   : > { %5767 = vmatpush1.bf16.msra.mxu1 %v16930_v46  ;;  %v14643_v46 = vld [vmem:[#allocation15 + $0x4e0] sm:$0xff]  }
0x14c9   : > { %5768 = vmatprep.subr.bf16.mxu1 %v16933_v12  ;;  %v14644_v12 = vld [vmem:[#allocation15 + $0x4a0] sm:$0xff]   ;;  %12968 = vmatprep.subr.bf16.mxu0 %v14643_v46 }
0x14ca   : > { %12969 = vmatpush3.bf16.msra.mxu0 %v14644_v12 }
0x14cc   : > { %5769 = vmatpush1.bf16.msra.mxu1 %v16936_v57  ;;  %v14645_v57 = vld [vmem:[#allocation15 + $0x4e8] sm:$0xff]  }
0x14cd   : > { %5770 = vmatprep.subr.bf16.mxu1 %v16939_v48  ;;  %v14646_v48 = vld [vmem:[#allocation15 + $0x4a8] sm:$0xff]   ;;  %12970 = vmatprep.subr.bf16.mxu0 %v14645_v57 }
0x14ce   : > { %12971 = vmatpush3.bf16.msra.mxu0 %v14646_v48 }
0x14d0   : > { %5771 = vmatpush1.bf16.msra.mxu1 %v16942_v49  ;;  %v14647_v49 = vld [vmem:[#allocation15 + $0x4f0] sm:$0xff]  }
0x14d1   : > { %5772 = vmatprep.subr.bf16.mxu1 %v16945_v50  ;;  %v14648_v50 = vld [vmem:[#allocation15 + $0x4b0] sm:$0xff]   ;;  %12972 = vmatprep.subr.bf16.mxu0 %v14647_v49 }
0x14d2   : > { %12973 = vmatpush3.bf16.msra.mxu0 %v14648_v50 }
0x14d4   : > { %5773 = vmatpush1.bf16.msra.mxu1 %v16948_v51  ;;  %v14649_v51 = vld [vmem:[#allocation15 + $0x4f8] sm:$0xff]  }
0x14d5   : > { %5774 = vmatprep.subr.bf16.mxu1 %v16951_v54  ;;  %v14650_v54 = vld [vmem:[#allocation15 + $0x4b8] sm:$0xff]   ;;  %12974 = vmatprep.subr.bf16.mxu0 %v14649_v51 }
0x14d6   : > { %12975 = vmatpush3.bf16.msra.mxu0 %v14650_v54 }
0x14d7   : > { %13697 = vmatprep.subr.bf16.mxu0 %v15880_v52 }
0x14d8   : > { %5775 = vmatpush1.bf16.msra.mxu1 %v16954_v56 }
0x14d9   : > { %5776 = vmatprep.subr.bf16.mxu1 %v16957_v58 }
0x14dc   : > { %5777 = vmatpush1.bf16.msra.mxu1 %v16960_v63 }
0x14dd   : > { %5778 = vmatprep.subr.bf16.mxu1 %v16963_v2 }
0x14e0   : > { %5779 = vmatpush1.bf16.msra.mxu1 %v16966_v55 }
0x14e1   : > { %5780 = vmatprep.subr.bf16.mxu1 %v16969_v59 }
0x14e4   : > { %5781 = vmatpush1.bf16.msra.mxu1 %v16972_v61 }
0x14e5   : > { %5782 = vmatprep.subr.bf16.mxu1 %v16975_v62 }
0x14e8   : > { %5783 = vmatpush1.bf16.msra.mxu1 %v16978_v1 }
0x14e9   : > { %5784 = vmatprep.subr.bf16.mxu1 %v17037_v15 }
0x14ec   : > { %5785 = vmatpush1.bf16.msra.mxu1 %v17040_v16 }
0x14ed   : > { %5786 = vmatprep.subr.bf16.mxu1 %v17043_v53 }
0x14f0   : > { %5787 = vmatpush1.bf16.msra.mxu1 %v17046_v17 }
0x14f1   : > { %5788 = vmatprep.subr.bf16.mxu1 %v17049_v18 }
0x14f4   : > { %5789 = vmatpush1.bf16.msra.mxu1 %v17052_v20 }
0x14f5   : > { %5790 = vmatprep.subr.bf16.mxu1 %v17055_v21 }
0x14f8   : > { %5791 = vmatpush1.bf16.msra.mxu1 %v17058_v22 }
0x14f9   : > { %6125 = vmatprep.subr.bf16.mxu1 %v16989_v3 }
0x158e   : > { %v5429_v56 = vpop.f32.mrb[68].mxu1 }
0x158f   : > { %v5436_v58 = vmul.f32 %v5429_v56, %v5429_v56  ;;  %v5431_v63 = vpop.f32.mrb[69].mxu1  ;;  %v5442_v1 = vrot.slane %v5429_v56, %v16588_v4 }
0x1590   : > { %v5433_v2 = vpop.f32.mrb[70].mxu1 }
0x1591   : > { %v5437_v55 = vsub.f32 %v5431_v63, %v5436_v58  ;;  %v5434_v59 = vpop.f32.mrb[71].mxu1  ;;  %v5443_v43 = vsub.f32 %v17138_v37, %v5442_v1  ;;  %v14652_v37 = vld [vmem:[#allocation15 + $0x508] sm:$0xff]  }
0x1593   : > { %v5438_v61 = vmax.f32 %v5437_v55, 0.0 }
0x1595   : > { %v5444_v62 = vadd.f32 1e-05, %v5438_v61 }
0x1597   : > { %15046 = vrsqrt.f32 %v5444_v62 }
0x15a1   : > { %v15047_v3 = vpop.eup %15046 }
0x15a2   : > { %v5449_v11 = vrot.slane %v15047_v3, %v16588_v4 }
0x15a4   : > { %v5450_v9 = vmul.f32 %v5449_v11, %v5443_v43 }
0x15a6   : > { %v17182_v38 = vadd.f32 %v5450_v9, %v17067_v31  ;;  %v14653_v31 = vld [vmem:[#allocation15 + $0x510] sm:$0xff]   ;;  %v17206_v9 = vld [vmem:[#allocation30] ss:$8 sps:$4 sm:$0xff]  }
0x15a8   : > { %v5511_v35 = vpack.c.bf16 %v17182_v38, %v17182_v38  ;;  %v5504_v36 = vrot.slane %v17182_v38, 1  ;;  %v5506_v33 = vrot.slane %v17182_v38, 7 }
0x15aa   : > { %5695 = vmatprep.mubr.bf16.mxu0 %v5511_v35  ;;  %v5508_v39 = vsel %vm1083_vm3, %v5504_v36, %v5506_v33  ;;  %v5509_v29 = vsel %vm1069_vm2, %v5504_v36, %v5506_v33  ;;  %v17209_v35 = vld [vmem:[#allocation30 + $0x14] ss:$8 sps:$4 sm:$0xff]   ;;  %v17212_v36 = vld [vmem:[#allocation30 + $0x10] ss:$8 sps:$4 sm:$0xff]   ;;  %v17215_v33 = vld [vmem:[#allocation30 + $0x24] ss:$8 sps:$4 sm:$0xff]  }
0x15ab   : > { %v5510_v13 = vpack.c.bf16 %v5508_v39, %v5508_v39  ;;  %v5512_v32 = vpack.c.bf16 %v5509_v29, %v5509_v29  ;;  %v17218_v39 = vld [vmem:[#allocation30 + $0x20] ss:$8 sps:$4 sm:$0xff]   ;;  %v17248_v29 = vld [vmem:[#allocation30 + $0x70] ss:$8 sps:$4 sm:$0xff]  }
0x15ad   : > { %5696 = vmatmul.mubr.bf16.vlgmr.msra.gmra.mrb[68].mxu0 %v5510_v13  ;;  %v17224_v13 = vld [vmem:[#allocation30 + $0x30] ss:$8 sps:$4 sm:$0xff]  }
0x15ae   : > { %13698 = vmatpush3.bf16.msra.mxu0 %v14651_v40  ;;  %13713 = vmatprep.mubr.msk.bf16.mxu0 %vm15881_vm12, %v15880_v52  ;;  %v17221_v40 = vld [vmem:[#allocation30 + $0x34] ss:$8 sps:$4 sm:$0xff]  }
0x15af   : > { %13699 = vmatprep.subr.bf16.mxu0 %v15880_v52 }
0x15b2   : > { %13700 = vmatpush3.bf16.msra.mxu0 %v14652_v37  ;;  %v17227_v37 = vld [vmem:[#allocation30 + $0x44] ss:$8 sps:$4 sm:$0xff]  }
0x15b3   : > { %13701 = vmatprep.subr.bf16.mxu0 %v15880_v52 }
0x15b6   : > { %13702 = vmatpush3.bf16.msra.mxu0 %v14653_v31  ;;  %v17230_v31 = vld [vmem:[#allocation30 + $0x40] ss:$8 sps:$4 sm:$0xff]  }
0x15b7   : > { %13703 = vmatprep.subr.bf16.mxu0 %v15880_v52 }
0x15ba   : > { %13704 = vmatpush3.bf16.msra.mxu0 %v14654_v14  ;;  %v17233_v14 = vld [vmem:[#allocation30 + $0x54] ss:$8 sps:$4 sm:$0xff]  }
0x15bb   : > { %13705 = vmatprep.subr.bf16.mxu0 %v15880_v52 }
0x15be   : > { %13706 = vmatpush3.bf16.msra.mxu0 %v14655_v24  ;;  %v17236_v24 = vld [vmem:[#allocation30 + $0x50] ss:$8 sps:$4 sm:$0xff]  }
0x15bf   : > { %13707 = vmatprep.subr.bf16.mxu0 %v15880_v52 }
0x15c2   : > { %13708 = vmatpush3.bf16.msra.mxu0 %v14656_v25  ;;  %v17239_v25 = vld [vmem:[#allocation30 + $0x64] ss:$8 sps:$4 sm:$0xff]  }
0x15c3   : > { %13709 = vmatprep.subr.bf16.mxu0 %v15880_v52 }
0x15c6   : > { %13710 = vmatpush3.bf16.msra.mxu0 %v14657_v27  ;;  %v17242_v27 = vld [vmem:[#allocation30 + $0x60] ss:$8 sps:$4 sm:$0xff]  }
0x15c7   : > { %13711 = vmatprep.subr.bf16.mxu0 %v15880_v52 }
0x15ca   : > { %13712 = vmatpush3.bf16.msra.mxu0 %v14658_v28  ;;  %v17245_v28 = vld [vmem:[#allocation30 + $0x74] ss:$8 sps:$4 sm:$0xff]  }
0x15cb   : > { %12991 = vmatprep.subr.bf16.mxu0 %v14659_v5  ;;  %v17254_v5 = vld [vmem:[#allocation30 + $0x80] ss:$8 sps:$4 sm:$0xff]  }
0x15cd   : > { %13714 = vmatmul.mubr.bf16.vlgmr.msra.gmra.mrb[72].mxu0 %v5512_v32  ;;  %v17251_v32 = vld [vmem:[#allocation30 + $0x84] ss:$8 sps:$4 sm:$0xff]  }
0x15ce   : > { %12992 = vmatpush3.bf16.msra.mxu0 %v14660_v34  ;;  %v17257_v34 = vld [vmem:[#allocation30 + $0x94] ss:$8 sps:$4 sm:$0xff]  }
0x1680   : > { %v12976_v26 = vpop.f32.mrb[68].mxu0 }
0x1681   : > { %v12977_v6 = vpop.f32.mrb[69].mxu0 }
0x1682   : > { %v12978_v10 = vadd.f32 %v12977_v6, %v12976_v26  ;;  %v12979_v42 = vpop.f32.mrb[70].mxu0  ;;  %v17260_v26 = vld [vmem:[#allocation30 + $0x90] ss:$8 sps:$4 sm:$0xff]   ;;  %v17263_v6 = vld [vmem:[#allocation30 + $0xa4] ss:$8 sps:$4 sm:$0xff]  }
0x1683   : > { %v12980_v7 = vpop.f32.mrb[71].mxu0  ;;  %v17269_v42 = vld [vmem:[#allocation30 + $0xb4] ss:$8 sps:$4 sm:$0xff]  }
0x1684   : > { %v5698_v0 = vadd.f32 %v12978_v10, %v12180_v8  ;;  %v17266_v10 = vld [vmem:[#allocation30 + $0xa0] ss:$8 sps:$4 sm:$0xff]   ;;  %v17272_v7 = vld [vmem:[#allocation30 + $0xb0] ss:$8 sps:$4 sm:$0xff]   ;;  %v17283_v8 = vld [vmem:[#allocation30 + $0x4] ss:$8 sps:$4 sm:$0xff]  }
0x16a0   : > { %v5737_v44 = vpop.f32.mrb[72].mxu0 }
0x16a1   : > { %v17199_v45 = vadd.f32 %v5737_v44, %v5698_v0  ;;  %v13715_v46 = vpop.f32.mrb[73].mxu0  ;;  %v14661_v0 = vld [vmem:[#allocation15 + $0x588] sm:$0xff]   ;;  %v14667_v44 = vld [vmem:[#allocation15 + $0x5a0] sm:$0xff]  }
0x16a2   : > { %v5740_v12 = vpop.f32.mrb[74].mxu0  ;;  %12993 = vmatprep.subr.bf16.mxu0 %v14661_v0  ;;  %v14671_v46 = vld [vmem:[#allocation15 + $0x5b0] sm:$0xff]  }
0x16a3   : > { %v5743_v57 = vmul.f32 %v17199_v45, %v17199_v45  ;;  %v5744_v48 = vsel %vm2631_vm5, %v17199_v45, 0.0  ;;  %v13716_v49 = vpop.f32.mrb[75].mxu0  ;;  %v14672_v12 = vld [vmem:[#allocation15 + $0x570] sm:$0xff]  }
0x16a4   : > { %v5745_v50 = vrot.slane %v5744_v48, 4 }
0x16a5   : > { %v5751_v51 = vsel %vm2631_vm5, %v5743_v57, 0.0  ;;  %v14673_v57 = vld [vmem:[#allocation15 + $0x5b8] sm:$0xff]  }
0x16a6   : > { %v5746_v54 = vadd.f32 %v5745_v50, %v5744_v48  ;;  %v5752_v56 = vrot.slane %v5751_v51, 4  ;;  %v14674_v48 = vld [vmem:[#allocation15 + $0x578] sm:$0xff]  }
0x16a8   : > { %v5747_v58 = vrot.slane %v5746_v54, 2  ;;  %v5753_v63 = vadd.f32 %v5752_v56, %v5751_v51 }
0x16aa   : > { %v5748_v2 = vadd.f32 %v5747_v58, %v5746_v54  ;;  %v5754_v55 = vrot.slane %v5753_v63, 2 }
0x16ac   : > { %v5755_v59 = vadd.f32 %v5754_v55, %v5753_v63  ;;  %v5749_v61 = vrot.slane %v5748_v2, 1 }
0x16ae   : > { %v5756_v62 = vrot.slane %v5755_v59, 1  ;;  %v5750_v1 = vadd.f32 %v5749_v61, %v5748_v2 }
0x16b0   : > { %v5757_v3 = vadd.f32 %v5756_v62, %v5755_v59  ;;  %v5758_v11 = vpack.c.bf16 %v5750_v1, %v5750_v1 }
0x16b2   : > { %v5759_v43 = vpack.c.bf16 %v5757_v3, %v5757_v3 }
0x16b4   : > { %5792 = vmatprep.mubr.bf16.mxu1 %v5759_v43 }
0x16b5   : > { %5793 = vmatmul.mubr.bf16.vlgmr.msra.gmra.mrb[72].mxu1 %v5758_v11 }
0x16b6   : > { %6126 = vmatpush1.bf16.msra.mxu1 %v17206_v9 }
0x16b7   : > { %6127 = vmatprep.subr.bf16.mxu1 %v17209_v35 }
0x16ba   : > { %6128 = vmatpush1.bf16.msra.mxu1 %v17212_v36 }
0x16bb   : > { %6129 = vmatprep.subr.bf16.mxu1 %v17215_v33 }
0x16be   : > { %6130 = vmatpush1.bf16.msra.mxu1 %v17218_v39 }
0x16bf   : > { %6131 = vmatprep.subr.bf16.mxu1 %v17221_v40 }
0x16c2   : > { %6132 = vmatpush1.bf16.msra.mxu1 %v17224_v13 }
0x16c3   : > { %6133 = vmatprep.subr.bf16.mxu1 %v17227_v37 }
0x16c6   : > { %6134 = vmatpush1.bf16.msra.mxu1 %v17230_v31 }
0x16c7   : > { %6135 = vmatprep.subr.bf16.mxu1 %v17233_v14 }
0x16ca   : > { %6136 = vmatpush1.bf16.msra.mxu1 %v17236_v24 }
0x16cb   : > { %6137 = vmatprep.subr.bf16.mxu1 %v17239_v25 }
0x16ce   : > { %6138 = vmatpush1.bf16.msra.mxu1 %v17242_v27 }
0x16cf   : > { %6139 = vmatprep.subr.bf16.mxu1 %v17245_v28 }
0x16d2   : > { %6140 = vmatpush1.bf16.msra.mxu1 %v17248_v29 }
0x16d3   : > { %6141 = vmatprep.subr.bf16.mxu1 %v17251_v32 }
0x16d6   : > { %6142 = vmatpush1.bf16.msra.mxu1 %v17254_v5 }
0x16d7   : > { %6143 = vmatprep.subr.bf16.mxu1 %v17257_v34 }
0x16da   : > { %6144 = vmatpush1.bf16.msra.mxu1 %v17260_v26 }
0x16db   : > { %6145 = vmatprep.subr.bf16.mxu1 %v17263_v6 }
0x16de   : > { %6146 = vmatpush1.bf16.msra.mxu1 %v17266_v10 }
0x16df   : > { %6147 = vmatprep.subr.bf16.mxu1 %v17269_v42 }
0x16e2   : > { %6148 = vmatpush1.bf16.msra.mxu1 %v17272_v7 }
0x16e3   : > { %6149 = vmatprep.subr.bf16.mxu1 %v17037_v15  ;;  %v14662_v15 = vld [vmem:[#allocation15 + $0x548] sm:$0xff]  }
0x16e4   : > { %12994 = vmatpush3.bf16.msra.mxu0 %v14662_v15 }
0x16e6   : > { %6150 = vmatpush1.bf16.msra.mxu1 %v17040_v16  ;;  %v14663_v16 = vld [vmem:[#allocation15 + $0x590] sm:$0xff]  }
0x16e7   : > { %6151 = vmatprep.subr.bf16.mxu1 %v17043_v53  ;;  %v14664_v53 = vld [vmem:[#allocation15 + $0x550] sm:$0xff]   ;;  %12995 = vmatprep.subr.bf16.mxu0 %v14663_v16  ;;  %v14675_v16 = vld [vmem:[#allocation15 + $0x5c0] sm:$0xff]  }
0x16e8   : > { %12996 = vmatpush3.bf16.msra.mxu0 %v14664_v53 }
0x16ea   : > { %6152 = vmatpush1.bf16.msra.mxu1 %v17046_v17  ;;  %v14665_v17 = vld [vmem:[#allocation15 + $0x598] sm:$0xff]  }
0x16eb   : > { %6153 = vmatprep.subr.bf16.mxu1 %v17049_v18  ;;  %v14666_v18 = vld [vmem:[#allocation15 + $0x558] sm:$0xff]   ;;  %12997 = vmatprep.subr.bf16.mxu0 %v14665_v17  ;;  %v14676_v17 = vld [vmem:[#allocation15 + $0x5c8] sm:$0xff]  }
0x16ec   : > { %12998 = vmatpush3.bf16.msra.mxu0 %v14666_v18  ;;  %v14678_v18 = vld [vmem:[#allocation15 + $0x5d8] sm:$0xff]  }
0x16ed   : > { %12999 = vmatprep.subr.bf16.mxu0 %v14667_v44  ;;  %v14679_v44 = vld [vmem:[#allocation15 + $0x5e0] sm:$0xff]  }
0x16ee   : > { %6154 = vmatpush1.bf16.msra.mxu1 %v17052_v20  ;;  %v14668_v20 = vld [vmem:[#allocation15 + $0x560] sm:$0xff]  }
0x16ef   : > { %6155 = vmatprep.subr.bf16.mxu1 %v17055_v21  ;;  %v14669_v21 = vld [vmem:[#allocation15 + $0x5a8] sm:$0xff]  }
0x16f0   : > { %13000 = vmatpush3.bf16.msra.mxu0 %v14668_v20  ;;  %v14680_v20 = vld [vmem:[#allocation15 + $0x5e8] sm:$0xff]  }
0x16f1   : > { %13001 = vmatprep.subr.bf16.mxu0 %v14669_v21  ;;  %v14681_v21 = vld [vmem:[#allocation15 + $0x5f0] sm:$0xff]  }
0x16f2   : > { %6156 = vmatpush1.bf16.msra.mxu1 %v17058_v22  ;;  %v14670_v22 = vld [vmem:[#allocation15 + $0x568] sm:$0xff]  }
0x16f3   : > { %6490 = vmatprep.subr.bf16.mxu1 %v17283_v8 }
0x16f4   : > { %13002 = vmatpush3.bf16.msra.mxu0 %v14670_v22  ;;  %v14682_v22 = vld [vmem:[#allocation15 + $0x5f8] sm:$0xff]  }
0x16f5   : > { %13003 = vmatprep.subr.bf16.mxu0 %v14671_v46 }
0x16f8   : > { %13004 = vmatpush3.bf16.msra.mxu0 %v14672_v12 }
0x16f9   : > { %13005 = vmatprep.subr.bf16.mxu0 %v14673_v57  ;;  %v14683_v57 = vld [vmem:[#allocation15 + $0x640] sm:$0xff]  }
0x16fc   : > { %13006 = vmatpush3.bf16.msra.mxu0 %v14674_v48  ;;  %v14684_v48 = vld [vmem:[#allocation15 + $0x600] sm:$0xff]  }
0x16fd   : > { %13717 = vmatprep.subr.bf16.mxu0 %v15880_v52 }
0x1788   : > { %v5794_v49 = vpop.f32.mrb[72].mxu1 }
0x1789   : > { %v5801_v50 = vmul.f32 %v5794_v49, %v5794_v49  ;;  %v5796_v51 = vpop.f32.mrb[73].mxu1  ;;  %v5807_v55 = vrot.slane %v5794_v49, %v16588_v4 }
0x178a   : > { %v5798_v54 = vpop.f32.mrb[74].mxu1 }
0x178b   : > { %v5802_v56 = vsub.f32 %v5796_v51, %v5801_v50  ;;  %v5799_v58 = vpop.f32.mrb[75].mxu1  ;;  %v5808_v61 = vsub.f32 %v17199_v45, %v5807_v55  ;;  %v14677_v45 = vld [vmem:[#allocation15 + $0x5d0] sm:$0xff]  }
0x178c   : > { %v12205_v58 = vld [vmem:[#allocation16 + $0x7] ss:$0 sm:$0xff] }
0x178d   : > { %v5803_v63 = vmax.f32 %v5802_v56, 0.0 }
0x178f   : > { %v5809_v2 = vadd.f32 1e-05, %v5803_v63 }
0x1791   : > { %15048 = vrsqrt.f32 %v5809_v2 }
0x179b   : > { %v15049_v59 = vpop.eup %15048 }
0x179c   : > { %v5814_v62 = vrot.slane %v15049_v59, %v16588_v4 }
0x179e   : > { %v5815_v1 = vmul.f32 %v5814_v62, %v5808_v61 }
0x17a0   : > { %v5816_v3 = vmax.f32 %v5815_v1, 0.0 }
0x17a2   : > { %v5876_v43 = vpack.c.bf16 %v5816_v3, %v5816_v3  ;;  %v5869_v11 = vrot.slane %v5816_v3, 1  ;;  %v5871_v0 = vrot.slane %v5816_v3, 7 }
0x17a4   : > { %6060 = vmatprep.mubr.bf16.mxu0 %v5876_v43  ;;  %v5873_v15 = vsel %vm1083_vm3, %v5869_v11, %v5871_v0  ;;  %v5874_v46 = vsel %vm1069_vm2, %v5869_v11, %v5871_v0 }
0x17a5   : > { %v5875_v53 = vpack.c.bf16 %v5873_v15, %v5873_v15  ;;  %v5877_v12 = vpack.c.bf16 %v5874_v46, %v5874_v46 }
0x17a7   : > { %6061 = vmatmul.mubr.bf16.vlgmr.msra.gmra.mrb[76].mxu0 %v5875_v53 }
0x17a8   : > { %13718 = vmatpush3.bf16.msra.mxu0 %v14675_v16  ;;  %13733 = vmatprep.mubr.msk.bf16.mxu0 %vm15881_vm12, %v15880_v52 }
0x17a9   : > { %13719 = vmatprep.subr.bf16.mxu0 %v15880_v52 }
0x17ac   : > { %13720 = vmatpush3.bf16.msra.mxu0 %v14676_v17 }
0x17ad   : > { %13721 = vmatprep.subr.bf16.mxu0 %v15880_v52 }
0x17b0   : > { %13722 = vmatpush3.bf16.msra.mxu0 %v14677_v45 }
0x17b1   : > { %13723 = vmatprep.subr.bf16.mxu0 %v15880_v52 }
0x17b4   : > { %13724 = vmatpush3.bf16.msra.mxu0 %v14678_v18 }
0x17b5   : > { %13725 = vmatprep.subr.bf16.mxu0 %v15880_v52 }
0x17b8   : > { %13726 = vmatpush3.bf16.msra.mxu0 %v14679_v44 }
0x17b9   : > { %13727 = vmatprep.subr.bf16.mxu0 %v15880_v52 }
0x17bc   : > { %13728 = vmatpush3.bf16.msra.mxu0 %v14680_v20 }
0x17bd   : > { %13729 = vmatprep.subr.bf16.mxu0 %v15880_v52 }
0x17c0   : > { %13730 = vmatpush3.bf16.msra.mxu0 %v14681_v21 }
0x17c1   : > { %13731 = vmatprep.subr.bf16.mxu0 %v15880_v52 }
0x17c4   : > { %13732 = vmatpush3.bf16.msra.mxu0 %v14682_v22 }
0x17c5   : > { %13022 = vmatprep.subr.bf16.mxu0 %v14683_v57  ;;  %v17331_v57 = vld [vmem:[#allocation30 + $0xc4] ss:$8 sps:$4 sm:$0xff]  }
0x17c7   : > { %13734 = vmatmul.mubr.bf16.vlgmr.msra.gmra.mrb[80].mxu0 %v5877_v12 }
0x17c8   : > { %13023 = vmatpush3.bf16.msra.mxu0 %v14684_v48  ;;  %v17334_v48 = vld [vmem:[#allocation30 + $0xc0] ss:$8 sps:$4 sm:$0xff]  }
0x187a   : > { %v13007_v49 = vpop.f32.mrb[76].mxu0 }
0x187b   : > { %v13008_v50 = vpop.f32.mrb[77].mxu0 }
0x187c   : > { %v13009_v51 = vadd.f32 %v13008_v50, %v13007_v49  ;;  %v13010_v54 = vpop.f32.mrb[78].mxu0  ;;  %v17337_v49 = vld [vmem:[#allocation30 + $0xd4] ss:$8 sps:$4 sm:$0xff]   ;;  %v17340_v50 = vld [vmem:[#allocation30 + $0xd0] ss:$8 sps:$4 sm:$0xff]  }
0x187d   : > { %v13011_v56 = vpop.f32.mrb[79].mxu0  ;;  %v17346_v54 = vld [vmem:[#allocation30 + $0xe0] ss:$8 sps:$4 sm:$0xff]  }
0x187e   : > { %v6063_v63 = vadd.f32 %v13009_v51, %v12205_v58  ;;  %v17343_v51 = vld [vmem:[#allocation30 + $0xe4] ss:$8 sps:$4 sm:$0xff]   ;;  %v17349_v56 = vld [vmem:[#allocation30 + $0xf4] ss:$8 sps:$4 sm:$0xff]   ;;  %v17352_v58 = vld [vmem:[#allocation30 + $0xf0] ss:$8 sps:$4 sm:$0xff]  }
0x189a   : > { %v6102_v2 = vpop.f32.mrb[80].mxu0 }
0x189b   : > { %v17301_v55 = vadd.f32 %v6102_v2, %v6063_v63  ;;  %v13735_v59 = vpop.f32.mrb[81].mxu0  ;;  %v14685_v63 = vld [vmem:[#allocation15 + $0x648] sm:$0xff]  }
0x189c   : > { %v6105_v61 = vpop.f32.mrb[82].mxu0  ;;  %v14686_v2 = vld [vmem:[#allocation15 + $0x608] sm:$0xff]   ;;  %13024 = vmatprep.subr.bf16.mxu0 %v14685_v63  ;;  %v14687_v59 = vld [vmem:[#allocation15 + $0x650] sm:$0xff]  }
0x189d   : > { %v6108_v62 = vmul.f32 %v17301_v55, %v17301_v55  ;;  %v6109_v1 = vsel %vm2631_vm5, %v17301_v55, 0.0  ;;  %v13736_v3 = vpop.f32.mrb[83].mxu0  ;;  %13025 = vmatpush3.bf16.msra.mxu0 %v14686_v2  ;;  %v14688_v61 = vld [vmem:[#allocation15 + $0x610] sm:$0xff]  }
0x189e   : > { %v6110_v43 = vrot.slane %v6109_v1, 4  ;;  %13026 = vmatprep.subr.bf16.mxu0 %v14687_v59  ;;  %v14691_v3 = vld [vmem:[#allocation15 + $0x660] sm:$0xff]  }
0x189f   : > { %v6116_v11 = vsel %vm2631_vm5, %v6108_v62, 0.0  ;;  %v14689_v62 = vld [vmem:[#allocation15 + $0x658] sm:$0xff]  }
0x18a0   : > { %v6111_v0 = vadd.f32 %v6110_v43, %v6109_v1  ;;  %v6117_v15 = vrot.slane %v6116_v11, 4  ;;  %v14690_v1 = vld [vmem:[#allocation15 + $0x618] sm:$0xff]   ;;  %v14692_v43 = vld [vmem:[#allocation15 + $0x620] sm:$0xff]  }
0x18a1   : > { %13027 = vmatpush3.bf16.msra.mxu0 %v14688_v61 }
0x18a2   : > { %v6112_v16 = vrot.slane %v6111_v0, 2  ;;  %v6118_v53 = vadd.f32 %v6117_v15, %v6116_v11  ;;  %13028 = vmatprep.subr.bf16.mxu0 %v14689_v62  ;;  %v14693_v11 = vld [vmem:[#allocation15 + $0x668] sm:$0xff]   ;;  %v14695_v15 = vld [vmem:[#allocation15 + $0x670] sm:$0xff]  }
0x18a4   : > { %v6113_v17 = vadd.f32 %v6112_v16, %v6111_v0  ;;  %v6119_v45 = vrot.slane %v6118_v53, 2  ;;  %v14694_v0 = vld [vmem:[#allocation15 + $0x628] sm:$0xff]   ;;  %v14696_v16 = vld [vmem:[#allocation15 + $0x630] sm:$0xff]  }
0x18a5   : > { %13029 = vmatpush3.bf16.msra.mxu0 %v14690_v1 }
0x18a6   : > { %v6120_v18 = vadd.f32 %v6119_v45, %v6118_v53  ;;  %v6114_v44 = vrot.slane %v6113_v17, 1  ;;  %13030 = vmatprep.subr.bf16.mxu0 %v14691_v3  ;;  %v14697_v53 = vld [vmem:[#allocation15 + $0x678] sm:$0xff]  }
0x18a8   : > { %v6121_v20 = vrot.slane %v6120_v18, 1  ;;  %v6115_v21 = vadd.f32 %v6114_v44, %v6113_v17  ;;  %v14698_v17 = vld [vmem:[#allocation15 + $0x638] sm:$0xff]  }
0x18a9   : > { %13031 = vmatpush3.bf16.msra.mxu0 %v14692_v43 }
0x18aa   : > { %v6122_v22 = vadd.f32 %v6121_v20, %v6120_v18  ;;  %v6123_v12 = vpack.c.bf16 %v6115_v21, %v6115_v21  ;;  %13032 = vmatprep.subr.bf16.mxu0 %v14693_v11 }
0x18ac   : > { %v6124_v46 = vpack.c.bf16 %v6122_v22, %v6122_v22 }
0x18ad   : > { %13033 = vmatpush3.bf16.msra.mxu0 %v14694_v0 }
0x18ae   : > { %6157 = vmatprep.mubr.bf16.mxu1 %v6124_v46  ;;  %13034 = vmatprep.subr.bf16.mxu0 %v14695_v15  ;;  %v14699_v15 = vld [vmem:[#allocation15 + $0x680] sm:$0xff]  }
0x18af   : > { %6158 = vmatmul.mubr.bf16.vlgmr.msra.gmra.mrb[76].mxu1 %v6123_v12 }
0x18b0   : > { %6491 = vmatpush1.bf16.msra.mxu1 %v17206_v9 }
0x18b1   : > { %6492 = vmatprep.subr.bf16.mxu1 %v17209_v35  ;;  %13035 = vmatpush3.bf16.msra.mxu0 %v14696_v16 }
0x18b2   : > { %13036 = vmatprep.subr.bf16.mxu0 %v14697_v53  ;;  %v14702_v53 = vld [vmem:[#allocation15 + $0x698] sm:$0xff]  }
0x18b4   : > { %6493 = vmatpush1.bf16.msra.mxu1 %v17212_v36 }
0x18b5   : > { %6494 = vmatprep.subr.bf16.mxu1 %v17215_v33  ;;  %13037 = vmatpush3.bf16.msra.mxu0 %v14698_v17  ;;  %v14703_v17 = vld [vmem:[#allocation15 + $0x6a0] sm:$0xff]  }
0x18b6   : > { %13737 = vmatprep.subr.bf16.mxu0 %v15880_v52 }
0x18b8   : > { %6495 = vmatpush1.bf16.msra.mxu1 %v17218_v39 }
0x18b9   : > { %6496 = vmatprep.subr.bf16.mxu1 %v17221_v40 }
0x18bc   : > { %6497 = vmatpush1.bf16.msra.mxu1 %v17224_v13 }
0x18bd   : > { %6498 = vmatprep.subr.bf16.mxu1 %v17227_v37 }
0x18c0   : > { %6499 = vmatpush1.bf16.msra.mxu1 %v17230_v31 }
0x18c1   : > { %6500 = vmatprep.subr.bf16.mxu1 %v17233_v14 }
0x18c4   : > { %6501 = vmatpush1.bf16.msra.mxu1 %v17236_v24 }
0x18c5   : > { %6502 = vmatprep.subr.bf16.mxu1 %v17239_v25 }
0x18c8   : > { %6503 = vmatpush1.bf16.msra.mxu1 %v17242_v27 }
0x18c9   : > { %6504 = vmatprep.subr.bf16.mxu1 %v17245_v28 }
0x18cc   : > { %6505 = vmatpush1.bf16.msra.mxu1 %v17248_v29 }
0x18cd   : > { %6506 = vmatprep.subr.bf16.mxu1 %v17251_v32 }
0x18d0   : > { %6507 = vmatpush1.bf16.msra.mxu1 %v17254_v5 }
0x18d1   : > { %6508 = vmatprep.subr.bf16.mxu1 %v17257_v34 }
0x18d4   : > { %6509 = vmatpush1.bf16.msra.mxu1 %v17260_v26 }
0x18d5   : > { %6510 = vmatprep.subr.bf16.mxu1 %v17263_v6 }
0x18d8   : > { %6511 = vmatpush1.bf16.msra.mxu1 %v17266_v10 }
0x18d9   : > { %6512 = vmatprep.subr.bf16.mxu1 %v17269_v42 }
0x18dc   : > { %6513 = vmatpush1.bf16.msra.mxu1 %v17272_v7 }
0x18dd   : > { %6514 = vmatprep.subr.bf16.mxu1 %v17331_v57 }
0x18e0   : > { %6515 = vmatpush1.bf16.msra.mxu1 %v17334_v48 }
0x18e1   : > { %6516 = vmatprep.subr.bf16.mxu1 %v17337_v49 }
0x18e4   : > { %6517 = vmatpush1.bf16.msra.mxu1 %v17340_v50 }
0x18e5   : > { %6518 = vmatprep.subr.bf16.mxu1 %v17343_v51 }
0x18e8   : > { %6519 = vmatpush1.bf16.msra.mxu1 %v17346_v54 }
0x18e9   : > { %6520 = vmatprep.subr.bf16.mxu1 %v17349_v56 }
0x18ec   : > { %6521 = vmatpush1.bf16.msra.mxu1 %v17352_v58 }
0x18ed   : > { %6855 = vmatprep.subr.bf16.mxu1 %v17283_v8 }
0x1982   : > { %v6159_v45 = vpop.f32.mrb[76].mxu1 }
0x1983   : > { %v6166_v18 = vmul.f32 %v6159_v45, %v6159_v45  ;;  %v6161_v44 = vpop.f32.mrb[77].mxu1  ;;  %v6172_v63 = vrot.slane %v6159_v45, %v16588_v4  ;;  %v14704_v45 = vld [vmem:[#allocation15 + $0x6a8] sm:$0xff]  }
0x1984   : > { %v6163_v20 = vpop.f32.mrb[78].mxu1 }
0x1985   : > { %v6167_v21 = vsub.f32 %v6161_v44, %v6166_v18  ;;  %v6164_v22 = vpop.f32.mrb[79].mxu1  ;;  %v6173_v59 = vsub.f32 %v17301_v55, %v6172_v63  ;;  %v14700_v55 = vld [vmem:[#allocation15 + $0x688] sm:$0xff]   ;;  %v14705_v18 = vld [vmem:[#allocation15 + $0x6b0] sm:$0xff]   ;;  %v14706_v44 = vld [vmem:[#allocation15 + $0x6b8] sm:$0xff]  }
0x1986   : > { %v14707_v22 = vld [vmem:[#allocation15 + $0x700] sm:$0xff]  }
0x1987   : > { %v6168_v46 = vmax.f32 %v6167_v21, 0.0 }
0x1989   : > { %v6174_v12 = vadd.f32 1e-05, %v6168_v46  ;;  %v14708_v46 = vld [vmem:[#allocation15 + $0x6c0] sm:$0xff]  }
0x198b   : > { %15050 = vrsqrt.f32 %v6174_v12 }
0x1995   : > { %v15051_v2 = vpop.eup %15050 }
0x1996   : > { %v6179_v61 = vrot.slane %v15051_v2, %v16588_v4 }
0x1998   : > { %v6180_v62 = vmul.f32 %v6179_v61, %v6173_v59 }
0x199a   : > { %v17361_v1 = vadd.f32 %v6180_v62, %v17182_v38  ;;  %v14701_v38 = vld [vmem:[#allocation15 + $0x690] sm:$0xff]   ;;  %v12230_v62 = vld [vmem:[#allocation16 + $0x8] ss:$0 sm:$0xff] }
0x199c   : > { %v6241_v3 = vpack.c.bf16 %v17361_v1, %v17361_v1  ;;  %v6234_v43 = vrot.slane %v17361_v1, 1  ;;  %v6236_v11 = vrot.slane %v17361_v1, 7 }
0x199e   : > { %6425 = vmatprep.mubr.bf16.mxu0 %v6241_v3  ;;  %v6238_v0 = vsel %vm1083_vm3, %v6234_v43, %v6236_v11  ;;  %v6239_v20 = vsel %vm1069_vm2, %v6234_v43, %v6236_v11 }
0x199f   : > { %v6240_v16 = vpack.c.bf16 %v6238_v0, %v6238_v0  ;;  %v6242_v21 = vpack.c.bf16 %v6239_v20, %v6239_v20 }
0x19a1   : > { %6426 = vmatmul.mubr.bf16.vlgmr.msra.gmra.mrb[84].mxu0 %v6240_v16 }
0x19a2   : > { %13738 = vmatpush3.bf16.msra.mxu0 %v14699_v15  ;;  %13753 = vmatprep.mubr.msk.bf16.mxu0 %vm15881_vm12, %v15880_v52 }
0x19a3   : > { %13739 = vmatprep.subr.bf16.mxu0 %v15880_v52 }
0x19a6   : > { %13740 = vmatpush3.bf16.msra.mxu0 %v14700_v55 }
0x19a7   : > { %13741 = vmatprep.subr.bf16.mxu0 %v15880_v52 }
0x19aa   : > { %13742 = vmatpush3.bf16.msra.mxu0 %v14701_v38 }
0x19ab   : > { %13743 = vmatprep.subr.bf16.mxu0 %v15880_v52 }
0x19ae   : > { %13744 = vmatpush3.bf16.msra.mxu0 %v14702_v53 }
0x19af   : > { %13745 = vmatprep.subr.bf16.mxu0 %v15880_v52 }
0x19b2   : > { %13746 = vmatpush3.bf16.msra.mxu0 %v14703_v17 }
0x19b3   : > { %13747 = vmatprep.subr.bf16.mxu0 %v15880_v52 }
0x19b6   : > { %13748 = vmatpush3.bf16.msra.mxu0 %v14704_v45 }
0x19b7   : > { %13749 = vmatprep.subr.bf16.mxu0 %v15880_v52 }
0x19ba   : > { %13750 = vmatpush3.bf16.msra.mxu0 %v14705_v18 }
0x19bb   : > { %13751 = vmatprep.subr.bf16.mxu0 %v15880_v52 }
0x19be   : > { %13752 = vmatpush3.bf16.msra.mxu0 %v14706_v44 }
0x19bf   : > { %13053 = vmatprep.subr.bf16.mxu0 %v14707_v22 }
0x19c1   : > { %13754 = vmatmul.mubr.bf16.vlgmr.msra.gmra.mrb[88].mxu0 %v6242_v21 }
0x19c2   : > { %13054 = vmatpush3.bf16.msra.mxu0 %v14708_v46 }
0x1a74   : > { %v13038_v12 = vpop.f32.mrb[84].mxu0 }
0x1a75   : > { %v13039_v63 = vpop.f32.mrb[85].mxu0 }
0x1a76   : > { %v13040_v2 = vadd.f32 %v13039_v63, %v13038_v12  ;;  %v13041_v59 = vpop.f32.mrb[86].mxu0 }
0x1a77   : > { %v13042_v61 = vpop.f32.mrb[87].mxu0 }
0x1a78   : > { %v6428_v3 = vadd.f32 %v13040_v2, %v12230_v62 }
0x1a94   : > { %v6467_v0 = vpop.f32.mrb[88].mxu0 }
0x1a95   : > { %v17378_v15 = vadd.f32 %v6467_v0, %v6428_v3  ;;  %v13755_v16 = vpop.f32.mrb[89].mxu0  ;;  %v14709_v3 = vld [vmem:[#allocation15 + $0x708] sm:$0xff]  }
0x1a96   : > { %v6470_v55 = vpop.f32.mrb[90].mxu0  ;;  %v14710_v0 = vld [vmem:[#allocation15 + $0x6c8] sm:$0xff]   ;;  %13055 = vmatprep.subr.bf16.mxu0 %v14709_v3  ;;  %v14711_v16 = vld [vmem:[#allocation15 + $0x710] sm:$0xff]  }
0x1a97   : > { %v6473_v43 = vmul.f32 %v17378_v15, %v17378_v15  ;;  %v6474_v11 = vsel %vm2631_vm5, %v17378_v15, 0.0  ;;  %v13756_v38 = vpop.f32.mrb[91].mxu0  ;;  %13056 = vmatpush3.bf16.msra.mxu0 %v14710_v0  ;;  %v14712_v55 = vld [vmem:[#allocation15 + $0x6d0] sm:$0xff]  }
0x1a98   : > { %v6475_v53 = vrot.slane %v6474_v11, 4  ;;  %13057 = vmatprep.subr.bf16.mxu0 %v14711_v16  ;;  %v14715_v38 = vld [vmem:[#allocation15 + $0x720] sm:$0xff]  }
0x1a99   : > { %v6481_v17 = vsel %vm2631_vm5, %v6473_v43, 0.0  ;;  %v14713_v43 = vld [vmem:[#allocation15 + $0x718] sm:$0xff]  }
0x1a9a   : > { %v6476_v45 = vadd.f32 %v6475_v53, %v6474_v11  ;;  %v6482_v18 = vrot.slane %v6481_v17, 4  ;;  %v14714_v11 = vld [vmem:[#allocation15 + $0x6d8] sm:$0xff]   ;;  %v14716_v53 = vld [vmem:[#allocation15 + $0x6e0] sm:$0xff]  }
0x1a9b   : > { %13058 = vmatpush3.bf16.msra.mxu0 %v14712_v55 }
0x1a9c   : > { %v6477_v44 = vrot.slane %v6476_v45, 2  ;;  %v6483_v20 = vadd.f32 %v6482_v18, %v6481_v17  ;;  %13059 = vmatprep.subr.bf16.mxu0 %v14713_v43  ;;  %v14717_v17 = vld [vmem:[#allocation15 + $0x728] sm:$0xff]   ;;  %v14719_v18 = vld [vmem:[#allocation15 + $0x730] sm:$0xff]  }
0x1a9e   : > { %v6478_v21 = vadd.f32 %v6477_v44, %v6476_v45  ;;  %v6484_v22 = vrot.slane %v6483_v20, 2  ;;  %v14718_v45 = vld [vmem:[#allocation15 + $0x6e8] sm:$0xff]   ;;  %v14720_v44 = vld [vmem:[#allocation15 + $0x6f0] sm:$0xff]  }
0x1a9f   : > { %13060 = vmatpush3.bf16.msra.mxu0 %v14714_v11 }
0x1aa0   : > { %v6485_v46 = vadd.f32 %v6484_v22, %v6483_v20  ;;  %v6479_v12 = vrot.slane %v6478_v21, 1  ;;  %13061 = vmatprep.subr.bf16.mxu0 %v14715_v38  ;;  %v14721_v20 = vld [vmem:[#allocation15 + $0x738] sm:$0xff]  }
0x1aa2   : > { %v6486_v63 = vrot.slane %v6485_v46, 1  ;;  %v6480_v2 = vadd.f32 %v6479_v12, %v6478_v21  ;;  %v14722_v21 = vld [vmem:[#allocation15 + $0x6f8] sm:$0xff]  }
0x1aa3   : > { %13062 = vmatpush3.bf16.msra.mxu0 %v14716_v53 }
0x1aa4   : > { %v6487_v59 = vadd.f32 %v6486_v63, %v6485_v46  ;;  %v6488_v62 = vpack.c.bf16 %v6480_v2, %v6480_v2  ;;  %13063 = vmatprep.subr.bf16.mxu0 %v14717_v17 }
0x1aa6   : > { %v6489_v61 = vpack.c.bf16 %v6487_v59, %v6487_v59 }
0x1aa7   : > { %13064 = vmatpush3.bf16.msra.mxu0 %v14718_v45 }
0x1aa8   : > { %6522 = vmatprep.mubr.bf16.mxu1 %v6489_v61  ;;  %13065 = vmatprep.subr.bf16.mxu0 %v14719_v18  ;;  %v14723_v18 = vld [vmem:[#allocation15 + $0x740] sm:$0xff]  }
0x1aa9   : > { %6523 = vmatmul.mubr.bf16.vlgmr.msra.gmra.mrb[80].mxu1 %v6488_v62 }
0x1aaa   : > { %6856 = vmatpush1.bf16.msra.mxu1 %v17206_v9 }
0x1aab   : > { %6857 = vmatprep.subr.bf16.mxu1 %v17209_v35  ;;  %13066 = vmatpush3.bf16.msra.mxu0 %v14720_v44 }
0x1aac   : > { %13067 = vmatprep.subr.bf16.mxu0 %v14721_v20  ;;  %v14724_v20 = vld [vmem:[#allocation15 + $0x748] sm:$0xff]  }
0x1aae   : > { %6858 = vmatpush1.bf16.msra.mxu1 %v17212_v36 }
0x1aaf   : > { %6859 = vmatprep.subr.bf16.mxu1 %v17215_v33  ;;  %13068 = vmatpush3.bf16.msra.mxu0 %v14722_v21  ;;  %v14726_v21 = vld [vmem:[#allocation15 + $0x758] sm:$0xff]  }
0x1ab0   : > { %13757 = vmatprep.subr.bf16.mxu0 %v15880_v52 }
0x1ab2   : > { %6860 = vmatpush1.bf16.msra.mxu1 %v17218_v39 }
0x1ab3   : > { %6861 = vmatprep.subr.bf16.mxu1 %v17221_v40 }
0x1ab6   : > { %6862 = vmatpush1.bf16.msra.mxu1 %v17224_v13 }
0x1ab7   : > { %6863 = vmatprep.subr.bf16.mxu1 %v17227_v37 }
0x1aba   : > { %6864 = vmatpush1.bf16.msra.mxu1 %v17230_v31 }
0x1abb   : > { %6865 = vmatprep.subr.bf16.mxu1 %v17233_v14 }
0x1abe   : > { %6866 = vmatpush1.bf16.msra.mxu1 %v17236_v24 }
0x1abf   : > { %6867 = vmatprep.subr.bf16.mxu1 %v17239_v25 }
0x1ac2   : > { %6868 = vmatpush1.bf16.msra.mxu1 %v17242_v27 }
0x1ac3   : > { %6869 = vmatprep.subr.bf16.mxu1 %v17245_v28 }
0x1ac6   : > { %6870 = vmatpush1.bf16.msra.mxu1 %v17248_v29 }
0x1ac7   : > { %6871 = vmatprep.subr.bf16.mxu1 %v17251_v32 }
0x1aca   : > { %6872 = vmatpush1.bf16.msra.mxu1 %v17254_v5 }
0x1acb   : > { %6873 = vmatprep.subr.bf16.mxu1 %v17257_v34 }
0x1ace   : > { %6874 = vmatpush1.bf16.msra.mxu1 %v17260_v26 }
0x1acf   : > { %6875 = vmatprep.subr.bf16.mxu1 %v17263_v6 }
0x1ad2   : > { %6876 = vmatpush1.bf16.msra.mxu1 %v17266_v10 }
0x1ad3   : > { %6877 = vmatprep.subr.bf16.mxu1 %v17269_v42 }
0x1ad6   : > { %6878 = vmatpush1.bf16.msra.mxu1 %v17272_v7 }
0x1ad7   : > { %6879 = vmatprep.subr.bf16.mxu1 %v17331_v57 }
0x1ada   : > { %6880 = vmatpush1.bf16.msra.mxu1 %v17334_v48 }
0x1adb   : > { %6881 = vmatprep.subr.bf16.mxu1 %v17337_v49 }
0x1ade   : > { %6882 = vmatpush1.bf16.msra.mxu1 %v17340_v50 }
0x1adf   : > { %6883 = vmatprep.subr.bf16.mxu1 %v17343_v51 }
0x1ae2   : > { %6884 = vmatpush1.bf16.msra.mxu1 %v17346_v54 }
0x1ae3   : > { %6885 = vmatprep.subr.bf16.mxu1 %v17349_v56 }
0x1ae6   : > { %6886 = vmatpush1.bf16.msra.mxu1 %v17352_v58 }
0x1ae7   : > { %7220 = vmatprep.subr.bf16.mxu1 %v17283_v8 }
0x1b7c   : > { %v6524_v22 = vpop.f32.mrb[80].mxu1 }
0x1b7d   : > { %v6531_v46 = vmul.f32 %v6524_v22, %v6524_v22  ;;  %v6526_v12 = vpop.f32.mrb[81].mxu1  ;;  %v6537_v3 = vrot.slane %v6524_v22, %v16588_v4  ;;  %v14727_v22 = vld [vmem:[#allocation15 + $0x760] sm:$0xff]  }
0x1b7e   : > { %v6528_v63 = vpop.f32.mrb[82].mxu1 }
0x1b7f   : > { %v6532_v2 = vsub.f32 %v6526_v12, %v6531_v46  ;;  %v6529_v59 = vpop.f32.mrb[83].mxu1  ;;  %v6538_v16 = vsub.f32 %v17378_v15, %v6537_v3  ;;  %v14725_v15 = vld [vmem:[#allocation15 + $0x750] sm:$0xff]   ;;  %v14728_v46 = vld [vmem:[#allocation15 + $0x768] sm:$0xff]   ;;  %v14730_v63 = vld [vmem:[#allocation15 + $0x778] sm:$0xff]  }
0x1b80   : > { %v14729_v12 = vld [vmem:[#allocation15 + $0x770] sm:$0xff]  }
0x1b81   : > { %v6533_v61 = vmax.f32 %v6532_v2, 0.0 }
0x1b83   : > { %v6539_v62 = vadd.f32 1e-05, %v6533_v61  ;;  %v14731_v61 = vld [vmem:[#allocation15 + $0x7c0] sm:$0xff]  }
0x1b85   : > { %15052 = vrsqrt.f32 %v6539_v62  ;;  %v14732_v62 = vld [vmem:[#allocation15 + $0x780] sm:$0xff]  }
0x1b8f   : > { %v15053_v0 = vpop.eup %15052 }
0x1b90   : > { %v6544_v55 = vrot.slane %v15053_v0, %v16588_v4 }
0x1b92   : > { %v6545_v43 = vmul.f32 %v6544_v55, %v6538_v16 }
0x1b94   : > { %v6546_v11 = vmax.f32 %v6545_v43, 0.0 }
0x1b96   : > { %v6606_v38 = vpack.c.bf16 %v6546_v11, %v6546_v11  ;;  %v6599_v53 = vrot.slane %v6546_v11, 1  ;;  %v6601_v17 = vrot.slane %v6546_v11, 7  ;;  %v12255_v11 = vld [vmem:[#allocation16 + $0x9] ss:$0 sm:$0xff] }
0x1b98   : > { %6790 = vmatprep.mubr.bf16.mxu0 %v6606_v38  ;;  %v6603_v45 = vsel %vm1083_vm3, %v6599_v53, %v6601_v17  ;;  %v6604_v2 = vsel %vm1069_vm2, %v6599_v53, %v6601_v17 }
0x1b99   : > { %v6605_v44 = vpack.c.bf16 %v6603_v45, %v6603_v45  ;;  %v6607_v59 = vpack.c.bf16 %v6604_v2, %v6604_v2 }
0x1b9b   : > { %6791 = vmatmul.mubr.bf16.vlgmr.msra.gmra.mrb[92].mxu0 %v6605_v44 }
0x1b9c   : > { %13758 = vmatpush3.bf16.msra.mxu0 %v14723_v18  ;;  %13773 = vmatprep.mubr.msk.bf16.mxu0 %vm15881_vm12, %v15880_v52 }
0x1b9d   : > { %13759 = vmatprep.subr.bf16.mxu0 %v15880_v52 }
0x1ba0   : > { %13760 = vmatpush3.bf16.msra.mxu0 %v14724_v20 }
0x1ba1   : > { %13761 = vmatprep.subr.bf16.mxu0 %v15880_v52 }
0x1ba4   : > { %13762 = vmatpush3.bf16.msra.mxu0 %v14725_v15 }
0x1ba5   : > { %13763 = vmatprep.subr.bf16.mxu0 %v15880_v52 }
0x1ba8   : > { %13764 = vmatpush3.bf16.msra.mxu0 %v14726_v21 }
0x1ba9   : > { %13765 = vmatprep.subr.bf16.mxu0 %v15880_v52 }
0x1bac   : > { %13766 = vmatpush3.bf16.msra.mxu0 %v14727_v22 }
0x1bad   : > { %13767 = vmatprep.subr.bf16.mxu0 %v15880_v52 }
0x1bb0   : > { %13768 = vmatpush3.bf16.msra.mxu0 %v14728_v46 }
0x1bb1   : > { %13769 = vmatprep.subr.bf16.mxu0 %v15880_v52 }
0x1bb4   : > { %13770 = vmatpush3.bf16.msra.mxu0 %v14729_v12 }
0x1bb5   : > { %13771 = vmatprep.subr.bf16.mxu0 %v15880_v52 }
0x1bb8   : > { %13772 = vmatpush3.bf16.msra.mxu0 %v14730_v63 }
0x1bb9   : > { %13084 = vmatprep.subr.bf16.mxu0 %v14731_v61 }
0x1bbb   : > { %13774 = vmatmul.mubr.bf16.vlgmr.msra.gmra.mrb[96].mxu0 %v6607_v59 }
0x1bbc   : > { %13085 = vmatpush3.bf16.msra.mxu0 %v14732_v62 }
0x1c6e   : > { %v13069_v3 = vpop.f32.mrb[92].mxu0 }
0x1c6f   : > { %v13070_v0 = vpop.f32.mrb[93].mxu0 }
0x1c70   : > { %v13071_v16 = vadd.f32 %v13070_v0, %v13069_v3  ;;  %v13072_v55 = vpop.f32.mrb[94].mxu0 }
0x1c71   : > { %v13073_v43 = vpop.f32.mrb[95].mxu0 }
0x1c72   : > { %v6793_v38 = vadd.f32 %v13071_v16, %v12255_v11 }
0x1c8e   : > { %v6832_v45 = vpop.f32.mrb[96].mxu0 }
0x1c8f   : > { %v17432_v18 = vadd.f32 %v6832_v45, %v6793_v38  ;;  %v13775_v44 = vpop.f32.mrb[97].mxu0 }
0x1c90   : > { %v6835_v20 = vpop.f32.mrb[98].mxu0 }
0x1c91   : > { %v6838_v53 = vmul.f32 %v17432_v18, %v17432_v18  ;;  %v6839_v17 = vsel %vm2631_vm5, %v17432_v18, 0.0  ;;  %v13776_v15 = vpop.f32.mrb[99].mxu0 }
0x1c92   : > { %v6840_v21 = vrot.slane %v6839_v17, 4 }
0x1c93   : > { %v6846_v22 = vsel %vm2631_vm5, %v6838_v53, 0.0 }
0x1c94   : > { %v6841_v46 = vadd.f32 %v6840_v21, %v6839_v17  ;;  %v6847_v12 = vrot.slane %v6846_v22, 4 }
0x1c96   : > { %v6842_v63 = vrot.slane %v6841_v46, 2  ;;  %v6848_v2 = vadd.f32 %v6847_v12, %v6846_v22  ;;  %v14747_v22 = vld [vmem:[#allocation15 + $0x800] sm:$0xff]   ;;  %v14750_v12 = vld [vmem:[#allocation15 + $0x818] sm:$0xff]  }
0x1c98   : > { %v6843_v59 = vadd.f32 %v6842_v63, %v6841_v46  ;;  %v6849_v61 = vrot.slane %v6848_v2, 2  ;;  %v14751_v63 = vld [vmem:[#allocation15 + $0x820] sm:$0xff]  }
0x1c9a   : > { %v6850_v62 = vadd.f32 %v6849_v61, %v6848_v2  ;;  %v6844_v3 = vrot.slane %v6843_v59, 1  ;;  %v14752_v2 = vld [vmem:[#allocation15 + $0x828] sm:$0xff]   ;;  %v14754_v61 = vld [vmem:[#allocation15 + $0x838] sm:$0xff]  }
0x1c9c   : > { %v6851_v0 = vrot.slane %v6850_v62, 1  ;;  %v6845_v16 = vadd.f32 %v6844_v3, %v6843_v59  ;;  %v14753_v59 = vld [vmem:[#allocation15 + $0x830] sm:$0xff]  }
0x1c9e   : > { %v6852_v55 = vadd.f32 %v6851_v0, %v6850_v62  ;;  %v6853_v11 = vpack.c.bf16 %v6845_v16, %v6845_v16  ;;  %v14755_v0 = vld [vmem:[#allocation15 + $0x880] sm:$0xff]  }
0x1c9f   : > { %v14756_v16 = vld [vmem:[#allocation15 + $0x840] sm:$0xff]  }
0x1ca0   : > { %v6854_v43 = vpack.c.bf16 %v6852_v55, %v6852_v55 }
0x1ca2   : > { %6887 = vmatprep.mubr.bf16.mxu1 %v6854_v43 }
0x1ca3   : > { %6888 = vmatmul.mubr.bf16.vlgmr.msra.gmra.mrb[84].mxu1 %v6853_v11 }
0x1ca4   : > { %7221 = vmatpush1.bf16.msra.mxu1 %v17206_v9  ;;  %v14733_v9 = vld [vmem:[#allocation15 + $0x7c8] sm:$0xff]  }
0x1ca5   : > { %7222 = vmatprep.subr.bf16.mxu1 %v17209_v35  ;;  %v14734_v35 = vld [vmem:[#allocation15 + $0x788] sm:$0xff]   ;;  %13086 = vmatprep.subr.bf16.mxu0 %v14733_v9 }
0x1ca6   : > { %13087 = vmatpush3.bf16.msra.mxu0 %v14734_v35 }
0x1ca8   : > { %7223 = vmatpush1.bf16.msra.mxu1 %v17212_v36  ;;  %v14735_v36 = vld [vmem:[#allocation15 + $0x7d0] sm:$0xff]  }
0x1ca9   : > { %7224 = vmatprep.subr.bf16.mxu1 %v17215_v33  ;;  %v14736_v33 = vld [vmem:[#allocation15 + $0x790] sm:$0xff]   ;;  %13088 = vmatprep.subr.bf16.mxu0 %v14735_v36  ;;  %v12280_v36 = vld [vmem:[#allocation16 + $0xa] ss:$0 sm:$0xff] }
0x1caa   : > { %13089 = vmatpush3.bf16.msra.mxu0 %v14736_v33 }
0x1cac   : > { %7225 = vmatpush1.bf16.msra.mxu1 %v17218_v39  ;;  %v14737_v39 = vld [vmem:[#allocation15 + $0x7d8] sm:$0xff]  }
0x1cad   : > { %7226 = vmatprep.subr.bf16.mxu1 %v17221_v40  ;;  %v14738_v40 = vld [vmem:[#allocation15 + $0x798] sm:$0xff]   ;;  %13090 = vmatprep.subr.bf16.mxu0 %v14737_v39 }
0x1cae   : > { %13091 = vmatpush3.bf16.msra.mxu0 %v14738_v40 }
0x1cb0   : > { %7227 = vmatpush1.bf16.msra.mxu1 %v17224_v13  ;;  %v14739_v13 = vld [vmem:[#allocation15 + $0x7e0] sm:$0xff]  }
0x1cb1   : > { %7228 = vmatprep.subr.bf16.mxu1 %v17227_v37  ;;  %v14740_v37 = vld [vmem:[#allocation15 + $0x7a0] sm:$0xff]   ;;  %13092 = vmatprep.subr.bf16.mxu0 %v14739_v13 }
0x1cb2   : > { %13093 = vmatpush3.bf16.msra.mxu0 %v14740_v37 }
0x1cb4   : > { %7229 = vmatpush1.bf16.msra.mxu1 %v17230_v31  ;;  %v14741_v31 = vld [vmem:[#allocation15 + $0x7e8] sm:$0xff]  }
0x1cb5   : > { %7230 = vmatprep.subr.bf16.mxu1 %v17233_v14  ;;  %v14742_v14 = vld [vmem:[#allocation15 + $0x7a8] sm:$0xff]   ;;  %13094 = vmatprep.subr.bf16.mxu0 %v14741_v31 }
0x1cb6   : > { %13095 = vmatpush3.bf16.msra.mxu0 %v14742_v14 }
0x1cb8   : > { %7231 = vmatpush1.bf16.msra.mxu1 %v17236_v24  ;;  %v14743_v24 = vld [vmem:[#allocation15 + $0x7f0] sm:$0xff]  }
0x1cb9   : > { %7232 = vmatprep.subr.bf16.mxu1 %v17239_v25  ;;  %v14744_v25 = vld [vmem:[#allocation15 + $0x7b0] sm:$0xff]   ;;  %13096 = vmatprep.subr.bf16.mxu0 %v14743_v24 }
0x1cba   : > { %13097 = vmatpush3.bf16.msra.mxu0 %v14744_v25 }
0x1cbc   : > { %7233 = vmatpush1.bf16.msra.mxu1 %v17242_v27  ;;  %v14745_v27 = vld [vmem:[#allocation15 + $0x7f8] sm:$0xff]  }
0x1cbd   : > { %7234 = vmatprep.subr.bf16.mxu1 %v17245_v28  ;;  %v14746_v28 = vld [vmem:[#allocation15 + $0x7b8] sm:$0xff]   ;;  %13098 = vmatprep.subr.bf16.mxu0 %v14745_v27 }
0x1cbe   : > { %13099 = vmatpush3.bf16.msra.mxu0 %v14746_v28 }
0x1cbf   : > { %13777 = vmatprep.subr.bf16.mxu0 %v15880_v52 }
0x1cc0   : > { %7235 = vmatpush1.bf16.msra.mxu1 %v17248_v29 }
0x1cc1   : > { %7236 = vmatprep.subr.bf16.mxu1 %v17251_v32 }
0x1cc4   : > { %7237 = vmatpush1.bf16.msra.mxu1 %v17254_v5 }
0x1cc5   : > { %7238 = vmatprep.subr.bf16.mxu1 %v17257_v34 }
0x1cc8   : > { %7239 = vmatpush1.bf16.msra.mxu1 %v17260_v26 }
0x1cc9   : > { %7240 = vmatprep.subr.bf16.mxu1 %v17263_v6 }
0x1ccc   : > { %7241 = vmatpush1.bf16.msra.mxu1 %v17266_v10 }
0x1ccd   : > { %7242 = vmatprep.subr.bf16.mxu1 %v17269_v42 }
0x1cd0   : > { %7243 = vmatpush1.bf16.msra.mxu1 %v17272_v7 }
0x1cd1   : > { %7244 = vmatprep.subr.bf16.mxu1 %v17331_v57 }
0x1cd4   : > { %7245 = vmatpush1.bf16.msra.mxu1 %v17334_v48 }
0x1cd5   : > { %7246 = vmatprep.subr.bf16.mxu1 %v17337_v49 }
0x1cd8   : > { %7247 = vmatpush1.bf16.msra.mxu1 %v17340_v50 }
0x1cd9   : > { %7248 = vmatprep.subr.bf16.mxu1 %v17343_v51 }
0x1cdc   : > { %7249 = vmatpush1.bf16.msra.mxu1 %v17346_v54 }
0x1cdd   : > { %7250 = vmatprep.subr.bf16.mxu1 %v17349_v56 }
0x1ce0   : > { %7251 = vmatpush1.bf16.msra.mxu1 %v17352_v58 }
0x1ce1   : > { %7585 = vmatprep.subr.bf16.mxu1 %v17283_v8 }
0x1d76   : > { %v6889_v29 = vpop.f32.mrb[84].mxu1 }
0x1d77   : > { %v6896_v32 = vmul.f32 %v6889_v29, %v6889_v29  ;;  %v6891_v5 = vpop.f32.mrb[85].mxu1  ;;  %v6902_v7 = vrot.slane %v6889_v29, %v16588_v4 }
0x1d78   : > { %v6893_v34 = vpop.f32.mrb[86].mxu1 }
0x1d79   : > { %v6897_v26 = vsub.f32 %v6891_v5, %v6896_v32  ;;  %v6894_v6 = vpop.f32.mrb[87].mxu1  ;;  %v6903_v38 = vsub.f32 %v17432_v18, %v6902_v7  ;;  %v14748_v18 = vld [vmem:[#allocation15 + $0x808] sm:$0xff]  }
0x1d7b   : > { %v6898_v10 = vmax.f32 %v6897_v26, 0.0 }
0x1d7d   : > { %v6904_v42 = vadd.f32 1e-05, %v6898_v10 }
0x1d7f   : > { %15054 = vrsqrt.f32 %v6904_v42 }
0x1d89   : > { %v15055_v8 = vpop.eup %15054 }
0x1d8a   : > { %v6909_v45 = vrot.slane %v15055_v8, %v16588_v4 }
0x1d8c   : > { %v6910_v44 = vmul.f32 %v6909_v45, %v6903_v38 }
0x1d8e   : > { %v17476_v20 = vadd.f32 %v6910_v44, %v17361_v1  ;;  %v14749_v1 = vld [vmem:[#allocation15 + $0x810] sm:$0xff]   ;;  %v17500_v44 = vld [vmem:[#allocation30] ss:$8 sps:$4 sm:$0xff]  }
0x1d90   : > { %v6971_v53 = vpack.c.bf16 %v17476_v20, %v17476_v20  ;;  %v6964_v17 = vrot.slane %v17476_v20, 1  ;;  %v6966_v15 = vrot.slane %v17476_v20, 7 }
0x1d92   : > { %7155 = vmatprep.mubr.bf16.mxu0 %v6971_v53  ;;  %v6968_v21 = vsel %vm1083_vm3, %v6964_v17, %v6966_v15  ;;  %v6969_v62 = vsel %vm1069_vm2, %v6964_v17, %v6966_v15  ;;  %v17503_v53 = vld [vmem:[#allocation30 + $0x14] ss:$8 sps:$4 sm:$0xff]   ;;  %v17506_v17 = vld [vmem:[#allocation30 + $0x10] ss:$8 sps:$4 sm:$0xff]   ;;  %v17509_v15 = vld [vmem:[#allocation30 + $0x24] ss:$8 sps:$4 sm:$0xff]  }
0x1d93   : > { %v6970_v46 = vpack.c.bf16 %v6968_v21, %v6968_v21  ;;  %v6972_v3 = vpack.c.bf16 %v6969_v62, %v6969_v62  ;;  %v17512_v21 = vld [vmem:[#allocation30 + $0x20] ss:$8 sps:$4 sm:$0xff]   ;;  %v17542_v62 = vld [vmem:[#allocation30 + $0x70] ss:$8 sps:$4 sm:$0xff]  }
0x1d95   : > { %7156 = vmatmul.mubr.bf16.vlgmr.msra.gmra.mrb[100].mxu0 %v6970_v46  ;;  %v17518_v46 = vld [vmem:[#allocation30 + $0x30] ss:$8 sps:$4 sm:$0xff]  }
0x1d96   : > { %13778 = vmatpush3.bf16.msra.mxu0 %v14747_v22  ;;  %13793 = vmatprep.mubr.msk.bf16.mxu0 %vm15881_vm12, %v15880_v52  ;;  %v17515_v22 = vld [vmem:[#allocation30 + $0x34] ss:$8 sps:$4 sm:$0xff]  }
0x1d97   : > { %13779 = vmatprep.subr.bf16.mxu0 %v15880_v52 }
0x1d9a   : > { %13780 = vmatpush3.bf16.msra.mxu0 %v14748_v18  ;;  %v17521_v18 = vld [vmem:[#allocation30 + $0x44] ss:$8 sps:$4 sm:$0xff]  }
0x1d9b   : > { %13781 = vmatprep.subr.bf16.mxu0 %v15880_v52 }
0x1d9e   : > { %13782 = vmatpush3.bf16.msra.mxu0 %v14749_v1  ;;  %v17524_v1 = vld [vmem:[#allocation30 + $0x40] ss:$8 sps:$4 sm:$0xff]  }
0x1d9f   : > { %13783 = vmatprep.subr.bf16.mxu0 %v15880_v52 }
0x1da2   : > { %13784 = vmatpush3.bf16.msra.mxu0 %v14750_v12  ;;  %v17527_v12 = vld [vmem:[#allocation30 + $0x54] ss:$8 sps:$4 sm:$0xff]  }
0x1da3   : > { %13785 = vmatprep.subr.bf16.mxu0 %v15880_v52 }
0x1da6   : > { %13786 = vmatpush3.bf16.msra.mxu0 %v14751_v63  ;;  %v17530_v63 = vld [vmem:[#allocation30 + $0x50] ss:$8 sps:$4 sm:$0xff]  }
0x1da7   : > { %13787 = vmatprep.subr.bf16.mxu0 %v15880_v52 }
0x1daa   : > { %13788 = vmatpush3.bf16.msra.mxu0 %v14752_v2  ;;  %v17533_v2 = vld [vmem:[#allocation30 + $0x64] ss:$8 sps:$4 sm:$0xff]  }
0x1dab   : > { %13789 = vmatprep.subr.bf16.mxu0 %v15880_v52 }
0x1dae   : > { %13790 = vmatpush3.bf16.msra.mxu0 %v14753_v59  ;;  %v17536_v59 = vld [vmem:[#allocation30 + $0x60] ss:$8 sps:$4 sm:$0xff]  }
0x1daf   : > { %13791 = vmatprep.subr.bf16.mxu0 %v15880_v52 }
0x1db2   : > { %13792 = vmatpush3.bf16.msra.mxu0 %v14754_v61  ;;  %v17539_v61 = vld [vmem:[#allocation30 + $0x74] ss:$8 sps:$4 sm:$0xff]  }
0x1db3   : > { %13115 = vmatprep.subr.bf16.mxu0 %v14755_v0  ;;  %v17548_v0 = vld [vmem:[#allocation30 + $0x80] ss:$8 sps:$4 sm:$0xff]  }
0x1db5   : > { %13794 = vmatmul.mubr.bf16.vlgmr.msra.gmra.mrb[104].mxu0 %v6972_v3  ;;  %v17545_v3 = vld [vmem:[#allocation30 + $0x84] ss:$8 sps:$4 sm:$0xff]  }
0x1db6   : > { %13116 = vmatpush3.bf16.msra.mxu0 %v14756_v16  ;;  %v17551_v16 = vld [vmem:[#allocation30 + $0x94] ss:$8 sps:$4 sm:$0xff]  }
0x1e68   : > { %v13100_v55 = vpop.f32.mrb[100].mxu0 }
0x1e69   : > { %v13101_v43 = vpop.f32.mrb[101].mxu0 }
0x1e6a   : > { %v13102_v11 = vadd.f32 %v13101_v43, %v13100_v55  ;;  %v13103_v9 = vpop.f32.mrb[102].mxu0  ;;  %v17554_v55 = vld [vmem:[#allocation30 + $0x90] ss:$8 sps:$4 sm:$0xff]   ;;  %v17557_v43 = vld [vmem:[#allocation30 + $0xa4] ss:$8 sps:$4 sm:$0xff]  }
0x1e6b   : > { %v13104_v35 = vpop.f32.mrb[103].mxu0  ;;  %v17563_v9 = vld [vmem:[#allocation30 + $0xb4] ss:$8 sps:$4 sm:$0xff]  }
0x1e6c   : > { %v7158_v33 = vadd.f32 %v13102_v11, %v12280_v36  ;;  %v17560_v11 = vld [vmem:[#allocation30 + $0xa0] ss:$8 sps:$4 sm:$0xff]   ;;  %v17566_v35 = vld [vmem:[#allocation30 + $0xb0] ss:$8 sps:$4 sm:$0xff]   ;;  %v17577_v36 = vld [vmem:[#allocation30 + $0x4] ss:$8 sps:$4 sm:$0xff]  }
0x1e88   : > { %v7197_v39 = vpop.f32.mrb[104].mxu0 }
0x1e89   : > { %v17493_v40 = vadd.f32 %v7197_v39, %v7158_v33  ;;  %v13795_v13 = vpop.f32.mrb[105].mxu0  ;;  %v14757_v33 = vld [vmem:[#allocation15 + $0x888] sm:$0xff]   ;;  %v14763_v39 = vld [vmem:[#allocation15 + $0x8a0] sm:$0xff]  }
0x1e8a   : > { %v7200_v37 = vpop.f32.mrb[106].mxu0  ;;  %13117 = vmatprep.subr.bf16.mxu0 %v14757_v33  ;;  %v14767_v13 = vld [vmem:[#allocation15 + $0x8b0] sm:$0xff]  }
0x1e8b   : > { %v7203_v31 = vmul.f32 %v17493_v40, %v17493_v40  ;;  %v7204_v14 = vsel %vm2631_vm5, %v17493_v40, 0.0  ;;  %v13796_v24 = vpop.f32.mrb[107].mxu0  ;;  %v14768_v37 = vld [vmem:[#allocation15 + $0x870] sm:$0xff]  }
0x1e8c   : > { %v7205_v25 = vrot.slane %v7204_v14, 4 }
0x1e8d   : > { %v7211_v27 = vsel %vm2631_vm5, %v7203_v31, 0.0  ;;  %v14769_v31 = vld [vmem:[#allocation15 + $0x8b8] sm:$0xff]  }
0x1e8e   : > { %v7206_v28 = vadd.f32 %v7205_v25, %v7204_v14  ;;  %v7212_v29 = vrot.slane %v7211_v27, 4  ;;  %v14770_v14 = vld [vmem:[#allocation15 + $0x878] sm:$0xff]  }
0x1e90   : > { %v7207_v32 = vrot.slane %v7206_v28, 2  ;;  %v7213_v5 = vadd.f32 %v7212_v29, %v7211_v27 }
0x1e92   : > { %v7208_v34 = vadd.f32 %v7207_v32, %v7206_v28  ;;  %v7214_v26 = vrot.slane %v7213_v5, 2 }
0x1e94   : > { %v7215_v6 = vadd.f32 %v7214_v26, %v7213_v5  ;;  %v7209_v10 = vrot.slane %v7208_v34, 1 }
0x1e96   : > { %v7216_v42 = vrot.slane %v7215_v6, 1  ;;  %v7210_v7 = vadd.f32 %v7209_v10, %v7208_v34 }
0x1e98   : > { %v7217_v8 = vadd.f32 %v7216_v42, %v7215_v6  ;;  %v7218_v45 = vpack.c.bf16 %v7210_v7, %v7210_v7 }
0x1e9a   : > { %v7219_v38 = vpack.c.bf16 %v7217_v8, %v7217_v8 }
0x1e9c   : > { %7252 = vmatprep.mubr.bf16.mxu1 %v7219_v38 }
0x1e9d   : > { %7253 = vmatmul.mubr.bf16.vlgmr.msra.gmra.mrb[88].mxu1 %v7218_v45 }
0x1e9e   : > { %7586 = vmatpush1.bf16.msra.mxu1 %v17500_v44 }
0x1e9f   : > { %7587 = vmatprep.subr.bf16.mxu1 %v17503_v53 }
0x1ea2   : > { %7588 = vmatpush1.bf16.msra.mxu1 %v17506_v17 }
0x1ea3   : > { %7589 = vmatprep.subr.bf16.mxu1 %v17509_v15 }
0x1ea6   : > { %7590 = vmatpush1.bf16.msra.mxu1 %v17512_v21 }
0x1ea7   : > { %7591 = vmatprep.subr.bf16.mxu1 %v17515_v22 }
0x1eaa   : > { %7592 = vmatpush1.bf16.msra.mxu1 %v17518_v46 }
0x1eab   : > { %7593 = vmatprep.subr.bf16.mxu1 %v17521_v18 }
0x1eae   : > { %7594 = vmatpush1.bf16.msra.mxu1 %v17524_v1 }
0x1eaf   : > { %7595 = vmatprep.subr.bf16.mxu1 %v17527_v12 }
0x1eb2   : > { %7596 = vmatpush1.bf16.msra.mxu1 %v17530_v63 }
0x1eb3   : > { %7597 = vmatprep.subr.bf16.mxu1 %v17533_v2 }
0x1eb6   : > { %7598 = vmatpush1.bf16.msra.mxu1 %v17536_v59 }
0x1eb7   : > { %7599 = vmatprep.subr.bf16.mxu1 %v17539_v61 }
0x1eba   : > { %7600 = vmatpush1.bf16.msra.mxu1 %v17542_v62 }
0x1ebb   : > { %7601 = vmatprep.subr.bf16.mxu1 %v17545_v3 }
0x1ebe   : > { %7602 = vmatpush1.bf16.msra.mxu1 %v17548_v0 }
0x1ebf   : > { %7603 = vmatprep.subr.bf16.mxu1 %v17551_v16 }
0x1ec2   : > { %7604 = vmatpush1.bf16.msra.mxu1 %v17554_v55 }
0x1ec3   : > { %7605 = vmatprep.subr.bf16.mxu1 %v17557_v43 }
0x1ec6   : > { %7606 = vmatpush1.bf16.msra.mxu1 %v17560_v11 }
0x1ec7   : > { %7607 = vmatprep.subr.bf16.mxu1 %v17563_v9 }
0x1eca   : > { %7608 = vmatpush1.bf16.msra.mxu1 %v17566_v35 }
0x1ecb   : > { %7609 = vmatprep.subr.bf16.mxu1 %v17331_v57  ;;  %v14758_v57 = vld [vmem:[#allocation15 + $0x848] sm:$0xff]  }
0x1ecc   : > { %13118 = vmatpush3.bf16.msra.mxu0 %v14758_v57 }
0x1ece   : > { %7610 = vmatpush1.bf16.msra.mxu1 %v17334_v48  ;;  %v14759_v48 = vld [vmem:[#allocation15 + $0x890] sm:$0xff]  }
0x1ecf   : > { %7611 = vmatprep.subr.bf16.mxu1 %v17337_v49  ;;  %v14760_v49 = vld [vmem:[#allocation15 + $0x850] sm:$0xff]   ;;  %13119 = vmatprep.subr.bf16.mxu0 %v14759_v48  ;;  %v14771_v48 = vld [vmem:[#allocation15 + $0x8c0] sm:$0xff]  }
0x1ed0   : > { %13120 = vmatpush3.bf16.msra.mxu0 %v14760_v49 }
0x1ed2   : > { %7612 = vmatpush1.bf16.msra.mxu1 %v17340_v50  ;;  %v14761_v50 = vld [vmem:[#allocation15 + $0x898] sm:$0xff]  }
0x1ed3   : > { %7613 = vmatprep.subr.bf16.mxu1 %v17343_v51  ;;  %v14762_v51 = vld [vmem:[#allocation15 + $0x858] sm:$0xff]   ;;  %13121 = vmatprep.subr.bf16.mxu0 %v14761_v50  ;;  %v14772_v50 = vld [vmem:[#allocation15 + $0x8c8] sm:$0xff]  }
0x1ed4   : > { %13122 = vmatpush3.bf16.msra.mxu0 %v14762_v51  ;;  %v14774_v51 = vld [vmem:[#allocation15 + $0x8d8] sm:$0xff]  }
0x1ed5   : > { %13123 = vmatprep.subr.bf16.mxu0 %v14763_v39  ;;  %v14775_v39 = vld [vmem:[#allocation15 + $0x8e0] sm:$0xff]  }
0x1ed6   : > { %7614 = vmatpush1.bf16.msra.mxu1 %v17346_v54  ;;  %v14764_v54 = vld [vmem:[#allocation15 + $0x860] sm:$0xff]  }
0x1ed7   : > { %7615 = vmatprep.subr.bf16.mxu1 %v17349_v56  ;;  %v14765_v56 = vld [vmem:[#allocation15 + $0x8a8] sm:$0xff]  }
0x1ed8   : > { %13124 = vmatpush3.bf16.msra.mxu0 %v14764_v54  ;;  %v14776_v54 = vld [vmem:[#allocation15 + $0x8e8] sm:$0xff]  }
0x1ed9   : > { %13125 = vmatprep.subr.bf16.mxu0 %v14765_v56  ;;  %v14777_v56 = vld [vmem:[#allocation15 + $0x8f0] sm:$0xff]  }
0x1eda   : > { %7616 = vmatpush1.bf16.msra.mxu1 %v17352_v58  ;;  %v14766_v58 = vld [vmem:[#allocation15 + $0x868] sm:$0xff]  }
0x1edb   : > { %7950 = vmatprep.subr.bf16.mxu1 %v17577_v36 }
0x1edc   : > { %13126 = vmatpush3.bf16.msra.mxu0 %v14766_v58  ;;  %v14778_v58 = vld [vmem:[#allocation15 + $0x8f8] sm:$0xff]  }
0x1edd   : > { %13127 = vmatprep.subr.bf16.mxu0 %v14767_v13 }
0x1ee0   : > { %13128 = vmatpush3.bf16.msra.mxu0 %v14768_v37 }
0x1ee1   : > { %13129 = vmatprep.subr.bf16.mxu0 %v14769_v31  ;;  %v14779_v31 = vld [vmem:[#allocation15 + $0x940] sm:$0xff]  }
0x1ee4   : > { %13130 = vmatpush3.bf16.msra.mxu0 %v14770_v14  ;;  %v14780_v14 = vld [vmem:[#allocation15 + $0x900] sm:$0xff]  }
0x1ee5   : > { %13797 = vmatprep.subr.bf16.mxu0 %v15880_v52 }
0x1f70   : > { %v7254_v24 = vpop.f32.mrb[88].mxu1 }
0x1f71   : > { %v7261_v25 = vmul.f32 %v7254_v24, %v7254_v24  ;;  %v7256_v27 = vpop.f32.mrb[89].mxu1  ;;  %v7267_v26 = vrot.slane %v7254_v24, %v16588_v4 }
0x1f72   : > { %v7258_v28 = vpop.f32.mrb[90].mxu1 }
0x1f73   : > { %v7262_v29 = vsub.f32 %v7256_v27, %v7261_v25  ;;  %v7259_v32 = vpop.f32.mrb[91].mxu1  ;;  %v7268_v10 = vsub.f32 %v17493_v40, %v7267_v26  ;;  %v14773_v40 = vld [vmem:[#allocation15 + $0x8d0] sm:$0xff]  }
0x1f74   : > { %v12305_v32 = vld [vmem:[#allocation16 + $0xb] ss:$0 sm:$0xff] }
0x1f75   : > { %v7263_v5 = vmax.f32 %v7262_v29, 0.0 }
0x1f77   : > { %v7269_v34 = vadd.f32 1e-05, %v7263_v5 }
0x1f79   : > { %15056 = vrsqrt.f32 %v7269_v34 }
0x1f83   : > { %v15057_v6 = vpop.eup %15056 }
0x1f84   : > { %v7274_v42 = vrot.slane %v15057_v6, %v16588_v4 }
0x1f86   : > { %v7275_v7 = vmul.f32 %v7274_v42, %v7268_v10 }
0x1f88   : > { %v7276_v8 = vmax.f32 %v7275_v7, 0.0 }
0x1f8a   : > { %v7336_v38 = vpack.c.bf16 %v7276_v8, %v7276_v8  ;;  %v7329_v45 = vrot.slane %v7276_v8, 1  ;;  %v7331_v33 = vrot.slane %v7276_v8, 7 }
0x1f8c   : > { %7520 = vmatprep.mubr.bf16.mxu0 %v7336_v38  ;;  %v7333_v57 = vsel %vm1083_vm3, %v7329_v45, %v7331_v33  ;;  %v7334_v13 = vsel %vm1069_vm2, %v7329_v45, %v7331_v33 }
0x1f8d   : > { %v7335_v49 = vpack.c.bf16 %v7333_v57, %v7333_v57  ;;  %v7337_v37 = vpack.c.bf16 %v7334_v13, %v7334_v13 }
0x1f8f   : > { %7521 = vmatmul.mubr.bf16.vlgmr.msra.gmra.mrb[108].mxu0 %v7335_v49 }
0x1f90   : > { %13798 = vmatpush3.bf16.msra.mxu0 %v14771_v48  ;;  %13813 = vmatprep.mubr.msk.bf16.mxu0 %vm15881_vm12, %v15880_v52 }
0x1f91   : > { %13799 = vmatprep.subr.bf16.mxu0 %v15880_v52 }
0x1f94   : > { %13800 = vmatpush3.bf16.msra.mxu0 %v14772_v50 }
0x1f95   : > { %13801 = vmatprep.subr.bf16.mxu0 %v15880_v52 }
0x1f98   : > { %13802 = vmatpush3.bf16.msra.mxu0 %v14773_v40 }
0x1f99   : > { %13803 = vmatprep.subr.bf16.mxu0 %v15880_v52 }
0x1f9c   : > { %13804 = vmatpush3.bf16.msra.mxu0 %v14774_v51 }
0x1f9d   : > { %13805 = vmatprep.subr.bf16.mxu0 %v15880_v52 }
0x1fa0   : > { %13806 = vmatpush3.bf16.msra.mxu0 %v14775_v39 }
0x1fa1   : > { %13807 = vmatprep.subr.bf16.mxu0 %v15880_v52 }
0x1fa4   : > { %13808 = vmatpush3.bf16.msra.mxu0 %v14776_v54 }
0x1fa5   : > { %13809 = vmatprep.subr.bf16.mxu0 %v15880_v52 }
0x1fa8   : > { %13810 = vmatpush3.bf16.msra.mxu0 %v14777_v56 }
0x1fa9   : > { %13811 = vmatprep.subr.bf16.mxu0 %v15880_v52 }
0x1fac   : > { %13812 = vmatpush3.bf16.msra.mxu0 %v14778_v58 }
0x1fad   : > { %13146 = vmatprep.subr.bf16.mxu0 %v14779_v31  ;;  %v17625_v31 = vld [vmem:[#allocation30 + $0xc4] ss:$8 sps:$4 sm:$0xff]  }
0x1faf   : > { %13814 = vmatmul.mubr.bf16.vlgmr.msra.gmra.mrb[112].mxu0 %v7337_v37 }
0x1fb0   : > { %13147 = vmatpush3.bf16.msra.mxu0 %v14780_v14  ;;  %v17628_v14 = vld [vmem:[#allocation30 + $0xc0] ss:$8 sps:$4 sm:$0xff]  }
0x2062   : > { %v13131_v24 = vpop.f32.mrb[108].mxu0 }
0x2063   : > { %v13132_v25 = vpop.f32.mrb[109].mxu0 }
0x2064   : > { %v13133_v27 = vadd.f32 %v13132_v25, %v13131_v24  ;;  %v13134_v28 = vpop.f32.mrb[110].mxu0  ;;  %v17631_v24 = vld [vmem:[#allocation30 + $0xd4] ss:$8 sps:$4 sm:$0xff]   ;;  %v17634_v25 = vld [vmem:[#allocation30 + $0xd0] ss:$8 sps:$4 sm:$0xff]  }
0x2065   : > { %v13135_v29 = vpop.f32.mrb[111].mxu0  ;;  %v17640_v28 = vld [vmem:[#allocation30 + $0xe0] ss:$8 sps:$4 sm:$0xff]  }
0x2066   : > { %v7523_v5 = vadd.f32 %v13133_v27, %v12305_v32  ;;  %v17637_v27 = vld [vmem:[#allocation30 + $0xe4] ss:$8 sps:$4 sm:$0xff]   ;;  %v17643_v29 = vld [vmem:[#allocation30 + $0xf4] ss:$8 sps:$4 sm:$0xff]   ;;  %v17646_v32 = vld [vmem:[#allocation30 + $0xf0] ss:$8 sps:$4 sm:$0xff]  }
0x2082   : > { %v7562_v34 = vpop.f32.mrb[112].mxu0 }
0x2083   : > { %v17595_v26 = vadd.f32 %v7562_v34, %v7523_v5  ;;  %v13815_v6 = vpop.f32.mrb[113].mxu0  ;;  %v14781_v5 = vld [vmem:[#allocation15 + $0x948] sm:$0xff]  }
0x2084   : > { %v7565_v10 = vpop.f32.mrb[114].mxu0  ;;  %v14782_v34 = vld [vmem:[#allocation15 + $0x908] sm:$0xff]   ;;  %13148 = vmatprep.subr.bf16.mxu0 %v14781_v5  ;;  %v14783_v6 = vld [vmem:[#allocation15 + $0x950] sm:$0xff]  }
0x2085   : > { %v7568_v42 = vmul.f32 %v17595_v26, %v17595_v26  ;;  %v7569_v7 = vsel %vm2631_vm5, %v17595_v26, 0.0  ;;  %v13816_v8 = vpop.f32.mrb[115].mxu0  ;;  %13149 = vmatpush3.bf16.msra.mxu0 %v14782_v34  ;;  %v14784_v10 = vld [vmem:[#allocation15 + $0x910] sm:$0xff]  }
0x2086   : > { %v7570_v38 = vrot.slane %v7569_v7, 4  ;;  %13150 = vmatprep.subr.bf16.mxu0 %v14783_v6  ;;  %v14787_v8 = vld [vmem:[#allocation15 + $0x960] sm:$0xff]  }
0x2087   : > { %v7576_v45 = vsel %vm2631_vm5, %v7568_v42, 0.0  ;;  %v14785_v42 = vld [vmem:[#allocation15 + $0x958] sm:$0xff]  }
0x2088   : > { %v7571_v33 = vadd.f32 %v7570_v38, %v7569_v7  ;;  %v7577_v57 = vrot.slane %v7576_v45, 4  ;;  %v14786_v7 = vld [vmem:[#allocation15 + $0x918] sm:$0xff]   ;;  %v14788_v38 = vld [vmem:[#allocation15 + $0x920] sm:$0xff]  }
0x2089   : > { %13151 = vmatpush3.bf16.msra.mxu0 %v14784_v10 }
0x208a   : > { %v7572_v48 = vrot.slane %v7571_v33, 2  ;;  %v7578_v49 = vadd.f32 %v7577_v57, %v7576_v45  ;;  %13152 = vmatprep.subr.bf16.mxu0 %v14785_v42  ;;  %v14789_v45 = vld [vmem:[#allocation15 + $0x968] sm:$0xff]   ;;  %v14791_v57 = vld [vmem:[#allocation15 + $0x970] sm:$0xff]  }
0x208c   : > { %v7573_v50 = vadd.f32 %v7572_v48, %v7571_v33  ;;  %v7579_v40 = vrot.slane %v7578_v49, 2  ;;  %v14790_v33 = vld [vmem:[#allocation15 + $0x928] sm:$0xff]   ;;  %v14792_v48 = vld [vmem:[#allocation15 + $0x930] sm:$0xff]  }
0x208d   : > { %13153 = vmatpush3.bf16.msra.mxu0 %v14786_v7 }
0x208e   : > { %v7580_v51 = vadd.f32 %v7579_v40, %v7578_v49  ;;  %v7574_v39 = vrot.slane %v7573_v50, 1  ;;  %13154 = vmatprep.subr.bf16.mxu0 %v14787_v8  ;;  %v14793_v49 = vld [vmem:[#allocation15 + $0x978] sm:$0xff]  }
0x2090   : > { %v7581_v54 = vrot.slane %v7580_v51, 1  ;;  %v7575_v56 = vadd.f32 %v7574_v39, %v7573_v50  ;;  %v14794_v50 = vld [vmem:[#allocation15 + $0x938] sm:$0xff]  }
0x2091   : > { %13155 = vmatpush3.bf16.msra.mxu0 %v14788_v38 }
0x2092   : > { %v7582_v58 = vadd.f32 %v7581_v54, %v7580_v51  ;;  %v7583_v37 = vpack.c.bf16 %v7575_v56, %v7575_v56  ;;  %13156 = vmatprep.subr.bf16.mxu0 %v14789_v45 }
0x2094   : > { %v7584_v13 = vpack.c.bf16 %v7582_v58, %v7582_v58 }
0x2095   : > { %13157 = vmatpush3.bf16.msra.mxu0 %v14790_v33 }
0x2096   : > { %7617 = vmatprep.mubr.bf16.mxu1 %v7584_v13  ;;  %13158 = vmatprep.subr.bf16.mxu0 %v14791_v57  ;;  %v14795_v57 = vld [vmem:[#allocation15 + $0x980] sm:$0xff]  }
0x2097   : > { %7618 = vmatmul.mubr.bf16.vlgmr.msra.gmra.mrb[92].mxu1 %v7583_v37 }
0x2098   : > { %7951 = vmatpush1.bf16.msra.mxu1 %v17500_v44 }
0x2099   : > { %7952 = vmatprep.subr.bf16.mxu1 %v17503_v53  ;;  %13159 = vmatpush3.bf16.msra.mxu0 %v14792_v48 }
0x209a   : > { %13160 = vmatprep.subr.bf16.mxu0 %v14793_v49  ;;  %v14798_v49 = vld [vmem:[#allocation15 + $0x998] sm:$0xff]  }
0x209c   : > { %7953 = vmatpush1.bf16.msra.mxu1 %v17506_v17 }
0x209d   : > { %7954 = vmatprep.subr.bf16.mxu1 %v17509_v15  ;;  %13161 = vmatpush3.bf16.msra.mxu0 %v14794_v50  ;;  %v14799_v50 = vld [vmem:[#allocation15 + $0x9a0] sm:$0xff]  }
0x209e   : > { %13817 = vmatprep.subr.bf16.mxu0 %v15880_v52 }
0x20a0   : > { %7955 = vmatpush1.bf16.msra.mxu1 %v17512_v21 }
0x20a1   : > { %7956 = vmatprep.subr.bf16.mxu1 %v17515_v22 }
0x20a4   : > { %7957 = vmatpush1.bf16.msra.mxu1 %v17518_v46 }
0x20a5   : > { %7958 = vmatprep.subr.bf16.mxu1 %v17521_v18 }
0x20a8   : > { %7959 = vmatpush1.bf16.msra.mxu1 %v17524_v1 }
0x20a9   : > { %7960 = vmatprep.subr.bf16.mxu1 %v17527_v12 }
0x20ac   : > { %7961 = vmatpush1.bf16.msra.mxu1 %v17530_v63 }
0x20ad   : > { %7962 = vmatprep.subr.bf16.mxu1 %v17533_v2 }
0x20b0   : > { %7963 = vmatpush1.bf16.msra.mxu1 %v17536_v59 }
0x20b1   : > { %7964 = vmatprep.subr.bf16.mxu1 %v17539_v61 }
0x20b4   : > { %7965 = vmatpush1.bf16.msra.mxu1 %v17542_v62 }
0x20b5   : > { %7966 = vmatprep.subr.bf16.mxu1 %v17545_v3 }
0x20b8   : > { %7967 = vmatpush1.bf16.msra.mxu1 %v17548_v0 }
0x20b9   : > { %7968 = vmatprep.subr.bf16.mxu1 %v17551_v16 }
0x20bc   : > { %7969 = vmatpush1.bf16.msra.mxu1 %v17554_v55 }
0x20bd   : > { %7970 = vmatprep.subr.bf16.mxu1 %v17557_v43 }
0x20c0   : > { %7971 = vmatpush1.bf16.msra.mxu1 %v17560_v11 }
0x20c1   : > { %7972 = vmatprep.subr.bf16.mxu1 %v17563_v9 }
0x20c4   : > { %7973 = vmatpush1.bf16.msra.mxu1 %v17566_v35 }
0x20c5   : > { %7974 = vmatprep.subr.bf16.mxu1 %v17625_v31 }
0x20c8   : > { %7975 = vmatpush1.bf16.msra.mxu1 %v17628_v14 }
0x20c9   : > { %7976 = vmatprep.subr.bf16.mxu1 %v17631_v24 }
0x20cc   : > { %7977 = vmatpush1.bf16.msra.mxu1 %v17634_v25 }
0x20cd   : > { %7978 = vmatprep.subr.bf16.mxu1 %v17637_v27 }
0x20d0   : > { %7979 = vmatpush1.bf16.msra.mxu1 %v17640_v28 }
0x20d1   : > { %7980 = vmatprep.subr.bf16.mxu1 %v17643_v29 }
0x20d4   : > { %7981 = vmatpush1.bf16.msra.mxu1 %v17646_v32 }
0x20d5   : > { %8315 = vmatprep.subr.bf16.mxu1 %v17577_v36 }
0x216a   : > { %v7619_v40 = vpop.f32.mrb[92].mxu1 }
0x216b   : > { %v7626_v51 = vmul.f32 %v7619_v40, %v7619_v40  ;;  %v7621_v39 = vpop.f32.mrb[93].mxu1  ;;  %v7632_v5 = vrot.slane %v7619_v40, %v16588_v4  ;;  %v14800_v40 = vld [vmem:[#allocation15 + $0x9a8] sm:$0xff]  }
0x216c   : > { %v7623_v54 = vpop.f32.mrb[94].mxu1 }
0x216d   : > { %v7627_v56 = vsub.f32 %v7621_v39, %v7626_v51  ;;  %v7624_v58 = vpop.f32.mrb[95].mxu1  ;;  %v7633_v6 = vsub.f32 %v17595_v26, %v7632_v5  ;;  %v14796_v26 = vld [vmem:[#allocation15 + $0x988] sm:$0xff]   ;;  %v14801_v51 = vld [vmem:[#allocation15 + $0x9b0] sm:$0xff]   ;;  %v14802_v39 = vld [vmem:[#allocation15 + $0x9b8] sm:$0xff]  }
0x216e   : > { %v14803_v58 = vld [vmem:[#allocation15 + $0xa00] sm:$0xff]  }
0x216f   : > { %v7628_v13 = vmax.f32 %v7627_v56, 0.0 }
0x2171   : > { %v7634_v37 = vadd.f32 1e-05, %v7628_v13  ;;  %v14804_v13 = vld [vmem:[#allocation15 + $0x9c0] sm:$0xff]  }
0x2173   : > { %15058 = vrsqrt.f32 %v7634_v37 }
0x217d   : > { %v15059_v34 = vpop.eup %15058 }
0x217e   : > { %v7639_v10 = vrot.slane %v15059_v34, %v16588_v4 }
0x2180   : > { %v7640_v42 = vmul.f32 %v7639_v10, %v7633_v6 }
0x2182   : > { %v17655_v7 = vadd.f32 %v7640_v42, %v17476_v20  ;;  %v14797_v20 = vld [vmem:[#allocation15 + $0x990] sm:$0xff]   ;;  %v12330_v42 = vld [vmem:[#allocation16 + $0xc] ss:$0 sm:$0xff] }
0x2184   : > { %v7701_v8 = vpack.c.bf16 %v17655_v7, %v17655_v7  ;;  %v7694_v38 = vrot.slane %v17655_v7, 1  ;;  %v7696_v45 = vrot.slane %v17655_v7, 7 }
0x2186   : > { %7885 = vmatprep.mubr.bf16.mxu0 %v7701_v8  ;;  %v7698_v33 = vsel %vm1083_vm3, %v7694_v38, %v7696_v45  ;;  %v7699_v54 = vsel %vm1069_vm2, %v7694_v38, %v7696_v45 }
0x2187   : > { %v7700_v48 = vpack.c.bf16 %v7698_v33, %v7698_v33  ;;  %v7702_v56 = vpack.c.bf16 %v7699_v54, %v7699_v54 }
0x2189   : > { %7886 = vmatmul.mubr.bf16.vlgmr.msra.gmra.mrb[116].mxu0 %v7700_v48 }
0x218a   : > { %13818 = vmatpush3.bf16.msra.mxu0 %v14795_v57  ;;  %13833 = vmatprep.mubr.msk.bf16.mxu0 %vm15881_vm12, %v15880_v52 }
0x218b   : > { %13819 = vmatprep.subr.bf16.mxu0 %v15880_v52 }
0x218e   : > { %13820 = vmatpush3.bf16.msra.mxu0 %v14796_v26 }
0x218f   : > { %13821 = vmatprep.subr.bf16.mxu0 %v15880_v52 }
0x2192   : > { %13822 = vmatpush3.bf16.msra.mxu0 %v14797_v20 }
0x2193   : > { %13823 = vmatprep.subr.bf16.mxu0 %v15880_v52 }
0x2196   : > { %13824 = vmatpush3.bf16.msra.mxu0 %v14798_v49 }
0x2197   : > { %13825 = vmatprep.subr.bf16.mxu0 %v15880_v52 }
0x219a   : > { %13826 = vmatpush3.bf16.msra.mxu0 %v14799_v50 }
0x219b   : > { %13827 = vmatprep.subr.bf16.mxu0 %v15880_v52 }
0x219e   : > { %13828 = vmatpush3.bf16.msra.mxu0 %v14800_v40 }
0x219f   : > { %13829 = vmatprep.subr.bf16.mxu0 %v15880_v52 }
0x21a2   : > { %13830 = vmatpush3.bf16.msra.mxu0 %v14801_v51 }
0x21a3   : > { %13831 = vmatprep.subr.bf16.mxu0 %v15880_v52 }
0x21a6   : > { %13832 = vmatpush3.bf16.msra.mxu0 %v14802_v39 }
0x21a7   : > { %13177 = vmatprep.subr.bf16.mxu0 %v14803_v58 }
0x21a9   : > { %13834 = vmatmul.mubr.bf16.vlgmr.msra.gmra.mrb[120].mxu0 %v7702_v56 }
0x21aa   : > { %13178 = vmatpush3.bf16.msra.mxu0 %v14804_v13 }
0x225c   : > { %v13162_v37 = vpop.f32.mrb[116].mxu0 }
0x225d   : > { %v13163_v5 = vpop.f32.mrb[117].mxu0 }
0x225e   : > { %v13164_v34 = vadd.f32 %v13163_v5, %v13162_v37  ;;  %v13165_v6 = vpop.f32.mrb[118].mxu0 }
0x225f   : > { %v13166_v10 = vpop.f32.mrb[119].mxu0 }
0x2260   : > { %v7888_v8 = vadd.f32 %v13164_v34, %v12330_v42 }
0x227c   : > { %v7927_v33 = vpop.f32.mrb[120].mxu0 }
0x227d   : > { %v17672_v57 = vadd.f32 %v7927_v33, %v7888_v8  ;;  %v13835_v48 = vpop.f32.mrb[121].mxu0  ;;  %v14805_v8 = vld [vmem:[#allocation15 + $0xa08] sm:$0xff]  }
0x227e   : > { %v7930_v26 = vpop.f32.mrb[122].mxu0  ;;  %v14806_v33 = vld [vmem:[#allocation15 + $0x9c8] sm:$0xff]   ;;  %13179 = vmatprep.subr.bf16.mxu0 %v14805_v8  ;;  %v14807_v48 = vld [vmem:[#allocation15 + $0xa10] sm:$0xff]  }
0x227f   : > { %v7933_v38 = vmul.f32 %v17672_v57, %v17672_v57  ;;  %v7934_v45 = vsel %vm2631_vm5, %v17672_v57, 0.0  ;;  %v13836_v20 = vpop.f32.mrb[123].mxu0  ;;  %13180 = vmatpush3.bf16.msra.mxu0 %v14806_v33  ;;  %v14808_v26 = vld [vmem:[#allocation15 + $0x9d0] sm:$0xff]  }
0x2280   : > { %v7935_v49 = vrot.slane %v7934_v45, 4  ;;  %13181 = vmatprep.subr.bf16.mxu0 %v14807_v48  ;;  %v14811_v20 = vld [vmem:[#allocation15 + $0xa20] sm:$0xff]  }
0x2281   : > { %v7941_v50 = vsel %vm2631_vm5, %v7933_v38, 0.0  ;;  %v14809_v38 = vld [vmem:[#allocation15 + $0xa18] sm:$0xff]  }
0x2282   : > { %v7936_v40 = vadd.f32 %v7935_v49, %v7934_v45  ;;  %v7942_v51 = vrot.slane %v7941_v50, 4  ;;  %v14810_v45 = vld [vmem:[#allocation15 + $0x9d8] sm:$0xff]   ;;  %v14812_v49 = vld [vmem:[#allocation15 + $0x9e0] sm:$0xff]  }
0x2283   : > { %13182 = vmatpush3.bf16.msra.mxu0 %v14808_v26 }
0x2284   : > { %v7937_v39 = vrot.slane %v7936_v40, 2  ;;  %v7943_v54 = vadd.f32 %v7942_v51, %v7941_v50  ;;  %13183 = vmatprep.subr.bf16.mxu0 %v14809_v38  ;;  %v14813_v50 = vld [vmem:[#allocation15 + $0xa28] sm:$0xff]   ;;  %v14815_v51 = vld [vmem:[#allocation15 + $0xa30] sm:$0xff]  }
0x2286   : > { %v7938_v56 = vadd.f32 %v7937_v39, %v7936_v40  ;;  %v7944_v58 = vrot.slane %v7943_v54, 2  ;;  %v14814_v40 = vld [vmem:[#allocation15 + $0x9e8] sm:$0xff]   ;;  %v14816_v39 = vld [vmem:[#allocation15 + $0x9f0] sm:$0xff]  }
0x2287   : > { %13184 = vmatpush3.bf16.msra.mxu0 %v14810_v45 }
0x2288   : > { %v7945_v13 = vadd.f32 %v7944_v58, %v7943_v54  ;;  %v7939_v37 = vrot.slane %v7938_v56, 1  ;;  %13185 = vmatprep.subr.bf16.mxu0 %v14811_v20  ;;  %v14817_v54 = vld [vmem:[#allocation15 + $0xa38] sm:$0xff]  }
0x228a   : > { %v7946_v5 = vrot.slane %v7945_v13, 1  ;;  %v7940_v34 = vadd.f32 %v7939_v37, %v7938_v56  ;;  %v14818_v56 = vld [vmem:[#allocation15 + $0x9f8] sm:$0xff]  }
0x228b   : > { %13186 = vmatpush3.bf16.msra.mxu0 %v14812_v49 }
0x228c   : > { %v7947_v6 = vadd.f32 %v7946_v5, %v7945_v13  ;;  %v7948_v42 = vpack.c.bf16 %v7940_v34, %v7940_v34  ;;  %13187 = vmatprep.subr.bf16.mxu0 %v14813_v50 }
0x228e   : > { %v7949_v10 = vpack.c.bf16 %v7947_v6, %v7947_v6 }
0x228f   : > { %13188 = vmatpush3.bf16.msra.mxu0 %v14814_v40 }
0x2290   : > { %7982 = vmatprep.mubr.bf16.mxu1 %v7949_v10  ;;  %13189 = vmatprep.subr.bf16.mxu0 %v14815_v51  ;;  %v14819_v51 = vld [vmem:[#allocation15 + $0xa40] sm:$0xff]  }
0x2291   : > { %7983 = vmatmul.mubr.bf16.vlgmr.msra.gmra.mrb[96].mxu1 %v7948_v42 }
0x2292   : > { %8316 = vmatpush1.bf16.msra.mxu1 %v17500_v44 }
0x2293   : > { %8317 = vmatprep.subr.bf16.mxu1 %v17503_v53  ;;  %13190 = vmatpush3.bf16.msra.mxu0 %v14816_v39 }
0x2294   : > { %13191 = vmatprep.subr.bf16.mxu0 %v14817_v54  ;;  %v14820_v54 = vld [vmem:[#allocation15 + $0xa48] sm:$0xff]  }
0x2296   : > { %8318 = vmatpush1.bf16.msra.mxu1 %v17506_v17 }
0x2297   : > { %8319 = vmatprep.subr.bf16.mxu1 %v17509_v15  ;;  %13192 = vmatpush3.bf16.msra.mxu0 %v14818_v56  ;;  %v14822_v56 = vld [vmem:[#allocation15 + $0xa58] sm:$0xff]  }
0x2298   : > { %13837 = vmatprep.subr.bf16.mxu0 %v15880_v52 }
0x229a   : > { %8320 = vmatpush1.bf16.msra.mxu1 %v17512_v21 }
0x229b   : > { %8321 = vmatprep.subr.bf16.mxu1 %v17515_v22 }
0x229e   : > { %8322 = vmatpush1.bf16.msra.mxu1 %v17518_v46 }
0x229f   : > { %8323 = vmatprep.subr.bf16.mxu1 %v17521_v18 }
0x22a2   : > { %8324 = vmatpush1.bf16.msra.mxu1 %v17524_v1 }
0x22a3   : > { %8325 = vmatprep.subr.bf16.mxu1 %v17527_v12 }
0x22a6   : > { %8326 = vmatpush1.bf16.msra.mxu1 %v17530_v63 }
0x22a7   : > { %8327 = vmatprep.subr.bf16.mxu1 %v17533_v2 }
0x22aa   : > { %8328 = vmatpush1.bf16.msra.mxu1 %v17536_v59 }
0x22ab   : > { %8329 = vmatprep.subr.bf16.mxu1 %v17539_v61 }
0x22ae   : > { %8330 = vmatpush1.bf16.msra.mxu1 %v17542_v62 }
0x22af   : > { %8331 = vmatprep.subr.bf16.mxu1 %v17545_v3 }
0x22b2   : > { %8332 = vmatpush1.bf16.msra.mxu1 %v17548_v0 }
0x22b3   : > { %8333 = vmatprep.subr.bf16.mxu1 %v17551_v16 }
0x22b6   : > { %8334 = vmatpush1.bf16.msra.mxu1 %v17554_v55 }
0x22b7   : > { %8335 = vmatprep.subr.bf16.mxu1 %v17557_v43 }
0x22ba   : > { %8336 = vmatpush1.bf16.msra.mxu1 %v17560_v11 }
0x22bb   : > { %8337 = vmatprep.subr.bf16.mxu1 %v17563_v9 }
0x22be   : > { %8338 = vmatpush1.bf16.msra.mxu1 %v17566_v35 }
0x22bf   : > { %8339 = vmatprep.subr.bf16.mxu1 %v17625_v31 }
0x22c2   : > { %8340 = vmatpush1.bf16.msra.mxu1 %v17628_v14 }
0x22c3   : > { %8341 = vmatprep.subr.bf16.mxu1 %v17631_v24 }
0x22c6   : > { %8342 = vmatpush1.bf16.msra.mxu1 %v17634_v25 }
0x22c7   : > { %8343 = vmatprep.subr.bf16.mxu1 %v17637_v27 }
0x22ca   : > { %8344 = vmatpush1.bf16.msra.mxu1 %v17640_v28 }
0x22cb   : > { %8345 = vmatprep.subr.bf16.mxu1 %v17643_v29 }
0x22ce   : > { %8346 = vmatpush1.bf16.msra.mxu1 %v17646_v32 }
0x22cf   : > { %8680 = vmatprep.subr.bf16.mxu1 %v17577_v36 }
0x2364   : > { %v7984_v58 = vpop.f32.mrb[96].mxu1 }
0x2365   : > { %v7991_v13 = vmul.f32 %v7984_v58, %v7984_v58  ;;  %v7986_v37 = vpop.f32.mrb[97].mxu1  ;;  %v7997_v8 = vrot.slane %v7984_v58, %v16588_v4  ;;  %v14823_v58 = vld [vmem:[#allocation15 + $0xa60] sm:$0xff]  }
0x2366   : > { %v7988_v5 = vpop.f32.mrb[98].mxu1 }
0x2367   : > { %v7992_v34 = vsub.f32 %v7986_v37, %v7991_v13  ;;  %v7989_v6 = vpop.f32.mrb[99].mxu1  ;;  %v7998_v48 = vsub.f32 %v17672_v57, %v7997_v8  ;;  %v14821_v57 = vld [vmem:[#allocation15 + $0xa50] sm:$0xff]   ;;  %v14824_v13 = vld [vmem:[#allocation15 + $0xa68] sm:$0xff]   ;;  %v14826_v5 = vld [vmem:[#allocation15 + $0xa78] sm:$0xff]  }
0x2368   : > { %v14825_v37 = vld [vmem:[#allocation15 + $0xa70] sm:$0xff]  }
0x2369   : > { %v7993_v10 = vmax.f32 %v7992_v34, 0.0 }
0x236b   : > { %v7999_v42 = vadd.f32 1e-05, %v7993_v10  ;;  %v14827_v10 = vld [vmem:[#allocation15 + $0xac0] sm:$0xff]  }
0x236d   : > { %15060 = vrsqrt.f32 %v7999_v42  ;;  %v14828_v42 = vld [vmem:[#allocation15 + $0xa80] sm:$0xff]  }
0x2377   : > { %v15061_v33 = vpop.eup %15060 }
0x2378   : > { %v8004_v26 = vrot.slane %v15061_v33, %v16588_v4 }
0x237a   : > { %v8005_v38 = vmul.f32 %v8004_v26, %v7998_v48 }
0x237c   : > { %v8006_v45 = vmax.f32 %v8005_v38, 0.0 }
0x237e   : > { %v8066_v20 = vpack.c.bf16 %v8006_v45, %v8006_v45  ;;  %v8059_v49 = vrot.slane %v8006_v45, 1  ;;  %v8061_v50 = vrot.slane %v8006_v45, 7  ;;  %v12355_v45 = vld [vmem:[#allocation16 + $0xd] ss:$0 sm:$0xff] }
0x2380   : > { %8250 = vmatprep.mubr.bf16.mxu0 %v8066_v20  ;;  %v8063_v40 = vsel %vm1083_vm3, %v8059_v49, %v8061_v50  ;;  %v8064_v34 = vsel %vm1069_vm2, %v8059_v49, %v8061_v50 }
0x2381   : > { %v8065_v39 = vpack.c.bf16 %v8063_v40, %v8063_v40  ;;  %v8067_v6 = vpack.c.bf16 %v8064_v34, %v8064_v34 }
0x2383   : > { %8251 = vmatmul.mubr.bf16.vlgmr.msra.gmra.mrb[124].mxu0 %v8065_v39 }
0x2384   : > { %13838 = vmatpush3.bf16.msra.mxu0 %v14819_v51  ;;  %13853 = vmatprep.mubr.msk.bf16.mxu0 %vm15881_vm12, %v15880_v52 }
0x2385   : > { %13839 = vmatprep.subr.bf16.mxu0 %v15880_v52 }
0x2388   : > { %13840 = vmatpush3.bf16.msra.mxu0 %v14820_v54 }
0x2389   : > { %13841 = vmatprep.subr.bf16.mxu0 %v15880_v52 }
0x238c   : > { %13842 = vmatpush3.bf16.msra.mxu0 %v14821_v57 }
0x238d   : > { %13843 = vmatprep.subr.bf16.mxu0 %v15880_v52 }
0x2390   : > { %13844 = vmatpush3.bf16.msra.mxu0 %v14822_v56 }
0x2391   : > { %13845 = vmatprep.subr.bf16.mxu0 %v15880_v52 }
0x2394   : > { %13846 = vmatpush3.bf16.msra.mxu0 %v14823_v58 }
0x2395   : > { %13847 = vmatprep.subr.bf16.mxu0 %v15880_v52 }
0x2398   : > { %13848 = vmatpush3.bf16.msra.mxu0 %v14824_v13 }
0x2399   : > { %13849 = vmatprep.subr.bf16.mxu0 %v15880_v52 }
0x239c   : > { %13850 = vmatpush3.bf16.msra.mxu0 %v14825_v37 }
0x239d   : > { %13851 = vmatprep.subr.bf16.mxu0 %v15880_v52 }
0x23a0   : > { %13852 = vmatpush3.bf16.msra.mxu0 %v14826_v5 }
0x23a1   : > { %13208 = vmatprep.subr.bf16.mxu0 %v14827_v10 }
0x23a3   : > { %13854 = vmatmul.mubr.bf16.vlgmr.msra.gmra.mrb[128].mxu0 %v8067_v6 }
0x23a4   : > { %13209 = vmatpush3.bf16.msra.mxu0 %v14828_v42 }
0x2456   : > { %v13193_v8 = vpop.f32.mrb[124].mxu0 }
0x2457   : > { %v13194_v33 = vpop.f32.mrb[125].mxu0 }
0x2458   : > { %v13195_v48 = vadd.f32 %v13194_v33, %v13193_v8  ;;  %v13196_v26 = vpop.f32.mrb[126].mxu0 }
0x2459   : > { %v13197_v38 = vpop.f32.mrb[127].mxu0 }
0x245a   : > { %v8253_v20 = vadd.f32 %v13195_v48, %v12355_v45 }
0x2476   : > { %v8292_v40 = vpop.f32.mrb[128].mxu0 }
0x2477   : > { %v17726_v51 = vadd.f32 %v8292_v40, %v8253_v20  ;;  %v13855_v39 = vpop.f32.mrb[129].mxu0 }
0x2478   : > { %v8295_v54 = vpop.f32.mrb[130].mxu0 }
0x2479   : > { %v8298_v49 = vmul.f32 %v17726_v51, %v17726_v51  ;;  %v8299_v50 = vsel %vm2631_vm5, %v17726_v51, 0.0  ;;  %v13856_v57 = vpop.f32.mrb[131].mxu0 }
0x247a   : > { %v8300_v56 = vrot.slane %v8299_v50, 4 }
0x247b   : > { %v8306_v58 = vsel %vm2631_vm5, %v8298_v49, 0.0 }
0x247c   : > { %v8301_v13 = vadd.f32 %v8300_v56, %v8299_v50  ;;  %v8307_v37 = vrot.slane %v8306_v58, 4 }
0x247e   : > { %v8302_v5 = vrot.slane %v8301_v13, 2  ;;  %v8308_v34 = vadd.f32 %v8307_v37, %v8306_v58  ;;  %v14843_v58 = vld [vmem:[#allocation15 + $0xb00] sm:$0xff]   ;;  %v14846_v37 = vld [vmem:[#allocation15 + $0xb18] sm:$0xff]  }
0x2480   : > { %v8303_v6 = vadd.f32 %v8302_v5, %v8301_v13  ;;  %v8309_v10 = vrot.slane %v8308_v34, 2  ;;  %v14847_v5 = vld [vmem:[#allocation15 + $0xb20] sm:$0xff]  }
0x2482   : > { %v8310_v42 = vadd.f32 %v8309_v10, %v8308_v34  ;;  %v8304_v8 = vrot.slane %v8303_v6, 1  ;;  %v14848_v34 = vld [vmem:[#allocation15 + $0xb28] sm:$0xff]   ;;  %v14850_v10 = vld [vmem:[#allocation15 + $0xb38] sm:$0xff]  }
0x2484   : > { %v8311_v33 = vrot.slane %v8310_v42, 1  ;;  %v8305_v48 = vadd.f32 %v8304_v8, %v8303_v6  ;;  %v14849_v6 = vld [vmem:[#allocation15 + $0xb30] sm:$0xff]  }
0x2486   : > { %v8312_v26 = vadd.f32 %v8311_v33, %v8310_v42  ;;  %v8313_v45 = vpack.c.bf16 %v8305_v48, %v8305_v48  ;;  %v14851_v33 = vld [vmem:[#allocation15 + $0xb80] sm:$0xff]  }
0x2487   : > { %v14852_v48 = vld [vmem:[#allocation15 + $0xb40] sm:$0xff]  }
0x2488   : > { %v8314_v38 = vpack.c.bf16 %v8312_v26, %v8312_v26 }
0x248a   : > { %8347 = vmatprep.mubr.bf16.mxu1 %v8314_v38 }
0x248b   : > { %8348 = vmatmul.mubr.bf16.vlgmr.msra.gmra.mrb[100].mxu1 %v8313_v45 }
0x248c   : > { %8681 = vmatpush1.bf16.msra.mxu1 %v17500_v44  ;;  %v14829_v44 = vld [vmem:[#allocation15 + $0xac8] sm:$0xff]  }
0x248d   : > { %8682 = vmatprep.subr.bf16.mxu1 %v17503_v53  ;;  %v14830_v53 = vld [vmem:[#allocation15 + $0xa88] sm:$0xff]   ;;  %13210 = vmatprep.subr.bf16.mxu0 %v14829_v44 }
0x248e   : > { %13211 = vmatpush3.bf16.msra.mxu0 %v14830_v53 }
0x2490   : > { %8683 = vmatpush1.bf16.msra.mxu1 %v17506_v17  ;;  %v14831_v17 = vld [vmem:[#allocation15 + $0xad0] sm:$0xff]  }
0x2491   : > { %8684 = vmatprep.subr.bf16.mxu1 %v17509_v15  ;;  %v14832_v15 = vld [vmem:[#allocation15 + $0xa90] sm:$0xff]   ;;  %13212 = vmatprep.subr.bf16.mxu0 %v14831_v17  ;;  %v12380_v17 = vld [vmem:[#allocation16 + $0xe] ss:$0 sm:$0xff] }
0x2492   : > { %13213 = vmatpush3.bf16.msra.mxu0 %v14832_v15 }
0x2494   : > { %8685 = vmatpush1.bf16.msra.mxu1 %v17512_v21  ;;  %v14833_v21 = vld [vmem:[#allocation15 + $0xad8] sm:$0xff]  }
0x2495   : > { %8686 = vmatprep.subr.bf16.mxu1 %v17515_v22  ;;  %v14834_v22 = vld [vmem:[#allocation15 + $0xa98] sm:$0xff]   ;;  %13214 = vmatprep.subr.bf16.mxu0 %v14833_v21 }
0x2496   : > { %13215 = vmatpush3.bf16.msra.mxu0 %v14834_v22 }
0x2498   : > { %8687 = vmatpush1.bf16.msra.mxu1 %v17518_v46  ;;  %v14835_v46 = vld [vmem:[#allocation15 + $0xae0] sm:$0xff]  }
0x2499   : > { %8688 = vmatprep.subr.bf16.mxu1 %v17521_v18  ;;  %v14836_v18 = vld [vmem:[#allocation15 + $0xaa0] sm:$0xff]   ;;  %13216 = vmatprep.subr.bf16.mxu0 %v14835_v46 }
0x249a   : > { %13217 = vmatpush3.bf16.msra.mxu0 %v14836_v18 }
0x249c   : > { %8689 = vmatpush1.bf16.msra.mxu1 %v17524_v1  ;;  %v14837_v1 = vld [vmem:[#allocation15 + $0xae8] sm:$0xff]  }
0x249d   : > { %8690 = vmatprep.subr.bf16.mxu1 %v17527_v12  ;;  %v14838_v12 = vld [vmem:[#allocation15 + $0xaa8] sm:$0xff]   ;;  %13218 = vmatprep.subr.bf16.mxu0 %v14837_v1 }
0x249e   : > { %13219 = vmatpush3.bf16.msra.mxu0 %v14838_v12 }
0x24a0   : > { %8691 = vmatpush1.bf16.msra.mxu1 %v17530_v63  ;;  %v14839_v63 = vld [vmem:[#allocation15 + $0xaf0] sm:$0xff]  }
0x24a1   : > { %8692 = vmatprep.subr.bf16.mxu1 %v17533_v2  ;;  %v14840_v2 = vld [vmem:[#allocation15 + $0xab0] sm:$0xff]   ;;  %13220 = vmatprep.subr.bf16.mxu0 %v14839_v63 }
0x24a2   : > { %13221 = vmatpush3.bf16.msra.mxu0 %v14840_v2 }
0x24a4   : > { %8693 = vmatpush1.bf16.msra.mxu1 %v17536_v59  ;;  %v14841_v59 = vld [vmem:[#allocation15 + $0xaf8] sm:$0xff]  }
0x24a5   : > { %8694 = vmatprep.subr.bf16.mxu1 %v17539_v61  ;;  %v14842_v61 = vld [vmem:[#allocation15 + $0xab8] sm:$0xff]   ;;  %13222 = vmatprep.subr.bf16.mxu0 %v14841_v59 }
0x24a6   : > { %13223 = vmatpush3.bf16.msra.mxu0 %v14842_v61 }
0x24a7   : > { %13857 = vmatprep.subr.bf16.mxu0 %v15880_v52 }
0x24a8   : > { %8695 = vmatpush1.bf16.msra.mxu1 %v17542_v62 }
0x24a9   : > { %8696 = vmatprep.subr.bf16.mxu1 %v17545_v3 }
0x24ac   : > { %8697 = vmatpush1.bf16.msra.mxu1 %v17548_v0 }
0x24ad   : > { %8698 = vmatprep.subr.bf16.mxu1 %v17551_v16 }
0x24b0   : > { %8699 = vmatpush1.bf16.msra.mxu1 %v17554_v55 }
0x24b1   : > { %8700 = vmatprep.subr.bf16.mxu1 %v17557_v43 }
0x24b4   : > { %8701 = vmatpush1.bf16.msra.mxu1 %v17560_v11 }
0x24b5   : > { %8702 = vmatprep.subr.bf16.mxu1 %v17563_v9 }
0x24b8   : > { %8703 = vmatpush1.bf16.msra.mxu1 %v17566_v35 }
0x24b9   : > { %8704 = vmatprep.subr.bf16.mxu1 %v17625_v31 }
0x24bc   : > { %8705 = vmatpush1.bf16.msra.mxu1 %v17628_v14 }
0x24bd   : > { %8706 = vmatprep.subr.bf16.mxu1 %v17631_v24 }
0x24c0   : > { %8707 = vmatpush1.bf16.msra.mxu1 %v17634_v25 }
0x24c1   : > { %8708 = vmatprep.subr.bf16.mxu1 %v17637_v27 }
0x24c4   : > { %8709 = vmatpush1.bf16.msra.mxu1 %v17640_v28 }
0x24c5   : > { %8710 = vmatprep.subr.bf16.mxu1 %v17643_v29 }
0x24c8   : > { %8711 = vmatpush1.bf16.msra.mxu1 %v17646_v32 }
0x24c9   : > { %9045 = vmatprep.subr.bf16.mxu1 %v17577_v36 }
0x255e   : > { %v8349_v62 = vpop.f32.mrb[100].mxu1 }
0x255f   : > { %v8356_v3 = vmul.f32 %v8349_v62, %v8349_v62  ;;  %v8351_v0 = vpop.f32.mrb[101].mxu1  ;;  %v8362_v35 = vrot.slane %v8349_v62, %v16588_v4 }
0x2560   : > { %v8353_v16 = vpop.f32.mrb[102].mxu1 }
0x2561   : > { %v8357_v55 = vsub.f32 %v8351_v0, %v8356_v3  ;;  %v8354_v43 = vpop.f32.mrb[103].mxu1  ;;  %v8363_v20 = vsub.f32 %v17726_v51, %v8362_v35  ;;  %v14844_v51 = vld [vmem:[#allocation15 + $0xb08] sm:$0xff]  }
0x2563   : > { %v8358_v11 = vmax.f32 %v8357_v55, 0.0 }
0x2565   : > { %v8364_v9 = vadd.f32 1e-05, %v8358_v11 }
0x2567   : > { %15062 = vrsqrt.f32 %v8364_v9 }
0x2571   : > { %v15063_v36 = vpop.eup %15062 }
0x2572   : > { %v8369_v40 = vrot.slane %v15063_v36, %v16588_v4 }
0x2574   : > { %v8370_v39 = vmul.f32 %v8369_v40, %v8363_v20 }
0x2576   : > { %v17770_v54 = vadd.f32 %v8370_v39, %v17655_v7  ;;  %v14845_v7 = vld [vmem:[#allocation15 + $0xb10] sm:$0xff]   ;;  %v17794_v39 = vld [vmem:[#allocation30] ss:$8 sps:$4 sm:$0xff]  }
0x2578   : > { %v8431_v49 = vpack.c.bf16 %v17770_v54, %v17770_v54  ;;  %v8424_v50 = vrot.slane %v17770_v54, 1  ;;  %v8426_v57 = vrot.slane %v17770_v54, 7 }
0x257a   : > { %8615 = vmatprep.mubr.bf16.mxu0 %v8431_v49  ;;  %v8428_v56 = vsel %vm1083_vm3, %v8424_v50, %v8426_v57  ;;  %v8429_v42 = vsel %vm1069_vm2, %v8424_v50, %v8426_v57  ;;  %v17797_v49 = vld [vmem:[#allocation30 + $0x14] ss:$8 sps:$4 sm:$0xff]   ;;  %v17800_v50 = vld [vmem:[#allocation30 + $0x10] ss:$8 sps:$4 sm:$0xff]   ;;  %v17803_v57 = vld [vmem:[#allocation30 + $0x24] ss:$8 sps:$4 sm:$0xff]  }
0x257b   : > { %v8430_v13 = vpack.c.bf16 %v8428_v56, %v8428_v56  ;;  %v8432_v8 = vpack.c.bf16 %v8429_v42, %v8429_v42  ;;  %v17806_v56 = vld [vmem:[#allocation30 + $0x20] ss:$8 sps:$4 sm:$0xff]   ;;  %v17836_v42 = vld [vmem:[#allocation30 + $0x70] ss:$8 sps:$4 sm:$0xff]  }
0x257d   : > { %8616 = vmatmul.mubr.bf16.vlgmr.msra.gmra.mrb[132].mxu0 %v8430_v13  ;;  %v17812_v13 = vld [vmem:[#allocation30 + $0x30] ss:$8 sps:$4 sm:$0xff]  }
0x257e   : > { %13858 = vmatpush3.bf16.msra.mxu0 %v14843_v58  ;;  %13873 = vmatprep.mubr.msk.bf16.mxu0 %vm15881_vm12, %v15880_v52  ;;  %v17809_v58 = vld [vmem:[#allocation30 + $0x34] ss:$8 sps:$4 sm:$0xff]  }
0x257f   : > { %13859 = vmatprep.subr.bf16.mxu0 %v15880_v52 }
0x2582   : > { %13860 = vmatpush3.bf16.msra.mxu0 %v14844_v51  ;;  %v17815_v51 = vld [vmem:[#allocation30 + $0x44] ss:$8 sps:$4 sm:$0xff]  }
0x2583   : > { %13861 = vmatprep.subr.bf16.mxu0 %v15880_v52 }
0x2586   : > { %13862 = vmatpush3.bf16.msra.mxu0 %v14845_v7  ;;  %v17818_v7 = vld [vmem:[#allocation30 + $0x40] ss:$8 sps:$4 sm:$0xff]  }
0x2587   : > { %13863 = vmatprep.subr.bf16.mxu0 %v15880_v52 }
0x258a   : > { %13864 = vmatpush3.bf16.msra.mxu0 %v14846_v37  ;;  %v17821_v37 = vld [vmem:[#allocation30 + $0x54] ss:$8 sps:$4 sm:$0xff]  }
0x258b   : > { %13865 = vmatprep.subr.bf16.mxu0 %v15880_v52 }
0x258e   : > { %13866 = vmatpush3.bf16.msra.mxu0 %v14847_v5  ;;  %v17824_v5 = vld [vmem:[#allocation30 + $0x50] ss:$8 sps:$4 sm:$0xff]  }
0x258f   : > { %13867 = vmatprep.subr.bf16.mxu0 %v15880_v52 }
0x2592   : > { %13868 = vmatpush3.bf16.msra.mxu0 %v14848_v34  ;;  %v17827_v34 = vld [vmem:[#allocation30 + $0x64] ss:$8 sps:$4 sm:$0xff]  }
0x2593   : > { %13869 = vmatprep.subr.bf16.mxu0 %v15880_v52 }
0x2596   : > { %13870 = vmatpush3.bf16.msra.mxu0 %v14849_v6  ;;  %v17830_v6 = vld [vmem:[#allocation30 + $0x60] ss:$8 sps:$4 sm:$0xff]  }
0x2597   : > { %13871 = vmatprep.subr.bf16.mxu0 %v15880_v52 }
0x259a   : > { %13872 = vmatpush3.bf16.msra.mxu0 %v14850_v10  ;;  %v17833_v10 = vld [vmem:[#allocation30 + $0x74] ss:$8 sps:$4 sm:$0xff]  }
0x259b   : > { %13239 = vmatprep.subr.bf16.mxu0 %v14851_v33  ;;  %v17842_v33 = vld [vmem:[#allocation30 + $0x80] ss:$8 sps:$4 sm:$0xff]  }
0x259d   : > { %13874 = vmatmul.mubr.bf16.vlgmr.msra.gmra.mrb[136].mxu0 %v8432_v8  ;;  %v17839_v8 = vld [vmem:[#allocation30 + $0x84] ss:$8 sps:$4 sm:$0xff]  }
0x259e   : > { %13240 = vmatpush3.bf16.msra.mxu0 %v14852_v48  ;;  %v17845_v48 = vld [vmem:[#allocation30 + $0x94] ss:$8 sps:$4 sm:$0xff]  }
0x2650   : > { %v13224_v26 = vpop.f32.mrb[132].mxu0 }
0x2651   : > { %v13225_v38 = vpop.f32.mrb[133].mxu0 }
0x2652   : > { %v13226_v45 = vadd.f32 %v13225_v38, %v13224_v26  ;;  %v13227_v44 = vpop.f32.mrb[134].mxu0  ;;  %v17848_v26 = vld [vmem:[#allocation30 + $0x90] ss:$8 sps:$4 sm:$0xff]   ;;  %v17851_v38 = vld [vmem:[#allocation30 + $0xa4] ss:$8 sps:$4 sm:$0xff]  }
0x2653   : > { %v13228_v53 = vpop.f32.mrb[135].mxu0  ;;  %v17857_v44 = vld [vmem:[#allocation30 + $0xb4] ss:$8 sps:$4 sm:$0xff]  }
0x2654   : > { %v8618_v15 = vadd.f32 %v13226_v45, %v12380_v17  ;;  %v17854_v45 = vld [vmem:[#allocation30 + $0xa0] ss:$8 sps:$4 sm:$0xff]   ;;  %v17860_v53 = vld [vmem:[#allocation30 + $0xb0] ss:$8 sps:$4 sm:$0xff]   ;;  %v17871_v17 = vld [vmem:[#allocation30 + $0x4] ss:$8 sps:$4 sm:$0xff]  }
0x2670   : > { %v8657_v21 = vpop.f32.mrb[136].mxu0 }
0x2671   : > { %v17787_v22 = vadd.f32 %v8657_v21, %v8618_v15  ;;  %v13875_v46 = vpop.f32.mrb[137].mxu0  ;;  %v14853_v15 = vld [vmem:[#allocation15 + $0xb88] sm:$0xff]   ;;  %v14859_v21 = vld [vmem:[#allocation15 + $0xba0] sm:$0xff]  }
0x2672   : > { %v8660_v18 = vpop.f32.mrb[138].mxu0  ;;  %13241 = vmatprep.subr.bf16.mxu0 %v14853_v15  ;;  %v14863_v46 = vld [vmem:[#allocation15 + $0xbb0] sm:$0xff]  }
0x2673   : > { %v8663_v1 = vmul.f32 %v17787_v22, %v17787_v22  ;;  %v8664_v12 = vsel %vm2631_vm5, %v17787_v22, 0.0  ;;  %v13876_v63 = vpop.f32.mrb[139].mxu0  ;;  %v14864_v18 = vld [vmem:[#allocation15 + $0xb70] sm:$0xff]  }
0x2674   : > { %v8665_v2 = vrot.slane %v8664_v12, 4 }
0x2675   : > { %v8671_v59 = vsel %vm2631_vm5, %v8663_v1, 0.0  ;;  %v14865_v1 = vld [vmem:[#allocation15 + $0xbb8] sm:$0xff]  }
0x2676   : > { %v8666_v61 = vadd.f32 %v8665_v2, %v8664_v12  ;;  %v8672_v62 = vrot.slane %v8671_v59, 4  ;;  %v14866_v12 = vld [vmem:[#allocation15 + $0xb78] sm:$0xff]  }
0x2678   : > { %v8667_v3 = vrot.slane %v8666_v61, 2  ;;  %v8673_v0 = vadd.f32 %v8672_v62, %v8671_v59 }
0x267a   : > { %v8668_v16 = vadd.f32 %v8667_v3, %v8666_v61  ;;  %v8674_v55 = vrot.slane %v8673_v0, 2 }
0x267c   : > { %v8675_v43 = vadd.f32 %v8674_v55, %v8673_v0  ;;  %v8669_v11 = vrot.slane %v8668_v16, 1 }
0x267e   : > { %v8676_v9 = vrot.slane %v8675_v43, 1  ;;  %v8670_v35 = vadd.f32 %v8669_v11, %v8668_v16 }
0x2680   : > { %v8677_v36 = vadd.f32 %v8676_v9, %v8675_v43  ;;  %v8678_v40 = vpack.c.bf16 %v8670_v35, %v8670_v35 }
0x2682   : > { %v8679_v20 = vpack.c.bf16 %v8677_v36, %v8677_v36 }
0x2684   : > { %8712 = vmatprep.mubr.bf16.mxu1 %v8679_v20 }
0x2685   : > { %8713 = vmatmul.mubr.bf16.vlgmr.msra.gmra.mrb[104].mxu1 %v8678_v40 }
0x2686   : > { %9046 = vmatpush1.bf16.msra.mxu1 %v17794_v39 }
0x2687   : > { %9047 = vmatprep.subr.bf16.mxu1 %v17797_v49 }
0x268a   : > { %9048 = vmatpush1.bf16.msra.mxu1 %v17800_v50 }
0x268b   : > { %9049 = vmatprep.subr.bf16.mxu1 %v17803_v57 }
0x268e   : > { %9050 = vmatpush1.bf16.msra.mxu1 %v17806_v56 }
0x268f   : > { %9051 = vmatprep.subr.bf16.mxu1 %v17809_v58 }
0x2692   : > { %9052 = vmatpush1.bf16.msra.mxu1 %v17812_v13 }
0x2693   : > { %9053 = vmatprep.subr.bf16.mxu1 %v17815_v51 }
0x2696   : > { %9054 = vmatpush1.bf16.msra.mxu1 %v17818_v7 }
0x2697   : > { %9055 = vmatprep.subr.bf16.mxu1 %v17821_v37 }
0x269a   : > { %9056 = vmatpush1.bf16.msra.mxu1 %v17824_v5 }
0x269b   : > { %9057 = vmatprep.subr.bf16.mxu1 %v17827_v34 }
0x269e   : > { %9058 = vmatpush1.bf16.msra.mxu1 %v17830_v6 }
0x269f   : > { %9059 = vmatprep.subr.bf16.mxu1 %v17833_v10 }
0x26a2   : > { %9060 = vmatpush1.bf16.msra.mxu1 %v17836_v42 }
0x26a3   : > { %9061 = vmatprep.subr.bf16.mxu1 %v17839_v8 }
0x26a6   : > { %9062 = vmatpush1.bf16.msra.mxu1 %v17842_v33 }
0x26a7   : > { %9063 = vmatprep.subr.bf16.mxu1 %v17845_v48 }
0x26aa   : > { %9064 = vmatpush1.bf16.msra.mxu1 %v17848_v26 }
0x26ab   : > { %9065 = vmatprep.subr.bf16.mxu1 %v17851_v38 }
0x26ae   : > { %9066 = vmatpush1.bf16.msra.mxu1 %v17854_v45 }
0x26af   : > { %9067 = vmatprep.subr.bf16.mxu1 %v17857_v44 }
0x26b2   : > { %9068 = vmatpush1.bf16.msra.mxu1 %v17860_v53 }
0x26b3   : > { %9069 = vmatprep.subr.bf16.mxu1 %v17625_v31  ;;  %v14854_v31 = vld [vmem:[#allocation15 + $0xb48] sm:$0xff]  }
0x26b4   : > { %13242 = vmatpush3.bf16.msra.mxu0 %v14854_v31 }
0x26b6   : > { %9070 = vmatpush1.bf16.msra.mxu1 %v17628_v14  ;;  %v14855_v14 = vld [vmem:[#allocation15 + $0xb90] sm:$0xff]  }
0x26b7   : > { %9071 = vmatprep.subr.bf16.mxu1 %v17631_v24  ;;  %v14856_v24 = vld [vmem:[#allocation15 + $0xb50] sm:$0xff]   ;;  %13243 = vmatprep.subr.bf16.mxu0 %v14855_v14  ;;  %v14867_v14 = vld [vmem:[#allocation15 + $0xbc0] sm:$0xff]  }
0x26b8   : > { %13244 = vmatpush3.bf16.msra.mxu0 %v14856_v24 }
0x26ba   : > { %9072 = vmatpush1.bf16.msra.mxu1 %v17634_v25  ;;  %v14857_v25 = vld [vmem:[#allocation15 + $0xb98] sm:$0xff]  }
0x26bb   : > { %9073 = vmatprep.subr.bf16.mxu1 %v17637_v27  ;;  %v14858_v27 = vld [vmem:[#allocation15 + $0xb58] sm:$0xff]   ;;  %13245 = vmatprep.subr.bf16.mxu0 %v14857_v25  ;;  %v14868_v25 = vld [vmem:[#allocation15 + $0xbc8] sm:$0xff]  }
0x26bc   : > { %13246 = vmatpush3.bf16.msra.mxu0 %v14858_v27  ;;  %v14870_v27 = vld [vmem:[#allocation15 + $0xbd8] sm:$0xff]  }
0x26bd   : > { %13247 = vmatprep.subr.bf16.mxu0 %v14859_v21  ;;  %v14871_v21 = vld [vmem:[#allocation15 + $0xbe0] sm:$0xff]  }
0x26be   : > { %9074 = vmatpush1.bf16.msra.mxu1 %v17640_v28  ;;  %v14860_v28 = vld [vmem:[#allocation15 + $0xb60] sm:$0xff]  }
0x26bf   : > { %9075 = vmatprep.subr.bf16.mxu1 %v17643_v29  ;;  %v14861_v29 = vld [vmem:[#allocation15 + $0xba8] sm:$0xff]  }
0x26c0   : > { %13248 = vmatpush3.bf16.msra.mxu0 %v14860_v28  ;;  %v14872_v28 = vld [vmem:[#allocation15 + $0xbe8] sm:$0xff]  }
0x26c1   : > { %13249 = vmatprep.subr.bf16.mxu0 %v14861_v29  ;;  %v14873_v29 = vld [vmem:[#allocation15 + $0xbf0] sm:$0xff]  }
0x26c2   : > { %9076 = vmatpush1.bf16.msra.mxu1 %v17646_v32  ;;  %v14862_v32 = vld [vmem:[#allocation15 + $0xb68] sm:$0xff]  }
0x26c3   : > { %9410 = vmatprep.subr.bf16.mxu1 %v17871_v17 }
0x26c4   : > { %13250 = vmatpush3.bf16.msra.mxu0 %v14862_v32  ;;  %v14874_v32 = vld [vmem:[#allocation15 + $0xbf8] sm:$0xff]  }
0x26c5   : > { %13251 = vmatprep.subr.bf16.mxu0 %v14863_v46 }
0x26c8   : > { %13252 = vmatpush3.bf16.msra.mxu0 %v14864_v18 }
0x26c9   : > { %13253 = vmatprep.subr.bf16.mxu0 %v14865_v1  ;;  %v14875_v1 = vld [vmem:[#allocation15 + $0xc40] sm:$0xff]  }
0x26cc   : > { %13254 = vmatpush3.bf16.msra.mxu0 %v14866_v12  ;;  %v14876_v12 = vld [vmem:[#allocation15 + $0xc00] sm:$0xff]  }
0x26cd   : > { %13877 = vmatprep.subr.bf16.mxu0 %v15880_v52 }
0x2758   : > { %v8714_v63 = vpop.f32.mrb[104].mxu1 }
0x2759   : > { %v8721_v2 = vmul.f32 %v8714_v63, %v8714_v63  ;;  %v8716_v59 = vpop.f32.mrb[105].mxu1  ;;  %v8727_v55 = vrot.slane %v8714_v63, %v16588_v4 }
0x275a   : > { %v8718_v61 = vpop.f32.mrb[106].mxu1 }
0x275b   : > { %v8722_v62 = vsub.f32 %v8716_v59, %v8721_v2  ;;  %v8719_v3 = vpop.f32.mrb[107].mxu1  ;;  %v8728_v11 = vsub.f32 %v17787_v22, %v8727_v55  ;;  %v14869_v22 = vld [vmem:[#allocation15 + $0xbd0] sm:$0xff]  }
0x275c   : > { %v12405_v3 = vld [vmem:[#allocation16 + $0xf] ss:$0 sm:$0xff] }
0x275d   : > { %v8723_v0 = vmax.f32 %v8722_v62, 0.0 }
0x275f   : > { %v8729_v16 = vadd.f32 1e-05, %v8723_v0 }
0x2761   : > { %15064 = vrsqrt.f32 %v8729_v16 }
0x276b   : > { %v15065_v43 = vpop.eup %15064 }
0x276c   : > { %v8734_v9 = vrot.slane %v15065_v43, %v16588_v4 }
0x276e   : > { %v8735_v35 = vmul.f32 %v8734_v9, %v8728_v11 }
0x2770   : > { %v8736_v36 = vmax.f32 %v8735_v35, 0.0 }
0x2772   : > { %v8796_v20 = vpack.c.bf16 %v8736_v36, %v8736_v36  ;;  %v8789_v40 = vrot.slane %v8736_v36, 1  ;;  %v8791_v15 = vrot.slane %v8736_v36, 7 }
0x2774   : > { %8980 = vmatprep.mubr.bf16.mxu0 %v8796_v20  ;;  %v8793_v31 = vsel %vm1083_vm3, %v8789_v40, %v8791_v15  ;;  %v8794_v46 = vsel %vm1069_vm2, %v8789_v40, %v8791_v15 }
0x2775   : > { %v8795_v24 = vpack.c.bf16 %v8793_v31, %v8793_v31  ;;  %v8797_v18 = vpack.c.bf16 %v8794_v46, %v8794_v46 }
0x2777   : > { %8981 = vmatmul.mubr.bf16.vlgmr.msra.gmra.mrb[140].mxu0 %v8795_v24 }
0x2778   : > { %13878 = vmatpush3.bf16.msra.mxu0 %v14867_v14  ;;  %13893 = vmatprep.mubr.msk.bf16.mxu0 %vm15881_vm12, %v15880_v52 }
0x2779   : > { %13879 = vmatprep.subr.bf16.mxu0 %v15880_v52 }
0x277c   : > { %13880 = vmatpush3.bf16.msra.mxu0 %v14868_v25 }
0x277d   : > { %13881 = vmatprep.subr.bf16.mxu0 %v15880_v52 }
0x2780   : > { %13882 = vmatpush3.bf16.msra.mxu0 %v14869_v22 }
0x2781   : > { %13883 = vmatprep.subr.bf16.mxu0 %v15880_v52 }
0x2784   : > { %13884 = vmatpush3.bf16.msra.mxu0 %v14870_v27 }
0x2785   : > { %13885 = vmatprep.subr.bf16.mxu0 %v15880_v52 }
0x2788   : > { %13886 = vmatpush3.bf16.msra.mxu0 %v14871_v21 }
0x2789   : > { %13887 = vmatprep.subr.bf16.mxu0 %v15880_v52 }
0x278c   : > { %13888 = vmatpush3.bf16.msra.mxu0 %v14872_v28 }
0x278d   : > { %13889 = vmatprep.subr.bf16.mxu0 %v15880_v52 }
0x2790   : > { %13890 = vmatpush3.bf16.msra.mxu0 %v14873_v29 }
0x2791   : > { %13891 = vmatprep.subr.bf16.mxu0 %v15880_v52 }
0x2794   : > { %13892 = vmatpush3.bf16.msra.mxu0 %v14874_v32 }
0x2795   : > { %13270 = vmatprep.subr.bf16.mxu0 %v14875_v1  ;;  %v17919_v1 = vld [vmem:[#allocation30 + $0xc4] ss:$8 sps:$4 sm:$0xff]  }
0x2797   : > { %13894 = vmatmul.mubr.bf16.vlgmr.msra.gmra.mrb[144].mxu0 %v8797_v18 }
0x2798   : > { %13271 = vmatpush3.bf16.msra.mxu0 %v14876_v12  ;;  %v17922_v12 = vld [vmem:[#allocation30 + $0xc0] ss:$8 sps:$4 sm:$0xff]  }
0x284a   : > { %v13255_v63 = vpop.f32.mrb[140].mxu0 }
0x284b   : > { %v13256_v2 = vpop.f32.mrb[141].mxu0 }
0x284c   : > { %v13257_v59 = vadd.f32 %v13256_v2, %v13255_v63  ;;  %v13258_v61 = vpop.f32.mrb[142].mxu0  ;;  %v17925_v63 = vld [vmem:[#allocation30 + $0xd4] ss:$8 sps:$4 sm:$0xff]   ;;  %v17928_v2 = vld [vmem:[#allocation30 + $0xd0] ss:$8 sps:$4 sm:$0xff]  }
0x284d   : > { %v13259_v62 = vpop.f32.mrb[143].mxu0  ;;  %v17934_v61 = vld [vmem:[#allocation30 + $0xe0] ss:$8 sps:$4 sm:$0xff]  }
0x284e   : > { %v8983_v0 = vadd.f32 %v13257_v59, %v12405_v3  ;;  %v17931_v59 = vld [vmem:[#allocation30 + $0xe4] ss:$8 sps:$4 sm:$0xff]   ;;  %v17937_v62 = vld [vmem:[#allocation30 + $0xf4] ss:$8 sps:$4 sm:$0xff]   ;;  %v17940_v3 = vld [vmem:[#allocation30 + $0xf0] ss:$8 sps:$4 sm:$0xff]  }
0x286a   : > { %v9022_v16 = vpop.f32.mrb[144].mxu0 }
0x286b   : > { %v17889_v55 = vadd.f32 %v9022_v16, %v8983_v0  ;;  %v13895_v43 = vpop.f32.mrb[145].mxu0  ;;  %v14877_v0 = vld [vmem:[#allocation15 + $0xc48] sm:$0xff]  }
0x286c   : > { %v9025_v11 = vpop.f32.mrb[146].mxu0  ;;  %v14878_v16 = vld [vmem:[#allocation15 + $0xc08] sm:$0xff]   ;;  %13272 = vmatprep.subr.bf16.mxu0 %v14877_v0  ;;  %v14879_v43 = vld [vmem:[#allocation15 + $0xc50] sm:$0xff]  }
0x286d   : > { %v9028_v9 = vmul.f32 %v17889_v55, %v17889_v55  ;;  %v9029_v35 = vsel %vm2631_vm5, %v17889_v55, 0.0  ;;  %v13896_v36 = vpop.f32.mrb[147].mxu0  ;;  %13273 = vmatpush3.bf16.msra.mxu0 %v14878_v16  ;;  %v14880_v11 = vld [vmem:[#allocation15 + $0xc10] sm:$0xff]  }
0x286e   : > { %v9030_v20 = vrot.slane %v9029_v35, 4  ;;  %13274 = vmatprep.subr.bf16.mxu0 %v14879_v43  ;;  %v14883_v36 = vld [vmem:[#allocation15 + $0xc60] sm:$0xff]  }
0x286f   : > { %v9036_v40 = vsel %vm2631_vm5, %v9028_v9, 0.0  ;;  %v14881_v9 = vld [vmem:[#allocation15 + $0xc58] sm:$0xff]  }
0x2870   : > { %v9031_v15 = vadd.f32 %v9030_v20, %v9029_v35  ;;  %v9037_v31 = vrot.slane %v9036_v40, 4  ;;  %v14882_v35 = vld [vmem:[#allocation15 + $0xc18] sm:$0xff]   ;;  %v14884_v20 = vld [vmem:[#allocation15 + $0xc20] sm:$0xff]  }
0x2871   : > { %13275 = vmatpush3.bf16.msra.mxu0 %v14880_v11 }
0x2872   : > { %v9032_v14 = vrot.slane %v9031_v15, 2  ;;  %v9038_v24 = vadd.f32 %v9037_v31, %v9036_v40  ;;  %13276 = vmatprep.subr.bf16.mxu0 %v14881_v9  ;;  %v14885_v40 = vld [vmem:[#allocation15 + $0xc68] sm:$0xff]   ;;  %v14888_v31 = vld [vmem:[#allocation15 + $0xc30] sm:$0xff]  }
0x2874   : > { %v9033_v25 = vadd.f32 %v9032_v14, %v9031_v15  ;;  %v9039_v22 = vrot.slane %v9038_v24, 2  ;;  %v14886_v15 = vld [vmem:[#allocation15 + $0xc28] sm:$0xff]   ;;  %v14889_v14 = vld [vmem:[#allocation15 + $0xc78] sm:$0xff]  }
0x2875   : > { %13277 = vmatpush3.bf16.msra.mxu0 %v14882_v35 }
0x2876   : > { %v9040_v27 = vadd.f32 %v9039_v22, %v9038_v24  ;;  %v9034_v21 = vrot.slane %v9033_v25, 1  ;;  %13278 = vmatprep.subr.bf16.mxu0 %v14883_v36  ;;  %v14890_v24 = vld [vmem:[#allocation15 + $0xc38] sm:$0xff]  }
0x2878   : > { %v9041_v28 = vrot.slane %v9040_v27, 1  ;;  %v9035_v29 = vadd.f32 %v9034_v21, %v9033_v25 }
0x2879   : > { %13279 = vmatpush3.bf16.msra.mxu0 %v14884_v20 }
0x287a   : > { %v9042_v32 = vadd.f32 %v9041_v28, %v9040_v27  ;;  %v9043_v18 = vpack.c.bf16 %v9035_v29, %v9035_v29  ;;  %13280 = vmatprep.subr.bf16.mxu0 %v14885_v40 }
0x287c   : > { %v9044_v46 = vpack.c.bf16 %v9042_v32, %v9042_v32 }
0x287d   : > { %13281 = vmatpush3.bf16.msra.mxu0 %v14886_v15  ;;  %v14891_v15 = vld [vmem:[#allocation15 + $0xc80] sm:$0xff]  }
0x287e   : > { %9077 = vmatprep.mubr.bf16.mxu1 %v9044_v46 }
0x287f   : > { %9078 = vmatmul.mubr.bf16.vlgmr.msra.gmra.mrb[108].mxu1 %v9043_v18 }
0x2880   : > { %9411 = vmatpush1.bf16.msra.mxu1 %v17794_v39 }
0x2881   : > { %9412 = vmatprep.subr.bf16.mxu1 %v17797_v49 }
0x2884   : > { %9413 = vmatpush1.bf16.msra.mxu1 %v17800_v50 }
0x2885   : > { %9414 = vmatprep.subr.bf16.mxu1 %v17803_v57 }
0x2888   : > { %9415 = vmatpush1.bf16.msra.mxu1 %v17806_v56 }
0x2889   : > { %9416 = vmatprep.subr.bf16.mxu1 %v17809_v58 }
0x288c   : > { %9417 = vmatpush1.bf16.msra.mxu1 %v17812_v13 }
0x288d   : > { %9418 = vmatprep.subr.bf16.mxu1 %v17815_v51 }
0x2890   : > { %9419 = vmatpush1.bf16.msra.mxu1 %v17818_v7 }
0x2891   : > { %9420 = vmatprep.subr.bf16.mxu1 %v17821_v37 }
0x2894   : > { %9421 = vmatpush1.bf16.msra.mxu1 %v17824_v5 }
0x2895   : > { %9422 = vmatprep.subr.bf16.mxu1 %v17827_v34 }
0x2898   : > { %9423 = vmatpush1.bf16.msra.mxu1 %v17830_v6 }
0x2899   : > { %9424 = vmatprep.subr.bf16.mxu1 %v17833_v10 }
0x289c   : > { %9425 = vmatpush1.bf16.msra.mxu1 %v17836_v42 }
0x289d   : > { %9426 = vmatprep.subr.bf16.mxu1 %v17839_v8 }
0x28a0   : > { %9427 = vmatpush1.bf16.msra.mxu1 %v17842_v33 }
0x28a1   : > { %9428 = vmatprep.subr.bf16.mxu1 %v17845_v48 }
0x28a4   : > { %9429 = vmatpush1.bf16.msra.mxu1 %v17848_v26 }
0x28a5   : > { %9430 = vmatprep.subr.bf16.mxu1 %v17851_v38 }
0x28a8   : > { %9431 = vmatpush1.bf16.msra.mxu1 %v17854_v45 }
0x28a9   : > { %9432 = vmatprep.subr.bf16.mxu1 %v17857_v44 }
0x28ac   : > { %9433 = vmatpush1.bf16.msra.mxu1 %v17860_v53 }
0x28ad   : > { %9434 = vmatprep.subr.bf16.mxu1 %v17919_v1 }
0x28b0   : > { %9435 = vmatpush1.bf16.msra.mxu1 %v17922_v12 }
0x28b1   : > { %9436 = vmatprep.subr.bf16.mxu1 %v17925_v63 }
0x28b4   : > { %9437 = vmatpush1.bf16.msra.mxu1 %v17928_v2 }
0x28b5   : > { %9438 = vmatprep.subr.bf16.mxu1 %v17931_v59 }
0x28b8   : > { %9439 = vmatpush1.bf16.msra.mxu1 %v17934_v61 }
0x28b9   : > { %9440 = vmatprep.subr.bf16.mxu1 %v17937_v62 }
0x28bc   : > { %9441 = vmatpush1.bf16.msra.mxu1 %v17940_v3 }
0x28bd   : > { %9775 = vmatprep.subr.bf16.mxu1 %v17871_v17  ;;  %v14887_v17 = vld [vmem:[#allocation15 + $0xc70] sm:$0xff]  }
0x28be   : > { %13282 = vmatprep.subr.bf16.mxu0 %v14887_v17 }
0x28bf   : > { %13283 = vmatpush3.bf16.msra.mxu0 %v14888_v31  ;;  %v14894_v31 = vld [vmem:[#allocation15 + $0xc98] sm:$0xff]  }
0x28c0   : > { %13284 = vmatprep.subr.bf16.mxu0 %v14889_v14  ;;  %v14895_v14 = vld [vmem:[#allocation15 + $0xca0] sm:$0xff]  }
0x28c3   : > { %13285 = vmatpush3.bf16.msra.mxu0 %v14890_v24  ;;  %v14896_v24 = vld [vmem:[#allocation15 + $0xca8] sm:$0xff]  }
0x28c4   : > { %13897 = vmatprep.subr.bf16.mxu0 %v15880_v52 }
0x2952   : > { %v9079_v25 = vpop.f32.mrb[108].mxu1 }
0x2953   : > { %v9086_v22 = vmul.f32 %v9079_v25, %v9079_v25  ;;  %v9081_v27 = vpop.f32.mrb[109].mxu1  ;;  %v9092_v18 = vrot.slane %v9079_v25, %v16588_v4  ;;  %v14897_v25 = vld [vmem:[#allocation15 + $0xcb0] sm:$0xff]  }
0x2954   : > { %v9083_v21 = vpop.f32.mrb[110].mxu1 }
0x2955   : > { %v9087_v28 = vsub.f32 %v9081_v27, %v9086_v22  ;;  %v9084_v29 = vpop.f32.mrb[111].mxu1  ;;  %v9093_v16 = vsub.f32 %v17889_v55, %v9092_v18  ;;  %v14892_v55 = vld [vmem:[#allocation15 + $0xc88] sm:$0xff]   ;;  %v14898_v22 = vld [vmem:[#allocation15 + $0xcb8] sm:$0xff]  }
0x2956   : > { %v14900_v29 = vld [vmem:[#allocation15 + $0xcc0] sm:$0xff]  }
0x2957   : > { %v9088_v32 = vmax.f32 %v9087_v28, 0.0  ;;  %v14899_v28 = vld [vmem:[#allocation15 + $0xd00] sm:$0xff]  }
0x2959   : > { %v9094_v46 = vadd.f32 1e-05, %v9088_v32 }
0x295b   : > { %15066 = vrsqrt.f32 %v9094_v46 }
0x2965   : > { %v15067_v0 = vpop.eup %15066 }
0x2966   : > { %v9099_v43 = vrot.slane %v15067_v0, %v16588_v4 }
0x2968   : > { %v9100_v11 = vmul.f32 %v9099_v43, %v9093_v16  ;;  %v12430_v43 = vld [vmem:[#allocation16 + $0x10] ss:$0 sm:$0xff] }
0x296a   : > { %v17949_v9 = vadd.f32 %v9100_v11, %v17770_v54  ;;  %v14893_v54 = vld [vmem:[#allocation15 + $0xc90] sm:$0xff]  }
0x296c   : > { %v9161_v35 = vpack.c.bf16 %v17949_v9, %v17949_v9  ;;  %v9154_v36 = vrot.slane %v17949_v9, 1  ;;  %v9156_v20 = vrot.slane %v17949_v9, 7 }
0x296e   : > { %9345 = vmatprep.mubr.bf16.mxu0 %v9161_v35  ;;  %v9158_v40 = vsel %vm1083_vm3, %v9154_v36, %v9156_v20  ;;  %v9159_v27 = vsel %vm1069_vm2, %v9154_v36, %v9156_v20 }
0x296f   : > { %v9160_v17 = vpack.c.bf16 %v9158_v40, %v9158_v40  ;;  %v9162_v21 = vpack.c.bf16 %v9159_v27, %v9159_v27 }
0x2971   : > { %9346 = vmatmul.mubr.bf16.vlgmr.msra.gmra.mrb[148].mxu0 %v9160_v17 }
0x2972   : > { %13898 = vmatpush3.bf16.msra.mxu0 %v14891_v15  ;;  %13913 = vmatprep.mubr.msk.bf16.mxu0 %vm15881_vm12, %v15880_v52 }
0x2973   : > { %13899 = vmatprep.subr.bf16.mxu0 %v15880_v52 }
0x2976   : > { %13900 = vmatpush3.bf16.msra.mxu0 %v14892_v55 }
0x2977   : > { %13901 = vmatprep.subr.bf16.mxu0 %v15880_v52 }
0x297a   : > { %13902 = vmatpush3.bf16.msra.mxu0 %v14893_v54 }
0x297b   : > { %13903 = vmatprep.subr.bf16.mxu0 %v15880_v52 }
0x297e   : > { %13904 = vmatpush3.bf16.msra.mxu0 %v14894_v31 }
0x297f   : > { %13905 = vmatprep.subr.bf16.mxu0 %v15880_v52 }
0x2982   : > { %13906 = vmatpush3.bf16.msra.mxu0 %v14895_v14 }
0x2983   : > { %13907 = vmatprep.subr.bf16.mxu0 %v15880_v52 }
0x2986   : > { %13908 = vmatpush3.bf16.msra.mxu0 %v14896_v24 }
0x2987   : > { %13909 = vmatprep.subr.bf16.mxu0 %v15880_v52 }
0x298a   : > { %13910 = vmatpush3.bf16.msra.mxu0 %v14897_v25 }
0x298b   : > { %13911 = vmatprep.subr.bf16.mxu0 %v15880_v52 }
0x298e   : > { %13912 = vmatpush3.bf16.msra.mxu0 %v14898_v22 }
0x298f   : > { %13301 = vmatprep.subr.bf16.mxu0 %v14899_v28 }
0x2991   : > { %13914 = vmatmul.mubr.bf16.vlgmr.msra.gmra.mrb[152].mxu0 %v9162_v21 }
0x2992   : > { %13302 = vmatpush3.bf16.msra.mxu0 %v14900_v29 }
0x2a44   : > { %v13286_v32 = vpop.f32.mrb[148].mxu0 }
0x2a45   : > { %v13287_v46 = vpop.f32.mrb[149].mxu0 }
0x2a46   : > { %v13288_v18 = vadd.f32 %v13287_v46, %v13286_v32  ;;  %v13289_v0 = vpop.f32.mrb[150].mxu0 }
0x2a47   : > { %v13290_v16 = vpop.f32.mrb[151].mxu0 }
0x2a48   : > { %v9348_v11 = vadd.f32 %v13288_v18, %v12430_v43 }
0x2a64   : > { %v9387_v35 = vpop.f32.mrb[152].mxu0 }
0x2a65   : > { %v17966_v40 = vadd.f32 %v9387_v35, %v9348_v11  ;;  %v13915_v15 = vpop.f32.mrb[153].mxu0  ;;  %v14915_v11 = vld [vmem:[#allocation15 + $0xd40] sm:$0xff]  }
0x2a66   : > { %v9390_v17 = vpop.f32.mrb[154].mxu0  ;;  %v14916_v15 = vld [vmem:[#allocation15 + $0xd48] sm:$0xff]  }
0x2a67   : > { %v9393_v36 = vmul.f32 %v17966_v40, %v17966_v40  ;;  %v9394_v20 = vsel %vm2631_vm5, %v17966_v40, 0.0  ;;  %v13916_v55 = vpop.f32.mrb[155].mxu0  ;;  %v14918_v17 = vld [vmem:[#allocation15 + $0xd58] sm:$0xff]  }
0x2a68   : > { %v9395_v54 = vrot.slane %v9394_v20, 4  ;;  %v14921_v55 = vld [vmem:[#allocation15 + $0xd70] sm:$0xff]  }
0x2a69   : > { %v9401_v31 = vsel %vm2631_vm5, %v9393_v36, 0.0  ;;  %v14919_v36 = vld [vmem:[#allocation15 + $0xd60] sm:$0xff]  }
0x2a6a   : > { %v9396_v14 = vadd.f32 %v9395_v54, %v9394_v20  ;;  %v9402_v24 = vrot.slane %v9401_v31, 4  ;;  %v14920_v20 = vld [vmem:[#allocation15 + $0xd68] sm:$0xff]   ;;  %v14922_v54 = vld [vmem:[#allocation15 + $0xd78] sm:$0xff]  }
0x2a6c   : > { %v9397_v25 = vrot.slane %v9396_v14, 2  ;;  %v9403_v22 = vadd.f32 %v9402_v24, %v9401_v31 }
0x2a6e   : > { %v9398_v27 = vadd.f32 %v9397_v25, %v9396_v14  ;;  %v9404_v21 = vrot.slane %v9403_v22, 2 }
0x2a70   : > { %v9405_v28 = vadd.f32 %v9404_v21, %v9403_v22  ;;  %v9399_v29 = vrot.slane %v9398_v27, 1 }
0x2a72   : > { %v9406_v32 = vrot.slane %v9405_v28, 1  ;;  %v9400_v46 = vadd.f32 %v9399_v29, %v9398_v27 }
0x2a74   : > { %v9407_v18 = vadd.f32 %v9406_v32, %v9405_v28  ;;  %v9408_v16 = vpack.c.bf16 %v9400_v46, %v9400_v46  ;;  %v12455_v28 = vld [vmem:[#allocation16 + $0x11] ss:$0 sm:$0xff] }
0x2a76   : > { %v9409_v0 = vpack.c.bf16 %v9407_v18, %v9407_v18 }
0x2a78   : > { %9442 = vmatprep.mubr.bf16.mxu1 %v9409_v0 }
0x2a79   : > { %9443 = vmatmul.mubr.bf16.vlgmr.msra.gmra.mrb[112].mxu1 %v9408_v16 }
0x2a7a   : > { %9776 = vmatpush1.bf16.msra.mxu1 %v17794_v39  ;;  %v14901_v39 = vld [vmem:[#allocation15 + $0xd08] sm:$0xff]  }
0x2a7b   : > { %9777 = vmatprep.subr.bf16.mxu1 %v17797_v49  ;;  %v14902_v49 = vld [vmem:[#allocation15 + $0xcc8] sm:$0xff]   ;;  %13303 = vmatprep.subr.bf16.mxu0 %v14901_v39 }
0x2a7c   : > { %13304 = vmatpush3.bf16.msra.mxu0 %v14902_v49 }
0x2a7e   : > { %9778 = vmatpush1.bf16.msra.mxu1 %v17800_v50  ;;  %v14903_v50 = vld [vmem:[#allocation15 + $0xd10] sm:$0xff]  }
0x2a7f   : > { %9779 = vmatprep.subr.bf16.mxu1 %v17803_v57  ;;  %v14904_v57 = vld [vmem:[#allocation15 + $0xcd0] sm:$0xff]   ;;  %13305 = vmatprep.subr.bf16.mxu0 %v14903_v50 }
0x2a80   : > { %13306 = vmatpush3.bf16.msra.mxu0 %v14904_v57 }
0x2a82   : > { %9780 = vmatpush1.bf16.msra.mxu1 %v17806_v56  ;;  %v14905_v56 = vld [vmem:[#allocation15 + $0xd18] sm:$0xff]  }
0x2a83   : > { %9781 = vmatprep.subr.bf16.mxu1 %v17809_v58  ;;  %v14906_v58 = vld [vmem:[#allocation15 + $0xcd8] sm:$0xff]   ;;  %13307 = vmatprep.subr.bf16.mxu0 %v14905_v56 }
0x2a84   : > { %13308 = vmatpush3.bf16.msra.mxu0 %v14906_v58 }
0x2a86   : > { %9782 = vmatpush1.bf16.msra.mxu1 %v17812_v13  ;;  %v14907_v13 = vld [vmem:[#allocation15 + $0xd20] sm:$0xff]  }
0x2a87   : > { %9783 = vmatprep.subr.bf16.mxu1 %v17815_v51  ;;  %v14908_v51 = vld [vmem:[#allocation15 + $0xce0] sm:$0xff]   ;;  %13309 = vmatprep.subr.bf16.mxu0 %v14907_v13 }
0x2a88   : > { %13310 = vmatpush3.bf16.msra.mxu0 %v14908_v51 }
0x2a8a   : > { %9784 = vmatpush1.bf16.msra.mxu1 %v17818_v7  ;;  %v14909_v7 = vld [vmem:[#allocation15 + $0xd28] sm:$0xff]  }
0x2a8b   : > { %9785 = vmatprep.subr.bf16.mxu1 %v17821_v37  ;;  %v14910_v37 = vld [vmem:[#allocation15 + $0xce8] sm:$0xff]   ;;  %13311 = vmatprep.subr.bf16.mxu0 %v14909_v7 }
0x2a8c   : > { %13312 = vmatpush3.bf16.msra.mxu0 %v14910_v37 }
0x2a8e   : > { %9786 = vmatpush1.bf16.msra.mxu1 %v17824_v5  ;;  %v14911_v5 = vld [vmem:[#allocation15 + $0xd30] sm:$0xff]  }
0x2a8f   : > { %9787 = vmatprep.subr.bf16.mxu1 %v17827_v34  ;;  %v14912_v34 = vld [vmem:[#allocation15 + $0xcf0] sm:$0xff]   ;;  %13313 = vmatprep.subr.bf16.mxu0 %v14911_v5 }
0x2a90   : > { %13314 = vmatpush3.bf16.msra.mxu0 %v14912_v34 }
0x2a92   : > { %9788 = vmatpush1.bf16.msra.mxu1 %v17830_v6  ;;  %v14913_v6 = vld [vmem:[#allocation15 + $0xd38] sm:$0xff]  }
0x2a93   : > { %9789 = vmatprep.subr.bf16.mxu1 %v17833_v10  ;;  %v14914_v10 = vld [vmem:[#allocation15 + $0xcf8] sm:$0xff]   ;;  %13315 = vmatprep.subr.bf16.mxu0 %v14913_v6 }
0x2a94   : > { %13316 = vmatpush3.bf16.msra.mxu0 %v14914_v10 }
0x2a95   : > { %13917 = vmatprep.subr.bf16.mxu0 %v15880_v52 }
0x2a96   : > { %9790 = vmatpush1.bf16.msra.mxu1 %v17836_v42 }
0x2a97   : > { %9791 = vmatprep.subr.bf16.mxu1 %v17839_v8 }
0x2a9a   : > { %9792 = vmatpush1.bf16.msra.mxu1 %v17842_v33 }
0x2a9b   : > { %9793 = vmatprep.subr.bf16.mxu1 %v17845_v48 }
0x2a9e   : > { %9794 = vmatpush1.bf16.msra.mxu1 %v17848_v26 }
0x2a9f   : > { %9795 = vmatprep.subr.bf16.mxu1 %v17851_v38 }
0x2aa2   : > { %9796 = vmatpush1.bf16.msra.mxu1 %v17854_v45 }
0x2aa3   : > { %9797 = vmatprep.subr.bf16.mxu1 %v17857_v44 }
0x2aa6   : > { %9798 = vmatpush1.bf16.msra.mxu1 %v17860_v53 }
0x2aa7   : > { %9799 = vmatprep.subr.bf16.mxu1 %v17919_v1 }
0x2aaa   : > { %9800 = vmatpush1.bf16.msra.mxu1 %v17922_v12 }
0x2aab   : > { %9801 = vmatprep.subr.bf16.mxu1 %v17925_v63 }
0x2aae   : > { %9802 = vmatpush1.bf16.msra.mxu1 %v17928_v2 }
0x2aaf   : > { %9803 = vmatprep.subr.bf16.mxu1 %v17931_v59 }
0x2ab2   : > { %9804 = vmatpush1.bf16.msra.mxu1 %v17934_v61 }
0x2ab3   : > { %9805 = vmatprep.subr.bf16.mxu1 %v17937_v62 }
0x2ab6   : > { %9806 = vmatpush1.bf16.msra.mxu1 %v17940_v3 }
0x2ab7   : > { %13937 = vmatprep.subr.bf16.mxu1 %v15880_v52 }
0x2b4c   : > { %v9444_v42 = vpop.f32.mrb[112].mxu1 }
0x2b4d   : > { %v9451_v8 = vmul.f32 %v9444_v42, %v9444_v42  ;;  %v9446_v33 = vpop.f32.mrb[113].mxu1  ;;  %v9457_v53 = vrot.slane %v9444_v42, %v16588_v4 }
0x2b4e   : > { %v9448_v48 = vpop.f32.mrb[114].mxu1 }
0x2b4f   : > { %v9452_v26 = vsub.f32 %v9446_v33, %v9451_v8  ;;  %v9449_v38 = vpop.f32.mrb[115].mxu1  ;;  %v9458_v12 = vsub.f32 %v17966_v40, %v9457_v53  ;;  %v14917_v40 = vld [vmem:[#allocation15 + $0xd50] sm:$0xff]  }
0x2b51   : > { %v9453_v45 = vmax.f32 %v9452_v26, 0.0 }
0x2b53   : > { %v9459_v44 = vadd.f32 1e-05, %v9453_v45 }
0x2b55   : > { %15068 = vrsqrt.f32 %v9459_v44 }
0x2b5f   : > { %v15069_v1 = vpop.eup %15068 }
0x2b60   : > { %v9464_v63 = vrot.slane %v15069_v1, %v16588_v4 }
0x2b62   : > { %v9465_v2 = vmul.f32 %v9464_v63, %v9458_v12 }
0x2b64   : > { %v9466_v59 = vmax.f32 %v9465_v2, 0.0 }
0x2b66   : > { %v9526_v61 = vpack.c.bf16 %v9466_v59, %v9466_v59  ;;  %v9519_v62 = vrot.slane %v9466_v59, 1  ;;  %v9521_v3 = vrot.slane %v9466_v59, 7 }
0x2b68   : > { %9710 = vmatprep.mubr.bf16.mxu0 %v9526_v61  ;;  %v9523_v43 = vsel %vm1083_vm3, %v9519_v62, %v9521_v3  ;;  %v9524_v31 = vsel %vm1069_vm2, %v9519_v62, %v9521_v3 }
0x2b69   : > { %v9525_v35 = vpack.c.bf16 %v9523_v43, %v9523_v43  ;;  %v9527_v14 = vpack.c.bf16 %v9524_v31, %v9524_v31  ;;  %v14926_v31 = vld [vmem:[#allocation18 + $0x8] sm:$0xff]  }
0x2b6b   : > { %9711 = vmatmul.mubr.bf16.vlgmr.msra.gmra.mrb[156].mxu0 %v9525_v35  ;;  %v9882_v35 = vld [vmem:[%s18245_s25] sm:$0xf] }
0x2b6c   : > { %13918 = vmatpush3.bf16.msra.mxu0 %v14915_v11  ;;  %13933 = vmatprep.mubr.msk.bf16.mxu0 %vm15881_vm12, %v15880_v52 }
0x2b6d   : > { %13919 = vmatprep.subr.bf16.mxu0 %v15880_v52 }
0x2b70   : > { %13920 = vmatpush3.bf16.msra.mxu0 %v14916_v15  ;;  %v12481_v15 = vld [vmem:[%s18245_s25 + $0x4] sm:$0xf] }
0x2b71   : > { %13921 = vmatprep.subr.bf16.mxu0 %v15880_v52 }
0x2b74   : > { %13922 = vmatpush3.bf16.msra.mxu0 %v14917_v40  ;;  %v14923_v40 = vld [vmem:[#allocation18 + $0x40] sm:$0xff]  }
0x2b75   : > { %13923 = vmatprep.subr.bf16.mxu0 %v15880_v52 }
0x2b78   : > { %13924 = vmatpush3.bf16.msra.mxu0 %v14918_v17  ;;  %v14931_v17 = vld [vmem:[#allocation18 + $0x88] sm:$0xff]  }
0x2b79   : > { %13925 = vmatprep.subr.bf16.mxu0 %v15880_v52 }
0x2b7c   : > { %13926 = vmatpush3.bf16.msra.mxu0 %v14919_v36  ;;  %v12483_v36 = vld [vmem:[%s18245_s25 + $0x8] sm:$0xf] }
0x2b7d   : > { %13927 = vmatprep.subr.bf16.mxu0 %v15880_v52 }
0x2b80   : > { %13928 = vmatpush3.bf16.msra.mxu0 %v14920_v20  ;;  %v14924_v20 = vld [vmem:[#allocation18] sm:$0xff]  }
0x2b81   : > { %13929 = vmatprep.subr.bf16.mxu0 %v15880_v52 }
0x2b84   : > { %13930 = vmatpush3.bf16.msra.mxu0 %v14921_v55  ;;  %v14925_v55 = vld [vmem:[#allocation18 + $0x48] sm:$0xff]  }
0x2b85   : > { %13931 = vmatprep.subr.bf16.mxu0 %v15880_v52 }
0x2b88   : > { %13932 = vmatpush3.bf16.msra.mxu0 %v14922_v54  ;;  %v14934_v54 = vld [vmem:[#allocation18 + $0x90] sm:$0xff]  }
0x2b89   : > { %13943 = vmatprep.subr.bf16.mxu0 %v15880_v52 }
0x2b8b   : > { %13934 = vmatmul.mubr.bf16.vlgmr.msra.gmra.mrb[160].mxu0 %v9527_v14  ;;  %v14927_v14 = vld [vmem:[#allocation18 + $0x50] sm:$0xff]  }
0x2b8c   : > { %13945 = vmatprep.mubr.msk.bf16.mxu0 %vm15881_vm12, %v15880_v52 }
0x2c3e   : > { %v13317_v24 = vpop.f32.mrb[156].mxu0 }
0x2c3f   : > { %v13318_v25 = vpop.f32.mrb[157].mxu0 }
0x2c40   : > { %v13319_v22 = vadd.f32 %v13318_v25, %v13317_v24  ;;  %v13320_v27 = vpop.f32.mrb[158].mxu0  ;;  %v14937_v24 = vld [vmem:[#allocation18 + $0x98] sm:$0xff]   ;;  %v14929_v25 = vld [vmem:[#allocation18 + $0x10] sm:$0xff]  }
0x2c41   : > { %v13321_v21 = vpop.f32.mrb[159].mxu0  ;;  %v14940_v27 = vld [vmem:[#allocation18 + $0xa0] sm:$0xff]  }
0x2c42   : > { %v9713_v29 = vadd.f32 %v13319_v22, %v12455_v28  ;;  %v14930_v22 = vld [vmem:[#allocation18 + $0x58] sm:$0xff]   ;;  %v14933_v28 = vld [vmem:[#allocation18 + $0x60] sm:$0xff]  }
0x2c43   : > { %v14932_v21 = vld [vmem:[#allocation18 + $0x18] sm:$0xff]  }
0x2c5e   : > { %v9752_v32 = vpop.f32.mrb[160].mxu0 }
0x2c5f   : > { %v9753_v46 = vadd.f32 %v9752_v32, %v9713_v29  ;;  %v13935_v18 = vpop.f32.mrb[161].mxu0  ;;  %v14935_v29 = vld [vmem:[#allocation18 + $0x20] sm:$0xff]   ;;  %v14936_v32 = vld [vmem:[#allocation18 + $0x68] sm:$0xff]  }
0x2c60   : > { %v9755_v0 = vpop.f32.mrb[162].mxu0  ;;  %v14939_v18 = vld [vmem:[#allocation18 + $0x70] sm:$0xff]  }
0x2c61   : > { %v9758_v16 = vmul.f32 %v9753_v46, %v9753_v46  ;;  %v9759_v39 = vsel %vm2631_vm5, %v9753_v46, 0.0  ;;  %v13936_v49 = vpop.f32.mrb[163].mxu0  ;;  %v14941_v0 = vld [vmem:[#allocation18 + $0x30] sm:$0xff]  }
0x2c62   : > { %v9760_v50 = vrot.slane %v9759_v39, 4  ;;  %v14944_v49 = vld [vmem:[#allocation18 + $0x38] sm:$0xff]  }
0x2c63   : > { %v9766_v57 = vsel %vm2631_vm5, %v9758_v16, 0.0  ;;  %v14942_v16 = vld [vmem:[#allocation18 + $0x78] sm:$0xff]  }
0x2c64   : > { %v9761_v56 = vadd.f32 %v9760_v50, %v9759_v39  ;;  %v9767_v58 = vrot.slane %v9766_v57, 4  ;;  %v14943_v39 = vld [vmem:[#allocation18 + $0xa8] sm:$0xff]   ;;  %v14945_v50 = vld [vmem:[#allocation18 + $0xb0] sm:$0xff]  }
0x2c66   : > { %v9762_v13 = vrot.slane %v9761_v56, 2  ;;  %v9768_v51 = vadd.f32 %v9767_v58, %v9766_v57  ;;  %v15208_v57 = vld [vmem:[#allocation28 + $0x4] ss:$8 sps:$4 sm:$0xff]  }
0x2c68   : > { %v9763_v7 = vadd.f32 %v9762_v13, %v9761_v56  ;;  %v9769_v37 = vrot.slane %v9768_v51, 2  ;;  %v14946_v56 = vld [vmem:[#allocation18 + $0xb8] sm:$0xff]  }
0x2c6a   : > { %v9770_v5 = vadd.f32 %v9769_v37, %v9768_v51  ;;  %v9764_v34 = vrot.slane %v9763_v7, 1 }
0x2c6c   : > { %v9771_v6 = vrot.slane %v9770_v5, 1  ;;  %v9765_v10 = vadd.f32 %v9764_v34, %v9763_v7 }
0x2c6e   : > { %v9772_v42 = vadd.f32 %v9771_v6, %v9770_v5  ;;  %v9773_v33 = vpack.c.bf16 %v9765_v10, %v9765_v10 }
0x2c70   : > { %v9774_v8 = vpack.c.bf16 %v9772_v42, %v9772_v42 }
0x2c72   : > { %9807 = vmatprep.mubr.bf16.mxu1 %v9774_v8  ;;  %v15209_v8 = vld [vmem:[#allocation28] ss:$8 sps:$4 sm:$0xff]  }
0x2c73   : > { %9808 = vmatmul.mubr.bf16.vlgmr.msra.gmra.mrb[116].mxu1 %v9773_v33  ;;  %v15210_v33 = vld [vmem:[#allocation28 + $0x14] ss:$8 sps:$4 sm:$0xff]  }
0x2c74   : > { %13939 = vmatprep.mubr.msk.bf16.mxu1 %vm15881_vm12, %v15880_v52 }
0x2d46   : > { %v9809_v48 = vpop.f32.mrb[116].mxu1 }
0x2d47   : > { %v9816_v26 = vmul.f32 %v9809_v48, %v9809_v48  ;;  %v9811_v38 = vpop.f32.mrb[117].mxu1  ;;  %v9822_v63 = vrot.slane %v9809_v48, %v16588_v4 }
0x2d48   : > { %v9813_v45 = vpop.f32.mrb[118].mxu1 }
0x2d49   : > { %v9817_v44 = vsub.f32 %v9811_v38, %v9816_v26  ;;  %v9814_v53 = vpop.f32.mrb[119].mxu1  ;;  %v9823_v59 = vsub.f32 %v9753_v46, %v9822_v63  ;;  %v14938_v46 = vld [vmem:[#allocation18 + $0x28] sm:$0xff]   ;;  %v15211_v45 = vld [vmem:[#allocation28 + $0x10] ss:$8 sps:$4 sm:$0xff]   ;;  %v15214_v63 = vld [vmem:[#allocation28 + $0x34] ss:$8 sps:$4 sm:$0xff]  }
0x2d4a   : > { %v15212_v53 = vld [vmem:[#allocation28 + $0x24] ss:$8 sps:$4 sm:$0xff]  }
0x2d4b   : > { %v9818_v1 = vmax.f32 %v9817_v44, 0.0 }
0x2d4d   : > { %v9824_v12 = vadd.f32 1e-05, %v9818_v1 }
0x2d4f   : > { %15070 = vrsqrt.f32 %v9824_v12  ;;  %v15213_v12 = vld [vmem:[#allocation28 + $0x20] ss:$8 sps:$4 sm:$0xff]  }
0x2d59   : > { %v15071_v2 = vpop.eup %15070 }
0x2d5a   : > { %v9829_v61 = vrot.slane %v15071_v2, %v16588_v4  ;;  %v15215_v2 = vld [vmem:[#allocation28 + $0x30] ss:$8 sps:$4 sm:$0xff]  }
0x2d5c   : > { %v9830_v62 = vmul.f32 %v9829_v61, %v9823_v59  ;;  %v15216_v59 = vld [vmem:[#allocation28 + $0x44] ss:$8 sps:$4 sm:$0xff]   ;;  %v15217_v61 = vld [vmem:[#allocation28 + $0x40] ss:$8 sps:$4 sm:$0xff]  }
0x2d5e   : > { %v9831_v3 = vadd.f32 %v9830_v62, %v17949_v9  ;;  %v14928_v9 = vld [vmem:[#allocation18 + $0x80] sm:$0xff]  }
0x2d5f   : > { %v15218_v62 = vld [vmem:[#allocation28 + $0x54] ss:$8 sps:$4 sm:$0xff]  }
0x2d60   : > { %v9881_v43 = vpack.c.bf16 %v9831_v3, %v9831_v3  ;;  %v15219_v3 = vld [vmem:[#allocation28 + $0x50] ss:$8 sps:$4 sm:$0xff]  }
0x2d62   : > { %v9888_v11 = vsel %vm1076_vm0, %v9881_v43, 0  ;;  %v15220_v43 = vld [vmem:[#allocation28 + $0x64] ss:$8 sps:$4 sm:$0xff]  }
0x2d63   : > { %13938 = vmatpush3.bf16.msra.mxu1 %v9888_v11  ;;  %13944 = vmatpush3.bf16.msra.mxu0 %v9888_v11 }
0x2d64   : > { %13949 = vmatprep.subr.bf16.mxu0 %v15880_v52  ;;  %13955 = vmatprep.subr.bf16.mxu1 %v15880_v52 }
0x2d66   : > { %13940 = vmatmul.mubr.msk.bf16.vlgmr.msra.gmra.mrb[120].mxu1 %vm9883_vm4, %v9882_v35  ;;  %13946 = vmatmul.mubr.msk.bf16.vlgmr.msra.gmra.mrb[164].mxu0 %vm9883_vm4, %v12481_v15  ;;  %v15222_v35 = vld [vmem:[#allocation28 + $0x74] ss:$8 sps:$4 sm:$0xff]   ;;  %v15223_v15 = vld [vmem:[#allocation28 + $0x70] ss:$8 sps:$4 sm:$0xff]  }
0x2d67   : > { %13950 = vmatpush3.bf16.msra.mxu0 %v9888_v11  ;;  %13951 = vmatprep.mubr.msk.bf16.mxu0 %vm15881_vm12, %v15880_v52  ;;  %v15221_v11 = vld [vmem:[#allocation28 + $0x60] ss:$8 sps:$4 sm:$0xff]  }
0x2d68   : > { %13338 = vmatprep.subr.bf16.mxu0 %v14923_v40  ;;  %13956 = vmatpush3.bf16.msra.mxu1 %v14928_v9  ;;  %v15224_v40 = vld [vmem:[#allocation28 + $0x84] ss:$8 sps:$4 sm:$0xff]   ;;  %v15225_v9 = vld [vmem:[#allocation28 + $0x80] ss:$8 sps:$4 sm:$0xff]  }
0x2d69   : > { %13957 = vmatprep.subr.bf16.mxu1 %v15880_v52  ;;  %13971 = vmatprep.mubr.msk.bf16.mxu1 %vm15881_vm12, %v15880_v52 }
0x2d6c   : > { %13958 = vmatpush3.bf16.msra.mxu1 %v14931_v17  ;;  %v15226_v17 = vld [vmem:[#allocation28 + $0x94] ss:$8 sps:$4 sm:$0xff]  }
0x2d6d   : > { %13959 = vmatprep.subr.bf16.mxu1 %v15880_v52 }
0x2d6e   : > { %13952 = vmatmul.mubr.msk.bf16.vlgmr.msra.gmra.mrb[168].mxu0 %vm9883_vm4, %v12483_v36  ;;  %v15227_v36 = vld [vmem:[#allocation28 + $0x90] ss:$8 sps:$4 sm:$0xff]  }
0x2d6f   : > { %13339 = vmatpush3.bf16.msra.mxu0 %v14924_v20  ;;  %v15228_v20 = vld [vmem:[#allocation28 + $0xa4] ss:$8 sps:$4 sm:$0xff]  }
0x2d70   : > { %13340 = vmatprep.subr.bf16.mxu0 %v14925_v55  ;;  %13960 = vmatpush3.bf16.msra.mxu1 %v14934_v54  ;;  %v15229_v55 = vld [vmem:[#allocation28 + $0xa0] ss:$8 sps:$4 sm:$0xff]   ;;  %v15230_v54 = vld [vmem:[#allocation28 + $0xb4] ss:$8 sps:$4 sm:$0xff]  }
0x2d71   : > { %13961 = vmatprep.subr.bf16.mxu1 %v15880_v52 }
0x2d73   : > { %13341 = vmatpush3.bf16.msra.mxu0 %v14926_v31  ;;  %v15231_v31 = vld [vmem:[#allocation28 + $0xb0] ss:$8 sps:$4 sm:$0xff]  }
0x2d74   : > { %13342 = vmatprep.subr.bf16.mxu0 %v14927_v14  ;;  %13962 = vmatpush3.bf16.msra.mxu1 %v14937_v24  ;;  %v15232_v14 = vld [vmem:[#allocation28 + $0xc4] ss:$8 sps:$4 sm:$0xff]   ;;  %v15233_v24 = vld [vmem:[#allocation28 + $0xc0] ss:$8 sps:$4 sm:$0xff]  }
0x2d75   : > { %13963 = vmatprep.subr.bf16.mxu1 %v15880_v52 }
0x2d77   : > { %13343 = vmatpush3.bf16.msra.mxu0 %v14929_v25  ;;  %v15234_v25 = vld [vmem:[#allocation28 + $0xd4] ss:$8 sps:$4 sm:$0xff]  }
0x2d78   : > { %13344 = vmatprep.subr.bf16.mxu0 %v14930_v22  ;;  %13964 = vmatpush3.bf16.msra.mxu1 %v14940_v27  ;;  %v15235_v22 = vld [vmem:[#allocation28 + $0xd0] ss:$8 sps:$4 sm:$0xff]   ;;  %v15236_v27 = vld [vmem:[#allocation28 + $0xe4] ss:$8 sps:$4 sm:$0xff]  }
0x2d79   : > { %13965 = vmatprep.subr.bf16.mxu1 %v15880_v52 }
0x2d7b   : > { %13345 = vmatpush3.bf16.msra.mxu0 %v14932_v21  ;;  %v15237_v21 = vld [vmem:[#allocation28 + $0xe0] ss:$8 sps:$4 sm:$0xff]  }
0x2d7c   : > { %13346 = vmatprep.subr.bf16.mxu0 %v14933_v28  ;;  %13966 = vmatpush3.bf16.msra.mxu1 %v14943_v39  ;;  %v15238_v28 = vld [vmem:[#allocation28 + $0xf4] ss:$8 sps:$4 sm:$0xff]  }
0x2d7d   : > { %13967 = vmatprep.subr.bf16.mxu1 %v15880_v52 }
0x2d7f   : > { %13347 = vmatpush3.bf16.msra.mxu0 %v14935_v29  ;;  %v15239_v29 = vld [vmem:[#allocation28 + $0xf0] ss:$8 sps:$4 sm:$0xff]  }
0x2d80   : > { %13348 = vmatprep.subr.bf16.mxu0 %v14936_v32  ;;  %13968 = vmatpush3.bf16.msra.mxu1 %v14945_v50 }
0x2d81   : > { %13969 = vmatprep.subr.bf16.mxu1 %v15880_v52 }
0x2d83   : > { %13349 = vmatpush3.bf16.msra.mxu0 %v14938_v46 }
0x2d84   : > { %13350 = vmatprep.subr.bf16.mxu0 %v14939_v18  ;;  %13970 = vmatpush3.bf16.msra.mxu1 %v14946_v56  ;;  %v12485_v18 = vld [vmem:[#allocation19] ss:$0 sm:$0xff] }
0x2d85   : > { %13975 = vmatprep.subr.bf16.mxu1 %v15880_v52 }
0x2d87   : > { %13351 = vmatpush3.bf16.msra.mxu0 %v14941_v0 }
0x2d88   : > { %13352 = vmatprep.subr.bf16.mxu0 %v14942_v16 }
0x2d8b   : > { %13353 = vmatpush3.bf16.msra.mxu0 %v14944_v49 }
0x2d8c   : > { %10268 = vmatprep.subr.bf16.mxu0 %v15208_v57 }
0x2e39   : > { %v9924_v58 = vpop.f32.mrb[120].mxu1  ;;  %v9970_v13 = vpop.f32.mrb[164].mxu0 }
0x2e3a   : > { %v9930_v51 = vpack.c.bf16 %v9924_v58, %v9924_v58  ;;  %v9976_v7 = vpack.c.bf16 %v9970_v13, %v9970_v13  ;;  %v13941_v37 = vpop.f32.mrb[121].mxu1  ;;  %v13947_v5 = vpop.f32.mrb[165].mxu0 }
0x2e3b   : > { %v9927_v34 = vpop.f32.mrb[122].mxu1  ;;  %v9973_v6 = vpop.f32.mrb[166].mxu0 }
0x2e3c   : > { %v13942_v10 = vpop.f32.mrb[123].mxu1  ;;  %v13948_v42 = vpop.f32.mrb[167].mxu0  ;;  %10205 = vmatprep.mubr.bf16.mxu0 %v9976_v7 }
0x2e3d   : > { %10206 = vmatmul.mubr.bf16.vlgmr.msra.gmra.mrb[172].mxu0 %v9930_v51 }
0x2e3e   : > { %10269 = vmatpush1.bf16.msra.mxu0 %v15209_v8 }
0x2e3f   : > { %10270 = vmatprep.subr.bf16.mxu0 %v15210_v33 }
0x2e41   : > { %v10016_v48 = vpop.f32.mrb[168].mxu0 }
0x2e42   : > { %v10022_v26 = vpack.c.bf16 %v10016_v48, %v10016_v48  ;;  %v13953_v38 = vpop.f32.mrb[169].mxu0  ;;  %10271 = vmatpush1.bf16.msra.mxu0 %v15211_v45 }
0x2e43   : > { %v10019_v44 = vpop.f32.mrb[170].mxu0  ;;  %10272 = vmatprep.subr.bf16.mxu0 %v15212_v53  ;;  %v14955_v53 = vld [vmem:[#allocation21 + $0x80] sm:$0xff]  }
0x2e44   : > { %v13954_v1 = vpop.f32.mrb[171].mxu0  ;;  %13972 = vmatmul.mubr.bf16.vlgmr.msra.gmra.mrb[124].mxu1 %v10022_v26 }
0x2e45   : > { %13977 = vmatprep.mubr.msk.bf16.mxu1 %vm15881_vm12, %v15880_v52  ;;  %v14958_v1 = vld [vmem:[#allocation21 + $0x88] sm:$0xff]  }
0x2e46   : > { %10273 = vmatpush1.bf16.msra.mxu0 %v15213_v12  ;;  %v14961_v12 = vld [vmem:[#allocation21 + $0x90] sm:$0xff]  }
0x2e47   : > { %10274 = vmatprep.subr.bf16.mxu0 %v15214_v63 }
0x2e4a   : > { %10275 = vmatpush1.bf16.msra.mxu0 %v15215_v2 }
0x2e4b   : > { %10276 = vmatprep.subr.bf16.mxu0 %v15216_v59 }
0x2e4e   : > { %10277 = vmatpush1.bf16.msra.mxu0 %v15217_v61 }
0x2e4f   : > { %10278 = vmatprep.subr.bf16.mxu0 %v15218_v62 }
0x2e52   : > { %10279 = vmatpush1.bf16.msra.mxu0 %v15219_v3 }
0x2e53   : > { %10280 = vmatprep.subr.bf16.mxu0 %v15220_v43 }
0x2e56   : > { %10281 = vmatpush1.bf16.msra.mxu0 %v15221_v11 }
0x2e57   : > { %10282 = vmatprep.subr.bf16.mxu0 %v15222_v35 }
0x2e5a   : > { %10283 = vmatpush1.bf16.msra.mxu0 %v15223_v15 }
0x2e5b   : > { %10284 = vmatprep.subr.bf16.mxu0 %v15224_v40 }
0x2e5e   : > { %10285 = vmatpush1.bf16.msra.mxu0 %v15225_v9 }
0x2e5f   : > { %10286 = vmatprep.subr.bf16.mxu0 %v15226_v17 }
0x2e62   : > { %10287 = vmatpush1.bf16.msra.mxu0 %v15227_v36 }
0x2e63   : > { %10288 = vmatprep.subr.bf16.mxu0 %v15228_v20 }
0x2e66   : > { %10289 = vmatpush1.bf16.msra.mxu0 %v15229_v55 }
0x2e67   : > { %10290 = vmatprep.subr.bf16.mxu0 %v15230_v54  ;;  %v14947_v54 = vld [vmem:[%s18246_s23] sm:$0xff]  }
0x2e6a   : > { %10291 = vmatpush1.bf16.msra.mxu0 %v15231_v31  ;;  %v14948_v31 = vld [vmem:[%s18246_s23 + $0x8] sm:$0xff]  }
0x2e6b   : > { %10292 = vmatprep.subr.bf16.mxu0 %v15232_v14  ;;  %v14950_v14 = vld [vmem:[#allocation21 + $0x40] sm:$0xff]  }
0x2e6e   : > { %10293 = vmatpush1.bf16.msra.mxu0 %v15233_v24  ;;  %v14949_v24 = vld [vmem:[%s18246_s23 + $0x10] sm:$0xff]  }
0x2e6f   : > { %10294 = vmatprep.subr.bf16.mxu0 %v15234_v25  ;;  %v14951_v25 = vld [vmem:[#allocation21] sm:$0xff]  }
0x2e72   : > { %10295 = vmatpush1.bf16.msra.mxu0 %v15235_v22  ;;  %v14952_v22 = vld [vmem:[#allocation21 + $0x48] sm:$0xff]  }
0x2e73   : > { %10296 = vmatprep.subr.bf16.mxu0 %v15236_v27  ;;  %v14953_v27 = vld [vmem:[#allocation21 + $0x8] sm:$0xff]  }
0x2e76   : > { %10297 = vmatpush1.bf16.msra.mxu0 %v15237_v21  ;;  %v14954_v21 = vld [vmem:[#allocation21 + $0x50] sm:$0xff]  }
0x2e77   : > { %10298 = vmatprep.subr.bf16.mxu0 %v15238_v28  ;;  %v14956_v28 = vld [vmem:[#allocation21 + $0x10] sm:$0xff]  }
0x2e7a   : > { %10299 = vmatpush1.bf16.msra.mxu0 %v15239_v29  ;;  %v14957_v29 = vld [vmem:[#allocation21 + $0x58] sm:$0xff]  }
0x2e7b   : > { %13993 = vmatprep.subr.bf16.mxu0 %v15880_v52 }
0x2f10   : > { %v13354_v32 = vpop.f32.mrb[172].mxu0 }
0x2f11   : > { %v13355_v46 = vpop.f32.mrb[173].mxu0 }
0x2f12   : > { %v13356_v0 = vadd.f32 %v13355_v46, %v13354_v32  ;;  %v13357_v16 = vpop.f32.mrb[174].mxu0  ;;  %v14959_v32 = vld [vmem:[#allocation21 + $0x18] sm:$0xff]   ;;  %v14960_v46 = vld [vmem:[#allocation21 + $0x60] sm:$0xff]  }
0x2f13   : > { %v13358_v39 = vpop.f32.mrb[175].mxu0  ;;  %v14964_v16 = vld [vmem:[#allocation21 + $0x98] sm:$0xff]  }
0x2f14   : > { %v10208_v49 = vadd.f32 %v13356_v0, %v12485_v18  ;;  %v14962_v18 = vld [vmem:[#allocation21 + $0x20] sm:$0xff]   ;;  %v14963_v0 = vld [vmem:[#allocation21 + $0x68] sm:$0xff]  }
0x2f15   : > { %v14965_v39 = vld [vmem:[#allocation21 + $0x28] sm:$0xff]  }
0x2f17   : > { %v10247_v50 = vpop.f32.mrb[124].mxu1 }
0x2f18   : > { %v10248_v57 = vadd.f32 %v10247_v50, %v10208_v49  ;;  %v13973_v56 = vpop.f32.mrb[125].mxu1  ;;  %v14966_v49 = vld [vmem:[#allocation21 + $0x70] sm:$0xff]   ;;  %v14967_v50 = vld [vmem:[#allocation21 + $0xa0] sm:$0xff]  }
0x2f19   : > { %v10250_v58 = vpop.f32.mrb[126].mxu1  ;;  %v14969_v56 = vld [vmem:[#allocation21 + $0x78] sm:$0xff]  }
0x2f1a   : > { %v10253_v13 = vmul.f32 %v10248_v57, %v10248_v57  ;;  %v10254_v51 = vrot.slane %v10248_v57, 4  ;;  %v13974_v7 = vpop.f32.mrb[127].mxu1  ;;  %v14970_v58 = vld [vmem:[#allocation21 + $0xa8] sm:$0xff]  }
0x2f1b   : > { %v15240_v7 = vld [vmem:[#allocation27 + $0x4] ss:$8 sps:$4 sm:$0xff]  }
0x2f1c   : > { %v10255_v37 = vadd.f32 %v10254_v51, %v10248_v57  ;;  %v10260_v5 = vrot.slane %v10253_v13, 4  ;;  %v14972_v51 = vld [vmem:[#allocation21 + $0xb0] sm:$0xff]  }
0x2f1e   : > { %v10256_v34 = vrot.slane %v10255_v37, 2  ;;  %v10261_v6 = vadd.f32 %v10260_v5, %v10253_v13  ;;  %v14971_v13 = vld [vmem:[#allocation21 + $0x38] sm:$0xff]  }
0x2f20   : > { %v10262_v10 = vrot.slane %v10261_v6, 2  ;;  %v10257_v42 = vadd.f32 %v10256_v34, %v10255_v37  ;;  %v14973_v37 = vld [vmem:[#allocation21 + $0xb8] sm:$0xff]  }
0x2f22   : > { %v10263_v8 = vadd.f32 %v10262_v10, %v10261_v6  ;;  %v10258_v33 = vrot.slane %v10257_v42, 1 }
0x2f24   : > { %v10264_v48 = vrot.slane %v10263_v8, 1  ;;  %v10259_v26 = vadd.f32 %v10258_v33, %v10257_v42 }
0x2f26   : > { %v10265_v38 = vadd.f32 %v10264_v48, %v10263_v8  ;;  %v10266_v44 = vpack.c.bf16 %v10259_v26, %v10259_v26 }
0x2f28   : > { %v10267_v45 = vpack.c.bf16 %v10265_v38, %v10265_v38 }
0x2f2a   : > { %10300 = vmatprep.mubr.bf16.mxu0 %v10267_v45  ;;  %v15241_v45 = vld [vmem:[#allocation27] ss:$8 sps:$4 sm:$0xff]  }
0x2f2b   : > { %10301 = vmatmul.mubr.bf16.vlgmr.msra.gmra.mrb[176].mxu0 %v10266_v44 }
0x2f2c   : > { %14009 = vmatprep.mubr.msk.bf16.mxu0 %vm15881_vm12, %v15880_v52  ;;  %13994 = vmatpush3.bf16.msra.mxu0 %v14955_v53  ;;  %v15242_v53 = vld [vmem:[#allocation27 + $0x14] ss:$8 sps:$4 sm:$0xff]  }
0x2f2d   : > { %13995 = vmatprep.subr.bf16.mxu0 %v15880_v52 }
0x2f30   : > { %13996 = vmatpush3.bf16.msra.mxu0 %v14958_v1 }
0x2f31   : > { %13997 = vmatprep.subr.bf16.mxu0 %v15880_v52 }
0x2f34   : > { %13998 = vmatpush3.bf16.msra.mxu0 %v14961_v12 }
0x2f35   : > { %13999 = vmatprep.subr.bf16.mxu0 %v15880_v52 }
0x2f38   : > { %14000 = vmatpush3.bf16.msra.mxu0 %v14964_v16  ;;  %v15271_v16 = vld [vmem:[#allocation27 + $0xf0] ss:$8 sps:$4 sm:$0xff]  }
0x2f39   : > { %14001 = vmatprep.subr.bf16.mxu0 %v15880_v52 }
0x2f3c   : > { %14002 = vmatpush3.bf16.msra.mxu0 %v14967_v50 }
0x2f3d   : > { %14003 = vmatprep.subr.bf16.mxu0 %v15880_v52 }
0x2f40   : > { %14004 = vmatpush3.bf16.msra.mxu0 %v14970_v58 }
0x2f41   : > { %14005 = vmatprep.subr.bf16.mxu0 %v15880_v52 }
0x2f44   : > { %14006 = vmatpush3.bf16.msra.mxu0 %v14972_v51 }
0x2f45   : > { %14007 = vmatprep.subr.bf16.mxu0 %v15880_v52 }
0x2f48   : > { %14008 = vmatpush3.bf16.msra.mxu0 %v14973_v37 }
0x2ffe   : > { %v10302_v63 = vpop.f32.mrb[176].mxu0 }
0x2fff   : > { %v10309_v2 = vmul.f32 %v10302_v63, %v10302_v63  ;;  %v10304_v59 = vpop.f32.mrb[177].mxu0  ;;  %v10315_v35 = vrot.slane %v10302_v63, %v16588_v4 }
0x3000   : > { %v10306_v61 = vpop.f32.mrb[178].mxu0 }
0x3001   : > { %v10310_v62 = vsub.f32 %v10304_v59, %v10309_v2  ;;  %v10307_v3 = vpop.f32.mrb[179].mxu0  ;;  %v10316_v40 = vsub.f32 %v10248_v57, %v10315_v35  ;;  %v14968_v57 = vld [vmem:[#allocation21 + $0x30] sm:$0xff]   ;;  %v15249_v35 = vld [vmem:[#allocation27 + $0x40] ss:$8 sps:$4 sm:$0xff]  }
0x3002   : > { %v15243_v59 = vld [vmem:[#allocation27 + $0x10] ss:$8 sps:$4 sm:$0xff]   ;;  %v15244_v61 = vld [vmem:[#allocation27 + $0x24] ss:$8 sps:$4 sm:$0xff]   ;;  %v15246_v3 = vld [vmem:[#allocation27 + $0x34] ss:$8 sps:$4 sm:$0xff]  }
0x3003   : > { %v10311_v43 = vmax.f32 %v10310_v62, 0.0  ;;  %v15245_v62 = vld [vmem:[#allocation27 + $0x20] ss:$8 sps:$4 sm:$0xff]  }
0x3005   : > { %v10317_v11 = vadd.f32 1e-05, %v10311_v43  ;;  %v15247_v43 = vld [vmem:[#allocation27 + $0x30] ss:$8 sps:$4 sm:$0xff]  }
0x3007   : > { %15072 = vrsqrt.f32 %v10317_v11  ;;  %v15248_v11 = vld [vmem:[#allocation27 + $0x44] ss:$8 sps:$4 sm:$0xff]  }
0x3011   : > { %v15073_v15 = vpop.eup %15072 }
0x3012   : > { %v10322_v9 = vrot.slane %v15073_v15, %v16588_v4  ;;  %v15250_v15 = vld [vmem:[#allocation27 + $0x54] ss:$8 sps:$4 sm:$0xff]  }
0x3014   : > { %v10323_v17 = vmul.f32 %v10322_v9, %v10316_v40  ;;  %v15251_v40 = vld [vmem:[#allocation27 + $0x50] ss:$8 sps:$4 sm:$0xff]   ;;  %v15252_v9 = vld [vmem:[#allocation27 + $0x64] ss:$8 sps:$4 sm:$0xff]  }
0x3016   : > { %v10324_v36 = vmax.f32 %v10323_v17, 0.0  ;;  %v15253_v17 = vld [vmem:[#allocation27 + $0x60] ss:$8 sps:$4 sm:$0xff]  }
0x3018   : > { %v10374_v20 = vpack.c.bf16 %v10324_v36, %v10324_v36  ;;  %v15254_v36 = vld [vmem:[#allocation27 + $0x74] ss:$8 sps:$4 sm:$0xff]  }
0x301a   : > { %v10386_v55 = vsel %vm2631_vm5, %v10374_v20, 0  ;;  %v15255_v20 = vld [vmem:[#allocation27 + $0x70] ss:$8 sps:$4 sm:$0xff]  }
0x301b   : > { %13976 = vmatpush3.bf16.msra.mxu1 %v10386_v55 }
0x301c   : > { %13981 = vmatprep.subr.bf16.mxu1 %v15880_v52 }
0x301e   : > { %13978 = vmatmul.mubr.msk.bf16.vlgmr.msra.gmra.mrb[128].mxu1 %vm2627_vm6, %v14947_v54  ;;  %v15257_v54 = vld [vmem:[#allocation27 + $0x80] ss:$8 sps:$4 sm:$0xff]  }
0x301f   : > { %13982 = vmatpush3.bf16.msra.mxu1 %v10386_v55  ;;  %13983 = vmatprep.mubr.msk.bf16.mxu1 %vm15881_vm12, %v15880_v52 }
0x3020   : > { %13987 = vmatprep.subr.bf16.mxu1 %v15880_v52 }
0x3026   : > { %13984 = vmatmul.mubr.msk.bf16.vlgmr.msra.gmra.mrb[132].mxu1 %vm2627_vm6, %v14948_v31  ;;  %v15258_v31 = vld [vmem:[#allocation27 + $0x94] ss:$8 sps:$4 sm:$0xff]  }
0x3027   : > { %13988 = vmatpush3.bf16.msra.mxu1 %v10386_v55  ;;  %13989 = vmatprep.mubr.msk.bf16.mxu1 %vm15881_vm12, %v15880_v52  ;;  %v15256_v55 = vld [vmem:[#allocation27 + $0x84] ss:$8 sps:$4 sm:$0xff]  }
0x3028   : > { %13375 = vmatprep.subr.bf16.mxu1 %v14950_v14  ;;  %v15259_v14 = vld [vmem:[#allocation27 + $0x90] ss:$8 sps:$4 sm:$0xff]  }
0x302e   : > { %13990 = vmatmul.mubr.msk.bf16.vlgmr.msra.gmra.mrb[136].mxu1 %vm2627_vm6, %v14949_v24  ;;  %v15260_v24 = vld [vmem:[#allocation27 + $0xa4] ss:$8 sps:$4 sm:$0xff]  }
0x302f   : > { %13376 = vmatpush3.bf16.msra.mxu1 %v14951_v25  ;;  %v15261_v25 = vld [vmem:[#allocation27 + $0xa0] ss:$8 sps:$4 sm:$0xff]  }
0x3030   : > { %13377 = vmatprep.subr.bf16.mxu1 %v14952_v22  ;;  %v15262_v22 = vld [vmem:[#allocation27 + $0xb4] ss:$8 sps:$4 sm:$0xff]  }
0x3033   : > { %13378 = vmatpush3.bf16.msra.mxu1 %v14953_v27  ;;  %v15263_v27 = vld [vmem:[#allocation27 + $0xb0] ss:$8 sps:$4 sm:$0xff]  }
0x3034   : > { %13379 = vmatprep.subr.bf16.mxu1 %v14954_v21  ;;  %v15264_v21 = vld [vmem:[#allocation27 + $0xc4] ss:$8 sps:$4 sm:$0xff]  }
0x3037   : > { %13380 = vmatpush3.bf16.msra.mxu1 %v14956_v28  ;;  %v15265_v28 = vld [vmem:[#allocation27 + $0xc0] ss:$8 sps:$4 sm:$0xff]  }
0x3038   : > { %13381 = vmatprep.subr.bf16.mxu1 %v14957_v29  ;;  %v15266_v29 = vld [vmem:[#allocation27 + $0xd4] ss:$8 sps:$4 sm:$0xff]  }
0x303b   : > { %13382 = vmatpush3.bf16.msra.mxu1 %v14959_v32  ;;  %v15267_v32 = vld [vmem:[#allocation27 + $0xd0] ss:$8 sps:$4 sm:$0xff]  }
0x303c   : > { %13383 = vmatprep.subr.bf16.mxu1 %v14960_v46  ;;  %v15268_v46 = vld [vmem:[#allocation27 + $0xe4] ss:$8 sps:$4 sm:$0xff]  }
0x303f   : > { %13384 = vmatpush3.bf16.msra.mxu1 %v14962_v18  ;;  %v15269_v18 = vld [vmem:[#allocation27 + $0xe0] ss:$8 sps:$4 sm:$0xff]  }
0x3040   : > { %13385 = vmatprep.subr.bf16.mxu1 %v14963_v0  ;;  %v15270_v0 = vld [vmem:[#allocation27 + $0xf4] ss:$8 sps:$4 sm:$0xff]  }
0x3043   : > { %13386 = vmatpush3.bf16.msra.mxu1 %v14965_v39  ;;  %v14974_v39 = vld [vmem:[#allocation24 + $0x40] sm:$0xff]  }
0x3044   : > { %13387 = vmatprep.subr.bf16.mxu1 %v14966_v49  ;;  %13406 = vmatprep.subr.bf16.mxu0 %v14974_v39  ;;  %v14997_v39 = vld [vmem:[#allocation24 + $0x128] sm:$0xff]  }
0x3047   : > { %13388 = vmatpush3.bf16.msra.mxu1 %v14968_v57 }
0x3048   : > { %13389 = vmatprep.subr.bf16.mxu1 %v14969_v56 }
0x304b   : > { %13390 = vmatpush3.bf16.msra.mxu1 %v14971_v13  ;;  %v12520_v13 = vld [vmem:[#allocation22] ss:$0 sm:$0xff] }
0x304c   : > { %10786 = vmatprep.subr.bf16.mxu1 %v15240_v7 }
0x30f1   : > { %v10422_v5 = vpop.f32.mrb[128].mxu1 }
0x30f2   : > { %v13979_v34 = vpop.f32.mrb[129].mxu1 }
0x30f3   : > { %v10425_v6 = vpop.f32.mrb[130].mxu1 }
0x30f4   : > { %v10429_v10 = vpack.c.bf16 %v10425_v6, %v10422_v5  ;;  %v13980_v42 = vpop.f32.mrb[131].mxu1 }
0x30f9   : > { %v10475_v8 = vpop.f32.mrb[132].mxu1 }
0x30fa   : > { %v13985_v33 = vpop.f32.mrb[133].mxu1 }
0x30fb   : > { %v10478_v48 = vpop.f32.mrb[134].mxu1 }
0x30fc   : > { %v10482_v26 = vpack.c.bf16 %v10478_v48, %v10475_v8  ;;  %v13986_v38 = vpop.f32.mrb[135].mxu1 }
0x30fe   : > { %10718 = vmatprep.mubr.bf16.mxu1 %v10482_v26 }
0x30ff   : > { %10719 = vmatmul.mubr.bf16.vlgmr.msra.gmra.mrb[140].mxu1 %v10429_v10 }
0x3100   : > { %10787 = vmatpush1.bf16.msra.mxu1 %v15241_v45 }
0x3101   : > { %v10528_v44 = vpop.f32.mrb[136].mxu1  ;;  %10788 = vmatprep.subr.bf16.mxu1 %v15242_v53 }
0x3102   : > { %v13991_v1 = vpop.f32.mrb[137].mxu1 }
0x3103   : > { %v10531_v12 = vpop.f32.mrb[138].mxu1 }
0x3104   : > { %v10535_v63 = vpack.c.bf16 %v10531_v12, %v10528_v44  ;;  %v13992_v2 = vpop.f32.mrb[139].mxu1  ;;  %10789 = vmatpush1.bf16.msra.mxu1 %v15243_v59 }
0x3105   : > { %10790 = vmatprep.subr.bf16.mxu1 %v15244_v61 }
0x3106   : > { %14010 = vmatmul.mubr.bf16.vlgmr.msra.gmra.mrb[180].mxu0 %v10535_v63 }
0x3108   : > { %10791 = vmatpush1.bf16.msra.mxu1 %v15245_v62 }
0x3109   : > { %10792 = vmatprep.subr.bf16.mxu1 %v15246_v3 }
0x310c   : > { %10793 = vmatpush1.bf16.msra.mxu1 %v15247_v43 }
0x310d   : > { %10794 = vmatprep.subr.bf16.mxu1 %v15248_v11 }
0x3110   : > { %10795 = vmatpush1.bf16.msra.mxu1 %v15249_v35 }
0x3111   : > { %10796 = vmatprep.subr.bf16.mxu1 %v15250_v15  ;;  %v14975_v15 = vld [vmem:[#allocation24] sm:$0xff]  }
0x3112   : > { %13407 = vmatpush3.bf16.msra.mxu0 %v14975_v15 }
0x3114   : > { %10797 = vmatpush1.bf16.msra.mxu1 %v15251_v40  ;;  %v14976_v40 = vld [vmem:[#allocation24 + $0x140] sm:$0xff]  }
0x3115   : > { %10798 = vmatprep.subr.bf16.mxu1 %v15252_v9  ;;  %v14977_v9 = vld [vmem:[#allocation24 + $0x100] sm:$0xff]  }
0x3118   : > { %10799 = vmatpush1.bf16.msra.mxu1 %v15253_v17  ;;  %v14978_v17 = vld [vmem:[#allocation24 + $0x48] sm:$0xff]  }
0x3119   : > { %10800 = vmatprep.subr.bf16.mxu1 %v15254_v36  ;;  %v14979_v36 = vld [vmem:[#allocation24 + $0x8] sm:$0xff]   ;;  %13408 = vmatprep.subr.bf16.mxu0 %v14978_v17 }
0x311a   : > { %13409 = vmatpush3.bf16.msra.mxu0 %v14979_v36 }
0x311c   : > { %10801 = vmatpush1.bf16.msra.mxu1 %v15255_v20  ;;  %v14980_v20 = vld [vmem:[#allocation24 + $0x148] sm:$0xff]  }
0x311d   : > { %10802 = vmatprep.subr.bf16.mxu1 %v15256_v55  ;;  %v14981_v55 = vld [vmem:[#allocation24 + $0x108] sm:$0xff]  }
0x3120   : > { %10803 = vmatpush1.bf16.msra.mxu1 %v15257_v54  ;;  %v14982_v54 = vld [vmem:[#allocation24 + $0x50] sm:$0xff]  }
0x3121   : > { %10804 = vmatprep.subr.bf16.mxu1 %v15258_v31  ;;  %v14983_v31 = vld [vmem:[#allocation24 + $0x10] sm:$0xff]   ;;  %13410 = vmatprep.subr.bf16.mxu0 %v14982_v54  ;;  %v15007_v54 = vld [vmem:[#allocation24 + $0x80] sm:$0xff]  }
0x3122   : > { %13411 = vmatpush3.bf16.msra.mxu0 %v14983_v31 }
0x3124   : > { %10805 = vmatpush1.bf16.msra.mxu1 %v15259_v14  ;;  %v14984_v14 = vld [vmem:[#allocation24 + $0x150] sm:$0xff]  }
0x3125   : > { %10806 = vmatprep.subr.bf16.mxu1 %v15260_v24  ;;  %v14985_v24 = vld [vmem:[#allocation24 + $0x110] sm:$0xff]  }
0x3128   : > { %10807 = vmatpush1.bf16.msra.mxu1 %v15261_v25  ;;  %v14986_v25 = vld [vmem:[#allocation24 + $0x58] sm:$0xff]  }
0x3129   : > { %10808 = vmatprep.subr.bf16.mxu1 %v15262_v22  ;;  %v14987_v22 = vld [vmem:[#allocation24 + $0x18] sm:$0xff]   ;;  %13412 = vmatprep.subr.bf16.mxu0 %v14986_v25  ;;  %v15008_v25 = vld [vmem:[#allocation24 + $0xc8] sm:$0xff]  }
0x312a   : > { %13413 = vmatpush3.bf16.msra.mxu0 %v14987_v22 }
0x312c   : > { %10809 = vmatpush1.bf16.msra.mxu1 %v15263_v27  ;;  %v14988_v27 = vld [vmem:[#allocation24 + $0x158] sm:$0xff]  }
0x312d   : > { %10810 = vmatprep.subr.bf16.mxu1 %v15264_v21  ;;  %v14989_v21 = vld [vmem:[#allocation24 + $0x118] sm:$0xff]  }
0x3130   : > { %10811 = vmatpush1.bf16.msra.mxu1 %v15265_v28  ;;  %v14990_v28 = vld [vmem:[#allocation24 + $0x60] sm:$0xff]  }
0x3131   : > { %10812 = vmatprep.subr.bf16.mxu1 %v15266_v29  ;;  %v14991_v29 = vld [vmem:[#allocation24 + $0x20] sm:$0xff]   ;;  %13414 = vmatprep.subr.bf16.mxu0 %v14990_v28 }
0x3132   : > { %13415 = vmatpush3.bf16.msra.mxu0 %v14991_v29  ;;  %v15009_v29 = vld [vmem:[#allocation24 + $0x88] sm:$0xff]  }
0x3134   : > { %10813 = vmatpush1.bf16.msra.mxu1 %v15267_v32  ;;  %v14992_v32 = vld [vmem:[#allocation24 + $0x160] sm:$0xff]  }
0x3135   : > { %10814 = vmatprep.subr.bf16.mxu1 %v15268_v46  ;;  %v14993_v46 = vld [vmem:[#allocation24 + $0x120] sm:$0xff]  }
0x3138   : > { %10815 = vmatpush1.bf16.msra.mxu1 %v15269_v18  ;;  %v14994_v18 = vld [vmem:[#allocation24 + $0x68] sm:$0xff]  }
0x3139   : > { %10816 = vmatprep.subr.bf16.mxu1 %v15270_v0  ;;  %v14995_v0 = vld [vmem:[#allocation24 + $0x28] sm:$0xff]   ;;  %13416 = vmatprep.subr.bf16.mxu0 %v14994_v18 }
0x313a   : > { %13417 = vmatpush3.bf16.msra.mxu0 %v14995_v0  ;;  %v15012_v0 = vld [vmem:[#allocation24 + $0xd8] sm:$0xff]  }
0x313c   : > { %10817 = vmatpush1.bf16.msra.mxu1 %v15271_v16  ;;  %v14996_v16 = vld [vmem:[#allocation24 + $0x168] sm:$0xff]  }
0x313d   : > { %13450 = vmatprep.subr.bf16.mxu1 %v14976_v40 }
0x31d2   : > { %v13391_v49 = vpop.f32.mrb[140].mxu1 }
0x31d3   : > { %v13392_v50 = vpop.f32.mrb[141].mxu1 }
0x31d4   : > { %v13393_v57 = vadd.f32 %v13392_v50, %v13391_v49  ;;  %v13394_v56 = vpop.f32.mrb[142].mxu1  ;;  %v14998_v49 = vld [vmem:[#allocation24 + $0x70] sm:$0xff]  }
0x31d5   : > { %v13395_v58 = vpop.f32.mrb[143].mxu1  ;;  %v14999_v50 = vld [vmem:[#allocation24 + $0x30] sm:$0xff]   ;;  %13418 = vmatprep.subr.bf16.mxu0 %v14998_v49  ;;  %v15017_v49 = vld [vmem:[#allocation24 + $0xa8] sm:$0xff]  }
0x31d6   : > { %v13396_v51 = vadd.f32 %v13395_v58, %v13394_v56  ;;  %v10721_v7 = vadd.f32 %v13393_v57, %v12520_v13  ;;  %v15000_v57 = vld [vmem:[#allocation24 + $0x170] sm:$0xff]   ;;  %v15002_v58 = vld [vmem:[#allocation24 + $0x78] sm:$0xff]   ;;  %13419 = vmatpush3.bf16.msra.mxu0 %v14999_v50 }
0x31d7   : > { %v15001_v56 = vld [vmem:[#allocation24 + $0x130] sm:$0xff]   ;;  %13420 = vmatprep.subr.bf16.mxu0 %v15002_v58  ;;  %v15021_v58 = vld [vmem:[#allocation24 + $0xb8] sm:$0xff]  }
0x31d8   : > { %v10724_v6 = vadd.f32 %v13396_v51, %v12520_v13  ;;  %v15003_v13 = vld [vmem:[#allocation24 + $0x38] sm:$0xff]   ;;  %v15018_v50 = vld [vmem:[#allocation24 + $0xf0] sm:$0xff]  }
0x31d9   : > { %v10761_v37 = vpop.f32.mrb[180].mxu0  ;;  %v15004_v51 = vld [vmem:[#allocation24 + $0x178] sm:$0xff]  }
0x31da   : > { %v18090_v5 = vadd.f32 %v10761_v37, %v10721_v7  ;;  %v14011_v34 = vpop.f32.mrb[181].mxu0  ;;  %v15005_v7 = vld [vmem:[#allocation24 + $0x138] sm:$0xff]   ;;  %13421 = vmatpush3.bf16.msra.mxu0 %v15003_v13  ;;  %v15006_v37 = vld [vmem:[#allocation24 + $0xc0] sm:$0xff]  }
0x31db   : > { %v10764_v10 = vpop.f32.mrb[182].mxu0  ;;  %13428 = vmatprep.subr.bf16.mxu0 %v15006_v37  ;;  %v15022_v13 = vld [vmem:[#allocation24 + $0x180] sm:$0xff]   ;;  %v15025_v37 = vld [vmem:[#allocation24 + $0x198] sm:$0xff]  }
0x31dc   : > { %v18092_v42 = vadd.f32 %v10764_v10, %v10724_v6  ;;  %v14012_v8 = vpop.f32.mrb[183].mxu0  ;;  %v10768_v33 = vmul.f32 %v18090_v5, %v18090_v5 }
0x31de   : > { %v10769_v48 = vmul.f32 %v18092_v42, %v18092_v42  ;;  %v10770_v26 = vadd.f32 %v18092_v42, %v18090_v5 }
0x31e0   : > { %v10771_v38 = vrot.slane %v10770_v26, 4  ;;  %v10777_v45 = vadd.f32 %v10769_v48, %v10768_v33 }
0x31e2   : > { %v10772_v44 = vadd.f32 %v10771_v38, %v10770_v26  ;;  %v10778_v53 = vrot.slane %v10777_v45, 4 }
0x31e4   : > { %v10773_v1 = vrot.slane %v10772_v44, 2  ;;  %v10779_v12 = vadd.f32 %v10778_v53, %v10777_v45 }
0x31e6   : > { %v10774_v63 = vadd.f32 %v10773_v1, %v10772_v44  ;;  %v10780_v2 = vrot.slane %v10779_v12, 2 }
0x31e8   : > { %v10781_v59 = vadd.f32 %v10780_v2, %v10779_v12  ;;  %v10775_v61 = vrot.slane %v10774_v63, 1 }
0x31ea   : > { %v10782_v62 = vrot.slane %v10781_v59, 1  ;;  %v10776_v3 = vadd.f32 %v10775_v61, %v10774_v63 }
0x31ec   : > { %v10783_v43 = vadd.f32 %v10782_v62, %v10781_v59  ;;  %v10784_v35 = vpack.c.bf16 %v10776_v3, %v10776_v3 }
0x31ee   : > { %v10785_v11 = vpack.c.bf16 %v10783_v43, %v10783_v43 }
0x31f0   : > { %10818 = vmatprep.mubr.bf16.mxu1 %v10785_v11 }
0x31f1   : > { %10819 = vmatmul.mubr.bf16.vlgmr.msra.gmra.mrb[144].mxu1 %v10784_v35 }
0x31f2   : > { %13451 = vmatpush3.bf16.msra.mxu1 %v14977_v9 }
0x31f3   : > { %13452 = vmatprep.subr.bf16.mxu1 %v14980_v20 }
0x31f6   : > { %13453 = vmatpush3.bf16.msra.mxu1 %v14981_v55 }
0x31f7   : > { %13454 = vmatprep.subr.bf16.mxu1 %v14984_v14 }
0x31fa   : > { %13455 = vmatpush3.bf16.msra.mxu1 %v14985_v24 }
0x31fb   : > { %13456 = vmatprep.subr.bf16.mxu1 %v14988_v27 }
0x31fe   : > { %13457 = vmatpush3.bf16.msra.mxu1 %v14989_v21 }
0x31ff   : > { %13458 = vmatprep.subr.bf16.mxu1 %v14992_v32 }
0x3202   : > { %13459 = vmatpush3.bf16.msra.mxu1 %v14993_v46 }
0x3203   : > { %13460 = vmatprep.subr.bf16.mxu1 %v14996_v16  ;;  %v15015_v16 = vld [vmem:[#allocation24 + $0xa0] sm:$0xff]  }
0x3206   : > { %13461 = vmatpush3.bf16.msra.mxu1 %v14997_v39  ;;  %v15016_v39 = vld [vmem:[#allocation24 + $0xe8] sm:$0xff]  }
0x3207   : > { %13462 = vmatprep.subr.bf16.mxu1 %v15000_v57  ;;  %v15019_v57 = vld [vmem:[#allocation24 + $0xb0] sm:$0xff]  }
0x320a   : > { %13463 = vmatpush3.bf16.msra.mxu1 %v15001_v56  ;;  %v15020_v56 = vld [vmem:[#allocation24 + $0xf8] sm:$0xff]  }
0x320b   : > { %13464 = vmatprep.subr.bf16.mxu1 %v15004_v51  ;;  %v15023_v51 = vld [vmem:[#allocation24 + $0x188] sm:$0xff]  }
0x320e   : > { %13465 = vmatpush3.bf16.msra.mxu1 %v15005_v7  ;;  %v15024_v7 = vld [vmem:[#allocation24 + $0x190] sm:$0xff]  }
0x32c4   : > { %v10820_v34 = vpop.f32.mrb[144].mxu1 }
0x32c5   : > { %v10827_v6 = vmul.f32 %v10820_v34, %v10820_v34  ;;  %v10822_v10 = vpop.f32.mrb[145].mxu1  ;;  %v10833_v45 = vrot.slane %v10820_v34, %v16588_v4  ;;  %v15026_v34 = vld [vmem:[#allocation24 + $0x1a0] sm:$0xff]  }
0x32c6   : > { %v10824_v8 = vpop.f32.mrb[146].mxu1 }
0x32c7   : > { %v10828_v33 = vsub.f32 %v10822_v10, %v10827_v6  ;;  %v10825_v48 = vpop.f32.mrb[147].mxu1  ;;  %v10834_v53 = vsub.f32 %v18090_v5, %v10833_v45  ;;  %v10835_v1 = vsub.f32 %v18092_v42, %v10833_v45  ;;  %v15028_v6 = vld [vmem:[#allocation24 + $0x1b0] sm:$0xff]   ;;  %v15029_v10 = vld [vmem:[#allocation24 + $0x1b8] sm:$0xff]  }
0x32c9   : > { %v10829_v26 = vmax.f32 %v10828_v33, 0.0 }
0x32cb   : > { %v10836_v38 = vadd.f32 1e-05, %v10829_v26 }
0x32cd   : > { %15074 = vrsqrt.f32 %v10836_v38 }
0x32d7   : > { %v15075_v44 = vpop.eup %15074 }
0x32d8   : > { %v10841_v12 = vrot.slane %v15075_v44, %v16588_v4 }
0x32da   : > { %v10842_v63 = vmul.f32 %v10841_v12, %v10834_v53  ;;  %v10843_v2 = vmul.f32 %v10841_v12, %v10835_v1 }
0x32dc   : > { %v10844_v59 = vmax.f32 %v10842_v63, 0.0  ;;  %v10845_v61 = vmax.f32 %v10843_v2, 0.0 }
0x32de   : > { %v10967_v62 = vrot.slane %v10844_v59, 6  ;;  %v10968_v3 = vrot.slane %v10845_v61, 6  ;;  %v10985_v43 = vrot.slane %v10844_v59, 2  ;;  %v10986_v11 = vrot.slane %v10845_v61, 2 }
0x32df   : > { %v10961_v35 = vrot.slane %v10844_v59, 5  ;;  %v10962_v15 = vrot.slane %v10845_v61, 5  ;;  %v10979_v40 = vrot.slane %v10844_v59, 1  ;;  %v10980_v9 = vrot.slane %v10845_v61, 1 }
0x32e0   : > { %v10969_v17 = vsel %vm1076_vm0, %v10967_v62, %v10968_v3  ;;  %v10987_v5 = vsel %vm1097_vm10, %v10985_v43, %v10986_v11  ;;  %v11000_v36 = vpack.c.bf16 %v10845_v61, %v10844_v59  ;;  %v10973_v42 = vrot.slane %v10844_v59, 7 }
0x32e1   : > { %v12604_v20 = vpack.c.bf16 %v10969_v17, %v10967_v62  ;;  %v12615_v4 = vpack.c.bf16 %v10986_v11, %v10987_v5  ;;  %v10963_v55 = vsel %vm1069_vm2, %v10961_v35, %v10962_v15  ;;  %v10981_v31 = vsel %vm1090_vm13, %v10979_v40, %v10980_v9 }
0x32e2   : > { %v12608_v14 = vpack.c.bf16 %v10963_v55, %v10961_v35  ;;  %v12618_v24 = vpack.c.bf16 %v10980_v9, %v10981_v31  ;;  %v10974_v22 = vrot.slane %v10845_v61, 7  ;;  %v10991_v27 = vrot.slane %v10844_v59, 3  ;;  %v12545_v59 = vld [vmem:[#allocation25] ss:$0 sm:$0xff] }
0x32e3   : > { %12605 = vmatprep.mubr.msk.bf16.mxu0 %vm16498_vm7, %v12604_v20  ;;  %12616 = vmatprep.mubr.msk.bf16.mxu1 %vm16545_vm11, %v12615_v4  ;;  %v10992_v21 = vrot.slane %v10845_v61, 3 }
0x32e4   : > { %12609 = vmatmul.mubr.msk.bf16.vlgmr.msra.gmra.mrb[184].mxu0 %vm16517_vm8, %v12608_v14  ;;  %12619 = vmatmul.mubr.msk.bf16.vlgmr.msra.gmra.mrb[148].mxu1 %vm16565_vm14, %v12618_v24  ;;  %v10975_v28 = vsel %vm1083_vm3, %v10973_v42, %v10974_v22 }
0x32e5   : > { %13429 = vmatpush3.bf16.msra.mxu0 %v15007_v54  ;;  %11419 = vmatprep.mubr.bf16.mxu0 %v11000_v36  ;;  %v12612_v32 = vpack.c.bf16 %v10975_v28, %v10973_v42  ;;  %v10993_v46 = vsel %vm1104_vm15, %v10991_v27, %v10992_v21 }
0x32e6   : > { %13430 = vmatprep.subr.bf16.mxu0 %v15008_v25  ;;  %v12621_v18 = vpack.c.bf16 %v10992_v21, %v10993_v46 }
0x32e9   : > { %13431 = vmatpush3.bf16.msra.mxu0 %v15009_v29 }
0x32ea   : > { %13432 = vmatprep.subr.bf16.mxu0 %v15010_v30 }
0x32ed   : > { %13433 = vmatpush3.bf16.msra.mxu0 %v15011_v60 }
0x32ee   : > { %13434 = vmatprep.subr.bf16.mxu0 %v15012_v0 }
0x32f1   : > { %13435 = vmatpush3.bf16.msra.mxu0 %v15013_v41 }
0x32f2   : > { %13436 = vmatprep.subr.bf16.mxu0 %v15014_v19 }
0x32f5   : > { %13437 = vmatpush3.bf16.msra.mxu0 %v15015_v16 }
0x32f6   : > { %13438 = vmatprep.subr.bf16.mxu0 %v15016_v39 }
0x32f9   : > { %13439 = vmatpush3.bf16.msra.mxu0 %v15017_v49 }
0x32fa   : > { %13440 = vmatprep.subr.bf16.mxu0 %v15018_v50 }
0x32fd   : > { %13441 = vmatpush3.bf16.msra.mxu0 %v15019_v57 }
0x32fe   : > { %13442 = vmatprep.subr.bf16.mxu0 %v15020_v56 }
0x3301   : > { %13443 = vmatpush3.bf16.msra.mxu0 %v15021_v58 }
0x3302   : > { %14013 = vmatprep.subr.bf16.mxu0 %v15880_v52 }
0x3304   : > { %12613 = vmatmul.mubr.msk.bf16.vlgmr.msra.gmra.mrb[188].mxu0 %vm16529_vm9, %v12612_v32 }
0x3305   : > { %14014 = vmatpush3.bf16.msra.mxu0 %v15022_v13  ;;  %14029 = vmatprep.mubr.msk.bf16.mxu0 %vm15881_vm12, %v15880_v52 }
0x3306   : > { %14015 = vmatprep.subr.bf16.mxu0 %v15880_v52 }
0x3309   : > { %14016 = vmatpush3.bf16.msra.mxu0 %v15023_v51 }
0x330a   : > { %14017 = vmatprep.subr.bf16.mxu0 %v15880_v52 }
0x330d   : > { %14018 = vmatpush3.bf16.msra.mxu0 %v15024_v7 }
0x330e   : > { %14019 = vmatprep.subr.bf16.mxu0 %v15880_v52 }
0x3311   : > { %14020 = vmatpush3.bf16.msra.mxu0 %v15025_v37 }
0x3312   : > { %14021 = vmatprep.subr.bf16.mxu0 %v15880_v52 }
0x3315   : > { %14022 = vmatpush3.bf16.msra.mxu0 %v15026_v34 }
0x3316   : > { %14023 = vmatprep.subr.bf16.mxu0 %v15880_v52 }
0x3319   : > { %14024 = vmatpush3.bf16.msra.mxu0 %v15027_v47 }
0x331a   : > { %14025 = vmatprep.subr.bf16.mxu0 %v15880_v52 }
0x331d   : > { %14026 = vmatpush3.bf16.msra.mxu0 %v15028_v6 }
0x331e   : > { %14027 = vmatprep.subr.bf16.mxu0 %v15880_v52 }
0x3321   : > { %14028 = vmatpush3.bf16.msra.mxu0 %v15029_v10 }
0x3324   : > { %14030 = vmatmul.mubr.msk.bf16.vlgmr.msra.gmra.mrb[192].mxu0 %vm16573_vm1, %v12621_v18 }
0x33b7   : > { %v13422_v8 = vpop.f32.mrb[184].mxu0  ;;  %v13466_v33 = vpop.f32.mrb[148].mxu1 }
0x33b8   : > { %v13423_v48 = vpop.f32.mrb[185].mxu0  ;;  %v13467_v26 = vpop.f32.mrb[149].mxu1 }
0x33b9   : > { %v13424_v38 = vadd.f32 %v13423_v48, %v13422_v8  ;;  %v13468_v45 = vadd.f32 %v13467_v26, %v13466_v33  ;;  %v13425_v44 = vpop.f32.mrb[186].mxu0  ;;  %v13469_v53 = vpop.f32.mrb[150].mxu1 }
0x33ba   : > { %v13426_v1 = vpop.f32.mrb[187].mxu0  ;;  %v13470_v12 = vpop.f32.mrb[151].mxu1 }
0x33bb   : > { %v13427_v63 = vadd.f32 %v13426_v1, %v13425_v44  ;;  %v13471_v2 = vadd.f32 %v13470_v12, %v13469_v53  ;;  %v11381_v52 = vadd.f32 %v13424_v38, %v12545_v59 }
0x33bd   : > { %v11384_v11 = vadd.f32 %v13427_v63, %v12545_v59 }
0x33d7   : > { %v13444_v61 = vpop.f32.mrb[188].mxu0 }
0x33d8   : > { %v13445_v62 = vpop.f32.mrb[189].mxu0 }
0x33d9   : > { %v13446_v3 = vadd.f32 %v13445_v62, %v13444_v61  ;;  %v13447_v43 = vpop.f32.mrb[190].mxu0 }
0x33da   : > { %v13448_v23 = vpop.f32.mrb[191].mxu0 }
0x33db   : > { %v11422_v35 = vadd.f32 %v13446_v3, %v11381_v52  ;;  %v13449_v15 = vadd.f32 %v13448_v23, %v13447_v43 }
0x33dd   : > { %v11425_v40 = vadd.f32 %v13449_v15, %v11384_v11  ;;  %v11463_v9 = vadd.f32 %v13468_v45, %v11422_v35 }
0x33df   : > { %v11466_v17 = vadd.f32 %v13471_v2, %v11425_v40 }
0x33f7   : > { %v11503_v5 = vpop.f32.mrb[192].mxu0 }
0x33f8   : > { %v11504_v36 = vadd.f32 %v11503_v5, %v11463_v9  ;;  %v14031_v42 = vpop.f32.mrb[193].mxu0 }
0x33f9   : > { %v11506_v20 = vpop.f32.mrb[194].mxu0 }
0x33fa   : > { %15076 = vtanh.f32 %v11504_v36  ;;  %v11507_v4 = vadd.f32 %v11506_v20, %v11466_v17  ;;  %v14032_v55 = vpop.f32.mrb[195].mxu0 }
0x33fc   : > { %15078 = vtanh.f32 %v11507_v4 }
0x3404   : > { %v15077_v54 = vpop.eup %15076 }
0x3405   : > { %11512 = vst [vmem:[%s949_s29] sm:$0xff] %v15077_v54 }
0x3406   : > { %v15079_v31 = vpop.eup %15078 }
0x3407   : > { %11513 = vst [vmem:[%s949_s29 + $0x8] sm:$0xff] %v15079_v31 }
0x3408 PF: > { %s18248_s4 = sld [smem:[#allocation41_spill]] }
0x340e   : > { %s42_s3 = sadd.s32 1, %s18248_s4  }
0x340f   : > { %p39_p8 = scmp.ge.s32.totalorder %s42_s3, 4  }
0x3411   :  { %41 = sbr.rel (!%p39_p8) target bundleno = 24 (0x18), region = 257 }
0x3418   :  { %11536 = vsyncpa [#allocation3], 1 }
0x3419   :  { %11538 = vsyncpa [#allocation3 + $0x1], 1 }
0x341a   :  { %11539 = vsyncpa [#allocation5], 1 }
0x341b   :  { %11540 = vsyncpa [#allocation8], 1 }
0x341c   :  { %11541 = vsyncpa [#allocation11], 1 }
0x341d   :  { %11542 = vsyncpa [#allocation14], 1 }
0x341e   :  { %11543 = vsyncpa [#allocation17], 1 }
0x341f   :  { %11544 = vsyncpa [#allocation20], 1 }
0x3420   :  { %11545 = vsyncpa [#allocation23], 1 }
0x3421   :  { %11546 = vsyncpa [#allocation26], 1 }
0x3422   :  { %11547 = vsyncpa [#allocation29], 1 }

</bundles_post_ra>
